<compile_context>
chip_gen: v7x
topology: tpu7x:2x2x1
jax: 0.10.0
libtpu: 0.0.40
codegen_flags: <defaults>
</compile_context>

<pallas_src>
import functools
import math

import jax
import jax.numpy as jnp
from jax import lax
from jax.experimental import pallas as pl
from jax.experimental.pallas import tpu as pltpu

# float32 = exact torch numerics (default so the built-in check is tight).
# jnp.bfloat16 = production choice: bf16 MXU operands, half the weight DMA.
MATMUL_DTYPE = jnp.float32

# Exact erf GELU (== torch.nn.GELU() default).  Flip to True to route the GELU
# to the EUP tanh slot (frees VALU); changes numerics slightly vs torch.
USE_TANH_GELU = False

FF_LANE_CHUNK = 256   # FeedForward lane-chunk size (multiple of 128)


def _gelu(x):
    if USE_TANH_GELU:
        return jax.nn.gelu(x, approximate=True)
    return 0.5 * x * (1.0 + lax.erf(x * (1.0 / math.sqrt(2.0))))


def _cmix(w, h):
    """Per-token channel mix: (O, C) @ (C, T) -> (O, T), f32 accumulation."""
    return jnp.dot(w, h.astype(w.dtype), preferred_element_type=jnp.float32)


def _maxpool_lanes(x, sel, df):
    """MaxPool1d(kernel=df, stride=df) over the lane (token) axis of (C, T).

    Running max over the next df-1 lanes via XLU rotations (log-depth tree),
    then a strided lane downsample done as a 0/1 selection matmul with the
    host-precomputed `sel` (T, T//df) matrix (exact: one 1.0 per column).
    Wrap-around only contaminates lanes > T - df, which are never selected.
    # TODO(synk): unlike a true strided max-pool, 0*NaN from a non-selected
    # lane would propagate NaN into the pooled output.
    """
    _, t = x.shape
    r = x
    span = 1
    while span < df:
        step = min(span, df - span)
        r = jnp.maximum(r, pltpu.roll(r, shift=t - step, axis=1))
        span += step
    return jnp.dot(r.astype(sel.dtype), sel, preferred_element_type=jnp.float32)


def _encoder_kernel(x_ref, sel_ref,
                    ln1_g_ref, ln1_b_ref, wa_ref, ba_ref,
                    ln2_g_ref, ln2_b_ref, w1_ref, b1_ref, w2_ref, b2_ref,
                    wd_ref, bd_ref,
                    o_ref, *, downscaling_factor, ff_chunk):
    x = x_ref[0].astype(jnp.float32)            # (C, TN): channels x tokens
    c, tn = x.shape
    num_blocks = wa_ref.shape[0]                # layers * 2 emptyPointSwinBlocks

    # Hoisted constants (JAX does not CSE broadcast_in_dim across iterations).
    ones_row = jnp.ones((1, c), jnp.float32)
    inv_c = 1.0 / c

    def layernorm(h, g, b, eps=1e-5):
        # Per-token channel sums on the (otherwise ~idle) MXU instead of an
        # XLU sublane reduce; mean/var accumulation stays f32.
        s1 = jnp.dot(ones_row, h, preferred_element_type=jnp.float32)
        s2 = jnp.dot(ones_row, h * h, preferred_element_type=jnp.float32)
        mu = s1 * inv_c
        var = jnp.maximum(s2 * inv_c - mu * mu, 0.0)
        return (h - mu) * lax.rsqrt(var + eps) * g + b

    def swin_block(l, x):
        # Residual(PreNorm(emptyWSA)): Conv1d(k=1) == per-token channel mix.
        h = layernorm(x, ln1_g_ref[l], ln1_b_ref[l])
        x = x + _cmix(wa_ref[l], h) + ba_ref[l]
        # Residual(PreNorm(FeedForward)): Linear -> GELU -> Linear, chunked
        # over 128-aligned lane slices so the (H, chunk) hidden stays a small
        # fraction of the register file (no spills inside the block loop).
        h = layernorm(x, ln2_g_ref[l], ln2_b_ref[l])
        outs = []
        for c0 in range(0, tn, ff_chunk):
            hc = _cmix(w1_ref[l], h[:, c0:c0 + ff_chunk]) + b1_ref[l]
            hc = _gelu(hc).astype(w2_ref.dtype)      # narrow early (bf16 mode)
            outs.append(_cmix(w2_ref[l], hc) + b2_ref[l])
        ff = outs[0] if len(outs) == 1 else jnp.concatenate(outs, axis=1)
        return x + ff

    # unroll=True fully unrolls (fine for small stacks); for deeper stacks use
    # partial unroll to bound live ranges / code size.  For very large `layers`
    # the block index could move onto an "arbitrary" grid axis with x carried
    # in a VMEM scratch instead.
    unroll = True if num_blocks <= 4 else 2
    x = lax.fori_loop(0, num_blocks, swin_block, x, unroll=unroll)

    # emptyPointMerging: MaxPool1d(df, stride=df) over tokens, then Conv1d(k=1)
    y = _maxpool_lanes(x, sel_ref[...], downscaling_factor)     # (C, TM)
    out = _cmix(wd_ref[...], y) + bd_ref[...]                   # (C_out, TM)
    o_ref[0] = out.astype(o_ref.dtype)                          # lane-dense store


def _choose_token_tile(n, df, batch, target=2048, min_steps=4):
    """Largest TN <= target with TN % (128*df) == 0 (so both the input tile and
    the pooled output tile are lane-aligned) that divides N, preferring tiles
    that keep batch * n_tiles >= min_steps (v7x: 2 TCs each want >=2 pipelined
    steps).  Falls back to the full N (block == full dim is always legal)."""
    step = 128 * df
    if n % step != 0:
        return n
    cands = [t for t in range(step, min(target, n) + 1, step) if n % t == 0]
    if not cands:
        return n
    good = [t for t in cands if batch * (n // t) >= min_steps]
    return max(good) if good else max(cands)


def empty_point_swin_encoder_layer(x, params, downscaling_factor, *, token_tile=2048):
    """x: (B, C_in, N) NCL (PyTorch layout). Returns (B, C_out, N // df) NCL."""
    B, C_in, N = x.shape
    df = downscaling_factor
    if N % df != 0:
        # TODO(synk): torch MaxPool1d silently drops the remainder; not implemented.
        raise ValueError("N must be divisible by downscaling_factor")
    M = N // df
    C_out = params["wd"].shape[0]
    H = params["w1"].shape[1]
    NB = params["wa"].shape[0]

    TN = _choose_token_tile(N, df, B, target=token_tile)
    TM = TN // df
    n_tiles = N // TN
    ff_chunk = FF_LANE_CHUNK if (TN >= FF_LANE_CHUNK and TN % FF_LANE_CHUNK == 0) else TN

    # Host-precomputed 0/1 strided-downsample selection matrix (one 1.0 per
    # column).  Passed with a constant index_map so it is DMA'd only once.
    # Exact in bf16 as well, so it lives in MATMUL_DTYPE.
    sel = (jnp.arange(TN, dtype=jnp.int32)[:, None]
           == df * jnp.arange(TM, dtype=jnp.int32)[None, :]).astype(MATMUL_DTYPE)

    param_order = ["ln1_g", "ln1_b", "wa", "ba", "ln2_g", "ln2_b",
                   "w1", "b1", "w2", "b2", "wd", "bd"]
    param_arrays = [params[k] for k in param_order]

    # Constant-index full blocks: Pallas only re-DMAs a block when its index
    # changes, so these are fetched once.  On v7x (64 MiB VMEM) with big layer
    # stacks, add pipeline_mode=pl.Buffered(1) here to stop double-buffering
    # them (or stream from HBM via memory_space=pl.ANY + make_async_copy).
    def full_spec(shape):
        nd = len(shape)
        return pl.BlockSpec(shape, lambda b, t, _nd=nd: (0,) * _nd)

    in_specs = [pl.BlockSpec((1, C_in, TN), lambda b, t: (b, 0, t)),
                full_spec(sel.shape)]
    in_specs += [full_spec(p.shape) for p in param_arrays]
    out_spec = pl.BlockSpec((1, C_out, TM), lambda b, t: (b, 0, t))

    flops = ((2 * C_in * C_in + 4 * C_in * H + 8 * C_in) * NB * B * N
             + 2 * C_in * TM * B * N            # pooling selection matmul
             + 2 * C_in * C_out * B * M)
    bytes_accessed = (int(x.size) * x.dtype.itemsize
                      + B * M * C_out * 4
                      + int(sel.size) * sel.dtype.itemsize
                      + sum(int(p.size) * p.dtype.itemsize for p in param_arrays))
    cost = pl.CostEstimate(flops=int(flops),
                           transcendentals=int(B * N * NB * H),
                           bytes_accessed=int(bytes_accessed))

    return pl.pallas_call(
        functools.partial(_encoder_kernel, downscaling_factor=df, ff_chunk=ff_chunk),
        out_shape=jax.ShapeDtypeStruct((B, C_out, M), jnp.float32),
        grid=(B, n_tiles),                              # batch x token-tiles
        in_specs=in_specs,
        out_specs=out_spec,
        compiler_params=pltpu.CompilerParams(
            dimension_semantics=("parallel", "parallel"),
            vmem_limit_bytes=32 * 1024 * 1024),
        cost_estimate=cost,
    )(x, sel, *param_arrays)


def init_params(key, in_channels, out_channels, layers, mlp_dim):
    """Deterministic synthetic parameters (shapes follow the module __init__).
    Weight matrices are stored (out, in) so the kernel computes W @ x on the
    channel-major (C, tokens) tile; matmul weights live in MATMUL_DTYPE."""
    NB = layers * 2            # each emptyPointSwinAttentionBlock = wmha + swmha
    C, H, O = in_channels, mlp_dim, out_channels
    ks = jax.random.split(key, 12)
    n = lambda k, s, sc: sc * jax.random.normal(k, s, dtype=jnp.float32)
    return dict(
        ln1_g=1.0 + n(ks[0], (NB, C, 1), 0.1),
        ln1_b=n(ks[1], (NB, C, 1), 0.1),
        wa=n(ks[2], (NB, C, C), 1.0 / (C ** 0.5)).astype(MATMUL_DTYPE),   # emptyWSA Conv1d(k=1)
        ba=n(ks[3], (NB, C, 1), 0.1),
        ln2_g=1.0 + n(ks[4], (NB, C, 1), 0.1),
        ln2_b=n(ks[5], (NB, C, 1), 0.1),
        w1=n(ks[6], (NB, H, C), 1.0 / (C ** 0.5)).astype(MATMUL_DTYPE),   # FF Linear1
        b1=n(ks[7], (NB, H, 1), 0.1),
        w2=n(ks[8], (NB, C, H), 1.0 / (H ** 0.5)).astype(MATMUL_DTYPE),   # FF Linear2
        b2=n(ks[9], (NB, C, 1), 0.1),
        wd=n(ks[10], (O, C), 1.0 / (C ** 0.5)).astype(MATMUL_DTYPE),      # merging Conv1d(k=1)
        bd=n(ks[11], (O, 1), 0.1),
    )


def reference(x, params, downscaling_factor):
    """Pure-JAX reference of the same forward pass (channel-major layout),
    mirroring the kernel's matmul operand dtype (MATMUL_DTYPE) with f32
    accumulation; LayerNorm / GELU / pooling / biases in f32 as in torch."""
    def ln(x, g, b, eps=1e-5):
        mu = jnp.mean(x, axis=1, keepdims=True)
        var = jnp.mean(jnp.square(x - mu), axis=1, keepdims=True)
        return (x - mu) * lax.rsqrt(var + eps) * g[None] + b[None]

    def cmix(w, h):          # (O, C) @ (B, C, N) -> (B, O, N)
        return jnp.einsum("oc,bcn->bon", w, h.astype(w.dtype),
                          preferred_element_type=jnp.float32)

    x = x.astype(jnp.float32)
    NB = params["wa"].shape[0]
    for l in range(NB):
        h = ln(x, params["ln1_g"][l], params["ln1_b"][l])
        x = x + cmix(params["wa"][l], h) + params["ba"][l][None]
        h = ln(x, params["ln2_g"][l], params["ln2_b"][l])
        h = _gelu(cmix(params["w1"][l], h) + params["b1"][l][None])
        x = x + cmix(params["w2"][l], h.astype(params["w2"].dtype)) + params["b2"][l][None]
    B, C, N = x.shape
    M = N // downscaling_factor
    y = jnp.max(x.reshape(B, C, M, downscaling_factor), axis=-1)
    return cmix(params["wd"], y) + params["bd"][None]


if __name__ == "__main__":
    # Module config: emptyPointSwinEncoderLayer(in_channels=16, out_channels=32,
    #   downscaling_factor=8, layers=2, heads=4, head_dim=8, window_size=8,
    #   empty_attn=True, empty_downsample=True, mlp_dim=None -> 4*in_channels)
    B, C_in, C_out = 2, 16, 32
    N, df = 2048, 8            # token axis tiles into 2 x 1024-token tiles
    layers = 2                 # -> 4 emptyPointSwinBlocks
    mlp_dim = 4 * C_in

    key = jax.random.PRNGKey(0)
    kx, kp = jax.random.split(key)
    x = jax.random.normal(kx, (B, C_in, N), dtype=jnp.float32)   # (B, C_in, N) NCL
    params = init_params(kp, C_in, C_out, layers, mlp_dim)

    out = empty_point_swin_encoder_layer(x, params, df)
    out = jax.block_until_ready(out)

    ref = reference(x, params, df)
    assert out.shape == (B, C_out, N // df), out.shape
    tol = 1e-3 if MATMUL_DTYPE == jnp.float32 else 3e-2
    err = float(jnp.max(jnp.abs(out - ref)))
    assert jnp.allclose(out, ref, atol=tol, rtol=tol), err
    print("KERNEL_OK")
</pallas_src>

<mosaic_0001>
module attributes {stable_mosaic.version = 11 : i64} {
  func.func @_encoder_kernel(%arg0: i32, %arg1: i32, %arg2: memref<1x16x1024xf32, #tpu.memory_space<vmem>>, %arg3: memref<1024x128xf32, #tpu.memory_space<vmem>>, %arg4: memref<4x16x1xf32, #tpu.memory_space<vmem>>, %arg5: memref<4x16x1xf32, #tpu.memory_space<vmem>>, %arg6: memref<4x16x16xf32, #tpu.memory_space<vmem>>, %arg7: memref<4x16x1xf32, #tpu.memory_space<vmem>>, %arg8: memref<4x16x1xf32, #tpu.memory_space<vmem>>, %arg9: memref<4x16x1xf32, #tpu.memory_space<vmem>>, %arg10: memref<4x64x16xf32, #tpu.memory_space<vmem>>, %arg11: memref<4x64x1xf32, #tpu.memory_space<vmem>>, %arg12: memref<4x16x64xf32, #tpu.memory_space<vmem>>, %arg13: memref<4x16x1xf32, #tpu.memory_space<vmem>>, %arg14: memref<32x16xf32, #tpu.memory_space<vmem>>, %arg15: memref<32x1xf32, #tpu.memory_space<vmem>>, %arg16: memref<1x32x128xf32, #tpu.memory_space<vmem>>) attributes {dimension_semantics = [#tpu.dimension_semantics<parallel>, #tpu.dimension_semantics<parallel>], iteration_bounds = array<i64: 2, 2>, scalar_prefetch = 0 : i64, scratch_operands = 0 : i64, tpu.core_type = #tpu.core_type<tc>, window_params = [{transform_indices = @transform_0, window_bounds = array<i64: 1, 16, 1024>}, {pipeline_mode = #tpu.pipeline_mode<synchronous>, transform_indices = @transform_1, window_bounds = array<i64: 1024, 128>}, {pipeline_mode = #tpu.pipeline_mode<synchronous>, transform_indices = @transform_2, window_bounds = array<i64: 4, 16, 1>}, {pipeline_mode = #tpu.pipeline_mode<synchronous>, transform_indices = @transform_3, window_bounds = array<i64: 4, 16, 1>}, {pipeline_mode = #tpu.pipeline_mode<synchronous>, transform_indices = @transform_4, window_bounds = array<i64: 4, 16, 16>}, {pipeline_mode = #tpu.pipeline_mode<synchronous>, transform_indices = @transform_5, window_bounds = array<i64: 4, 16, 1>}, {pipeline_mode = #tpu.pipeline_mode<synchronous>, transform_indices = @transform_6, window_bounds = array<i64: 4, 16, 1>}, {pipeline_mode = #tpu.pipeline_mode<synchronous>, transform_indices = @transform_7, window_bounds = array<i64: 4, 16, 1>}, {pipeline_mode = #tpu.pipeline_mode<synchronous>, transform_indices = @transform_8, window_bounds = array<i64: 4, 64, 16>}, {pipeline_mode = #tpu.pipeline_mode<synchronous>, transform_indices = @transform_9, window_bounds = array<i64: 4, 64, 1>}, {pipeline_mode = #tpu.pipeline_mode<synchronous>, transform_indices = @transform_10, window_bounds = array<i64: 4, 16, 64>}, {pipeline_mode = #tpu.pipeline_mode<synchronous>, transform_indices = @transform_11, window_bounds = array<i64: 4, 16, 1>}, {pipeline_mode = #tpu.pipeline_mode<synchronous>, transform_indices = @transform_12, window_bounds = array<i64: 32, 16>}, {pipeline_mode = #tpu.pipeline_mode<synchronous>, transform_indices = @transform_13, window_bounds = array<i64: 32, 1>}, {transform_indices = @transform_14, window_bounds = array<i64: 1, 32, 128>}]} {
    %c0 = arith.constant 0 : index
    %c0_0 = arith.constant 0 : index
    %c0_1 = arith.constant 0 : index
    %0 = vector.load %arg2[%c0, %c0_0, %c0_1] : memref<1x16x1024xf32, #tpu.memory_space<vmem>>, vector<1x16x1024xf32>
    %1 = vector.shape_cast %0 : vector<1x16x1024xf32> to vector<16x1024xf32>
    %cst = arith.constant 1.000000e+00 : f32
    %2 = vector.broadcast %cst : f32 to vector<1x16xf32>
    %c0_i32 = arith.constant 0 : i32
    %3 = arith.index_cast %c0_i32 : i32 to index
    %c0_2 = arith.constant 0 : index
    %c0_3 = arith.constant 0 : index
    %4 = vector.load %arg4[%3, %c0_2, %c0_3] : memref<4x16x1xf32, #tpu.memory_space<vmem>>, vector<1x16x1xf32>
    %5 = vector.shape_cast %4 : vector<1x16x1xf32> to vector<16x1xf32>
    %6 = arith.index_cast %c0_i32 : i32 to index
    %c0_4 = arith.constant 0 : index
    %c0_5 = arith.constant 0 : index
    %7 = vector.load %arg5[%6, %c0_4, %c0_5] : memref<4x16x1xf32, #tpu.memory_space<vmem>>, vector<1x16x1xf32>
    %8 = vector.shape_cast %7 : vector<1x16x1xf32> to vector<16x1xf32>
    %cst_6 = arith.constant dense<0.000000e+00> : vector<1x1024xf32>
    %9 = tpu.matmul %2, %1, %cst_6 {dimension_numbers = #tpu.dot_dimension_numbers<[1], [0], [0], [1], [0, 0, 1, 1], [], []>} : vector<1x16xf32>, vector<16x1024xf32>, vector<1x1024xf32> -> vector<1x1024xf32>
    %10 = arith.mulf %1, %1 : vector<16x1024xf32>
    %cst_7 = arith.constant dense<0.000000e+00> : vector<1x1024xf32>
    %11 = tpu.matmul %2, %10, %cst_7 {dimension_numbers = #tpu.dot_dimension_numbers<[1], [0], [0], [1], [0, 0, 1, 1], [], []>} : vector<1x16xf32>, vector<16x1024xf32>, vector<1x1024xf32> -> vector<1x1024xf32>
    %cst_8 = arith.constant 6.250000e-02 : f32
    %12 = vector.broadcast %cst_8 : f32 to vector<1x1024xf32>
    %13 = arith.mulf %9, %12 : vector<1x1024xf32>
    %cst_9 = arith.constant 6.250000e-02 : f32
    %14 = vector.broadcast %cst_9 : f32 to vector<1x1024xf32>
    %15 = arith.mulf %11, %14 : vector<1x1024xf32>
    %16 = arith.mulf %13, %13 : vector<1x1024xf32>
    %17 = arith.subf %15, %16 : vector<1x1024xf32>
    %cst_10 = arith.constant 0.000000e+00 : f32
    %18 = vector.broadcast %cst_10 : f32 to vector<1x1024xf32>
    %19 = arith.maximumf %17, %18 : vector<1x1024xf32>
    %20 = vector.broadcast %13 : vector<1x1024xf32> to vector<16x1024xf32>
    %21 = arith.subf %1, %20 : vector<16x1024xf32>
    %cst_11 = arith.constant 9.99999974E-6 : f32
    %22 = vector.broadcast %cst_11 : f32 to vector<1x1024xf32>
    %23 = arith.addf %19, %22 : vector<1x1024xf32>
    %24 = math.rsqrt %23 : vector<1x1024xf32>
    %25 = vector.broadcast %24 : vector<1x1024xf32> to vector<16x1024xf32>
    %26 = arith.mulf %21, %25 : vector<16x1024xf32>
    %27 = vector.broadcast %5 : vector<16x1xf32> to vector<16x1024xf32>
    %28 = arith.mulf %26, %27 : vector<16x1024xf32>
    %29 = vector.broadcast %8 : vector<16x1xf32> to vector<16x1024xf32>
    %30 = arith.addf %28, %29 : vector<16x1024xf32>
    %31 = arith.index_cast %c0_i32 : i32 to index
    %c0_12 = arith.constant 0 : index
    %c0_13 = arith.constant 0 : index
    %32 = vector.load %arg6[%31, %c0_12, %c0_13] : memref<4x16x16xf32, #tpu.memory_space<vmem>>, vector<1x16x16xf32>
    %33 = vector.shape_cast %32 : vector<1x16x16xf32> to vector<16x16xf32>
    %cst_14 = arith.constant dense<0.000000e+00> : vector<16x1024xf32>
    %34 = tpu.matmul %33, %30, %cst_14 {dimension_numbers = #tpu.dot_dimension_numbers<[1], [0], [0], [1], [0, 0, 1, 1], [], []>} : vector<16x16xf32>, vector<16x1024xf32>, vector<16x1024xf32> -> vector<16x1024xf32>
    %35 = arith.addf %1, %34 : vector<16x1024xf32>
    %36 = arith.index_cast %c0_i32 : i32 to index
    %c0_15 = arith.constant 0 : index
    %c0_16 = arith.constant 0 : index
    %37 = vector.load %arg7[%36, %c0_15, %c0_16] : memref<4x16x1xf32, #tpu.memory_space<vmem>>, vector<1x16x1xf32>
    %38 = vector.shape_cast %37 : vector<1x16x1xf32> to vector<16x1xf32>
    %39 = vector.broadcast %38 : vector<16x1xf32> to vector<16x1024xf32>
    %40 = arith.addf %35, %39 : vector<16x1024xf32>
    %41 = arith.index_cast %c0_i32 : i32 to index
    %c0_17 = arith.constant 0 : index
    %c0_18 = arith.constant 0 : index
    %42 = vector.load %arg8[%41, %c0_17, %c0_18] : memref<4x16x1xf32, #tpu.memory_space<vmem>>, vector<1x16x1xf32>
    %43 = vector.shape_cast %42 : vector<1x16x1xf32> to vector<16x1xf32>
    %44 = arith.index_cast %c0_i32 : i32 to index
    %c0_19 = arith.constant 0 : index
    %c0_20 = arith.constant 0 : index
    %45 = vector.load %arg9[%44, %c0_19, %c0_20] : memref<4x16x1xf32, #tpu.memory_space<vmem>>, vector<1x16x1xf32>
    %46 = vector.shape_cast %45 : vector<1x16x1xf32> to vector<16x1xf32>
    %cst_21 = arith.constant dense<0.000000e+00> : vector<1x1024xf32>
    %47 = tpu.matmul %2, %40, %cst_21 {dimension_numbers = #tpu.dot_dimension_numbers<[1], [0], [0], [1], [0, 0, 1, 1], [], []>} : vector<1x16xf32>, vector<16x1024xf32>, vector<1x1024xf32> -> vector<1x1024xf32>
    %48 = arith.mulf %40, %40 : vector<16x1024xf32>
    %cst_22 = arith.constant dense<0.000000e+00> : vector<1x1024xf32>
    %49 = tpu.matmul %2, %48, %cst_22 {dimension_numbers = #tpu.dot_dimension_numbers<[1], [0], [0], [1], [0, 0, 1, 1], [], []>} : vector<1x16xf32>, vector<16x1024xf32>, vector<1x1024xf32> -> vector<1x1024xf32>
    %cst_23 = arith.constant 6.250000e-02 : f32
    %50 = vector.broadcast %cst_23 : f32 to vector<1x1024xf32>
    %51 = arith.mulf %47, %50 : vector<1x1024xf32>
    %cst_24 = arith.constant 6.250000e-02 : f32
    %52 = vector.broadcast %cst_24 : f32 to vector<1x1024xf32>
    %53 = arith.mulf %49, %52 : vector<1x1024xf32>
    %54 = arith.mulf %51, %51 : vector<1x1024xf32>
    %55 = arith.subf %53, %54 : vector<1x1024xf32>
    %cst_25 = arith.constant 0.000000e+00 : f32
    %56 = vector.broadcast %cst_25 : f32 to vector<1x1024xf32>
    %57 = arith.maximumf %55, %56 : vector<1x1024xf32>
    %58 = vector.broadcast %51 : vector<1x1024xf32> to vector<16x1024xf32>
    %59 = arith.subf %40, %58 : vector<16x1024xf32>
    %cst_26 = arith.constant 9.99999974E-6 : f32
    %60 = vector.broadcast %cst_26 : f32 to vector<1x1024xf32>
    %61 = arith.addf %57, %60 : vector<1x1024xf32>
    %62 = math.rsqrt %61 : vector<1x1024xf32>
    %63 = vector.broadcast %62 : vector<1x1024xf32> to vector<16x1024xf32>
    %64 = arith.mulf %59, %63 : vector<16x1024xf32>
    %65 = vector.broadcast %43 : vector<16x1xf32> to vector<16x1024xf32>
    %66 = arith.mulf %64, %65 : vector<16x1024xf32>
    %67 = vector.broadcast %46 : vector<16x1xf32> to vector<16x1024xf32>
    %68 = arith.addf %66, %67 : vector<16x1024xf32>
    %69 = arith.index_cast %c0_i32 : i32 to index
    %c0_27 = arith.constant 0 : index
    %c0_28 = arith.constant 0 : index
    %70 = vector.load %arg10[%69, %c0_27, %c0_28] : memref<4x64x16xf32, #tpu.memory_space<vmem>>, vector<1x64x16xf32>
    %71 = vector.shape_cast %70 : vector<1x64x16xf32> to vector<64x16xf32>
    %72 = vector.extract_strided_slice %68 {offsets = [0, 0], sizes = [16, 256], strides = [1, 1]} : vector<16x1024xf32> to vector<16x256xf32>
    %cst_29 = arith.constant dense<0.000000e+00> : vector<64x256xf32>
    %73 = tpu.matmul %71, %72, %cst_29 {dimension_numbers = #tpu.dot_dimension_numbers<[1], [0], [0], [1], [0, 0, 1, 1], [], []>} : vector<64x16xf32>, vector<16x256xf32>, vector<64x256xf32> -> vector<64x256xf32>
    %74 = arith.index_cast %c0_i32 : i32 to index
    %c0_30 = arith.constant 0 : index
    %c0_31 = arith.constant 0 : index
    %75 = vector.load %arg11[%74, %c0_30, %c0_31] : memref<4x64x1xf32, #tpu.memory_space<vmem>>, vector<1x64x1xf32>
    %76 = vector.shape_cast %75 : vector<1x64x1xf32> to vector<64x1xf32>
    %77 = vector.broadcast %76 : vector<64x1xf32> to vector<64x256xf32>
    %78 = arith.addf %73, %77 : vector<64x256xf32>
    %cst_32 = arith.constant 5.000000e-01 : f32
    %79 = vector.broadcast %cst_32 : f32 to vector<64x256xf32>
    %80 = arith.mulf %79, %78 : vector<64x256xf32>
    %cst_33 = arith.constant 0.707106769 : f32
    %81 = vector.broadcast %cst_33 : f32 to vector<64x256xf32>
    %82 = arith.mulf %78, %81 : vector<64x256xf32>
    %83 = math.erf %82 : vector<64x256xf32>
    %cst_34 = arith.constant 1.000000e+00 : f32
    %84 = vector.broadcast %cst_34 : f32 to vector<64x256xf32>
    %85 = arith.addf %84, %83 : vector<64x256xf32>
    %86 = arith.mulf %80, %85 : vector<64x256xf32>
    %87 = arith.index_cast %c0_i32 : i32 to index
    %c0_35 = arith.constant 0 : index
    %c0_36 = arith.constant 0 : index
    %88 = vector.load %arg12[%87, %c0_35, %c0_36] : memref<4x16x64xf32, #tpu.memory_space<vmem>>, vector<1x16x64xf32>
    %89 = vector.shape_cast %88 : vector<1x16x64xf32> to vector<16x64xf32>
    %cst_37 = arith.constant dense<0.000000e+00> : vector<16x256xf32>
    %90 = tpu.matmul %89, %86, %cst_37 {dimension_numbers = #tpu.dot_dimension_numbers<[1], [0], [0], [1], [0, 0, 1, 1], [], []>} : vector<16x64xf32>, vector<64x256xf32>, vector<16x256xf32> -> vector<16x256xf32>
    %91 = arith.index_cast %c0_i32 : i32 to index
    %c0_38 = arith.constant 0 : index
    %c0_39 = arith.constant 0 : index
    %92 = vector.load %arg13[%91, %c0_38, %c0_39] : memref<4x16x1xf32, #tpu.memory_space<vmem>>, vector<1x16x1xf32>
    %93 = vector.shape_cast %92 : vector<1x16x1xf32> to vector<16x1xf32>
    %94 = vector.broadcast %93 : vector<16x1xf32> to vector<16x256xf32>
    %95 = arith.addf %90, %94 : vector<16x256xf32>
    %96 = arith.index_cast %c0_i32 : i32 to index
    %c0_40 = arith.constant 0 : index
    %c0_41 = arith.constant 0 : index
    %97 = vector.load %arg10[%96, %c0_40, %c0_41] : memref<4x64x16xf32, #tpu.memory_space<vmem>>, vector<1x64x16xf32>
    %98 = vector.shape_cast %97 : vector<1x64x16xf32> to vector<64x16xf32>
    %99 = vector.extract_strided_slice %68 {offsets = [0, 256], sizes = [16, 256], strides = [1, 1]} : vector<16x1024xf32> to vector<16x256xf32>
    %cst_42 = arith.constant dense<0.000000e+00> : vector<64x256xf32>
    %100 = tpu.matmul %98, %99, %cst_42 {dimension_numbers = #tpu.dot_dimension_numbers<[1], [0], [0], [1], [0, 0, 1, 1], [], []>} : vector<64x16xf32>, vector<16x256xf32>, vector<64x256xf32> -> vector<64x256xf32>
    %101 = arith.index_cast %c0_i32 : i32 to index
    %c0_43 = arith.constant 0 : index
    %c0_44 = arith.constant 0 : index
    %102 = vector.load %arg11[%101, %c0_43, %c0_44] : memref<4x64x1xf32, #tpu.memory_space<vmem>>, vector<1x64x1xf32>
    %103 = vector.shape_cast %102 : vector<1x64x1xf32> to vector<64x1xf32>
    %104 = vector.broadcast %103 : vector<64x1xf32> to vector<64x256xf32>
    %105 = arith.addf %100, %104 : vector<64x256xf32>
    %cst_45 = arith.constant 5.000000e-01 : f32
    %106 = vector.broadcast %cst_45 : f32 to vector<64x256xf32>
    %107 = arith.mulf %106, %105 : vector<64x256xf32>
    %cst_46 = arith.constant 0.707106769 : f32
    %108 = vector.broadcast %cst_46 : f32 to vector<64x256xf32>
    %109 = arith.mulf %105, %108 : vector<64x256xf32>
    %110 = math.erf %109 : vector<64x256xf32>
    %cst_47 = arith.constant 1.000000e+00 : f32
    %111 = vector.broadcast %cst_47 : f32 to vector<64x256xf32>
    %112 = arith.addf %111, %110 : vector<64x256xf32>
    %113 = arith.mulf %107, %112 : vector<64x256xf32>
    %114 = arith.index_cast %c0_i32 : i32 to index
    %c0_48 = arith.constant 0 : index
    %c0_49 = arith.constant 0 : index
    %115 = vector.load %arg12[%114, %c0_48, %c0_49] : memref<4x16x64xf32, #tpu.memory_space<vmem>>, vector<1x16x64xf32>
    %116 = vector.shape_cast %115 : vector<1x16x64xf32> to vector<16x64xf32>
    %cst_50 = arith.constant dense<0.000000e+00> : vector<16x256xf32>
    %117 = tpu.matmul %116, %113, %cst_50 {dimension_numbers = #tpu.dot_dimension_numbers<[1], [0], [0], [1], [0, 0, 1, 1], [], []>} : vector<16x64xf32>, vector<64x256xf32>, vector<16x256xf32> -> vector<16x256xf32>
    %118 = arith.index_cast %c0_i32 : i32 to index
    %c0_51 = arith.constant 0 : index
    %c0_52 = arith.constant 0 : index
    %119 = vector.load %arg13[%118, %c0_51, %c0_52] : memref<4x16x1xf32, #tpu.memory_space<vmem>>, vector<1x16x1xf32>
    %120 = vector.shape_cast %119 : vector<1x16x1xf32> to vector<16x1xf32>
    %121 = vector.broadcast %120 : vector<16x1xf32> to vector<16x256xf32>
    %122 = arith.addf %117, %121 : vector<16x256xf32>
    %123 = arith.index_cast %c0_i32 : i32 to index
    %c0_53 = arith.constant 0 : index
    %c0_54 = arith.constant 0 : index
    %124 = vector.load %arg10[%123, %c0_53, %c0_54] : memref<4x64x16xf32, #tpu.memory_space<vmem>>, vector<1x64x16xf32>
    %125 = vector.shape_cast %124 : vector<1x64x16xf32> to vector<64x16xf32>
    %126 = vector.extract_strided_slice %68 {offsets = [0, 512], sizes = [16, 256], strides = [1, 1]} : vector<16x1024xf32> to vector<16x256xf32>
    %cst_55 = arith.constant dense<0.000000e+00> : vector<64x256xf32>
    %127 = tpu.matmul %125, %126, %cst_55 {dimension_numbers = #tpu.dot_dimension_numbers<[1], [0], [0], [1], [0, 0, 1, 1], [], []>} : vector<64x16xf32>, vector<16x256xf32>, vector<64x256xf32> -> vector<64x256xf32>
    %128 = arith.index_cast %c0_i32 : i32 to index
    %c0_56 = arith.constant 0 : index
    %c0_57 = arith.constant 0 : index
    %129 = vector.load %arg11[%128, %c0_56, %c0_57] : memref<4x64x1xf32, #tpu.memory_space<vmem>>, vector<1x64x1xf32>
    %130 = vector.shape_cast %129 : vector<1x64x1xf32> to vector<64x1xf32>
    %131 = vector.broadcast %130 : vector<64x1xf32> to vector<64x256xf32>
    %132 = arith.addf %127, %131 : vector<64x256xf32>
    %cst_58 = arith.constant 5.000000e-01 : f32
    %133 = vector.broadcast %cst_58 : f32 to vector<64x256xf32>
    %134 = arith.mulf %133, %132 : vector<64x256xf32>
    %cst_59 = arith.constant 0.707106769 : f32
    %135 = vector.broadcast %cst_59 : f32 to vector<64x256xf32>
    %136 = arith.mulf %132, %135 : vector<64x256xf32>
    %137 = math.erf %136 : vector<64x256xf32>
    %cst_60 = arith.constant 1.000000e+00 : f32
    %138 = vector.broadcast %cst_60 : f32 to vector<64x256xf32>
    %139 = arith.addf %138, %137 : vector<64x256xf32>
    %140 = arith.mulf %134, %139 : vector<64x256xf32>
    %141 = arith.index_cast %c0_i32 : i32 to index
    %c0_61 = arith.constant 0 : index
    %c0_62 = arith.constant 0 : index
    %142 = vector.load %arg12[%141, %c0_61, %c0_62] : memref<4x16x64xf32, #tpu.memory_space<vmem>>, vector<1x16x64xf32>
    %143 = vector.shape_cast %142 : vector<1x16x64xf32> to vector<16x64xf32>
    %cst_63 = arith.constant dense<0.000000e+00> : vector<16x256xf32>
    %144 = tpu.matmul %143, %140, %cst_63 {dimension_numbers = #tpu.dot_dimension_numbers<[1], [0], [0], [1], [0, 0, 1, 1], [], []>} : vector<16x64xf32>, vector<64x256xf32>, vector<16x256xf32> -> vector<16x256xf32>
    %145 = arith.index_cast %c0_i32 : i32 to index
    %c0_64 = arith.constant 0 : index
    %c0_65 = arith.constant 0 : index
    %146 = vector.load %arg13[%145, %c0_64, %c0_65] : memref<4x16x1xf32, #tpu.memory_space<vmem>>, vector<1x16x1xf32>
    %147 = vector.shape_cast %146 : vector<1x16x1xf32> to vector<16x1xf32>
    %148 = vector.broadcast %147 : vector<16x1xf32> to vector<16x256xf32>
    %149 = arith.addf %144, %148 : vector<16x256xf32>
    %150 = arith.index_cast %c0_i32 : i32 to index
    %c0_66 = arith.constant 0 : index
    %c0_67 = arith.constant 0 : index
    %151 = vector.load %arg10[%150, %c0_66, %c0_67] : memref<4x64x16xf32, #tpu.memory_space<vmem>>, vector<1x64x16xf32>
    %152 = vector.shape_cast %151 : vector<1x64x16xf32> to vector<64x16xf32>
    %153 = vector.extract_strided_slice %68 {offsets = [0, 768], sizes = [16, 256], strides = [1, 1]} : vector<16x1024xf32> to vector<16x256xf32>
    %cst_68 = arith.constant dense<0.000000e+00> : vector<64x256xf32>
    %154 = tpu.matmul %152, %153, %cst_68 {dimension_numbers = #tpu.dot_dimension_numbers<[1], [0], [0], [1], [0, 0, 1, 1], [], []>} : vector<64x16xf32>, vector<16x256xf32>, vector<64x256xf32> -> vector<64x256xf32>
    %155 = arith.index_cast %c0_i32 : i32 to index
    %c0_69 = arith.constant 0 : index
    %c0_70 = arith.constant 0 : index
    %156 = vector.load %arg11[%155, %c0_69, %c0_70] : memref<4x64x1xf32, #tpu.memory_space<vmem>>, vector<1x64x1xf32>
    %157 = vector.shape_cast %156 : vector<1x64x1xf32> to vector<64x1xf32>
    %158 = vector.broadcast %157 : vector<64x1xf32> to vector<64x256xf32>
    %159 = arith.addf %154, %158 : vector<64x256xf32>
    %cst_71 = arith.constant 5.000000e-01 : f32
    %160 = vector.broadcast %cst_71 : f32 to vector<64x256xf32>
    %161 = arith.mulf %160, %159 : vector<64x256xf32>
    %cst_72 = arith.constant 0.707106769 : f32
    %162 = vector.broadcast %cst_72 : f32 to vector<64x256xf32>
    %163 = arith.mulf %159, %162 : vector<64x256xf32>
    %164 = math.erf %163 : vector<64x256xf32>
    %cst_73 = arith.constant 1.000000e+00 : f32
    %165 = vector.broadcast %cst_73 : f32 to vector<64x256xf32>
    %166 = arith.addf %165, %164 : vector<64x256xf32>
    %167 = arith.mulf %161, %166 : vector<64x256xf32>
    %168 = arith.index_cast %c0_i32 : i32 to index
    %c0_74 = arith.constant 0 : index
    %c0_75 = arith.constant 0 : index
    %169 = vector.load %arg12[%168, %c0_74, %c0_75] : memref<4x16x64xf32, #tpu.memory_space<vmem>>, vector<1x16x64xf32>
    %170 = vector.shape_cast %169 : vector<1x16x64xf32> to vector<16x64xf32>
    %cst_76 = arith.constant dense<0.000000e+00> : vector<16x256xf32>
    %171 = tpu.matmul %170, %167, %cst_76 {dimension_numbers = #tpu.dot_dimension_numbers<[1], [0], [0], [1], [0, 0, 1, 1], [], []>} : vector<16x64xf32>, vector<64x256xf32>, vector<16x256xf32> -> vector<16x256xf32>
    %172 = arith.index_cast %c0_i32 : i32 to index
    %c0_77 = arith.constant 0 : index
    %c0_78 = arith.constant 0 : index
    %173 = vector.load %arg13[%172, %c0_77, %c0_78] : memref<4x16x1xf32, #tpu.memory_space<vmem>>, vector<1x16x1xf32>
    %174 = vector.shape_cast %173 : vector<1x16x1xf32> to vector<16x1xf32>
    %175 = vector.broadcast %174 : vector<16x1xf32> to vector<16x256xf32>
    %176 = arith.addf %171, %175 : vector<16x256xf32>
    %177 = tpu.concatenate %95, %122, %149, %176 in 1 : vector<16x256xf32>, vector<16x256xf32>, vector<16x256xf32>, vector<16x256xf32> -> vector<16x1024xf32>
    %178 = arith.addf %40, %177 : vector<16x1024xf32>
    %c1_i32 = arith.constant 1 : i32
    %179 = arith.index_cast %c1_i32 : i32 to index
    %c0_79 = arith.constant 0 : index
    %c0_80 = arith.constant 0 : index
    %180 = vector.load %arg4[%179, %c0_79, %c0_80] : memref<4x16x1xf32, #tpu.memory_space<vmem>>, vector<1x16x1xf32>
    %181 = vector.shape_cast %180 : vector<1x16x1xf32> to vector<16x1xf32>
    %182 = arith.index_cast %c1_i32 : i32 to index
    %c0_81 = arith.constant 0 : index
    %c0_82 = arith.constant 0 : index
    %183 = vector.load %arg5[%182, %c0_81, %c0_82] : memref<4x16x1xf32, #tpu.memory_space<vmem>>, vector<1x16x1xf32>
    %184 = vector.shape_cast %183 : vector<1x16x1xf32> to vector<16x1xf32>
    %cst_83 = arith.constant dense<0.000000e+00> : vector<1x1024xf32>
    %185 = tpu.matmul %2, %178, %cst_83 {dimension_numbers = #tpu.dot_dimension_numbers<[1], [0], [0], [1], [0, 0, 1, 1], [], []>} : vector<1x16xf32>, vector<16x1024xf32>, vector<1x1024xf32> -> vector<1x1024xf32>
    %186 = arith.mulf %178, %178 : vector<16x1024xf32>
    %cst_84 = arith.constant dense<0.000000e+00> : vector<1x1024xf32>
    %187 = tpu.matmul %2, %186, %cst_84 {dimension_numbers = #tpu.dot_dimension_numbers<[1], [0], [0], [1], [0, 0, 1, 1], [], []>} : vector<1x16xf32>, vector<16x1024xf32>, vector<1x1024xf32> -> vector<1x1024xf32>
    %cst_85 = arith.constant 6.250000e-02 : f32
    %188 = vector.broadcast %cst_85 : f32 to vector<1x1024xf32>
    %189 = arith.mulf %185, %188 : vector<1x1024xf32>
    %cst_86 = arith.constant 6.250000e-02 : f32
    %190 = vector.broadcast %cst_86 : f32 to vector<1x1024xf32>
    %191 = arith.mulf %187, %190 : vector<1x1024xf32>
    %192 = arith.mulf %189, %189 : vector<1x1024xf32>
    %193 = arith.subf %191, %192 : vector<1x1024xf32>
    %cst_87 = arith.constant 0.000000e+00 : f32
    %194 = vector.broadcast %cst_87 : f32 to vector<1x1024xf32>
    %195 = arith.maximumf %193, %194 : vector<1x1024xf32>
    %196 = vector.broadcast %189 : vector<1x1024xf32> to vector<16x1024xf32>
    %197 = arith.subf %178, %196 : vector<16x1024xf32>
    %cst_88 = arith.constant 9.99999974E-6 : f32
    %198 = vector.broadcast %cst_88 : f32 to vector<1x1024xf32>
    %199 = arith.addf %195, %198 : vector<1x1024xf32>
    %200 = math.rsqrt %199 : vector<1x1024xf32>
    %201 = vector.broadcast %200 : vector<1x1024xf32> to vector<16x1024xf32>
    %202 = arith.mulf %197, %201 : vector<16x1024xf32>
    %203 = vector.broadcast %181 : vector<16x1xf32> to vector<16x1024xf32>
    %204 = arith.mulf %202, %203 : vector<16x1024xf32>
    %205 = vector.broadcast %184 : vector<16x1xf32> to vector<16x1024xf32>
    %206 = arith.addf %204, %205 : vector<16x1024xf32>
    %207 = arith.index_cast %c1_i32 : i32 to index
    %c0_89 = arith.constant 0 : index
    %c0_90 = arith.constant 0 : index
    %208 = vector.load %arg6[%207, %c0_89, %c0_90] : memref<4x16x16xf32, #tpu.memory_space<vmem>>, vector<1x16x16xf32>
    %209 = vector.shape_cast %208 : vector<1x16x16xf32> to vector<16x16xf32>
    %cst_91 = arith.constant dense<0.000000e+00> : vector<16x1024xf32>
    %210 = tpu.matmul %209, %206, %cst_91 {dimension_numbers = #tpu.dot_dimension_numbers<[1], [0], [0], [1], [0, 0, 1, 1], [], []>} : vector<16x16xf32>, vector<16x1024xf32>, vector<16x1024xf32> -> vector<16x1024xf32>
    %211 = arith.addf %178, %210 : vector<16x1024xf32>
    %212 = arith.index_cast %c1_i32 : i32 to index
    %c0_92 = arith.constant 0 : index
    %c0_93 = arith.constant 0 : index
    %213 = vector.load %arg7[%212, %c0_92, %c0_93] : memref<4x16x1xf32, #tpu.memory_space<vmem>>, vector<1x16x1xf32>
    %214 = vector.shape_cast %213 : vector<1x16x1xf32> to vector<16x1xf32>
    %215 = vector.broadcast %214 : vector<16x1xf32> to vector<16x1024xf32>
    %216 = arith.addf %211, %215 : vector<16x1024xf32>
    %217 = arith.index_cast %c1_i32 : i32 to index
    %c0_94 = arith.constant 0 : index
    %c0_95 = arith.constant 0 : index
    %218 = vector.load %arg8[%217, %c0_94, %c0_95] : memref<4x16x1xf32, #tpu.memory_space<vmem>>, vector<1x16x1xf32>
    %219 = vector.shape_cast %218 : vector<1x16x1xf32> to vector<16x1xf32>
    %220 = arith.index_cast %c1_i32 : i32 to index
    %c0_96 = arith.constant 0 : index
    %c0_97 = arith.constant 0 : index
    %221 = vector.load %arg9[%220, %c0_96, %c0_97] : memref<4x16x1xf32, #tpu.memory_space<vmem>>, vector<1x16x1xf32>
    %222 = vector.shape_cast %221 : vector<1x16x1xf32> to vector<16x1xf32>
    %cst_98 = arith.constant dense<0.000000e+00> : vector<1x1024xf32>
    %223 = tpu.matmul %2, %216, %cst_98 {dimension_numbers = #tpu.dot_dimension_numbers<[1], [0], [0], [1], [0, 0, 1, 1], [], []>} : vector<1x16xf32>, vector<16x1024xf32>, vector<1x1024xf32> -> vector<1x1024xf32>
    %224 = arith.mulf %216, %216 : vector<16x1024xf32>
    %cst_99 = arith.constant dense<0.000000e+00> : vector<1x1024xf32>
    %225 = tpu.matmul %2, %224, %cst_99 {dimension_numbers = #tpu.dot_dimension_numbers<[1], [0], [0], [1], [0, 0, 1, 1], [], []>} : vector<1x16xf32>, vector<16x1024xf32>, vector<1x1024xf32> -> vector<1x1024xf32>
    %cst_100 = arith.constant 6.250000e-02 : f32
    %226 = vector.broadcast %cst_100 : f32 to vector<1x1024xf32>
    %227 = arith.mulf %223, %226 : vector<1x1024xf32>
    %cst_101 = arith.constant 6.250000e-02 : f32
    %228 = vector.broadcast %cst_101 : f32 to vector<1x1024xf32>
    %229 = arith.mulf %225, %228 : vector<1x1024xf32>
    %230 = arith.mulf %227, %227 : vector<1x1024xf32>
    %231 = arith.subf %229, %230 : vector<1x1024xf32>
    %cst_102 = arith.constant 0.000000e+00 : f32
    %232 = vector.broadcast %cst_102 : f32 to vector<1x1024xf32>
    %233 = arith.maximumf %231, %232 : vector<1x1024xf32>
    %234 = vector.broadcast %227 : vector<1x1024xf32> to vector<16x1024xf32>
    %235 = arith.subf %216, %234 : vector<16x1024xf32>
    %cst_103 = arith.constant 9.99999974E-6 : f32
    %236 = vector.broadcast %cst_103 : f32 to vector<1x1024xf32>
    %237 = arith.addf %233, %236 : vector<1x1024xf32>
    %238 = math.rsqrt %237 : vector<1x1024xf32>
    %239 = vector.broadcast %238 : vector<1x1024xf32> to vector<16x1024xf32>
    %240 = arith.mulf %235, %239 : vector<16x1024xf32>
    %241 = vector.broadcast %219 : vector<16x1xf32> to vector<16x1024xf32>
    %242 = arith.mulf %240, %241 : vector<16x1024xf32>
    %243 = vector.broadcast %222 : vector<16x1xf32> to vector<16x1024xf32>
    %244 = arith.addf %242, %243 : vector<16x1024xf32>
    %245 = arith.index_cast %c1_i32 : i32 to index
    %c0_104 = arith.constant 0 : index
    %c0_105 = arith.constant 0 : index
    %246 = vector.load %arg10[%245, %c0_104, %c0_105] : memref<4x64x16xf32, #tpu.memory_space<vmem>>, vector<1x64x16xf32>
    %247 = vector.shape_cast %246 : vector<1x64x16xf32> to vector<64x16xf32>
    %248 = vector.extract_strided_slice %244 {offsets = [0, 0], sizes = [16, 256], strides = [1, 1]} : vector<16x1024xf32> to vector<16x256xf32>
    %cst_106 = arith.constant dense<0.000000e+00> : vector<64x256xf32>
    %249 = tpu.matmul %247, %248, %cst_106 {dimension_numbers = #tpu.dot_dimension_numbers<[1], [0], [0], [1], [0, 0, 1, 1], [], []>} : vector<64x16xf32>, vector<16x256xf32>, vector<64x256xf32> -> vector<64x256xf32>
    %250 = arith.index_cast %c1_i32 : i32 to index
    %c0_107 = arith.constant 0 : index
    %c0_108 = arith.constant 0 : index
    %251 = vector.load %arg11[%250, %c0_107, %c0_108] : memref<4x64x1xf32, #tpu.memory_space<vmem>>, vector<1x64x1xf32>
    %252 = vector.shape_cast %251 : vector<1x64x1xf32> to vector<64x1xf32>
    %253 = vector.broadcast %252 : vector<64x1xf32> to vector<64x256xf32>
    %254 = arith.addf %249, %253 : vector<64x256xf32>
    %cst_109 = arith.constant 5.000000e-01 : f32
    %255 = vector.broadcast %cst_109 : f32 to vector<64x256xf32>
    %256 = arith.mulf %255, %254 : vector<64x256xf32>
    %cst_110 = arith.constant 0.707106769 : f32
    %257 = vector.broadcast %cst_110 : f32 to vector<64x256xf32>
    %258 = arith.mulf %254, %257 : vector<64x256xf32>
    %259 = math.erf %258 : vector<64x256xf32>
    %cst_111 = arith.constant 1.000000e+00 : f32
    %260 = vector.broadcast %cst_111 : f32 to vector<64x256xf32>
    %261 = arith.addf %260, %259 : vector<64x256xf32>
    %262 = arith.mulf %256, %261 : vector<64x256xf32>
    %263 = arith.index_cast %c1_i32 : i32 to index
    %c0_112 = arith.constant 0 : index
    %c0_113 = arith.constant 0 : index
    %264 = vector.load %arg12[%263, %c0_112, %c0_113] : memref<4x16x64xf32, #tpu.memory_space<vmem>>, vector<1x16x64xf32>
    %265 = vector.shape_cast %264 : vector<1x16x64xf32> to vector<16x64xf32>
    %cst_114 = arith.constant dense<0.000000e+00> : vector<16x256xf32>
    %266 = tpu.matmul %265, %262, %cst_114 {dimension_numbers = #tpu.dot_dimension_numbers<[1], [0], [0], [1], [0, 0, 1, 1], [], []>} : vector<16x64xf32>, vector<64x256xf32>, vector<16x256xf32> -> vector<16x256xf32>
    %267 = arith.index_cast %c1_i32 : i32 to index
    %c0_115 = arith.constant 0 : index
    %c0_116 = arith.constant 0 : index
    %268 = vector.load %arg13[%267, %c0_115, %c0_116] : memref<4x16x1xf32, #tpu.memory_space<vmem>>, vector<1x16x1xf32>
    %269 = vector.shape_cast %268 : vector<1x16x1xf32> to vector<16x1xf32>
    %270 = vector.broadcast %269 : vector<16x1xf32> to vector<16x256xf32>
    %271 = arith.addf %266, %270 : vector<16x256xf32>
    %272 = arith.index_cast %c1_i32 : i32 to index
    %c0_117 = arith.constant 0 : index
    %c0_118 = arith.constant 0 : index
    %273 = vector.load %arg10[%272, %c0_117, %c0_118] : memref<4x64x16xf32, #tpu.memory_space<vmem>>, vector<1x64x16xf32>
    %274 = vector.shape_cast %273 : vector<1x64x16xf32> to vector<64x16xf32>
    %275 = vector.extract_strided_slice %244 {offsets = [0, 256], sizes = [16, 256], strides = [1, 1]} : vector<16x1024xf32> to vector<16x256xf32>
    %cst_119 = arith.constant dense<0.000000e+00> : vector<64x256xf32>
    %276 = tpu.matmul %274, %275, %cst_119 {dimension_numbers = #tpu.dot_dimension_numbers<[1], [0], [0], [1], [0, 0, 1, 1], [], []>} : vector<64x16xf32>, vector<16x256xf32>, vector<64x256xf32> -> vector<64x256xf32>
    %277 = arith.index_cast %c1_i32 : i32 to index
    %c0_120 = arith.constant 0 : index
    %c0_121 = arith.constant 0 : index
    %278 = vector.load %arg11[%277, %c0_120, %c0_121] : memref<4x64x1xf32, #tpu.memory_space<vmem>>, vector<1x64x1xf32>
    %279 = vector.shape_cast %278 : vector<1x64x1xf32> to vector<64x1xf32>
    %280 = vector.broadcast %279 : vector<64x1xf32> to vector<64x256xf32>
    %281 = arith.addf %276, %280 : vector<64x256xf32>
    %cst_122 = arith.constant 5.000000e-01 : f32
    %282 = vector.broadcast %cst_122 : f32 to vector<64x256xf32>
    %283 = arith.mulf %282, %281 : vector<64x256xf32>
    %cst_123 = arith.constant 0.707106769 : f32
    %284 = vector.broadcast %cst_123 : f32 to vector<64x256xf32>
    %285 = arith.mulf %281, %284 : vector<64x256xf32>
    %286 = math.erf %285 : vector<64x256xf32>
    %cst_124 = arith.constant 1.000000e+00 : f32
    %287 = vector.broadcast %cst_124 : f32 to vector<64x256xf32>
    %288 = arith.addf %287, %286 : vector<64x256xf32>
    %289 = arith.mulf %283, %288 : vector<64x256xf32>
    %290 = arith.index_cast %c1_i32 : i32 to index
    %c0_125 = arith.constant 0 : index
    %c0_126 = arith.constant 0 : index
    %291 = vector.load %arg12[%290, %c0_125, %c0_126] : memref<4x16x64xf32, #tpu.memory_space<vmem>>, vector<1x16x64xf32>
    %292 = vector.shape_cast %291 : vector<1x16x64xf32> to vector<16x64xf32>
    %cst_127 = arith.constant dense<0.000000e+00> : vector<16x256xf32>
    %293 = tpu.matmul %292, %289, %cst_127 {dimension_numbers = #tpu.dot_dimension_numbers<[1], [0], [0], [1], [0, 0, 1, 1], [], []>} : vector<16x64xf32>, vector<64x256xf32>, vector<16x256xf32> -> vector<16x256xf32>
    %294 = arith.index_cast %c1_i32 : i32 to index
    %c0_128 = arith.constant 0 : index
    %c0_129 = arith.constant 0 : index
    %295 = vector.load %arg13[%294, %c0_128, %c0_129] : memref<4x16x1xf32, #tpu.memory_space<vmem>>, vector<1x16x1xf32>
    %296 = vector.shape_cast %295 : vector<1x16x1xf32> to vector<16x1xf32>
    %297 = vector.broadcast %296 : vector<16x1xf32> to vector<16x256xf32>
    %298 = arith.addf %293, %297 : vector<16x256xf32>
    %299 = arith.index_cast %c1_i32 : i32 to index
    %c0_130 = arith.constant 0 : index
    %c0_131 = arith.constant 0 : index
    %300 = vector.load %arg10[%299, %c0_130, %c0_131] : memref<4x64x16xf32, #tpu.memory_space<vmem>>, vector<1x64x16xf32>
    %301 = vector.shape_cast %300 : vector<1x64x16xf32> to vector<64x16xf32>
    %302 = vector.extract_strided_slice %244 {offsets = [0, 512], sizes = [16, 256], strides = [1, 1]} : vector<16x1024xf32> to vector<16x256xf32>
    %cst_132 = arith.constant dense<0.000000e+00> : vector<64x256xf32>
    %303 = tpu.matmul %301, %302, %cst_132 {dimension_numbers = #tpu.dot_dimension_numbers<[1], [0], [0], [1], [0, 0, 1, 1], [], []>} : vector<64x16xf32>, vector<16x256xf32>, vector<64x256xf32> -> vector<64x256xf32>
    %304 = arith.index_cast %c1_i32 : i32 to index
    %c0_133 = arith.constant 0 : index
    %c0_134 = arith.constant 0 : index
    %305 = vector.load %arg11[%304, %c0_133, %c0_134] : memref<4x64x1xf32, #tpu.memory_space<vmem>>, vector<1x64x1xf32>
    %306 = vector.shape_cast %305 : vector<1x64x1xf32> to vector<64x1xf32>
    %307 = vector.broadcast %306 : vector<64x1xf32> to vector<64x256xf32>
    %308 = arith.addf %303, %307 : vector<64x256xf32>
    %cst_135 = arith.constant 5.000000e-01 : f32
    %309 = vector.broadcast %cst_135 : f32 to vector<64x256xf32>
    %310 = arith.mulf %309, %308 : vector<64x256xf32>
    %cst_136 = arith.constant 0.707106769 : f32
    %311 = vector.broadcast %cst_136 : f32 to vector<64x256xf32>
    %312 = arith.mulf %308, %311 : vector<64x256xf32>
    %313 = math.erf %312 : vector<64x256xf32>
    %cst_137 = arith.constant 1.000000e+00 : f32
    %314 = vector.broadcast %cst_137 : f32 to vector<64x256xf32>
    %315 = arith.addf %314, %313 : vector<64x256xf32>
    %316 = arith.mulf %310, %315 : vector<64x256xf32>
    %317 = arith.index_cast %c1_i32 : i32 to index
    %c0_138 = arith.constant 0 : index
    %c0_139 = arith.constant 0 : index
    %318 = vector.load %arg12[%317, %c0_138, %c0_139] : memref<4x16x64xf32, #tpu.memory_space<vmem>>, vector<1x16x64xf32>
    %319 = vector.shape_cast %318 : vector<1x16x64xf32> to vector<16x64xf32>
    %cst_140 = arith.constant dense<0.000000e+00> : vector<16x256xf32>
    %320 = tpu.matmul %319, %316, %cst_140 {dimension_numbers = #tpu.dot_dimension_numbers<[1], [0], [0], [1], [0, 0, 1, 1], [], []>} : vector<16x64xf32>, vector<64x256xf32>, vector<16x256xf32> -> vector<16x256xf32>
    %321 = arith.index_cast %c1_i32 : i32 to index
    %c0_141 = arith.constant 0 : index
    %c0_142 = arith.constant 0 : index
    %322 = vector.load %arg13[%321, %c0_141, %c0_142] : memref<4x16x1xf32, #tpu.memory_space<vmem>>, vector<1x16x1xf32>
    %323 = vector.shape_cast %322 : vector<1x16x1xf32> to vector<16x1xf32>
    %324 = vector.broadcast %323 : vector<16x1xf32> to vector<16x256xf32>
    %325 = arith.addf %320, %324 : vector<16x256xf32>
    %326 = arith.index_cast %c1_i32 : i32 to index
    %c0_143 = arith.constant 0 : index
    %c0_144 = arith.constant 0 : index
    %327 = vector.load %arg10[%326, %c0_143, %c0_144] : memref<4x64x16xf32, #tpu.memory_space<vmem>>, vector<1x64x16xf32>
    %328 = vector.shape_cast %327 : vector<1x64x16xf32> to vector<64x16xf32>
    %329 = vector.extract_strided_slice %244 {offsets = [0, 768], sizes = [16, 256], strides = [1, 1]} : vector<16x1024xf32> to vector<16x256xf32>
    %cst_145 = arith.constant dense<0.000000e+00> : vector<64x256xf32>
    %330 = tpu.matmul %328, %329, %cst_145 {dimension_numbers = #tpu.dot_dimension_numbers<[1], [0], [0], [1], [0, 0, 1, 1], [], []>} : vector<64x16xf32>, vector<16x256xf32>, vector<64x256xf32> -> vector<64x256xf32>
    %331 = arith.index_cast %c1_i32 : i32 to index
    %c0_146 = arith.constant 0 : index
    %c0_147 = arith.constant 0 : index
    %332 = vector.load %arg11[%331, %c0_146, %c0_147] : memref<4x64x1xf32, #tpu.memory_space<vmem>>, vector<1x64x1xf32>
    %333 = vector.shape_cast %332 : vector<1x64x1xf32> to vector<64x1xf32>
    %334 = vector.broadcast %333 : vector<64x1xf32> to vector<64x256xf32>
    %335 = arith.addf %330, %334 : vector<64x256xf32>
    %cst_148 = arith.constant 5.000000e-01 : f32
    %336 = vector.broadcast %cst_148 : f32 to vector<64x256xf32>
    %337 = arith.mulf %336, %335 : vector<64x256xf32>
    %cst_149 = arith.constant 0.707106769 : f32
    %338 = vector.broadcast %cst_149 : f32 to vector<64x256xf32>
    %339 = arith.mulf %335, %338 : vector<64x256xf32>
    %340 = math.erf %339 : vector<64x256xf32>
    %cst_150 = arith.constant 1.000000e+00 : f32
    %341 = vector.broadcast %cst_150 : f32 to vector<64x256xf32>
    %342 = arith.addf %341, %340 : vector<64x256xf32>
    %343 = arith.mulf %337, %342 : vector<64x256xf32>
    %344 = arith.index_cast %c1_i32 : i32 to index
    %c0_151 = arith.constant 0 : index
    %c0_152 = arith.constant 0 : index
    %345 = vector.load %arg12[%344, %c0_151, %c0_152] : memref<4x16x64xf32, #tpu.memory_space<vmem>>, vector<1x16x64xf32>
    %346 = vector.shape_cast %345 : vector<1x16x64xf32> to vector<16x64xf32>
    %cst_153 = arith.constant dense<0.000000e+00> : vector<16x256xf32>
    %347 = tpu.matmul %346, %343, %cst_153 {dimension_numbers = #tpu.dot_dimension_numbers<[1], [0], [0], [1], [0, 0, 1, 1], [], []>} : vector<16x64xf32>, vector<64x256xf32>, vector<16x256xf32> -> vector<16x256xf32>
    %348 = arith.index_cast %c1_i32 : i32 to index
    %c0_154 = arith.constant 0 : index
    %c0_155 = arith.constant 0 : index
    %349 = vector.load %arg13[%348, %c0_154, %c0_155] : memref<4x16x1xf32, #tpu.memory_space<vmem>>, vector<1x16x1xf32>
    %350 = vector.shape_cast %349 : vector<1x16x1xf32> to vector<16x1xf32>
    %351 = vector.broadcast %350 : vector<16x1xf32> to vector<16x256xf32>
    %352 = arith.addf %347, %351 : vector<16x256xf32>
    %353 = tpu.concatenate %271, %298, %325, %352 in 1 : vector<16x256xf32>, vector<16x256xf32>, vector<16x256xf32>, vector<16x256xf32> -> vector<16x1024xf32>
    %354 = arith.addf %216, %353 : vector<16x1024xf32>
    %c2_i32 = arith.constant 2 : i32
    %355 = arith.index_cast %c2_i32 : i32 to index
    %c0_156 = arith.constant 0 : index
    %c0_157 = arith.constant 0 : index
    %356 = vector.load %arg4[%355, %c0_156, %c0_157] : memref<4x16x1xf32, #tpu.memory_space<vmem>>, vector<1x16x1xf32>
    %357 = vector.shape_cast %356 : vector<1x16x1xf32> to vector<16x1xf32>
    %358 = arith.index_cast %c2_i32 : i32 to index
    %c0_158 = arith.constant 0 : index
    %c0_159 = arith.constant 0 : index
    %359 = vector.load %arg5[%358, %c0_158, %c0_159] : memref<4x16x1xf32, #tpu.memory_space<vmem>>, vector<1x16x1xf32>
    %360 = vector.shape_cast %359 : vector<1x16x1xf32> to vector<16x1xf32>
    %cst_160 = arith.constant dense<0.000000e+00> : vector<1x1024xf32>
    %361 = tpu.matmul %2, %354, %cst_160 {dimension_numbers = #tpu.dot_dimension_numbers<[1], [0], [0], [1], [0, 0, 1, 1], [], []>} : vector<1x16xf32>, vector<16x1024xf32>, vector<1x1024xf32> -> vector<1x1024xf32>
    %362 = arith.mulf %354, %354 : vector<16x1024xf32>
    %cst_161 = arith.constant dense<0.000000e+00> : vector<1x1024xf32>
    %363 = tpu.matmul %2, %362, %cst_161 {dimension_numbers = #tpu.dot_dimension_numbers<[1], [0], [0], [1], [0, 0, 1, 1], [], []>} : vector<1x16xf32>, vector<16x1024xf32>, vector<1x1024xf32> -> vector<1x1024xf32>
    %cst_162 = arith.constant 6.250000e-02 : f32
    %364 = vector.broadcast %cst_162 : f32 to vector<1x1024xf32>
    %365 = arith.mulf %361, %364 : vector<1x1024xf32>
    %cst_163 = arith.constant 6.250000e-02 : f32
    %366 = vector.broadcast %cst_163 : f32 to vector<1x1024xf32>
    %367 = arith.mulf %363, %366 : vector<1x1024xf32>
    %368 = arith.mulf %365, %365 : vector<1x1024xf32>
    %369 = arith.subf %367, %368 : vector<1x1024xf32>
    %cst_164 = arith.constant 0.000000e+00 : f32
    %370 = vector.broadcast %cst_164 : f32 to vector<1x1024xf32>
    %371 = arith.maximumf %369, %370 : vector<1x1024xf32>
    %372 = vector.broadcast %365 : vector<1x1024xf32> to vector<16x1024xf32>
    %373 = arith.subf %354, %372 : vector<16x1024xf32>
    %cst_165 = arith.constant 9.99999974E-6 : f32
    %374 = vector.broadcast %cst_165 : f32 to vector<1x1024xf32>
    %375 = arith.addf %371, %374 : vector<1x1024xf32>
    %376 = math.rsqrt %375 : vector<1x1024xf32>
    %377 = vector.broadcast %376 : vector<1x1024xf32> to vector<16x1024xf32>
    %378 = arith.mulf %373, %377 : vector<16x1024xf32>
    %379 = vector.broadcast %357 : vector<16x1xf32> to vector<16x1024xf32>
    %380 = arith.mulf %378, %379 : vector<16x1024xf32>
    %381 = vector.broadcast %360 : vector<16x1xf32> to vector<16x1024xf32>
    %382 = arith.addf %380, %381 : vector<16x1024xf32>
    %383 = arith.index_cast %c2_i32 : i32 to index
    %c0_166 = arith.constant 0 : index
    %c0_167 = arith.constant 0 : index
    %384 = vector.load %arg6[%383, %c0_166, %c0_167] : memref<4x16x16xf32, #tpu.memory_space<vmem>>, vector<1x16x16xf32>
    %385 = vector.shape_cast %384 : vector<1x16x16xf32> to vector<16x16xf32>
    %cst_168 = arith.constant dense<0.000000e+00> : vector<16x1024xf32>
    %386 = tpu.matmul %385, %382, %cst_168 {dimension_numbers = #tpu.dot_dimension_numbers<[1], [0], [0], [1], [0, 0, 1, 1], [], []>} : vector<16x16xf32>, vector<16x1024xf32>, vector<16x1024xf32> -> vector<16x1024xf32>
    %387 = arith.addf %354, %386 : vector<16x1024xf32>
    %388 = arith.index_cast %c2_i32 : i32 to index
    %c0_169 = arith.constant 0 : index
    %c0_170 = arith.constant 0 : index
    %389 = vector.load %arg7[%388, %c0_169, %c0_170] : memref<4x16x1xf32, #tpu.memory_space<vmem>>, vector<1x16x1xf32>
    %390 = vector.shape_cast %389 : vector<1x16x1xf32> to vector<16x1xf32>
    %391 = vector.broadcast %390 : vector<16x1xf32> to vector<16x1024xf32>
    %392 = arith.addf %387, %391 : vector<16x1024xf32>
    %393 = arith.index_cast %c2_i32 : i32 to index
    %c0_171 = arith.constant 0 : index
    %c0_172 = arith.constant 0 : index
    %394 = vector.load %arg8[%393, %c0_171, %c0_172] : memref<4x16x1xf32, #tpu.memory_space<vmem>>, vector<1x16x1xf32>
    %395 = vector.shape_cast %394 : vector<1x16x1xf32> to vector<16x1xf32>
    %396 = arith.index_cast %c2_i32 : i32 to index
    %c0_173 = arith.constant 0 : index
    %c0_174 = arith.constant 0 : index
    %397 = vector.load %arg9[%396, %c0_173, %c0_174] : memref<4x16x1xf32, #tpu.memory_space<vmem>>, vector<1x16x1xf32>
    %398 = vector.shape_cast %397 : vector<1x16x1xf32> to vector<16x1xf32>
    %cst_175 = arith.constant dense<0.000000e+00> : vector<1x1024xf32>
    %399 = tpu.matmul %2, %392, %cst_175 {dimension_numbers = #tpu.dot_dimension_numbers<[1], [0], [0], [1], [0, 0, 1, 1], [], []>} : vector<1x16xf32>, vector<16x1024xf32>, vector<1x1024xf32> -> vector<1x1024xf32>
    %400 = arith.mulf %392, %392 : vector<16x1024xf32>
    %cst_176 = arith.constant dense<0.000000e+00> : vector<1x1024xf32>
    %401 = tpu.matmul %2, %400, %cst_176 {dimension_numbers = #tpu.dot_dimension_numbers<[1], [0], [0], [1], [0, 0, 1, 1], [], []>} : vector<1x16xf32>, vector<16x1024xf32>, vector<1x1024xf32> -> vector<1x1024xf32>
    %cst_177 = arith.constant 6.250000e-02 : f32
    %402 = vector.broadcast %cst_177 : f32 to vector<1x1024xf32>
    %403 = arith.mulf %399, %402 : vector<1x1024xf32>
    %cst_178 = arith.constant 6.250000e-02 : f32
    %404 = vector.broadcast %cst_178 : f32 to vector<1x1024xf32>
    %405 = arith.mulf %401, %404 : vector<1x1024xf32>
    %406 = arith.mulf %403, %403 : vector<1x1024xf32>
    %407 = arith.subf %405, %406 : vector<1x1024xf32>
    %cst_179 = arith.constant 0.000000e+00 : f32
    %408 = vector.broadcast %cst_179 : f32 to vector<1x1024xf32>
    %409 = arith.maximumf %407, %408 : vector<1x1024xf32>
    %410 = vector.broadcast %403 : vector<1x1024xf32> to vector<16x1024xf32>
    %411 = arith.subf %392, %410 : vector<16x1024xf32>
    %cst_180 = arith.constant 9.99999974E-6 : f32
    %412 = vector.broadcast %cst_180 : f32 to vector<1x1024xf32>
    %413 = arith.addf %409, %412 : vector<1x1024xf32>
    %414 = math.rsqrt %413 : vector<1x1024xf32>
    %415 = vector.broadcast %414 : vector<1x1024xf32> to vector<16x1024xf32>
    %416 = arith.mulf %411, %415 : vector<16x1024xf32>
    %417 = vector.broadcast %395 : vector<16x1xf32> to vector<16x1024xf32>
    %418 = arith.mulf %416, %417 : vector<16x1024xf32>
    %419 = vector.broadcast %398 : vector<16x1xf32> to vector<16x1024xf32>
    %420 = arith.addf %418, %419 : vector<16x1024xf32>
    %421 = arith.index_cast %c2_i32 : i32 to index
    %c0_181 = arith.constant 0 : index
    %c0_182 = arith.constant 0 : index
    %422 = vector.load %arg10[%421, %c0_181, %c0_182] : memref<4x64x16xf32, #tpu.memory_space<vmem>>, vector<1x64x16xf32>
    %423 = vector.shape_cast %422 : vector<1x64x16xf32> to vector<64x16xf32>
    %424 = vector.extract_strided_slice %420 {offsets = [0, 0], sizes = [16, 256], strides = [1, 1]} : vector<16x1024xf32> to vector<16x256xf32>
    %cst_183 = arith.constant dense<0.000000e+00> : vector<64x256xf32>
    %425 = tpu.matmul %423, %424, %cst_183 {dimension_numbers = #tpu.dot_dimension_numbers<[1], [0], [0], [1], [0, 0, 1, 1], [], []>} : vector<64x16xf32>, vector<16x256xf32>, vector<64x256xf32> -> vector<64x256xf32>
    %426 = arith.index_cast %c2_i32 : i32 to index
    %c0_184 = arith.constant 0 : index
    %c0_185 = arith.constant 0 : index
    %427 = vector.load %arg11[%426, %c0_184, %c0_185] : memref<4x64x1xf32, #tpu.memory_space<vmem>>, vector<1x64x1xf32>
    %428 = vector.shape_cast %427 : vector<1x64x1xf32> to vector<64x1xf32>
    %429 = vector.broadcast %428 : vector<64x1xf32> to vector<64x256xf32>
    %430 = arith.addf %425, %429 : vector<64x256xf32>
    %cst_186 = arith.constant 5.000000e-01 : f32
    %431 = vector.broadcast %cst_186 : f32 to vector<64x256xf32>
    %432 = arith.mulf %431, %430 : vector<64x256xf32>
    %cst_187 = arith.constant 0.707106769 : f32
    %433 = vector.broadcast %cst_187 : f32 to vector<64x256xf32>
    %434 = arith.mulf %430, %433 : vector<64x256xf32>
    %435 = math.erf %434 : vector<64x256xf32>
    %cst_188 = arith.constant 1.000000e+00 : f32
    %436 = vector.broadcast %cst_188 : f32 to vector<64x256xf32>
    %437 = arith.addf %436, %435 : vector<64x256xf32>
    %438 = arith.mulf %432, %437 : vector<64x256xf32>
    %439 = arith.index_cast %c2_i32 : i32 to index
    %c0_189 = arith.constant 0 : index
    %c0_190 = arith.constant 0 : index
    %440 = vector.load %arg12[%439, %c0_189, %c0_190] : memref<4x16x64xf32, #tpu.memory_space<vmem>>, vector<1x16x64xf32>
    %441 = vector.shape_cast %440 : vector<1x16x64xf32> to vector<16x64xf32>
    %cst_191 = arith.constant dense<0.000000e+00> : vector<16x256xf32>
    %442 = tpu.matmul %441, %438, %cst_191 {dimension_numbers = #tpu.dot_dimension_numbers<[1], [0], [0], [1], [0, 0, 1, 1], [], []>} : vector<16x64xf32>, vector<64x256xf32>, vector<16x256xf32> -> vector<16x256xf32>
    %443 = arith.index_cast %c2_i32 : i32 to index
    %c0_192 = arith.constant 0 : index
    %c0_193 = arith.constant 0 : index
    %444 = vector.load %arg13[%443, %c0_192, %c0_193] : memref<4x16x1xf32, #tpu.memory_space<vmem>>, vector<1x16x1xf32>
    %445 = vector.shape_cast %444 : vector<1x16x1xf32> to vector<16x1xf32>
    %446 = vector.broadcast %445 : vector<16x1xf32> to vector<16x256xf32>
    %447 = arith.addf %442, %446 : vector<16x256xf32>
    %448 = arith.index_cast %c2_i32 : i32 to index
    %c0_194 = arith.constant 0 : index
    %c0_195 = arith.constant 0 : index
    %449 = vector.load %arg10[%448, %c0_194, %c0_195] : memref<4x64x16xf32, #tpu.memory_space<vmem>>, vector<1x64x16xf32>
    %450 = vector.shape_cast %449 : vector<1x64x16xf32> to vector<64x16xf32>
    %451 = vector.extract_strided_slice %420 {offsets = [0, 256], sizes = [16, 256], strides = [1, 1]} : vector<16x1024xf32> to vector<16x256xf32>
    %cst_196 = arith.constant dense<0.000000e+00> : vector<64x256xf32>
    %452 = tpu.matmul %450, %451, %cst_196 {dimension_numbers = #tpu.dot_dimension_numbers<[1], [0], [0], [1], [0, 0, 1, 1], [], []>} : vector<64x16xf32>, vector<16x256xf32>, vector<64x256xf32> -> vector<64x256xf32>
    %453 = arith.index_cast %c2_i32 : i32 to index
    %c0_197 = arith.constant 0 : index
    %c0_198 = arith.constant 0 : index
    %454 = vector.load %arg11[%453, %c0_197, %c0_198] : memref<4x64x1xf32, #tpu.memory_space<vmem>>, vector<1x64x1xf32>
    %455 = vector.shape_cast %454 : vector<1x64x1xf32> to vector<64x1xf32>
    %456 = vector.broadcast %455 : vector<64x1xf32> to vector<64x256xf32>
    %457 = arith.addf %452, %456 : vector<64x256xf32>
    %cst_199 = arith.constant 5.000000e-01 : f32
    %458 = vector.broadcast %cst_199 : f32 to vector<64x256xf32>
    %459 = arith.mulf %458, %457 : vector<64x256xf32>
    %cst_200 = arith.constant 0.707106769 : f32
    %460 = vector.broadcast %cst_200 : f32 to vector<64x256xf32>
    %461 = arith.mulf %457, %460 : vector<64x256xf32>
    %462 = math.erf %461 : vector<64x256xf32>
    %cst_201 = arith.constant 1.000000e+00 : f32
    %463 = vector.broadcast %cst_201 : f32 to vector<64x256xf32>
    %464 = arith.addf %463, %462 : vector<64x256xf32>
    %465 = arith.mulf %459, %464 : vector<64x256xf32>
    %466 = arith.index_cast %c2_i32 : i32 to index
    %c0_202 = arith.constant 0 : index
    %c0_203 = arith.constant 0 : index
    %467 = vector.load %arg12[%466, %c0_202, %c0_203] : memref<4x16x64xf32, #tpu.memory_space<vmem>>, vector<1x16x64xf32>
    %468 = vector.shape_cast %467 : vector<1x16x64xf32> to vector<16x64xf32>
    %cst_204 = arith.constant dense<0.000000e+00> : vector<16x256xf32>
    %469 = tpu.matmul %468, %465, %cst_204 {dimension_numbers = #tpu.dot_dimension_numbers<[1], [0], [0], [1], [0, 0, 1, 1], [], []>} : vector<16x64xf32>, vector<64x256xf32>, vector<16x256xf32> -> vector<16x256xf32>
    %470 = arith.index_cast %c2_i32 : i32 to index
    %c0_205 = arith.constant 0 : index
    %c0_206 = arith.constant 0 : index
    %471 = vector.load %arg13[%470, %c0_205, %c0_206] : memref<4x16x1xf32, #tpu.memory_space<vmem>>, vector<1x16x1xf32>
    %472 = vector.shape_cast %471 : vector<1x16x1xf32> to vector<16x1xf32>
    %473 = vector.broadcast %472 : vector<16x1xf32> to vector<16x256xf32>
    %474 = arith.addf %469, %473 : vector<16x256xf32>
    %475 = arith.index_cast %c2_i32 : i32 to index
    %c0_207 = arith.constant 0 : index
    %c0_208 = arith.constant 0 : index
    %476 = vector.load %arg10[%475, %c0_207, %c0_208] : memref<4x64x16xf32, #tpu.memory_space<vmem>>, vector<1x64x16xf32>
    %477 = vector.shape_cast %476 : vector<1x64x16xf32> to vector<64x16xf32>
    %478 = vector.extract_strided_slice %420 {offsets = [0, 512], sizes = [16, 256], strides = [1, 1]} : vector<16x1024xf32> to vector<16x256xf32>
    %cst_209 = arith.constant dense<0.000000e+00> : vector<64x256xf32>
    %479 = tpu.matmul %477, %478, %cst_209 {dimension_numbers = #tpu.dot_dimension_numbers<[1], [0], [0], [1], [0, 0, 1, 1], [], []>} : vector<64x16xf32>, vector<16x256xf32>, vector<64x256xf32> -> vector<64x256xf32>
    %480 = arith.index_cast %c2_i32 : i32 to index
    %c0_210 = arith.constant 0 : index
    %c0_211 = arith.constant 0 : index
    %481 = vector.load %arg11[%480, %c0_210, %c0_211] : memref<4x64x1xf32, #tpu.memory_space<vmem>>, vector<1x64x1xf32>
    %482 = vector.shape_cast %481 : vector<1x64x1xf32> to vector<64x1xf32>
    %483 = vector.broadcast %482 : vector<64x1xf32> to vector<64x256xf32>
    %484 = arith.addf %479, %483 : vector<64x256xf32>
    %cst_212 = arith.constant 5.000000e-01 : f32
    %485 = vector.broadcast %cst_212 : f32 to vector<64x256xf32>
    %486 = arith.mulf %485, %484 : vector<64x256xf32>
    %cst_213 = arith.constant 0.707106769 : f32
    %487 = vector.broadcast %cst_213 : f32 to vector<64x256xf32>
    %488 = arith.mulf %484, %487 : vector<64x256xf32>
    %489 = math.erf %488 : vector<64x256xf32>
    %cst_214 = arith.constant 1.000000e+00 : f32
    %490 = vector.broadcast %cst_214 : f32 to vector<64x256xf32>
    %491 = arith.addf %490, %489 : vector<64x256xf32>
    %492 = arith.mulf %486, %491 : vector<64x256xf32>
    %493 = arith.index_cast %c2_i32 : i32 to index
    %c0_215 = arith.constant 0 : index
    %c0_216 = arith.constant 0 : index
    %494 = vector.load %arg12[%493, %c0_215, %c0_216] : memref<4x16x64xf32, #tpu.memory_space<vmem>>, vector<1x16x64xf32>
    %495 = vector.shape_cast %494 : vector<1x16x64xf32> to vector<16x64xf32>
    %cst_217 = arith.constant dense<0.000000e+00> : vector<16x256xf32>
    %496 = tpu.matmul %495, %492, %cst_217 {dimension_numbers = #tpu.dot_dimension_numbers<[1], [0], [0], [1], [0, 0, 1, 1], [], []>} : vector<16x64xf32>, vector<64x256xf32>, vector<16x256xf32> -> vector<16x256xf32>
    %497 = arith.index_cast %c2_i32 : i32 to index
    %c0_218 = arith.constant 0 : index
    %c0_219 = arith.constant 0 : index
    %498 = vector.load %arg13[%497, %c0_218, %c0_219] : memref<4x16x1xf32, #tpu.memory_space<vmem>>, vector<1x16x1xf32>
    %499 = vector.shape_cast %498 : vector<1x16x1xf32> to vector<16x1xf32>
    %500 = vector.broadcast %499 : vector<16x1xf32> to vector<16x256xf32>
    %501 = arith.addf %496, %500 : vector<16x256xf32>
    %502 = arith.index_cast %c2_i32 : i32 to index
    %c0_220 = arith.constant 0 : index
    %c0_221 = arith.constant 0 : index
    %503 = vector.load %arg10[%502, %c0_220, %c0_221] : memref<4x64x16xf32, #tpu.memory_space<vmem>>, vector<1x64x16xf32>
    %504 = vector.shape_cast %503 : vector<1x64x16xf32> to vector<64x16xf32>
    %505 = vector.extract_strided_slice %420 {offsets = [0, 768], sizes = [16, 256], strides = [1, 1]} : vector<16x1024xf32> to vector<16x256xf32>
    %cst_222 = arith.constant dense<0.000000e+00> : vector<64x256xf32>
    %506 = tpu.matmul %504, %505, %cst_222 {dimension_numbers = #tpu.dot_dimension_numbers<[1], [0], [0], [1], [0, 0, 1, 1], [], []>} : vector<64x16xf32>, vector<16x256xf32>, vector<64x256xf32> -> vector<64x256xf32>
    %507 = arith.index_cast %c2_i32 : i32 to index
    %c0_223 = arith.constant 0 : index
    %c0_224 = arith.constant 0 : index
    %508 = vector.load %arg11[%507, %c0_223, %c0_224] : memref<4x64x1xf32, #tpu.memory_space<vmem>>, vector<1x64x1xf32>
    %509 = vector.shape_cast %508 : vector<1x64x1xf32> to vector<64x1xf32>
    %510 = vector.broadcast %509 : vector<64x1xf32> to vector<64x256xf32>
    %511 = arith.addf %506, %510 : vector<64x256xf32>
    %cst_225 = arith.constant 5.000000e-01 : f32
    %512 = vector.broadcast %cst_225 : f32 to vector<64x256xf32>
    %513 = arith.mulf %512, %511 : vector<64x256xf32>
    %cst_226 = arith.constant 0.707106769 : f32
    %514 = vector.broadcast %cst_226 : f32 to vector<64x256xf32>
    %515 = arith.mulf %511, %514 : vector<64x256xf32>
    %516 = math.erf %515 : vector<64x256xf32>
    %cst_227 = arith.constant 1.000000e+00 : f32
    %517 = vector.broadcast %cst_227 : f32 to vector<64x256xf32>
    %518 = arith.addf %517, %516 : vector<64x256xf32>
    %519 = arith.mulf %513, %518 : vector<64x256xf32>
    %520 = arith.index_cast %c2_i32 : i32 to index
    %c0_228 = arith.constant 0 : index
    %c0_229 = arith.constant 0 : index
    %521 = vector.load %arg12[%520, %c0_228, %c0_229] : memref<4x16x64xf32, #tpu.memory_space<vmem>>, vector<1x16x64xf32>
    %522 = vector.shape_cast %521 : vector<1x16x64xf32> to vector<16x64xf32>
    %cst_230 = arith.constant dense<0.000000e+00> : vector<16x256xf32>
    %523 = tpu.matmul %522, %519, %cst_230 {dimension_numbers = #tpu.dot_dimension_numbers<[1], [0], [0], [1], [0, 0, 1, 1], [], []>} : vector<16x64xf32>, vector<64x256xf32>, vector<16x256xf32> -> vector<16x256xf32>
    %524 = arith.index_cast %c2_i32 : i32 to index
    %c0_231 = arith.constant 0 : index
    %c0_232 = arith.constant 0 : index
    %525 = vector.load %arg13[%524, %c0_231, %c0_232] : memref<4x16x1xf32, #tpu.memory_space<vmem>>, vector<1x16x1xf32>
    %526 = vector.shape_cast %525 : vector<1x16x1xf32> to vector<16x1xf32>
    %527 = vector.broadcast %526 : vector<16x1xf32> to vector<16x256xf32>
    %528 = arith.addf %523, %527 : vector<16x256xf32>
    %529 = tpu.concatenate %447, %474, %501, %528 in 1 : vector<16x256xf32>, vector<16x256xf32>, vector<16x256xf32>, vector<16x256xf32> -> vector<16x1024xf32>
    %530 = arith.addf %392, %529 : vector<16x1024xf32>
    %c3_i32 = arith.constant 3 : i32
    %531 = arith.index_cast %c3_i32 : i32 to index
    %c0_233 = arith.constant 0 : index
    %c0_234 = arith.constant 0 : index
    %532 = vector.load %arg4[%531, %c0_233, %c0_234] : memref<4x16x1xf32, #tpu.memory_space<vmem>>, vector<1x16x1xf32>
    %533 = vector.shape_cast %532 : vector<1x16x1xf32> to vector<16x1xf32>
    %534 = arith.index_cast %c3_i32 : i32 to index
    %c0_235 = arith.constant 0 : index
    %c0_236 = arith.constant 0 : index
    %535 = vector.load %arg5[%534, %c0_235, %c0_236] : memref<4x16x1xf32, #tpu.memory_space<vmem>>, vector<1x16x1xf32>
    %536 = vector.shape_cast %535 : vector<1x16x1xf32> to vector<16x1xf32>
    %cst_237 = arith.constant dense<0.000000e+00> : vector<1x1024xf32>
    %537 = tpu.matmul %2, %530, %cst_237 {dimension_numbers = #tpu.dot_dimension_numbers<[1], [0], [0], [1], [0, 0, 1, 1], [], []>} : vector<1x16xf32>, vector<16x1024xf32>, vector<1x1024xf32> -> vector<1x1024xf32>
    %538 = arith.mulf %530, %530 : vector<16x1024xf32>
    %cst_238 = arith.constant dense<0.000000e+00> : vector<1x1024xf32>
    %539 = tpu.matmul %2, %538, %cst_238 {dimension_numbers = #tpu.dot_dimension_numbers<[1], [0], [0], [1], [0, 0, 1, 1], [], []>} : vector<1x16xf32>, vector<16x1024xf32>, vector<1x1024xf32> -> vector<1x1024xf32>
    %cst_239 = arith.constant 6.250000e-02 : f32
    %540 = vector.broadcast %cst_239 : f32 to vector<1x1024xf32>
    %541 = arith.mulf %537, %540 : vector<1x1024xf32>
    %cst_240 = arith.constant 6.250000e-02 : f32
    %542 = vector.broadcast %cst_240 : f32 to vector<1x1024xf32>
    %543 = arith.mulf %539, %542 : vector<1x1024xf32>
    %544 = arith.mulf %541, %541 : vector<1x1024xf32>
    %545 = arith.subf %543, %544 : vector<1x1024xf32>
    %cst_241 = arith.constant 0.000000e+00 : f32
    %546 = vector.broadcast %cst_241 : f32 to vector<1x1024xf32>
    %547 = arith.maximumf %545, %546 : vector<1x1024xf32>
    %548 = vector.broadcast %541 : vector<1x1024xf32> to vector<16x1024xf32>
    %549 = arith.subf %530, %548 : vector<16x1024xf32>
    %cst_242 = arith.constant 9.99999974E-6 : f32
    %550 = vector.broadcast %cst_242 : f32 to vector<1x1024xf32>
    %551 = arith.addf %547, %550 : vector<1x1024xf32>
    %552 = math.rsqrt %551 : vector<1x1024xf32>
    %553 = vector.broadcast %552 : vector<1x1024xf32> to vector<16x1024xf32>
    %554 = arith.mulf %549, %553 : vector<16x1024xf32>
    %555 = vector.broadcast %533 : vector<16x1xf32> to vector<16x1024xf32>
    %556 = arith.mulf %554, %555 : vector<16x1024xf32>
    %557 = vector.broadcast %536 : vector<16x1xf32> to vector<16x1024xf32>
    %558 = arith.addf %556, %557 : vector<16x1024xf32>
    %559 = arith.index_cast %c3_i32 : i32 to index
    %c0_243 = arith.constant 0 : index
    %c0_244 = arith.constant 0 : index
    %560 = vector.load %arg6[%559, %c0_243, %c0_244] : memref<4x16x16xf32, #tpu.memory_space<vmem>>, vector<1x16x16xf32>
    %561 = vector.shape_cast %560 : vector<1x16x16xf32> to vector<16x16xf32>
    %cst_245 = arith.constant dense<0.000000e+00> : vector<16x1024xf32>
    %562 = tpu.matmul %561, %558, %cst_245 {dimension_numbers = #tpu.dot_dimension_numbers<[1], [0], [0], [1], [0, 0, 1, 1], [], []>} : vector<16x16xf32>, vector<16x1024xf32>, vector<16x1024xf32> -> vector<16x1024xf32>
    %563 = arith.addf %530, %562 : vector<16x1024xf32>
    %564 = arith.index_cast %c3_i32 : i32 to index
    %c0_246 = arith.constant 0 : index
    %c0_247 = arith.constant 0 : index
    %565 = vector.load %arg7[%564, %c0_246, %c0_247] : memref<4x16x1xf32, #tpu.memory_space<vmem>>, vector<1x16x1xf32>
    %566 = vector.shape_cast %565 : vector<1x16x1xf32> to vector<16x1xf32>
    %567 = vector.broadcast %566 : vector<16x1xf32> to vector<16x1024xf32>
    %568 = arith.addf %563, %567 : vector<16x1024xf32>
    %569 = arith.index_cast %c3_i32 : i32 to index
    %c0_248 = arith.constant 0 : index
    %c0_249 = arith.constant 0 : index
    %570 = vector.load %arg8[%569, %c0_248, %c0_249] : memref<4x16x1xf32, #tpu.memory_space<vmem>>, vector<1x16x1xf32>
    %571 = vector.shape_cast %570 : vector<1x16x1xf32> to vector<16x1xf32>
    %572 = arith.index_cast %c3_i32 : i32 to index
    %c0_250 = arith.constant 0 : index
    %c0_251 = arith.constant 0 : index
    %573 = vector.load %arg9[%572, %c0_250, %c0_251] : memref<4x16x1xf32, #tpu.memory_space<vmem>>, vector<1x16x1xf32>
    %574 = vector.shape_cast %573 : vector<1x16x1xf32> to vector<16x1xf32>
    %cst_252 = arith.constant dense<0.000000e+00> : vector<1x1024xf32>
    %575 = tpu.matmul %2, %568, %cst_252 {dimension_numbers = #tpu.dot_dimension_numbers<[1], [0], [0], [1], [0, 0, 1, 1], [], []>} : vector<1x16xf32>, vector<16x1024xf32>, vector<1x1024xf32> -> vector<1x1024xf32>
    %576 = arith.mulf %568, %568 : vector<16x1024xf32>
    %cst_253 = arith.constant dense<0.000000e+00> : vector<1x1024xf32>
    %577 = tpu.matmul %2, %576, %cst_253 {dimension_numbers = #tpu.dot_dimension_numbers<[1], [0], [0], [1], [0, 0, 1, 1], [], []>} : vector<1x16xf32>, vector<16x1024xf32>, vector<1x1024xf32> -> vector<1x1024xf32>
    %cst_254 = arith.constant 6.250000e-02 : f32
    %578 = vector.broadcast %cst_254 : f32 to vector<1x1024xf32>
    %579 = arith.mulf %575, %578 : vector<1x1024xf32>
    %cst_255 = arith.constant 6.250000e-02 : f32
    %580 = vector.broadcast %cst_255 : f32 to vector<1x1024xf32>
    %581 = arith.mulf %577, %580 : vector<1x1024xf32>
    %582 = arith.mulf %579, %579 : vector<1x1024xf32>
    %583 = arith.subf %581, %582 : vector<1x1024xf32>
    %cst_256 = arith.constant 0.000000e+00 : f32
    %584 = vector.broadcast %cst_256 : f32 to vector<1x1024xf32>
    %585 = arith.maximumf %583, %584 : vector<1x1024xf32>
    %586 = vector.broadcast %579 : vector<1x1024xf32> to vector<16x1024xf32>
    %587 = arith.subf %568, %586 : vector<16x1024xf32>
    %cst_257 = arith.constant 9.99999974E-6 : f32
    %588 = vector.broadcast %cst_257 : f32 to vector<1x1024xf32>
    %589 = arith.addf %585, %588 : vector<1x1024xf32>
    %590 = math.rsqrt %589 : vector<1x1024xf32>
    %591 = vector.broadcast %590 : vector<1x1024xf32> to vector<16x1024xf32>
    %592 = arith.mulf %587, %591 : vector<16x1024xf32>
    %593 = vector.broadcast %571 : vector<16x1xf32> to vector<16x1024xf32>
    %594 = arith.mulf %592, %593 : vector<16x1024xf32>
    %595 = vector.broadcast %574 : vector<16x1xf32> to vector<16x1024xf32>
    %596 = arith.addf %594, %595 : vector<16x1024xf32>
    %597 = arith.index_cast %c3_i32 : i32 to index
    %c0_258 = arith.constant 0 : index
    %c0_259 = arith.constant 0 : index
    %598 = vector.load %arg10[%597, %c0_258, %c0_259] : memref<4x64x16xf32, #tpu.memory_space<vmem>>, vector<1x64x16xf32>
    %599 = vector.shape_cast %598 : vector<1x64x16xf32> to vector<64x16xf32>
    %600 = vector.extract_strided_slice %596 {offsets = [0, 0], sizes = [16, 256], strides = [1, 1]} : vector<16x1024xf32> to vector<16x256xf32>
    %cst_260 = arith.constant dense<0.000000e+00> : vector<64x256xf32>
    %601 = tpu.matmul %599, %600, %cst_260 {dimension_numbers = #tpu.dot_dimension_numbers<[1], [0], [0], [1], [0, 0, 1, 1], [], []>} : vector<64x16xf32>, vector<16x256xf32>, vector<64x256xf32> -> vector<64x256xf32>
    %602 = arith.index_cast %c3_i32 : i32 to index
    %c0_261 = arith.constant 0 : index
    %c0_262 = arith.constant 0 : index
    %603 = vector.load %arg11[%602, %c0_261, %c0_262] : memref<4x64x1xf32, #tpu.memory_space<vmem>>, vector<1x64x1xf32>
    %604 = vector.shape_cast %603 : vector<1x64x1xf32> to vector<64x1xf32>
    %605 = vector.broadcast %604 : vector<64x1xf32> to vector<64x256xf32>
    %606 = arith.addf %601, %605 : vector<64x256xf32>
    %cst_263 = arith.constant 5.000000e-01 : f32
    %607 = vector.broadcast %cst_263 : f32 to vector<64x256xf32>
    %608 = arith.mulf %607, %606 : vector<64x256xf32>
    %cst_264 = arith.constant 0.707106769 : f32
    %609 = vector.broadcast %cst_264 : f32 to vector<64x256xf32>
    %610 = arith.mulf %606, %609 : vector<64x256xf32>
    %611 = math.erf %610 : vector<64x256xf32>
    %cst_265 = arith.constant 1.000000e+00 : f32
    %612 = vector.broadcast %cst_265 : f32 to vector<64x256xf32>
    %613 = arith.addf %612, %611 : vector<64x256xf32>
    %614 = arith.mulf %608, %613 : vector<64x256xf32>
    %615 = arith.index_cast %c3_i32 : i32 to index
    %c0_266 = arith.constant 0 : index
    %c0_267 = arith.constant 0 : index
    %616 = vector.load %arg12[%615, %c0_266, %c0_267] : memref<4x16x64xf32, #tpu.memory_space<vmem>>, vector<1x16x64xf32>
    %617 = vector.shape_cast %616 : vector<1x16x64xf32> to vector<16x64xf32>
    %cst_268 = arith.constant dense<0.000000e+00> : vector<16x256xf32>
    %618 = tpu.matmul %617, %614, %cst_268 {dimension_numbers = #tpu.dot_dimension_numbers<[1], [0], [0], [1], [0, 0, 1, 1], [], []>} : vector<16x64xf32>, vector<64x256xf32>, vector<16x256xf32> -> vector<16x256xf32>
    %619 = arith.index_cast %c3_i32 : i32 to index
    %c0_269 = arith.constant 0 : index
    %c0_270 = arith.constant 0 : index
    %620 = vector.load %arg13[%619, %c0_269, %c0_270] : memref<4x16x1xf32, #tpu.memory_space<vmem>>, vector<1x16x1xf32>
    %621 = vector.shape_cast %620 : vector<1x16x1xf32> to vector<16x1xf32>
    %622 = vector.broadcast %621 : vector<16x1xf32> to vector<16x256xf32>
    %623 = arith.addf %618, %622 : vector<16x256xf32>
    %624 = arith.index_cast %c3_i32 : i32 to index
    %c0_271 = arith.constant 0 : index
    %c0_272 = arith.constant 0 : index
    %625 = vector.load %arg10[%624, %c0_271, %c0_272] : memref<4x64x16xf32, #tpu.memory_space<vmem>>, vector<1x64x16xf32>
    %626 = vector.shape_cast %625 : vector<1x64x16xf32> to vector<64x16xf32>
    %627 = vector.extract_strided_slice %596 {offsets = [0, 256], sizes = [16, 256], strides = [1, 1]} : vector<16x1024xf32> to vector<16x256xf32>
    %cst_273 = arith.constant dense<0.000000e+00> : vector<64x256xf32>
    %628 = tpu.matmul %626, %627, %cst_273 {dimension_numbers = #tpu.dot_dimension_numbers<[1], [0], [0], [1], [0, 0, 1, 1], [], []>} : vector<64x16xf32>, vector<16x256xf32>, vector<64x256xf32> -> vector<64x256xf32>
    %629 = arith.index_cast %c3_i32 : i32 to index
    %c0_274 = arith.constant 0 : index
    %c0_275 = arith.constant 0 : index
    %630 = vector.load %arg11[%629, %c0_274, %c0_275] : memref<4x64x1xf32, #tpu.memory_space<vmem>>, vector<1x64x1xf32>
    %631 = vector.shape_cast %630 : vector<1x64x1xf32> to vector<64x1xf32>
    %632 = vector.broadcast %631 : vector<64x1xf32> to vector<64x256xf32>
    %633 = arith.addf %628, %632 : vector<64x256xf32>
    %cst_276 = arith.constant 5.000000e-01 : f32
    %634 = vector.broadcast %cst_276 : f32 to vector<64x256xf32>
    %635 = arith.mulf %634, %633 : vector<64x256xf32>
    %cst_277 = arith.constant 0.707106769 : f32
    %636 = vector.broadcast %cst_277 : f32 to vector<64x256xf32>
    %637 = arith.mulf %633, %636 : vector<64x256xf32>
    %638 = math.erf %637 : vector<64x256xf32>
    %cst_278 = arith.constant 1.000000e+00 : f32
    %639 = vector.broadcast %cst_278 : f32 to vector<64x256xf32>
    %640 = arith.addf %639, %638 : vector<64x256xf32>
    %641 = arith.mulf %635, %640 : vector<64x256xf32>
    %642 = arith.index_cast %c3_i32 : i32 to index
    %c0_279 = arith.constant 0 : index
    %c0_280 = arith.constant 0 : index
    %643 = vector.load %arg12[%642, %c0_279, %c0_280] : memref<4x16x64xf32, #tpu.memory_space<vmem>>, vector<1x16x64xf32>
    %644 = vector.shape_cast %643 : vector<1x16x64xf32> to vector<16x64xf32>
    %cst_281 = arith.constant dense<0.000000e+00> : vector<16x256xf32>
    %645 = tpu.matmul %644, %641, %cst_281 {dimension_numbers = #tpu.dot_dimension_numbers<[1], [0], [0], [1], [0, 0, 1, 1], [], []>} : vector<16x64xf32>, vector<64x256xf32>, vector<16x256xf32> -> vector<16x256xf32>
    %646 = arith.index_cast %c3_i32 : i32 to index
    %c0_282 = arith.constant 0 : index
    %c0_283 = arith.constant 0 : index
    %647 = vector.load %arg13[%646, %c0_282, %c0_283] : memref<4x16x1xf32, #tpu.memory_space<vmem>>, vector<1x16x1xf32>
    %648 = vector.shape_cast %647 : vector<1x16x1xf32> to vector<16x1xf32>
    %649 = vector.broadcast %648 : vector<16x1xf32> to vector<16x256xf32>
    %650 = arith.addf %645, %649 : vector<16x256xf32>
    %651 = arith.index_cast %c3_i32 : i32 to index
    %c0_284 = arith.constant 0 : index
    %c0_285 = arith.constant 0 : index
    %652 = vector.load %arg10[%651, %c0_284, %c0_285] : memref<4x64x16xf32, #tpu.memory_space<vmem>>, vector<1x64x16xf32>
    %653 = vector.shape_cast %652 : vector<1x64x16xf32> to vector<64x16xf32>
    %654 = vector.extract_strided_slice %596 {offsets = [0, 512], sizes = [16, 256], strides = [1, 1]} : vector<16x1024xf32> to vector<16x256xf32>
    %cst_286 = arith.constant dense<0.000000e+00> : vector<64x256xf32>
    %655 = tpu.matmul %653, %654, %cst_286 {dimension_numbers = #tpu.dot_dimension_numbers<[1], [0], [0], [1], [0, 0, 1, 1], [], []>} : vector<64x16xf32>, vector<16x256xf32>, vector<64x256xf32> -> vector<64x256xf32>
    %656 = arith.index_cast %c3_i32 : i32 to index
    %c0_287 = arith.constant 0 : index
    %c0_288 = arith.constant 0 : index
    %657 = vector.load %arg11[%656, %c0_287, %c0_288] : memref<4x64x1xf32, #tpu.memory_space<vmem>>, vector<1x64x1xf32>
    %658 = vector.shape_cast %657 : vector<1x64x1xf32> to vector<64x1xf32>
    %659 = vector.broadcast %658 : vector<64x1xf32> to vector<64x256xf32>
    %660 = arith.addf %655, %659 : vector<64x256xf32>
    %cst_289 = arith.constant 5.000000e-01 : f32
    %661 = vector.broadcast %cst_289 : f32 to vector<64x256xf32>
    %662 = arith.mulf %661, %660 : vector<64x256xf32>
    %cst_290 = arith.constant 0.707106769 : f32
    %663 = vector.broadcast %cst_290 : f32 to vector<64x256xf32>
    %664 = arith.mulf %660, %663 : vector<64x256xf32>
    %665 = math.erf %664 : vector<64x256xf32>
    %cst_291 = arith.constant 1.000000e+00 : f32
    %666 = vector.broadcast %cst_291 : f32 to vector<64x256xf32>
    %667 = arith.addf %666, %665 : vector<64x256xf32>
    %668 = arith.mulf %662, %667 : vector<64x256xf32>
    %669 = arith.index_cast %c3_i32 : i32 to index
    %c0_292 = arith.constant 0 : index
    %c0_293 = arith.constant 0 : index
    %670 = vector.load %arg12[%669, %c0_292, %c0_293] : memref<4x16x64xf32, #tpu.memory_space<vmem>>, vector<1x16x64xf32>
    %671 = vector.shape_cast %670 : vector<1x16x64xf32> to vector<16x64xf32>
    %cst_294 = arith.constant dense<0.000000e+00> : vector<16x256xf32>
    %672 = tpu.matmul %671, %668, %cst_294 {dimension_numbers = #tpu.dot_dimension_numbers<[1], [0], [0], [1], [0, 0, 1, 1], [], []>} : vector<16x64xf32>, vector<64x256xf32>, vector<16x256xf32> -> vector<16x256xf32>
    %673 = arith.index_cast %c3_i32 : i32 to index
    %c0_295 = arith.constant 0 : index
    %c0_296 = arith.constant 0 : index
    %674 = vector.load %arg13[%673, %c0_295, %c0_296] : memref<4x16x1xf32, #tpu.memory_space<vmem>>, vector<1x16x1xf32>
    %675 = vector.shape_cast %674 : vector<1x16x1xf32> to vector<16x1xf32>
    %676 = vector.broadcast %675 : vector<16x1xf32> to vector<16x256xf32>
    %677 = arith.addf %672, %676 : vector<16x256xf32>
    %678 = arith.index_cast %c3_i32 : i32 to index
    %c0_297 = arith.constant 0 : index
    %c0_298 = arith.constant 0 : index
    %679 = vector.load %arg10[%678, %c0_297, %c0_298] : memref<4x64x16xf32, #tpu.memory_space<vmem>>, vector<1x64x16xf32>
    %680 = vector.shape_cast %679 : vector<1x64x16xf32> to vector<64x16xf32>
    %681 = vector.extract_strided_slice %596 {offsets = [0, 768], sizes = [16, 256], strides = [1, 1]} : vector<16x1024xf32> to vector<16x256xf32>
    %cst_299 = arith.constant dense<0.000000e+00> : vector<64x256xf32>
    %682 = tpu.matmul %680, %681, %cst_299 {dimension_numbers = #tpu.dot_dimension_numbers<[1], [0], [0], [1], [0, 0, 1, 1], [], []>} : vector<64x16xf32>, vector<16x256xf32>, vector<64x256xf32> -> vector<64x256xf32>
    %683 = arith.index_cast %c3_i32 : i32 to index
    %c0_300 = arith.constant 0 : index
    %c0_301 = arith.constant 0 : index
    %684 = vector.load %arg11[%683, %c0_300, %c0_301] : memref<4x64x1xf32, #tpu.memory_space<vmem>>, vector<1x64x1xf32>
    %685 = vector.shape_cast %684 : vector<1x64x1xf32> to vector<64x1xf32>
    %686 = vector.broadcast %685 : vector<64x1xf32> to vector<64x256xf32>
    %687 = arith.addf %682, %686 : vector<64x256xf32>
    %cst_302 = arith.constant 5.000000e-01 : f32
    %688 = vector.broadcast %cst_302 : f32 to vector<64x256xf32>
    %689 = arith.mulf %688, %687 : vector<64x256xf32>
    %cst_303 = arith.constant 0.707106769 : f32
    %690 = vector.broadcast %cst_303 : f32 to vector<64x256xf32>
    %691 = arith.mulf %687, %690 : vector<64x256xf32>
    %692 = math.erf %691 : vector<64x256xf32>
    %cst_304 = arith.constant 1.000000e+00 : f32
    %693 = vector.broadcast %cst_304 : f32 to vector<64x256xf32>
    %694 = arith.addf %693, %692 : vector<64x256xf32>
    %695 = arith.mulf %689, %694 : vector<64x256xf32>
    %696 = arith.index_cast %c3_i32 : i32 to index
    %c0_305 = arith.constant 0 : index
    %c0_306 = arith.constant 0 : index
    %697 = vector.load %arg12[%696, %c0_305, %c0_306] : memref<4x16x64xf32, #tpu.memory_space<vmem>>, vector<1x16x64xf32>
    %698 = vector.shape_cast %697 : vector<1x16x64xf32> to vector<16x64xf32>
    %cst_307 = arith.constant dense<0.000000e+00> : vector<16x256xf32>
    %699 = tpu.matmul %698, %695, %cst_307 {dimension_numbers = #tpu.dot_dimension_numbers<[1], [0], [0], [1], [0, 0, 1, 1], [], []>} : vector<16x64xf32>, vector<64x256xf32>, vector<16x256xf32> -> vector<16x256xf32>
    %700 = arith.index_cast %c3_i32 : i32 to index
    %c0_308 = arith.constant 0 : index
    %c0_309 = arith.constant 0 : index
    %701 = vector.load %arg13[%700, %c0_308, %c0_309] : memref<4x16x1xf32, #tpu.memory_space<vmem>>, vector<1x16x1xf32>
    %702 = vector.shape_cast %701 : vector<1x16x1xf32> to vector<16x1xf32>
    %703 = vector.broadcast %702 : vector<16x1xf32> to vector<16x256xf32>
    %704 = arith.addf %699, %703 : vector<16x256xf32>
    %705 = tpu.concatenate %623, %650, %677, %704 in 1 : vector<16x256xf32>, vector<16x256xf32>, vector<16x256xf32>, vector<16x256xf32> -> vector<16x1024xf32>
    %706 = arith.addf %568, %705 : vector<16x1024xf32>
    %c4_i32 = arith.constant 4 : i32
    %c0_310 = arith.constant 0 : index
    %c0_311 = arith.constant 0 : index
    %707 = vector.load %arg3[%c0_310, %c0_311] : memref<1024x128xf32, #tpu.memory_space<vmem>>, vector<1024x128xf32>
    %c1023_i32 = arith.constant 1023 : i32
    %708 = tpu.dynamic_rotate %706 by %c1023_i32 dim 1 : vector<16x1024xf32>, i32 -> vector<16x1024xf32>
    %709 = arith.maximumf %706, %708 : vector<16x1024xf32>
    %c1022_i32 = arith.constant 1022 : i32
    %710 = tpu.dynamic_rotate %709 by %c1022_i32 dim 1 : vector<16x1024xf32>, i32 -> vector<16x1024xf32>
    %711 = arith.maximumf %709, %710 : vector<16x1024xf32>
    %c1020_i32 = arith.constant 1020 : i32
    %712 = tpu.dynamic_rotate %711 by %c1020_i32 dim 1 : vector<16x1024xf32>, i32 -> vector<16x1024xf32>
    %713 = arith.maximumf %711, %712 : vector<16x1024xf32>
    %cst_312 = arith.constant dense<0.000000e+00> : vector<16x128xf32>
    %714 = tpu.matmul %713, %707, %cst_312 {dimension_numbers = #tpu.dot_dimension_numbers<[1], [0], [0], [1], [0, 0, 1, 1], [], []>} : vector<16x1024xf32>, vector<1024x128xf32>, vector<16x128xf32> -> vector<16x128xf32>
    %c0_313 = arith.constant 0 : index
    %c0_314 = arith.constant 0 : index
    %715 = vector.load %arg14[%c0_313, %c0_314] : memref<32x16xf32, #tpu.memory_space<vmem>>, vector<32x16xf32>
    %cst_315 = arith.constant dense<0.000000e+00> : vector<32x128xf32>
    %716 = tpu.matmul %715, %714, %cst_315 {dimension_numbers = #tpu.dot_dimension_numbers<[1], [0], [0], [1], [0, 0, 1, 1], [], []>} : vector<32x16xf32>, vector<16x128xf32>, vector<32x128xf32> -> vector<32x128xf32>
    %c0_316 = arith.constant 0 : index
    %c0_317 = arith.constant 0 : index
    %717 = vector.load %arg15[%c0_316, %c0_317] : memref<32x1xf32, #tpu.memory_space<vmem>>, vector<32x1xf32>
    %718 = vector.broadcast %717 : vector<32x1xf32> to vector<32x128xf32>
    %719 = arith.addf %716, %718 : vector<32x128xf32>
    %c0_318 = arith.constant 0 : index
    %c0_319 = arith.constant 0 : index
    %c0_320 = arith.constant 0 : index
    %720 = vector.load %arg16[%c0_318, %c0_319, %c0_320] : memref<1x32x128xf32, #tpu.memory_space<vmem>>, vector<1x32x128xf32>
    %721 = vector.shape_cast %720 : vector<1x32x128xf32> to vector<32x128xf32>
    %722 = vector.shape_cast %719 : vector<32x128xf32> to vector<1x32x128xf32>
    tpu.vector_store %arg16[%c0_318, %c0_319, %c0_320], %722 {strides = array<i32>} : memref<1x32x128xf32, #tpu.memory_space<vmem>>, vector<1x32x128xf32>,
    return
  }
  func.func @transform_0(%arg0: i32, %arg1: i32) -> (i32, i32, i32) {
    %c0_i32 = arith.constant 0 : i32
    %c0_i32_0 = arith.constant 0 : i32
    return %arg0, %c0_i32, %arg1 : i32, i32, i32
  }
  func.func @transform_1(%arg0: i32, %arg1: i32) -> (i32, i32) {
    %c0_i32 = arith.constant 0 : i32
    %c0_i32_0 = arith.constant 0 : i32
    %c0_i32_1 = arith.constant 0 : i32
    return %c0_i32, %c0_i32_0 : i32, i32
  }
  func.func @transform_2(%arg0: i32, %arg1: i32) -> (i32, i32, i32) {
    %c0_i32 = arith.constant 0 : i32
    %c0_i32_0 = arith.constant 0 : i32
    %c0_i32_1 = arith.constant 0 : i32
    %c0_i32_2 = arith.constant 0 : i32
    return %c0_i32, %c0_i32_0, %c0_i32_1 : i32, i32, i32
  }
  func.func @transform_3(%arg0: i32, %arg1: i32) -> (i32, i32, i32) {
    %c0_i32 = arith.constant 0 : i32
    %c0_i32_0 = arith.constant 0 : i32
    %c0_i32_1 = arith.constant 0 : i32
    %c0_i32_2 = arith.constant 0 : i32
    return %c0_i32, %c0_i32_0, %c0_i32_1 : i32, i32, i32
  }
  func.func @transform_4(%arg0: i32, %arg1: i32) -> (i32, i32, i32) {
    %c0_i32 = arith.constant 0 : i32
    %c0_i32_0 = arith.constant 0 : i32
    %c0_i32_1 = arith.constant 0 : i32
    %c0_i32_2 = arith.constant 0 : i32
    return %c0_i32, %c0_i32_0, %c0_i32_1 : i32, i32, i32
  }
  func.func @transform_5(%arg0: i32, %arg1: i32) -> (i32, i32, i32) {
    %c0_i32 = arith.constant 0 : i32
    %c0_i32_0 = arith.constant 0 : i32
    %c0_i32_1 = arith.constant 0 : i32
    %c0_i32_2 = arith.constant 0 : i32
    return %c0_i32, %c0_i32_0, %c0_i32_1 : i32, i32, i32
  }
  func.func @transform_6(%arg0: i32, %arg1: i32) -> (i32, i32, i32) {
    %c0_i32 = arith.constant 0 : i32
    %c0_i32_0 = arith.constant 0 : i32
    %c0_i32_1 = arith.constant 0 : i32
    %c0_i32_2 = arith.constant 0 : i32
    return %c0_i32, %c0_i32_0, %c0_i32_1 : i32, i32, i32
  }
  func.func @transform_7(%arg0: i32, %arg1: i32) -> (i32, i32, i32) {
    %c0_i32 = arith.constant 0 : i32
    %c0_i32_0 = arith.constant 0 : i32
    %c0_i32_1 = arith.constant 0 : i32
    %c0_i32_2 = arith.constant 0 : i32
    return %c0_i32, %c0_i32_0, %c0_i32_1 : i32, i32, i32
  }
  func.func @transform_8(%arg0: i32, %arg1: i32) -> (i32, i32, i32) {
    %c0_i32 = arith.constant 0 : i32
    %c0_i32_0 = arith.constant 0 : i32
    %c0_i32_1 = arith.constant 0 : i32
    %c0_i32_2 = arith.constant 0 : i32
    return %c0_i32, %c0_i32_0, %c0_i32_1 : i32, i32, i32
  }
  func.func @transform_9(%arg0: i32, %arg1: i32) -> (i32, i32, i32) {
    %c0_i32 = arith.constant 0 : i32
    %c0_i32_0 = arith.constant 0 : i32
    %c0_i32_1 = arith.constant 0 : i32
    %c0_i32_2 = arith.constant 0 : i32
    return %c0_i32, %c0_i32_0, %c0_i32_1 : i32, i32, i32
  }
  func.func @transform_10(%arg0: i32, %arg1: i32) -> (i32, i32, i32) {
    %c0_i32 = arith.constant 0 : i32
    %c0_i32_0 = arith.constant 0 : i32
    %c0_i32_1 = arith.constant 0 : i32
    %c0_i32_2 = arith.constant 0 : i32
    return %c0_i32, %c0_i32_0, %c0_i32_1 : i32, i32, i32
  }
  func.func @transform_11(%arg0: i32, %arg1: i32) -> (i32, i32, i32) {
    %c0_i32 = arith.constant 0 : i32
    %c0_i32_0 = arith.constant 0 : i32
    %c0_i32_1 = arith.constant 0 : i32
    %c0_i32_2 = arith.constant 0 : i32
    return %c0_i32, %c0_i32_0, %c0_i32_1 : i32, i32, i32
  }
  func.func @transform_12(%arg0: i32, %arg1: i32) -> (i32, i32) {
    %c0_i32 = arith.constant 0 : i32
    %c0_i32_0 = arith.constant 0 : i32
    %c0_i32_1 = arith.constant 0 : i32
    return %c0_i32, %c0_i32_0 : i32, i32
  }
  func.func @transform_13(%arg0: i32, %arg1: i32) -> (i32, i32) {
    %c0_i32 = arith.constant 0 : i32
    %c0_i32_0 = arith.constant 0 : i32
    %c0_i32_1 = arith.constant 0 : i32
    return %c0_i32, %c0_i32_0 : i32, i32
  }
  func.func @transform_14(%arg0: i32, %arg1: i32) -> (i32, i32, i32) {
    %c0_i32 = arith.constant 0 : i32
    %c0_i32_0 = arith.constant 0 : i32
    return %arg0, %c0_i32, %arg1 : i32, i32, i32
  }
}

</mosaic_0001>

<bundles_post_ra>
// kernel: tpu_custom_call.1
= control target key start
LH: loop header
LB: loop body
LE: loop exit
PB: predicated region body
PF: predicated region fallthrough
CT: control target
= control target key end

     0   :  { %s20767_s0 = inlined_call_operand.vmem [shape: f32[2,16,2048], index: 0, kind: input, shape index: {}]   ;;  %s20768_s1 = inlined_call_operand.hbm [shape: f32[1024,128], index: 1, kind: input, shape index: {}]   ;;  %s20769_s2 = inlined_call_operand.vmem [shape: f32[4,16,1], index: 2, kind: input, shape index: {}]   ;;  %s20770_s3 = inlined_call_operand.vmem [shape: f32[4,16,1], index: 3, kind: input, shape index: {}]   ;;  %s20771_s4 = inlined_call_operand.vmem [shape: f32[4,16,16], index: 4, kind: input, shape index: {}]   ;;  %s20772_s5 = inlined_call_operand.vmem [shape: f32[4,16,1], index: 5, kind: input, shape index: {}]   ;;  %s20773_s6 = inlined_call_operand.vmem [shape: f32[4,16,1], index: 6, kind: input, shape index: {}]   ;;  %s20774_s7 = inlined_call_operand.vmem [shape: f32[4,16,1], index: 7, kind: input, shape index: {}]   ;;  %s20775_s8 = inlined_call_operand.vmem [shape: f32[4,64,16], index: 8, kind: input, shape index: {}]   ;;  %s20776_s9 = inlined_call_operand.vmem [shape: f32[4,64,1], index: 9, kind: input, shape index: {}]   ;;  %s20777_s10 = inlined_call_operand.vmem [shape: f32[4,16,64], index: 10, kind: input, shape index: {}]   ;;  %s20778_s11 = inlined_call_operand.vmem [shape: f32[4,16,1], index: 11, kind: input, shape index: {}]   ;;  %s20779_s12 = inlined_call_operand.vmem [shape: f32[32,16], index: 12, kind: input, shape index: {}]   ;;  %s20780_s13 = inlined_call_operand.vmem [shape: f32[32,1], index: 13, kind: input, shape index: {}]   ;;  %s20781_s14 = inlined_call_operand.hbm [shape: f32[2,32,256], index: 14, kind: output, shape index: {}]  }
   0x1   :  { %20866 = sst [smem:[#allocation33_spill]] %s20767_s0 }
   0x2   :  { %20867 = sst [smem:[#allocation34_spill]] %s20768_s1 }
   0x3   :  { %20868 = sst [smem:[#allocation35_spill]] %s20775_s8 }
   0x4   :  { %20869 = sst [smem:[#allocation36_spill]] %s20777_s10 }
   0x5   :  { %20870 = sst [smem:[#allocation37_spill]] %s20779_s12 }
   0x6   :  { %20871 = sst [smem:[#allocation38_spill]] %s20780_s13 }
   0x7   :  { %20872 = sst [smem:[#allocation39_spill]] %s20781_s14 }
   0x8   :  { %19 = vsyncpa [#allocation4], 0 }
   0x9   :  { %20 = vsyncpa [#allocation5], 0 }
   0xa   :  { %22 = vsyncpa [#allocation5 + $0x1], 0  ;;  %s16436_s29 = smov 0   ;;  %s16438_s30 = smov 0  }
   0xb   :  { %s16440_s15 = smov 0   ;;  %s16442_s16 = smov 0  }
   0xc   :  { %s16444_s17 = smov 0   ;;  %s16446_s18 = smov 0  }
   0xd   :  { %s16448_s19 = smov 0   ;;  %s16450_s20 = smov 0  }
   0xe LB: > { %20873 = sst [smem:[#allocation9_spill]] %s16318_s29  ;;  %s14026_s21 = sadd.s32 4294967295, %s16346_s20   ;;  %s16346_s20 = sphi %s16450_s20, %s28_s20   ;;  %s16342_s19 = sphi %s16448_s19, %s21067_s19   ;;  %s16338_s18 = sphi %s16446_s18, %s21066_s18   ;;  %s16334_s17 = sphi %s16444_s17, %s21065_s17   ;;  %s16330_s16 = sphi %s16442_s16, %s21064_s16   ;;  %s16326_s15 = sphi %s16440_s15, %s21063_s15   ;;  %s16322_s30 = sphi %s16438_s30, %s21062_s30   ;;  %s16318_s29 = sphi %s16436_s29, %s21061_s29  }
   0xf   : > { %20874 = sst [smem:[#allocation10_spill]] %s16330_s16  ;;  %s14027_s22 = sadd.s32 4294967294, %s16346_s20  }
  0x10   : > { %20875 = sst [smem:[#allocation11_spill]] %s16334_s17  ;;  %s37_s23 = sadd.s32 1, %s16338_s18 }
  0x11   : > { %s40_s24 = sadd.s32 1, %s16342_s19  ;;  %p38_p0 = scmp.ge.s32.totalorder %s37_s23, 2 }
  0x12   : > { %s49_s25 = sadd.s32 1, %s16326_s15  ;;  %p56_p1 = scmp.ne.s32.totalorder %s16326_s15, %s16322_s30 }
  0x13   : > { %p57_p2 = scmp.eq.s32.totalorder %s16346_s20, 0  ;;  %s21069_s23 = smov (%p38_p0, %s37_s23), 0 }
  0x14   : > { %20876 = sst [smem:[#allocation12_spill]] %s21069_s23  ;;  %s21071_s24 = smov (!%p38_p0, %s40_s24), %s16342_s19 }
  0x15   : > { %s45_s26 = ssub.s32 %s16338_s18, %s21069_s23  ;;  %p16489_p3 = por %p57_p2, %p56_p1 }
  0x16   : > { %p42_p4 = scmp.ge.s32.totalorder %s21071_s24, 2  ;;  %p361_p5 = scmp.eq.s32.totalorder %s14026_s21, 3 }
  0x17   : > { %s20877_s27 = scalar_select %p16489_p3, 1, 0 }
  0x18   : > { %p366_p6 = scmp.ne.s32.totalorder %s16322_s30, %s16318_s29  ;;  %p367_p7 = scmp.eq.s32.totalorder %s14027_s22, 3 }
  0x19   : > { %s21073_s24 = smov (%p42_p4, %s21071_s24), 0  ;;  %p16497_p8 = por %p361_p5, %p56_p1 }
  0x1a   : > { %20878 = sst [smem:[#allocation13_spill]] %s21073_s24  ;;  %p16501_p9 = por %p367_p7, %p366_p6 }
  0x1b   : > { %s20879_s28 = scalar_select %p16497_p8, 1, 0 }
  0x1c   : > { %s20881_s14 = scalar_select %p16501_p9, 1, 0 }
  0x1d   : > { %20880 = sst [smem:[#allocation14_spill]] %s20879_s28  ;;  %s44_s23 = ssub.s32 %s16342_s19, %s21073_s24 }
  0x1e   : > { %20882 = sst [smem:[#allocation15_spill]] %s20881_s14  ;;  %p14028_p10 = scmp.ge.s32.totalorder %s16346_s20, 1 }
  0x1f   : > { %s46_s16 = sor.u32 %s45_s26, %s44_s23  ;;  %p374_p11 = scmp.lt.s32.totalorder %s16346_s20, 5 }
  0x20   : > { %p47_p12 = scmp.eq.s32.totalorder %s46_s16, 0  ;;  %p16513_p0 = scmp.eq.s32.totalorder %s14026_s21, 0 }
  0x21   : > { %p16509_p13 = pnand %p14028_p10, %p374_p11  ;;  %s16348_s14 = smov [#allocation3]  }
  0x22   : > { %s20884_s22 = scalar_select %p16513_p0, 1, 0 }
  0x23   : > { %s20883_s17 = scalar_select %p16509_p13, 1, 0 }
  0x24   : > { %s16518_s29 = scalar_select %p47_p12, %s16326_s15, %s49_s25  }
  0x25   : > { %p15346_p1 = pneg %p16509_p13  ;;  %s386_s24 = sshll.u32 %s16348_s14, 4  ;;  %s387_s24 = int_to_ptr.vmem [resolvable:$true] %s386_s24 }
  0x26   : > { %20885 = sst [smem:[#allocation16_spill]] %s16518_s29 }
  0x27   : > { %p16524_p2 = pnand %p16513_p0, %p15346_p1  ;;  %s20887_s1 = sld [smem:[#allocation34_spill]] }
  0x29   : > { %p16222_p5 = pneg %p16524_p2 }
  0x2d   : > { %s16220_s21 = scalar_lea.hbm %s20887_s1, 16384 }
  0x2e   : > { %p16221_p4 = scmp.ne.s32.totalorder %s20887_s1, %s16220_s21  ;;  %p16227_p10 = scmp.lt.u32.totalorder %s16220_s21, %s20887_s1 }
  0x30   : > { %p16223_p6 = pnand %p16222_p5, %p16221_p4 }
  0x32   : > { %p16224_p7 = pneg %p16223_p6 }
  0x34   : > { %p16229_p11 = pnand %p16227_p10, %p16224_p7 }
  0x36   : > { %16232 = shalt.err (!%p16229_p11)
}
  0x37   : > { %s16233_s29 = scalar_lea.vmem %s387_s24, 16384  ;;  %p16241_p8 = scmp.lt.s32.totalorder %s387_s24, %s387_s24 }
  0x38   : > { %p16234_p12 = scmp.ne.s32.totalorder %s387_s24, %s16233_s29  ;;  %p16242_p0 = scmp.lt.s32.totalorder %s16233_s29, %s16233_s29 }
  0x3a   : > { %p16236_p1 = pnand %p16234_p12, %p16222_p5  ;;  %p16243_p13 = por %p16242_p0, %p16241_p8 }
  0x3c   : > { %p16237_p9 = pneg %p16236_p1 }
  0x3e   : > { %p16244_p3 = pnand %p16243_p13, %p16237_p9 }
  0x40   : > { %16247 = shalt.err (!%p16244_p3)
}
  0x41   : > { %s16349_s12 = smov 128   ;;  %s16350_s28 = smov 8  }
  0x42   : > { %15349 = dma.hbm_to_vmem [thread:$0]  (!%p16524_p2), %s20887_s1, 16384, %s387_s24, [#allocation4], %s16349_s12, %s16349_s12, %s16350_s28  }
  0x43   : > { %p14030_p4 = scmp.ge.s32.totalorder %s16346_s20, 4 }
  0x44   : > { %p20888_p6 = scmp.ne.s32.totalorder (!%p14030_p4), %s20877_s27, 0 }
  0x45   : > { %432 = sbr.rel (%p14030_p4) target bundleno = 94 (0x5e), region = 68 }
  0x4c   : > { %435 = sbr.rel (!%p20888_p6) target bundleno = 94 (0x5e), region = 72  ;;  %s437_s29 = sand.u32 (%p20888_p6), 1, %s16326_s15  }
  0x4d   : > { %s14032_s21 = sshll.u32 (%p20888_p6), %s16338_s18, 3  ;;  %s14031_s14 = sshll.u32 (%p20888_p6), %s437_s29, 7 }
  0x4e   : > { %s14033_s25 = sshll.u32 (%p20888_p6), %s16342_s19, 5  ;;  %s20889_s0 = sld [smem:[#allocation33_spill]] (%p20888_p6) }
  0x4f   : > { %s442_s13 = sadd.s32 (%p20888_p6), %s14033_s25, %s14032_s21  ;;  %s439_s24 = scalar_lea.vmem (%p20888_p6), [#allocation2], %s14031_s14 }
  0x50   : > { %s14034_s10 = sshll.u32 (%p20888_p6), %s442_s13, 3 }
  0x54   : > { %s16553_s23 = scalar_lea.vmem %s20889_s0, %s14034_s10 }
  0x55   : > { %v457_v0 = vld [vmem:[%s16553_s23] sm:$0xff]  ;;  %v459_v1 = vld [vmem:[%s16553_s23 + $0x8] sm:$0xff]  ;;  %v461_v2 = vld [vmem:[%s16553_s23 + $0x10] sm:$0xff] }
  0x56   : > { %458 = vst [vmem:[%s439_s24] sm:$0xff] %v457_v0  ;;  %460 = vst [vmem:[%s439_s24 + $0x8] sm:$0xff] %v459_v1  ;;  %v463_v3 = vld [vmem:[%s16553_s23 + $0x18] sm:$0xff]  ;;  %v465_v4 = vld [vmem:[%s16553_s23 + $0x20] sm:$0xff] }
  0x57   : > { %462 = vst [vmem:[%s439_s24 + $0x10] sm:$0xff] %v461_v2  ;;  %v467_v5 = vld [vmem:[%s16553_s23 + $0x28] sm:$0xff]  ;;  %464 = vst [vmem:[%s439_s24 + $0x18] sm:$0xff] %v463_v3  ;;  %v469_v6 = vld [vmem:[%s16553_s23 + $0x30] sm:$0xff] }
  0x58   : > { %466 = vst [vmem:[%s439_s24 + $0x20] sm:$0xff] %v465_v4  ;;  %468 = vst [vmem:[%s439_s24 + $0x28] sm:$0xff] %v467_v5  ;;  %v471_v7 = vld [vmem:[%s16553_s23 + $0x38] sm:$0xff]  ;;  %v473_v8 = vld [vmem:[%s16553_s23 + $0x80] sm:$0xff] }
  0x59   : > { %470 = vst [vmem:[%s439_s24 + $0x30] sm:$0xff] %v469_v6  ;;  %472 = vst [vmem:[%s439_s24 + $0x38] sm:$0xff] %v471_v7  ;;  %v475_v9 = vld [vmem:[%s16553_s23 + $0x88] sm:$0xff]  ;;  %v477_v10 = vld [vmem:[%s16553_s23 + $0x90] sm:$0xff] }
  0x5a   : > { %474 = vst [vmem:[%s439_s24 + $0x40] sm:$0xff] %v473_v8  ;;  %v479_v11 = vld [vmem:[%s16553_s23 + $0x98] sm:$0xff]  ;;  %476 = vst [vmem:[%s439_s24 + $0x48] sm:$0xff] %v475_v9  ;;  %v481_v12 = vld [vmem:[%s16553_s23 + $0xa0] sm:$0xff] }
  0x5b   : > { %478 = vst [vmem:[%s439_s24 + $0x50] sm:$0xff] %v477_v10  ;;  %480 = vst [vmem:[%s439_s24 + $0x58] sm:$0xff] %v479_v11  ;;  %v483_v13 = vld [vmem:[%s16553_s23 + $0xa8] sm:$0xff]  ;;  %v485_v14 = vld [vmem:[%s16553_s23 + $0xb0] sm:$0xff] }
  0x5c   : > { %482 = vst [vmem:[%s439_s24 + $0x60] sm:$0xff] %v481_v12  ;;  %484 = vst [vmem:[%s439_s24 + $0x68] sm:$0xff] %v483_v13  ;;  %v487_v15 = vld [vmem:[%s16553_s23 + $0xb8] sm:$0xff] }
  0x5d   : > { %486 = vst [vmem:[%s439_s24 + $0x70] sm:$0xff] %v485_v14  ;;  %488 = vst [vmem:[%s439_s24 + $0x78] sm:$0xff] %v487_v15 }
  0x5e PF: > { %p20890_p3 = scmp.ne.s32.totalorder %s20883_s17, 0 }
  0x60   : > { %497 = sbr.rel (%p20890_p3) target bundleno = 8508 (0x213c), region = 95 }
  0x67   : > { %s16574_s8 = sand.u32 1, %s16322_s30   ;;  %p20891_p8 = scmp.ne.s32.totalorder %s20884_s22, 0 }
  0x68   : > { %s14036_s10 = sshll.u32 %s16574_s8, 7 }
  0x69   : > { %s16577_s13 = scalar_lea.vmem [#allocation2], %s14036_s10 }
  0x6a   : > { %16309 = dma.done.wait (%p20891_p8), [#allocation4], 16384  }
  0x6b   : > { %16311 = vsyncadd (%p20891_p8), [#allocation4], 4294950912  ;;  %v16351_v16 = vmov 0   ;;  %v20800_v17 = vmov 0.0   ;;  %v568_v18 = vld [vmem:[%s20770_s3] sm:$0xff]  ;;  %v16592_v20 = vld [vmem:[%s16577_s13 + $0x8] sm:$0xff] }
  0x6c   : > { %15434 = vset.pattern.permute.xlu1 %v16351_v16  ;;  %15433 = vset.pattern.permute.xlu0 %v16351_v16  ;;  %v566_v19 = vld [vmem:[%s20769_s2] sm:$0xff]  ;;  %v16595_v21 = vld [vmem:[%s16577_s13 + $0x48] sm:$0xff]  ;;  %v16598_v22 = vld [vmem:[%s16577_s13 + $0x18] sm:$0xff]  ;;  %v859_v33 = vmul.f32 %v16592_v20, %v16592_v20  ;;  %vm570_vm0 = vcmask 130048   ;;  %v20798_v55 = vmov 1.0   ;;  %s20906_s27 = sld [smem:[#allocation35_spill]] }
  0x6d   : > { %638 = vmatprep.mubr.f32.mxu0 %v20800_v17  ;;  %709 = vmatprep.mubr.f32.mxu1 %v20800_v17  ;;  %v16601_v23 = vld [vmem:[%s16577_s13 + $0x58] sm:$0xff]  ;;  %v14568_v24 = vpack.c.bf16 %v16595_v21, %v16592_v20  ;;  %v16608_v26 = vld [vmem:[%s16577_s13] sm:$0xff]  ;;  %v16614_v28 = vld [vmem:[%s16577_s13 + $0x10] sm:$0xff]  ;;  %v867_v34 = vmul.f32 %v16595_v21, %v16595_v21  ;;  %v861_v35 = vmul.f32 %v16598_v22, %v16598_v22  ;;  %s20909_s28 = sld [smem:[#allocation36_spill]]  ;;  %vm2801_vm1 = vcmask 523264   ;;  %s16354_s25 = smov 127  }
  0x6e   : > { %1338 = vperm.xlu1 %15434, %v568_v18   ;;  %1312 = vperm.xlu0 %15433, %v566_v19   ;;  %v14572_v25 = vpack.c.bf16 %v16601_v23, %v16598_v22  ;;  %v16611_v27 = vld [vmem:[%s16577_s13 + $0x40] sm:$0xff]  ;;  %v16619_v30 = vld [vmem:[%s16577_s13 + $0x50] sm:$0xff]  ;;  %v569_v31 = vld [vmem:[%s20770_s3 + $0x8] sm:$0xff]  ;;  %v869_v40 = vmul.f32 %v16601_v23, %v16601_v23  ;;  %v858_v41 = vmul.f32 %v16608_v26, %v16608_v26  ;;  %s16355_s26 = smov 126   ;;  %s21047_s14 = sld [smem:[#allocation38_spill]] }
  0x6f   : > { %v14570_v29 = vpack.c.bf16 %v16611_v27, %v16608_v26  ;;  %v567_v32 = vld [vmem:[%s20769_s2 + $0x8] sm:$0xff]  ;;  %14569 = vmatprep.subr.bf16.mxu0 %v14568_v24  ;;  %v14574_v36 = vpack.c.bf16 %v16619_v30, %v16614_v28  ;;  %v16642_v39 = vld [vmem:[%s16577_s13 + $0x38] sm:$0xff]  ;;  %v16654_v44 = vld [vmem:[%s16577_s13 + $0x20] sm:$0xff]  ;;  %v866_v46 = vmul.f32 %v16611_v27, %v16611_v27  ;;  %v860_v47 = vmul.f32 %v16614_v28, %v16614_v28  ;;  %s21050_s29 = sld [smem:[#allocation10_spill]]  ;;  %s14038_s17 = sshll.u32 %s16574_s8, 5 }
  0x70   : > { %14573 = vmatprep.subr.bf16.mxu1 %v14572_v25  ;;  %v16636_v37 = vld [vmem:[%s16577_s13 + $0x28] sm:$0xff]  ;;  %v16651_v43 = vld [vmem:[%s16577_s13 + $0x78] sm:$0xff]  ;;  %v16657_v45 = vld [vmem:[%s16577_s13 + $0x60] sm:$0xff]  ;;  %v868_v52 = vmul.f32 %v16619_v30, %v16619_v30  ;;  %v14584_v57 = vpack.c.bf16 %v867_v34, %v859_v33  ;;  %v14588_v58 = vpack.c.bf16 %v869_v40, %v861_v35  ;;  %v865_v63 = vmul.f32 %v16642_v39, %v16642_v39  ;;  %s548_s21 = scalar_lea.vmem [#allocation6], %s14038_s17  ;;  %s21051_s23 = sld [smem:[#allocation14_spill]] }
  0x71   : > { %v16639_v38 = vld [vmem:[%s16577_s13 + $0x68] sm:$0xff]  ;;  %14571 = vmatpush1.bf16.msra.mxu0 %v14570_v29  ;;  %14575 = vmatpush1.bf16.msra.mxu1 %v14574_v36  ;;  %v14580_v48 = vpack.c.bf16 %v16651_v43, %v16642_v39  ;;  %v14578_v49 = vpack.c.bf16 %v16657_v45, %v16654_v44  ;;  %v16668_v50 = vld [vmem:[%s16577_s13 + $0x30] sm:$0xff]  ;;  %v1694_v56 = vld [vmem:[%s20772_s5] sm:$0xff]  ;;  %v14586_v59 = vpack.c.bf16 %v866_v46, %v858_v41  ;;  %s13930_s16 = sshll.u32 %s548_s21, 4  ;;  %s21052_s10 = sld [smem:[#allocation39_spill]]  ;;  %s20708_s16 = int_to_ptr.vmem [resolvable:$true] %s13930_s16 }
  0x72   : > { %1343 = vperm.xlu1 %15434, %v569_v31   ;;  %v14576_v42 = vpack.c.bf16 %v16639_v38, %v16636_v37  ;;  %1317 = vperm.xlu0 %15433, %v567_v32   ;;  %v16671_v51 = vld [vmem:[%s16577_s13 + $0x70] sm:$0xff]  ;;  %v1695_v54 = vld [vmem:[%s20772_s5 + $0x8] sm:$0xff]  ;;  %v863_v60 = vmul.f32 %v16636_v37, %v16636_v37  ;;  %v14590_v61 = vpack.c.bf16 %v868_v52, %v860_v47  ;;  %v1722_v6 = vld [vmem:[%s20773_s6] sm:$0xff] }
  0x73   : > { %v14582_v53 = vpack.c.bf16 %v16671_v51, %v16668_v50  ;;  %14581 = vmatprep.subr.bf16.mxu1 %v14580_v48  ;;  %v871_v62 = vmul.f32 %v16639_v38, %v16639_v38  ;;  %v873_v0 = vmul.f32 %v16651_v43, %v16651_v43  ;;  %v862_v1 = vmul.f32 %v16654_v44, %v16654_v44  ;;  %v1723_v3 = vld [vmem:[%s20773_s6 + $0x8] sm:$0xff]  ;;  %v1724_v12 = vld [vmem:[%s20774_s7] sm:$0xff]  ;;  %v2525_v15 = vld [vmem:[%s20776_s9 + $0x18] sm:$0xff] }
  0x74   : > { %14577 = vmatprep.subr.bf16.mxu0 %v14576_v42  ;;  %14039 = vmatmul.mubr.msk.f32.vlgmr.msra.gmra.mrb[0].mxu0 %vm570_vm0, %v20798_v55  ;;  %v870_v2 = vmul.f32 %v16657_v45, %v16657_v45  ;;  %v864_v4 = vmul.f32 %v16668_v50, %v16668_v50  ;;  %v872_v5 = vmul.f32 %v16671_v51, %v16671_v51  ;;  %v1725_v11 = vld [vmem:[%s20774_s7 + $0x8] sm:$0xff]  ;;  %v2522_v14 = vld [vmem:[%s20776_s9] sm:$0xff]  ;;  %v2524_v16 = vld [vmem:[%s20776_s9 + $0x10] sm:$0xff] }
  0x75   : > { %14040 = vmatmul.mubr.msk.f32.vlgmr.msra.gmra.mrb[0].mxu1 %vm570_vm0, %v20798_v55  ;;  %14579 = vmatpush1.bf16.msra.mxu0 %v14578_v49  ;;  %v14592_v7 = vpack.c.bf16 %v871_v62, %v863_v60  ;;  %v14596_v8 = vpack.c.bf16 %v873_v0, %v865_v63  ;;  %v2523_v13 = vld [vmem:[%s20776_s9 + $0x8] sm:$0xff]  ;;  %v2526_v19 = vld [vmem:[%s20776_s9 + $0x20] sm:$0xff]  ;;  %v2529_v24 = vld [vmem:[%s20776_s9 + $0x38] sm:$0xff] }
  0x76   : > { %14583 = vmatpush1.bf16.msra.mxu1 %v14582_v53  ;;  %1703 = vperm.xlu1 %15434, %v1695_v54   ;;  %v14594_v9 = vpack.c.bf16 %v870_v2, %v862_v1  ;;  %v14598_v10 = vpack.c.bf16 %v872_v5, %v864_v4  ;;  %v2527_v18 = vld [vmem:[%s20776_s9 + $0x28] sm:$0xff]  ;;  %v2528_v25 = vld [vmem:[%s20776_s9 + $0x30] sm:$0xff]  ;;  %v2789_v31 = vld [vmem:[%s20778_s11] sm:$0xff]  ;;  %p21053_p13 = scmp.ne.s32.totalorder %s21051_s23, 0 }
  0x77   : > { %1698 = vperm.xlu0 %15433, %v1694_v56   ;;  %780 = vmatprep.mubr.f32.mxu0 %v20800_v17  ;;  %v2790_v29 = vld [vmem:[%s20778_s11 + $0x8] sm:$0xff]  ;;  %v14104_v32 = vld [vmem:[%s20769_s2 + $0x18] sm:$0xff]  ;;  %v14103_v33 = vld [vmem:[%s20769_s2 + $0x10] sm:$0xff] }
  0x78   : > { %851 = vmatprep.mubr.f32.mxu1 %v20800_v17  ;;  %14041 = vmatmul.mubr.msk.f32.vlgmr.msra.gmra.mrb[2].mxu0 %vm570_vm0, %v20798_v55  ;;  %v14106_v34 = vld [vmem:[%s20770_s3 + $0x18] sm:$0xff]  ;;  %v14105_v35 = vld [vmem:[%s20770_s3 + $0x10] sm:$0xff]  ;;  %v14148_v48 = vld [vmem:[%s20776_s9 + $0x48] sm:$0xff] }
  0x79   : > { %14042 = vmatmul.mubr.msk.f32.vlgmr.msra.gmra.mrb[2].mxu1 %vm570_vm0, %v20798_v55  ;;  %14585 = vmatprep.subr.bf16.mxu0 %v14584_v57  ;;  %v14126_v36 = vld [vmem:[%s20772_s5 + $0x18] sm:$0xff]  ;;  %v14125_v40 = vld [vmem:[%s20772_s5 + $0x10] sm:$0xff]  ;;  %v14147_v49 = vld [vmem:[%s20776_s9 + $0x40] sm:$0xff] }
  0x7a   : > { %14589 = vmatprep.subr.bf16.mxu1 %v14588_v58  ;;  %14587 = vmatpush1.bf16.msra.mxu0 %v14586_v59  ;;  %v14128_v41 = vld [vmem:[%s20773_s6 + $0x18] sm:$0xff]  ;;  %v14127_v42 = vld [vmem:[%s20773_s6 + $0x10] sm:$0xff]  ;;  %v14152_v54 = vld [vmem:[%s20776_s9 + $0x68] sm:$0xff] }
  0x7b   : > { %14591 = vmatpush1.bf16.msra.mxu1 %v14590_v61  ;;  %2469 = vperm.xlu1 %15434, %v1723_v3   ;;  %v14130_v46 = vld [vmem:[%s20774_s7 + $0x18] sm:$0xff]  ;;  %v14129_v47 = vld [vmem:[%s20774_s7 + $0x10] sm:$0xff]  ;;  %v14151_v56 = vld [vmem:[%s20776_s9 + $0x60] sm:$0xff] }
  0x7c   : > { %2464 = vperm.xlu0 %15433, %v1722_v6   ;;  %938 = vmatprep.mubr.f32.mxu0 %v20800_v17  ;;  %v14150_v52 = vld [vmem:[%s20776_s9 + $0x58] sm:$0xff]  ;;  %v14149_v53 = vld [vmem:[%s20776_s9 + $0x50] sm:$0xff]  ;;  %v14200_v61 = vld [vmem:[%s20769_s2 + $0x28] sm:$0xff] }
  0x7d   : > { %1009 = vmatprep.mubr.f32.mxu1 %v20800_v17  ;;  %14043 = vmatmul.mubr.msk.f32.vlgmr.msra.gmra.mrb[4].mxu0 %vm570_vm0, %v20798_v55  ;;  %v14154_v57 = vld [vmem:[%s20776_s9 + $0x78] sm:$0xff]  ;;  %v14153_v58 = vld [vmem:[%s20776_s9 + $0x70] sm:$0xff]  ;;  %v14199_v62 = vld [vmem:[%s20769_s2 + $0x20] sm:$0xff] }
  0x7e   : > { %14044 = vmatmul.mubr.msk.f32.vlgmr.msra.gmra.mrb[4].mxu1 %vm570_vm0, %v20798_v55  ;;  %14593 = vmatprep.subr.bf16.mxu0 %v14592_v7  ;;  %v14166_v59 = vld [vmem:[%s20778_s11 + $0x18] sm:$0xff]  ;;  %v14165_v60 = vld [vmem:[%s20778_s11 + $0x10] sm:$0xff]  ;;  %v14202_v63 = vld [vmem:[%s20770_s3 + $0x28] sm:$0xff] }
  0x7f   : > { %14597 = vmatprep.subr.bf16.mxu1 %v14596_v8  ;;  %14595 = vmatpush1.bf16.msra.mxu0 %v14594_v9  ;;  %v14201_v0 = vld [vmem:[%s20770_s3 + $0x20] sm:$0xff]  ;;  %v14222_v1 = vld [vmem:[%s20772_s5 + $0x28] sm:$0xff]  ;;  %v14246_v9 = vld [vmem:[%s20776_s9 + $0x98] sm:$0xff] }
  0x80   : > { %14599 = vmatpush1.bf16.msra.mxu1 %v14598_v10  ;;  %2495 = vperm.xlu1 %15434, %v1725_v11   ;;  %v14221_v2 = vld [vmem:[%s20772_s5 + $0x20] sm:$0xff]  ;;  %v14224_v3 = vld [vmem:[%s20773_s6 + $0x28] sm:$0xff]  ;;  %v14245_v10 = vld [vmem:[%s20776_s9 + $0x90] sm:$0xff] }
  0x81   : > { %2490 = vperm.xlu0 %15433, %v1724_v12   ;;  %1080 = vmatprep.mubr.f32.mxu0 %v20800_v17  ;;  %v14223_v4 = vld [vmem:[%s20773_s6 + $0x20] sm:$0xff]  ;;  %v14226_v5 = vld [vmem:[%s20774_s7 + $0x28] sm:$0xff] }
  0x82   : > { %1151 = vmatprep.mubr.f32.mxu1 %v20800_v17  ;;  %14045 = vmatmul.mubr.msk.f32.vlgmr.msra.gmra.mrb[6].mxu0 %vm570_vm0, %v20798_v55  ;;  %v14225_v6 = vld [vmem:[%s20774_s7 + $0x20] sm:$0xff]  ;;  %v14244_v7 = vld [vmem:[%s20776_s9 + $0x88] sm:$0xff] }
  0x83   : > { %14046 = vmatmul.mubr.msk.f32.vlgmr.msra.gmra.mrb[6].mxu1 %vm570_vm0, %v20798_v55  ;;  %1434 = vmatprep.mubr.f32.mxu0 %v20800_v17  ;;  %v14243_v8 = vld [vmem:[%s20776_s9 + $0x80] sm:$0xff]  ;;  %v14248_v11 = vld [vmem:[%s20776_s9 + $0xa8] sm:$0xff] }
  0x84   : > { %2537 = vperm.xlu1 %15434, %v2523_v13   ;;  %1511 = vmatprep.mubr.f32.mxu1 %v20800_v17  ;;  %v14247_v12 = vld [vmem:[%s20776_s9 + $0xa0] sm:$0xff]  ;;  %v14250_v13 = vld [vmem:[%s20776_s9 + $0xb8] sm:$0xff] }
  0x85   : > { %2532 = vperm.xlu0 %15433, %v2522_v14   ;;  %v14249_v14 = vld [vmem:[%s20776_s9 + $0xb0] sm:$0xff] }
  0x88   : > { %2547 = vperm.xlu1 %15434, %v2525_v15   ;;  %v14262_v15 = vld [vmem:[%s20778_s11 + $0x28] sm:$0xff] }
  0x89   : > { %2542 = vperm.xlu0 %15433, %v2524_v16   ;;  %v14261_v16 = vld [vmem:[%s20778_s11 + $0x20] sm:$0xff] }
  0x8c   : > { %2557 = vperm.xlu1 %15434, %v2527_v18   ;;  %v14296_v18 = vld [vmem:[%s20769_s2 + $0x38] sm:$0xff] }
  0x8d   : > { %2552 = vperm.xlu0 %15433, %v2526_v19   ;;  %v14295_v19 = vld [vmem:[%s20769_s2 + $0x30] sm:$0xff] }
  0x90   : > { %2567 = vperm.xlu1 %15434, %v2529_v24   ;;  %v14298_v24 = vld [vmem:[%s20770_s3 + $0x38] sm:$0xff] }
  0x91   : > { %2562 = vperm.xlu0 %15433, %v2528_v25   ;;  %v14297_v25 = vld [vmem:[%s20770_s3 + $0x30] sm:$0xff] }
  0x94   : > { %2798 = vperm.xlu1 %15434, %v2790_v29   ;;  %v14318_v29 = vld [vmem:[%s20772_s5 + $0x38] sm:$0xff] }
  0x95   : > { %2793 = vperm.xlu0 %15433, %v2789_v31   ;;  %v14317_v31 = vld [vmem:[%s20772_s5 + $0x30] sm:$0xff] }
  0x98   : > { %4460 = vperm.xlu1 %15434, %v14104_v32   ;;  %v14320_v32 = vld [vmem:[%s20773_s6 + $0x38] sm:$0xff] }
  0x99   : > { %4455 = vperm.xlu0 %15433, %v14103_v33   ;;  %v14319_v33 = vld [vmem:[%s20773_s6 + $0x30] sm:$0xff] }
  0x9c   : > { %4486 = vperm.xlu1 %15434, %v14106_v34   ;;  %v14322_v34 = vld [vmem:[%s20774_s7 + $0x38] sm:$0xff] }
  0x9d   : > { %4481 = vperm.xlu0 %15433, %v14105_v35   ;;  %v14321_v35 = vld [vmem:[%s20774_s7 + $0x30] sm:$0xff] }
  0xa0   : > { %4848 = vperm.xlu1 %15434, %v14126_v36   ;;  %v14340_v36 = vld [vmem:[%s20776_s9 + $0xc8] sm:$0xff] }
  0xa1   : > { %4843 = vperm.xlu0 %15433, %v14125_v40   ;;  %v14339_v40 = vld [vmem:[%s20776_s9 + $0xc0] sm:$0xff] }
  0xa4   : > { %5616 = vperm.xlu1 %15434, %v14128_v41   ;;  %v14342_v41 = vld [vmem:[%s20776_s9 + $0xd8] sm:$0xff] }
  0xa5   : > { %5611 = vperm.xlu0 %15433, %v14127_v42   ;;  %v14341_v42 = vld [vmem:[%s20776_s9 + $0xd0] sm:$0xff] }
  0xa8   : > { %5642 = vperm.xlu1 %15434, %v14130_v46   ;;  %v14344_v46 = vld [vmem:[%s20776_s9 + $0xe8] sm:$0xff] }
  0xa9   : > { %5637 = vperm.xlu0 %15433, %v14129_v47   ;;  %v14343_v47 = vld [vmem:[%s20776_s9 + $0xe0] sm:$0xff] }
  0xac   : > { %5686 = vperm.xlu1 %15434, %v14148_v48   ;;  %v14346_v48 = vld [vmem:[%s20776_s9 + $0xf8] sm:$0xff] }
  0xad   : > { %5681 = vperm.xlu0 %15433, %v14147_v49   ;;  %v14345_v49 = vld [vmem:[%s20776_s9 + $0xf0] sm:$0xff] }
  0xb0   : > { %5696 = vperm.xlu1 %15434, %v14150_v52   ;;  %v14358_v52 = vld [vmem:[%s20778_s11 + $0x38] sm:$0xff] }
  0xb1   : > { %5691 = vperm.xlu0 %15433, %v14149_v53   ;;  %v14357_v53 = vld [vmem:[%s20778_s11 + $0x30] sm:$0xff] }
  0xb4   : > { %5706 = vperm.xlu1 %15434, %v14152_v54  }
  0xb5   : > { %5701 = vperm.xlu0 %15433, %v14151_v56  }
  0xb8   : > { %5716 = vperm.xlu1 %15434, %v14154_v57  }
  0xb9   : > { %5711 = vperm.xlu0 %15433, %v14153_v58  }
  0xbc   : > { %5949 = vperm.xlu1 %15434, %v14166_v59  }
  0xbd   : > { %5944 = vperm.xlu0 %15433, %v14165_v60   ;;  %v20797_v60 = vlaneseq }
  0xc0   : > { %7610 = vperm.xlu1 %15434, %v14200_v61  }
  0xc1   : > { %7605 = vperm.xlu0 %15433, %v14199_v62  }
  0xc4   : > { %7636 = vperm.xlu1 %15434, %v14202_v63  }
  0xc5   : > { %7631 = vperm.xlu0 %15433, %v14201_v0  }
  0xc8   : > { %7998 = vperm.xlu1 %15434, %v14222_v1  }
  0xc9   : > { %7993 = vperm.xlu0 %15433, %v14221_v2  }
  0xcc   : > { %8766 = vperm.xlu1 %15434, %v14224_v3  }
  0xcd   : > { %8761 = vperm.xlu0 %15433, %v14223_v4   ;;  %v1199_v4 = vshrl.u32 %v20797_v60, 7 }
  0xd0   : > { %8792 = vperm.xlu1 %15434, %v14226_v5  }
  0xd1   : > { %8787 = vperm.xlu0 %15433, %v14225_v6  }
  0xd4   : > { %8836 = vperm.xlu1 %15434, %v14244_v7  }
  0xd5   : > { %8831 = vperm.xlu0 %15433, %v14243_v8  }
  0xd8   : > { %8846 = vperm.xlu1 %15434, %v14246_v9  }
  0xd9   : > { %8841 = vperm.xlu0 %15433, %v14245_v10  }
  0xdc   : > { %8856 = vperm.xlu1 %15434, %v14248_v11  }
  0xdd   : > { %8851 = vperm.xlu0 %15433, %v14247_v12  }
  0xe0   : > { %8866 = vperm.xlu1 %15434, %v14250_v13  }
  0xe1   : > { %8861 = vperm.xlu0 %15433, %v14249_v14  }
  0xe4   : > { %9099 = vperm.xlu1 %15434, %v14262_v15  }
  0xe5   : > { %9094 = vperm.xlu0 %15433, %v14261_v16  }
  0xe8   : > { %10760 = vperm.xlu1 %15434, %v14296_v18  }
  0xe9   : > { %10755 = vperm.xlu0 %15433, %v14295_v19  }
  0xec   : > { %10786 = vperm.xlu1 %15434, %v14298_v24  }
  0xed   : > { %10781 = vperm.xlu0 %15433, %v14297_v25  }
  0xf0   : > { %11148 = vperm.xlu1 %15434, %v14318_v29  }
  0xf1   : > { %11143 = vperm.xlu0 %15433, %v14317_v31   ;;  %v16958_v31 = vsub.s32 0, %v1199_v4 }
  0xf3   : > { %20892 = vst [vmem:[#allocation17_spill] sm:$0xff] %v16958_v31 }
  0xf4   : > { %11916 = vperm.xlu1 %15434, %v14320_v32  }
  0xf5   : > { %11911 = vperm.xlu0 %15433, %v14319_v33  }
  0xf8   : > { %11942 = vperm.xlu1 %15434, %v14322_v34  }
  0xf9   : > { %11937 = vperm.xlu0 %15433, %v14321_v35  }
  0xfc   : > { %11986 = vperm.xlu1 %15434, %v14340_v36  }
  0xfd   : > { %11981 = vperm.xlu0 %15433, %v14339_v40  }
 0x100   : > { %11996 = vperm.xlu1 %15434, %v14342_v41  }
 0x101   : > { %11991 = vperm.xlu0 %15433, %v14341_v42  }
 0x104   : > { %12006 = vperm.xlu1 %15434, %v14344_v46  }
 0x105   : > { %12001 = vperm.xlu0 %15433, %v14343_v47  }
 0x108   : > { %12016 = vperm.xlu1 %15434, %v14346_v48  }
 0x109   : > { %12011 = vperm.xlu0 %15433, %v14345_v49  }
 0x10c   : > { %12249 = vperm.xlu1 %15434, %v14358_v52  }
 0x10d   : > { %12244 = vperm.xlu0 %15433, %v14357_v53  }
 0x147   : > { %v640_v54 = vpop.f32.mrb[0].mxu0 }
 0x148   : > { %v642_v56 = vpop.f32.mrb[1].mxu0  ;;  %v711_v57 = vpop.f32.mrb[0].mxu1  ;;  %v1158_v62 = vmul.f32 0.0625, %v640_v54 }
 0x149   : > { %v713_v58 = vpop.f32.mrb[1].mxu1  ;;  %v16945_v63 = vmul.f32 0.0625, %v711_v57  ;;  %v1159_v2 = vmul.f32 0.0625, %v642_v56 }
 0x14a   : > { %v16947_v3 = vmul.f32 0.0625, %v713_v58  ;;  %v1174_v7 = vmul.f32 %v1158_v62, %v1158_v62 }
 0x14b   : > { %v782_v59 = vpop.f32.mrb[2].mxu0  ;;  %v1176_v11 = vmul.f32 %v16945_v63, %v16945_v63  ;;  %v1175_v19 = vmul.f32 %v1159_v2, %v1159_v2 }
 0x14c   : > { %v784_v61 = vpop.f32.mrb[3].mxu0  ;;  %v853_v0 = vpop.f32.mrb[2].mxu1  ;;  %v16950_v5 = vmul.f32 0.0625, %v782_v59  ;;  %v1177_v29 = vmul.f32 %v16947_v3, %v16947_v3 }
 0x14d   : > { %v855_v1 = vpop.f32.mrb[3].mxu1  ;;  %v1163_v8 = vmul.f32 0.0625, %v784_v61  ;;  %v1164_v13 = vmul.f32 0.0625, %v853_v0 }
 0x14e   : > { %v16954_v14 = vmul.f32 0.0625, %v855_v1  ;;  %v1178_v32 = vmul.f32 %v16950_v5, %v16950_v5 }
 0x14f   : > { %v1179_v41 = vmul.f32 %v1163_v8, %v1163_v8  ;;  %v1180_v47 = vmul.f32 %v1164_v13, %v1164_v13 }
 0x150   : > { %v940_v6 = vpop.f32.mrb[4].mxu0  ;;  %v1181_v49 = vmul.f32 %v16954_v14, %v16954_v14 }
 0x151   : > { %v1166_v9 = vmul.f32 0.0625, %v940_v6  ;;  %v1011_v10 = vpop.f32.mrb[4].mxu1  ;;  %v942_v12 = vpop.f32.mrb[5].mxu0 }
 0x152   : > { %v1168_v15 = vmul.f32 0.0625, %v1011_v10  ;;  %v1167_v16 = vmul.f32 0.0625, %v942_v12  ;;  %v1013_v18 = vpop.f32.mrb[5].mxu1 }
 0x153   : > { %v1182_v24 = vsub.f32 %v1166_v9, %v1174_v7  ;;  %v1169_v25 = vmul.f32 0.0625, %v1013_v18 }
 0x154   : > { %v1184_v34 = vsub.f32 %v1168_v15, %v1176_v11  ;;  %v1183_v35 = vsub.f32 %v1167_v16, %v1175_v19  ;;  %v1201_v19 = vrot.slane %v1158_v62, %v16958_v31  ;;  %v16977_v62 = vrot.slane %v1163_v8, %v16958_v31 }
 0x155   : > { %v1190_v33 = vmax.f32 %v1182_v24, 0.0  ;;  %v1185_v36 = vsub.f32 %v1169_v25, %v1177_v29  ;;  %v1082_v40 = vpop.f32.mrb[6].mxu0  ;;  %v1205_v29 = vrot.slane %v1159_v2, %v16958_v31  ;;  %v1229_v8 = vrot.slane %v16954_v14, %v16958_v31 }
 0x156   : > { %v1170_v42 = vmul.f32 0.0625, %v1082_v40  ;;  %v1153_v46 = vpop.f32.mrb[6].mxu1  ;;  %v1084_v48 = vpop.f32.mrb[7].mxu0  ;;  %v1192_v53 = vmax.f32 %v1184_v34, 0.0  ;;  %v1191_v54 = vmax.f32 %v1183_v35, 0.0  ;;  %v1213_v34 = vrot.slane %v16947_v3, %v16958_v31 }
 0x157   : > { %v1246_v52 = vadd.f32 1e-05, %v1190_v33  ;;  %v1193_v56 = vmax.f32 %v1185_v36, 0.0  ;;  %v1155_v57 = vpop.f32.mrb[7].mxu1  ;;  %v1172_v59 = vmul.f32 0.0625, %v1153_v46  ;;  %v1171_v61 = vmul.f32 0.0625, %v1084_v48  ;;  %v16970_v35 = vpop.permute.xlu0 %1312 }
 0x158   : > { %v1186_v58 = vsub.f32 %v1170_v42, %v1178_v32  ;;  %v1173_v0 = vmul.f32 0.0625, %v1155_v57  ;;  %v1248_v1 = vadd.f32 1e-05, %v1192_v53  ;;  %v1247_v4 = vadd.f32 1e-05, %v1191_v54 }
 0x159   : > { %15540 = vrsqrt.f32 %v1246_v52  ;;  %v1249_v6 = vadd.f32 1e-05, %v1193_v56  ;;  %v1188_v9 = vsub.f32 %v1172_v59, %v1180_v47  ;;  %v1187_v10 = vsub.f32 %v1171_v61, %v1179_v41  ;;  %v16984_v41 = vpop.permute.xlu1 %1338 }
 0x15a   : > { %v1194_v7 = vmax.f32 %v1186_v58, 0.0  ;;  %v1189_v11 = vsub.f32 %v1173_v0, %v1181_v49  ;;  %15542 = vrsqrt.f32 %v1248_v1  ;;  %v1209_v32 = vrot.slane %v16945_v63, %v16958_v31 }
 0x15b   : > { %15544 = vrsqrt.f32 %v1247_v4  ;;  %v1196_v15 = vmax.f32 %v1188_v9, 0.0  ;;  %v1195_v16 = vmax.f32 %v1187_v10, 0.0  ;;  %v16974_v36 = vrot.slane %v16950_v5, %v16958_v31  ;;  %v17006_v4 = vpop.permute.xlu0 %1317 }
 0x15c   : > { %v1250_v12 = vadd.f32 1e-05, %v1194_v7  ;;  %15546 = vrsqrt.f32 %v1249_v6  ;;  %v1197_v18 = vmax.f32 %v1189_v11, 0.0  ;;  %v1230_v2 = vsub.f32 %v16608_v26, %v1201_v19 }
 0x15d   : > { %v1252_v24 = vadd.f32 1e-05, %v1196_v15  ;;  %v1251_v25 = vadd.f32 1e-05, %v1195_v16  ;;  %v1238_v40 = vsub.f32 %v16611_v27, %v1201_v19  ;;  %v16982_v63 = vrot.slane %v1164_v13, %v16958_v31  ;;  %v17016_v19 = vpop.permute.xlu1 %1343 }
 0x15e   : > { %15548 = vrsqrt.f32 %v1250_v12  ;;  %v1253_v33 = vadd.f32 1e-05, %v1197_v18  ;;  %v1231_v42 = vsub.f32 %v16592_v20, %v1205_v29  ;;  %v1239_v5 = vsub.f32 %v16595_v21, %v1205_v29 }
 0x15f   : > { %15550 = vrsqrt.f32 %v1252_v24  ;;  %v1232_v46 = vsub.f32 %v16614_v28, %v1209_v32  ;;  %v1240_v47 = vsub.f32 %v16619_v30, %v1209_v32  ;;  %v1233_v48 = vsub.f32 %v16598_v22, %v1213_v34 }
 0x160   : > { %15552 = vrsqrt.f32 %v1251_v25  ;;  %v1241_v13 = vsub.f32 %v16601_v23, %v1213_v34  ;;  %v1234_v53 = vsub.f32 %v16654_v44, %v16974_v36  ;;  %v1242_v54 = vsub.f32 %v16657_v45, %v16974_v36 }
 0x161   : > { %15554 = vrsqrt.f32 %v1253_v33  ;;  %v1235_v56 = vsub.f32 %v16636_v37, %v16977_v62  ;;  %v1243_v14 = vsub.f32 %v16639_v38, %v16977_v62  ;;  %v1236_v58 = vsub.f32 %v16668_v50, %v16982_v63 }
 0x162   : > { %v1244_v6 = vsub.f32 %v16671_v51, %v16982_v63  ;;  %v1237_v7 = vsub.f32 %v16642_v39, %v1229_v8  ;;  %v1245_v9 = vsub.f32 %v16651_v43, %v1229_v8 }
 0x163   : > { %v15541_v3 = vpop.eup %15540 }
 0x164   : > { %v1265_v49 = vrot.slane %v15541_v3, %v16958_v31  ;;  %v15543_v52 = vpop.eup %15542 }
 0x165   : > { %v15545_v57 = vpop.eup %15544  ;;  %v1273_v59 = vrot.slane %v15543_v52, %v16958_v31 }
 0x166   : > { %v1294_v61 = vmul.f32 %v1265_v49, %v1230_v2  ;;  %v1302_v0 = vmul.f32 %v1265_v49, %v1238_v40  ;;  %v15547_v1 = vpop.eup %15546  ;;  %v1269_v10 = vrot.slane %v15545_v57, %v16958_v31 }
 0x167   : > { %v1277_v12 = vrot.slane %v15547_v1, %v16958_v31  ;;  %v1296_v18 = vmul.f32 %v1273_v59, %v1232_v46  ;;  %v1304_v29 = vmul.f32 %v1273_v59, %v1240_v47 }
 0x168   : > { %v15549_v11 = vpop.eup %15548  ;;  %v1320_v15 = vmul.f32 %v16970_v35, %v1294_v61  ;;  %v1328_v16 = vmul.f32 %v17006_v4, %v1302_v0  ;;  %v1295_v24 = vmul.f32 %v1269_v10, %v1231_v42  ;;  %v1303_v25 = vmul.f32 %v1269_v10, %v1239_v5 }
 0x169   : > { %v1281_v32 = vrot.slane %v15549_v11, %v16958_v31  ;;  %v15551_v33 = vpop.eup %15550  ;;  %v1297_v34 = vmul.f32 %v1277_v12, %v1233_v48  ;;  %v1305_v36 = vmul.f32 %v1277_v12, %v1241_v13  ;;  %v1322_v42 = vmul.f32 %v16970_v35, %v1296_v18 }
 0x16a   : > { %v1346_v62 = vadd.f32 %v16984_v41, %v1320_v15  ;;  %v1354_v2 = vadd.f32 %v17016_v19, %v1328_v16  ;;  %v15553_v40 = vpop.eup %15552  ;;  %v1289_v3 = vrot.slane %v15551_v33, %v16958_v31  ;;  %v1321_v8 = vmul.f32 %v16970_v35, %v1295_v24 }
 0x16b   : > { %v1329_v46 = vmul.f32 %v17006_v4, %v1303_v25  ;;  %v15555_v5 = vpop.eup %15554  ;;  %v1323_v47 = vmul.f32 %v16970_v35, %v1297_v34  ;;  %v1331_v49 = vmul.f32 %v17006_v4, %v1305_v36  ;;  %v1330_v13 = vmul.f32 %v17006_v4, %v1304_v29 }
 0x16c   : > { %v14602_v48 = vpack.c.bf16 %v1354_v2, %v1346_v62  ;;  %v1347_v52 = vadd.f32 %v16984_v41, %v1321_v8  ;;  %v1348_v59 = vadd.f32 %v16984_v41, %v1322_v42  ;;  %v1285_v61 = vrot.slane %v15553_v40, %v16958_v31 }
 0x16d   : > { %v1355_v57 = vadd.f32 %v17016_v19, %v1329_v46  ;;  %v1349_v0 = vadd.f32 %v16984_v41, %v1323_v47  ;;  %v1357_v1 = vadd.f32 %v17016_v19, %v1331_v49  ;;  %v1356_v10 = vadd.f32 %v17016_v19, %v1330_v13 }
 0x16e   : > { %v1293_v11 = vrot.slane %v15555_v5, %v16958_v31  ;;  %v1299_v15 = vmul.f32 %v1285_v61, %v1235_v56  ;;  %v1307_v16 = vmul.f32 %v1285_v61, %v1243_v14  ;;  %v1298_v18 = vmul.f32 %v1281_v32, %v1234_v53  ;;  %v1362_v56 = vld [vmem:[%s20771_s4] sm:$0xff] }
 0x16f   : > { %v14600_v12 = vpack.c.bf16 %v1355_v57, %v1347_v52  ;;  %v14604_v24 = vpack.c.bf16 %v1357_v1, %v1349_v0  ;;  %v14606_v25 = vpack.c.bf16 %v1356_v10, %v1348_v59  ;;  %v1306_v62 = vmul.f32 %v1281_v32, %v1242_v54 }
 0x170   : > { %v1301_v29 = vmul.f32 %v1293_v11, %v1237_v7  ;;  %v1309_v33 = vmul.f32 %v1293_v11, %v1245_v9  ;;  %v1325_v34 = vmul.f32 %v16970_v35, %v1299_v15  ;;  %v1333_v36 = vmul.f32 %v17006_v4, %v1307_v16 }
 0x171   : > { %14601 = vmatprep.subr.bf16.mxu0 %v14600_v12  ;;  %v1324_v2 = vmul.f32 %v16970_v35, %v1298_v18  ;;  %14605 = vmatprep.subr.bf16.mxu1 %v14604_v24  ;;  %v1300_v7 = vmul.f32 %v1289_v3, %v1236_v58  ;;  %v1332_v54 = vmul.f32 %v17006_v4, %v1306_v62  ;;  %v1704_v18 = vpop.permute.xlu1 %1703 }
 0x172   : > { %14603 = vmatpush1.bf16.msra.mxu0 %v14602_v48  ;;  %v1327_v53 = vmul.f32 %v16970_v35, %v1301_v29  ;;  %v1335_v14 = vmul.f32 %v17006_v4, %v1309_v33  ;;  %14607 = vmatpush1.bf16.msra.mxu1 %v14606_v25  ;;  %v1351_v9 = vadd.f32 %v16984_v41, %v1325_v34 }
 0x173   : > { %v1359_v40 = vadd.f32 %v17016_v19, %v1333_v36  ;;  %v1350_v32 = vadd.f32 %v16984_v41, %v1324_v2  ;;  %v1308_v42 = vmul.f32 %v1289_v3, %v1244_v6  ;;  %v1326_v5 = vmul.f32 %v16970_v35, %v1300_v7  ;;  %v1363_v35 = vld [vmem:[%s20771_s4 + $0x8] sm:$0xff] }
 0x174   : > { %v1353_v8 = vadd.f32 %v16984_v41, %v1327_v53  ;;  %v1361_v46 = vadd.f32 %v17016_v19, %v1335_v14  ;;  %v1358_v47 = vadd.f32 %v17016_v19, %v1332_v54 }
 0x175   : > { %14047 = vmatmul.mubr.msk.f32.vlgmr.msra.gmra.mrb[8].mxu0 %vm570_vm0, %v1362_v56  ;;  %v14608_v58 = vpack.c.bf16 %v1359_v40, %v1351_v9  ;;  %14049 = vmatmul.mubr.msk.f32.vlgmr.msra.gmra.mrb[8].mxu1 %vm570_vm0, %v1362_v56  ;;  %v1334_v48 = vmul.f32 %v17006_v4, %v1308_v42  ;;  %v1352_v13 = vadd.f32 %v16984_v41, %v1326_v5 }
 0x176   : > { %v14612_v49 = vpack.c.bf16 %v1361_v46, %v1353_v8  ;;  %1440 = vmatprep.mubr.f32.mxu0 %v20800_v17  ;;  %v14610_v52 = vpack.c.bf16 %v1358_v47, %v1350_v32  ;;  %1517 = vmatprep.mubr.f32.mxu1 %v20800_v17 }
 0x177   : > { %14609 = vmatprep.subr.bf16.mxu0 %v14608_v58  ;;  %v1360_v63 = vadd.f32 %v17016_v19, %v1334_v48 }
 0x178   : > { %14613 = vmatprep.subr.bf16.mxu1 %v14612_v49  ;;  %14611 = vmatpush1.bf16.msra.mxu0 %v14610_v52 }
 0x179   : > { %v14614_v6 = vpack.c.bf16 %v1360_v63, %v1352_v13  ;;  %14048 = vmatmul.mubr.msk.f32.gmra.mrb[10].mxu0 %vm570_vm0, %v1363_v35  ;;  %14050 = vmatmul.mubr.msk.f32.gmra.mrb[10].mxu1 %vm570_vm0, %v1363_v35 }
 0x17a   : > { %1588 = vmatprep.mubr.f32.mxu0 %v20800_v17  ;;  %1665 = vmatprep.mubr.f32.mxu1 %v20800_v17 }
 0x17b   : > { %14615 = vmatpush1.bf16.msra.mxu1 %v14614_v6 }
 0x17d   : > { %14051 = vmatmul.mubr.msk.f32.vlgmr.msra.gmra.mrb[12].mxu0 %vm570_vm0, %v1362_v56 }
 0x17e   : > { %14053 = vmatmul.mubr.msk.f32.vlgmr.msra.gmra.mrb[12].mxu1 %vm570_vm0, %v1362_v56  ;;  %1594 = vmatprep.mubr.f32.mxu0 %v20800_v17 }
 0x17f   : > { %1671 = vmatprep.mubr.f32.mxu1 %v20800_v17 }
 0x181   : > { %14052 = vmatmul.mubr.msk.f32.gmra.mrb[14].mxu0 %vm570_vm0, %v1363_v35 }
 0x182   : > { %14054 = vmatmul.mubr.msk.f32.gmra.mrb[14].mxu1 %vm570_vm0, %v1363_v35  ;;  %1790 = vmatprep.mubr.f32.mxu0 %v20800_v17 }
 0x183   : > { %1861 = vmatprep.mubr.f32.mxu1 %v20800_v17 }
 0x248   : > { %v1436_v41 = vpop.f32.mrb[8].mxu0  ;;  %v1513_v4 = vpop.f32.mrb[8].mxu1 }
 0x249   : > { %v1438_v19 = vpop.f32.mrb[9].mxu0  ;;  %v1515_v3 = vpop.f32.mrb[9].mxu1  ;;  %v1678_v1 = vadd.f32 %v1436_v41, %v16608_v26  ;;  %v1680_v10 = vadd.f32 %v1513_v4, %v16614_v28 }
 0x24a   : > { %v1679_v57 = vadd.f32 %v1438_v19, %v16592_v20  ;;  %v1681_v59 = vadd.f32 %v1515_v3, %v16598_v22  ;;  %v1699_v20 = vpop.permute.xlu0 %1698 }
 0x24b   : > { %v17097_v34 = vadd.f32 %v1699_v20, %v1678_v1  ;;  %v17099_v36 = vadd.f32 %v1699_v20, %v1680_v10 }
 0x24c   : > { %v1442_v61 = vpop.f32.mrb[10].mxu0  ;;  %v1519_v0 = vpop.f32.mrb[10].mxu1  ;;  %v17089_v33 = vadd.f32 %v1699_v20, %v1679_v57  ;;  %v17091_v26 = vadd.f32 %v1699_v20, %v1681_v59 }
 0x24d   : > { %v1686_v11 = vadd.f32 %v1442_v61, %v16611_v27  ;;  %v1688_v12 = vadd.f32 %v1519_v0, %v16619_v30  ;;  %v1444_v15 = vpop.f32.mrb[11].mxu0  ;;  %v1521_v16 = vpop.f32.mrb[11].mxu1  ;;  %20896 = vst [vmem:[#allocation21_spill] sm:$0xff] %v17097_v34  ;;  %20897 = vst [vmem:[#allocation22_spill] sm:$0xff] %v17099_v36  ;;  %v2010_v0 = vmul.f32 %v17097_v34, %v17097_v34 }
 0x24e   : > { %v1687_v24 = vadd.f32 %v1444_v15, %v16595_v21  ;;  %v1689_v25 = vadd.f32 %v1521_v16, %v16601_v23  ;;  %20894 = vst [vmem:[#allocation19_spill] sm:$0xff] %v17091_v26  ;;  %v2011_v35 = vmul.f32 %v17089_v33, %v17089_v33  ;;  %v2013_v41 = vmul.f32 %v17091_v26, %v17091_v26 }
 0x24f   : > { %v17085_v29 = vadd.f32 %v1704_v18, %v1686_v11  ;;  %v17087_v22 = vadd.f32 %v1704_v18, %v1688_v12  ;;  %v2012_v10 = vmul.f32 %v17099_v36, %v17099_v36 }
 0x250   : > { %v17093_v28 = vadd.f32 %v1704_v18, %v1687_v24  ;;  %v17095_v27 = vadd.f32 %v1704_v18, %v1689_v25  ;;  %v1590_v30 = vpop.f32.mrb[12].mxu0 }
 0x251   : > { %20893 = vst [vmem:[#allocation18_spill] sm:$0xff] %v17087_v22  ;;  %v1667_v21 = vpop.f32.mrb[12].mxu1  ;;  %v1592_v23 = vpop.f32.mrb[13].mxu0  ;;  %v1682_v53 = vadd.f32 %v1590_v30, %v16654_v44  ;;  %v14618_v14 = vpack.c.bf16 %v17085_v29, %v17097_v34  ;;  %v14622_v7 = vpack.c.bf16 %v17087_v22, %v17099_v36  ;;  %v2018_v4 = vmul.f32 %v17085_v29, %v17085_v29 }
 0x252   : > { %20895 = vst [vmem:[#allocation20_spill] sm:$0xff] %v17095_v27  ;;  %v1669_v62 = vpop.f32.mrb[13].mxu1  ;;  %v14616_v2 = vpack.c.bf16 %v17093_v28, %v17089_v33  ;;  %v14620_v56 = vpack.c.bf16 %v17095_v27, %v17091_v26  ;;  %v1683_v9 = vadd.f32 %v1592_v23, %v16636_v37  ;;  %v1684_v44 = vadd.f32 %v1667_v21, %v16668_v50 }
 0x253   : > { %v1685_v54 = vadd.f32 %v1669_v62, %v16642_v39  ;;  %v17116_v47 = vadd.f32 %v1699_v20, %v1682_v53  ;;  %v2019_v39 = vmul.f32 %v17093_v28, %v17093_v28  ;;  %v2020_v57 = vmul.f32 %v17087_v22, %v17087_v22 }
 0x254   : > { %v1596_v40 = vpop.f32.mrb[14].mxu0  ;;  %14617 = vmatprep.subr.bf16.mxu0 %v14616_v2  ;;  %14621 = vmatprep.subr.bf16.mxu1 %v14620_v56  ;;  %v14634_v12 = vpack.c.bf16 %v2018_v4, %v2010_v0 }
 0x255   : > { %v1690_v32 = vadd.f32 %v1596_v40, %v16657_v45  ;;  %v1673_v8 = vpop.f32.mrb[14].mxu1  ;;  %v1598_v46 = vpop.f32.mrb[15].mxu0  ;;  %14619 = vmatpush1.bf16.msra.mxu0 %v14618_v14  ;;  %14623 = vmatpush1.bf16.msra.mxu1 %v14622_v7  ;;  %20898 = vst [vmem:[#allocation23_spill] sm:$0xff] %v17116_v47  ;;  %v17123_v45 = vadd.f32 %v1699_v20, %v1683_v9 }
 0x256   : > { %v1692_v42 = vadd.f32 %v1673_v8, %v16671_v51  ;;  %v1691_v5 = vadd.f32 %v1598_v46, %v16639_v38  ;;  %v1675_v58 = vpop.f32.mrb[15].mxu1  ;;  %v17133_v38 = vadd.f32 %v1699_v20, %v1685_v54  ;;  %v17141_v51 = vadd.f32 %v1699_v20, %v1684_v44 }
 0x257   : > { %v17118_v37 = vadd.f32 %v1704_v18, %v1690_v32  ;;  %v1693_v49 = vadd.f32 %v1675_v58, %v16651_v43  ;;  %20900 = vst [vmem:[#allocation25_spill] sm:$0xff] %v17123_v45  ;;  %v2021_v43 = vmul.f32 %v17095_v27, %v17095_v27  ;;  %v14632_v3 = vpack.c.bf16 %v2019_v39, %v2011_v35 }
 0x258   : > { %v17125_v48 = vadd.f32 %v1704_v18, %v1692_v42  ;;  %v17127_v13 = vadd.f32 %v1704_v18, %v1691_v5  ;;  %14055 = vmatmul.mubr.msk.f32.vlgmr.msra.gmra.mrb[16].mxu0 %vm570_vm0, %v20798_v55  ;;  %14056 = vmatmul.mubr.msk.f32.vlgmr.msra.gmra.mrb[16].mxu1 %vm570_vm0, %v20798_v55  ;;  %20903 = vst [vmem:[#allocation28_spill] sm:$0xff] %v17133_v38  ;;  %20905 = vst [vmem:[#allocation30_spill] sm:$0xff] %v17141_v51 }
 0x259   : > { %20899 = vst [vmem:[#allocation24_spill] sm:$0xff] %v17118_v37  ;;  %v17135_v50 = vadd.f32 %v1704_v18, %v1693_v49  ;;  %1932 = vmatprep.mubr.f32.mxu0 %v20800_v17  ;;  %2003 = vmatprep.mubr.f32.mxu1 %v20800_v17  ;;  %v14626_v6 = vpack.c.bf16 %v17118_v37, %v17116_v47 }
 0x25a   : > { %20901 = vst [vmem:[#allocation26_spill] sm:$0xff] %v17125_v48  ;;  %20902 = vst [vmem:[#allocation27_spill] sm:$0xff] %v17127_v13  ;;  %v14624_v52 = vpack.c.bf16 %v17127_v13, %v17123_v45  ;;  %v14630_v19 = vpack.c.bf16 %v17125_v48, %v17141_v51  ;;  %v2023_v59 = vmul.f32 %v17127_v13, %v17127_v13 }
 0x25b   : > { %20904 = vst [vmem:[#allocation29_spill] sm:$0xff] %v17135_v50  ;;  %v14628_v63 = vpack.c.bf16 %v17135_v50, %v17133_v38  ;;  %v14636_v61 = vpack.c.bf16 %v2021_v43, %v2013_v41  ;;  %v2025_v1 = vmul.f32 %v17135_v50, %v17135_v50  ;;  %v2015_v11 = vmul.f32 %v17123_v45, %v17123_v45 }
 0x25c   : > { %14625 = vmatprep.subr.bf16.mxu0 %v14624_v52  ;;  %v2017_v15 = vmul.f32 %v17133_v38, %v17133_v38  ;;  %v2022_v16 = vmul.f32 %v17118_v37, %v17118_v37  ;;  %v14638_v18 = vpack.c.bf16 %v2020_v57, %v2012_v10  ;;  %v2024_v25 = vmul.f32 %v17125_v48, %v17125_v48 }
 0x25d   : > { %14629 = vmatprep.subr.bf16.mxu1 %v14628_v63  ;;  %14627 = vmatpush1.bf16.msra.mxu0 %v14626_v6  ;;  %v14640_v24 = vpack.c.bf16 %v2023_v59, %v2015_v11  ;;  %v2014_v30 = vmul.f32 %v17116_v47, %v17116_v47  ;;  %v2016_v21 = vmul.f32 %v17141_v51, %v17141_v51 }
 0x25e   : > { %14631 = vmatpush1.bf16.msra.mxu1 %v14630_v19  ;;  %14633 = vmatprep.subr.bf16.mxu0 %v14632_v3  ;;  %v14644_v20 = vpack.c.bf16 %v2025_v1, %v2017_v15 }
 0x25f   : > { %14637 = vmatprep.subr.bf16.mxu1 %v14636_v61  ;;  %v14642_v23 = vpack.c.bf16 %v2022_v16, %v2014_v30  ;;  %v14646_v62 = vpack.c.bf16 %v2024_v25, %v2016_v21 }
 0x260   : > { %14057 = vmatmul.mubr.msk.f32.vlgmr.msra.gmra.mrb[18].mxu0 %vm570_vm0, %v20798_v55 }
 0x261   : > { %14058 = vmatmul.mubr.msk.f32.vlgmr.msra.gmra.mrb[18].mxu1 %vm570_vm0, %v20798_v55  ;;  %14635 = vmatpush1.bf16.msra.mxu0 %v14634_v12 }
 0x262   : > { %14639 = vmatpush1.bf16.msra.mxu1 %v14638_v18  ;;  %14641 = vmatprep.subr.bf16.mxu0 %v14640_v24 }
 0x263   : > { %14645 = vmatprep.subr.bf16.mxu1 %v14644_v20  ;;  %2090 = vmatprep.mubr.f32.mxu0 %v20800_v17 }
 0x264   : > { %2161 = vmatprep.mubr.f32.mxu1 %v20800_v17  ;;  %14059 = vmatmul.mubr.msk.f32.vlgmr.msra.gmra.mrb[20].mxu0 %vm570_vm0, %v20798_v55 }
 0x265   : > { %14060 = vmatmul.mubr.msk.f32.vlgmr.msra.gmra.mrb[20].mxu1 %vm570_vm0, %v20798_v55  ;;  %14643 = vmatpush1.bf16.msra.mxu0 %v14642_v23 }
 0x266   : > { %14647 = vmatpush1.bf16.msra.mxu1 %v14646_v62  ;;  %2232 = vmatprep.mubr.f32.mxu0 %v20800_v17 }
 0x267   : > { %2303 = vmatprep.mubr.f32.mxu1 %v20800_v17 }
 0x268   : > { %14061 = vmatmul.mubr.msk.f32.vlgmr.msra.gmra.mrb[22].mxu0 %vm570_vm0, %v20798_v55 }
 0x269   : > { %14062 = vmatmul.mubr.msk.f32.vlgmr.msra.gmra.mrb[22].mxu1 %vm570_vm0, %v20798_v55  ;;  %2658 = vmatprep.mubr.f32.mxu0 %v20800_v17 }
 0x26a   : > { %2872 = vmatprep.mubr.f32.mxu1 %v20800_v17 }
 0x32b   : > { %v1792_v2 = vpop.f32.mrb[16].mxu0  ;;  %v1863_v56 = vpop.f32.mrb[16].mxu1 }
 0x32c   : > { %v1794_v53 = vpop.f32.mrb[17].mxu0  ;;  %v1865_v14 = vpop.f32.mrb[17].mxu1  ;;  %v2312_v32 = vmul.f32 0.0625, %v1863_v56  ;;  %v2310_v46 = vmul.f32 0.0625, %v1792_v2 }
 0x32d   : > { %v2311_v44 = vmul.f32 0.0625, %v1794_v53  ;;  %v2313_v42 = vmul.f32 0.0625, %v1865_v14 }
 0x32e   : > { %v2328_v49 = vmul.f32 %v2312_v32, %v2312_v32  ;;  %v2326_v52 = vmul.f32 %v2310_v46, %v2310_v46 }
 0x32f   : > { %v2327_v35 = vmul.f32 %v2311_v44, %v2311_v44  ;;  %v2329_v63 = vmul.f32 %v2313_v42, %v2313_v42 }
 0x333   : > { %v1934_v7 = vpop.f32.mrb[18].mxu0 }
 0x334   : > { %v2005_v9 = vpop.f32.mrb[18].mxu1  ;;  %v1936_v40 = vpop.f32.mrb[19].mxu0  ;;  %v17197_v8 = vmul.f32 0.0625, %v1934_v7 }
 0x335   : > { %v2007_v54 = vpop.f32.mrb[19].mxu1  ;;  %v17199_v5 = vmul.f32 0.0625, %v1936_v40  ;;  %v2316_v6 = vmul.f32 0.0625, %v2005_v9 }
 0x336   : > { %v2330_v4 = vmul.f32 %v17197_v8, %v17197_v8  ;;  %v2317_v19 = vmul.f32 0.0625, %v2007_v54 }
 0x337   : > { %v2092_v58 = vpop.f32.mrb[20].mxu0  ;;  %v2332_v59 = vmul.f32 %v2316_v6, %v2316_v6  ;;  %v2331_v61 = vmul.f32 %v17199_v5, %v17199_v5 }
 0x338   : > { %v2163_v39 = vpop.f32.mrb[20].mxu1  ;;  %v2094_v43 = vpop.f32.mrb[21].mxu0  ;;  %v2318_v3 = vmul.f32 0.0625, %v2092_v58  ;;  %v2333_v11 = vmul.f32 %v2317_v19, %v2317_v19 }
 0x339   : > { %v2165_v41 = vpop.f32.mrb[21].mxu1  ;;  %v2320_v57 = vmul.f32 0.0625, %v2163_v39  ;;  %v2319_v0 = vmul.f32 0.0625, %v2094_v43 }
 0x33a   : > { %v2321_v1 = vmul.f32 0.0625, %v2165_v41  ;;  %v2334_v12 = vsub.f32 %v2318_v3, %v2326_v52 }
 0x33b   : > { %v2234_v10 = vpop.f32.mrb[22].mxu0  ;;  %v2336_v15 = vsub.f32 %v2320_v57, %v2328_v49  ;;  %v2335_v25 = vsub.f32 %v2319_v0, %v2327_v35  ;;  %v2353_v0 = vrot.slane %v2310_v46, %v16958_v31 }
 0x33c   : > { %v2322_v16 = vmul.f32 0.0625, %v2234_v10  ;;  %v2305_v18 = vpop.f32.mrb[22].mxu1  ;;  %v2236_v24 = vpop.f32.mrb[23].mxu0  ;;  %v2337_v20 = vsub.f32 %v2321_v1, %v2329_v63  ;;  %v2342_v62 = vmax.f32 %v2334_v12, 0.0  ;;  %v2357_v1 = vrot.slane %v2311_v44, %v16958_v31 }
 0x33d   : > { %v2324_v30 = vmul.f32 0.0625, %v2305_v18  ;;  %v2323_v21 = vmul.f32 0.0625, %v2236_v24  ;;  %v2307_v23 = vpop.f32.mrb[23].mxu1  ;;  %v2344_v2 = vmax.f32 %v2336_v15, 0.0  ;;  %v2343_v14 = vmax.f32 %v2335_v25, 0.0  ;;  %v17227_v18 = vpop.permute.xlu0 %2464 }
 0x33e   : > { %v2338_v56 = vsub.f32 %v2322_v16, %v2330_v4  ;;  %v2325_v53 = vmul.f32 0.0625, %v2307_v23  ;;  %v2345_v7 = vmax.f32 %v2337_v20, 0.0  ;;  %v2398_v54 = vadd.f32 1e-05, %v2342_v62 }
 0x33f   : > { %v2340_v9 = vsub.f32 %v2324_v30, %v2332_v59  ;;  %v2339_v40 = vsub.f32 %v2323_v21, %v2331_v61  ;;  %v2400_v58 = vadd.f32 1e-05, %v2344_v2  ;;  %v2399_v43 = vadd.f32 1e-05, %v2343_v14  ;;  %v17233_v30 = vpop.permute.xlu1 %2469 }
 0x340   : > { %v2346_v39 = vmax.f32 %v2338_v56, 0.0  ;;  %v2341_v49 = vsub.f32 %v2325_v53, %v2333_v11  ;;  %v2401_v52 = vadd.f32 1e-05, %v2345_v7  ;;  %15556 = vrsqrt.f32 %v2398_v54 }
 0x341   : > { %v2348_v41 = vmax.f32 %v2340_v9, 0.0  ;;  %v2347_v35 = vmax.f32 %v2339_v40, 0.0  ;;  %15558 = vrsqrt.f32 %v2400_v58  ;;  %v2361_v59 = vrot.slane %v2312_v32, %v16958_v31 }
 0x342   : > { %v2402_v63 = vadd.f32 1e-05, %v2346_v39  ;;  %v2349_v57 = vmax.f32 %v2341_v49, 0.0  ;;  %15560 = vrsqrt.f32 %v2399_v43  ;;  %v2365_v10 = vrot.slane %v2313_v42, %v16958_v31 }
 0x343   : > { %v2404_v3 = vadd.f32 1e-05, %v2348_v41  ;;  %v2403_v4 = vadd.f32 1e-05, %v2347_v35  ;;  %15562 = vrsqrt.f32 %v2401_v52  ;;  %v17211_v11 = vrot.slane %v17197_v8, %v16958_v31 }
 0x344   : > { %15564 = vrsqrt.f32 %v2402_v63  ;;  %v2405_v61 = vadd.f32 1e-05, %v2349_v57  ;;  %v17214_v12 = vrot.slane %v2316_v6, %v16958_v31  ;;  %v2382_v15 = vsub.f32 %v17097_v34, %v2353_v0 }
 0x345   : > { %15566 = vrsqrt.f32 %v2404_v3  ;;  %v2390_v46 = vsub.f32 %v17085_v29, %v2353_v0  ;;  %v17220_v32 = vrot.slane %v17199_v5, %v16958_v31  ;;  %v2384_v44 = vsub.f32 %v17099_v36, %v2361_v59 }
 0x346   : > { %15568 = vrsqrt.f32 %v2403_v4  ;;  %v2392_v42 = vsub.f32 %v17087_v22, %v2361_v59  ;;  %v17225_v16 = vrot.slane %v2317_v19, %v16958_v31  ;;  %v2383_v6 = vsub.f32 %v17089_v33, %v2357_v1 }
 0x347   : > { %15570 = vrsqrt.f32 %v2405_v61  ;;  %v2391_v24 = vsub.f32 %v17093_v28, %v2357_v1  ;;  %v2385_v25 = vsub.f32 %v17091_v26, %v2365_v10  ;;  %v2393_v5 = vsub.f32 %v17095_v27, %v2365_v10  ;;  %v2491_v61 = vpop.permute.xlu0 %2490 }
 0x348   : > { %v2386_v21 = vsub.f32 %v17116_v47, %v17211_v11  ;;  %v2394_v19 = vsub.f32 %v17118_v37, %v17211_v11  ;;  %v2388_v23 = vsub.f32 %v17141_v51, %v17214_v12  ;;  %v2396_v56 = vsub.f32 %v17125_v48, %v17214_v12 }
 0x349   : > { %v2387_v53 = vsub.f32 %v17123_v45, %v17220_v32  ;;  %v2395_v14 = vsub.f32 %v17127_v13, %v17220_v32  ;;  %v2389_v40 = vsub.f32 %v17133_v38, %v17225_v16  ;;  %v2397_v43 = vsub.f32 %v17135_v50, %v17225_v16 }
 0x34a   : > { %v15557_v8 = vpop.eup %15556 }
 0x34b   : > { %v15559_v20 = vpop.eup %15558  ;;  %v2417_v62 = vrot.slane %v15557_v8, %v16958_v31 }
 0x34c   : > { %v15561_v2 = vpop.eup %15560  ;;  %v2425_v7 = vrot.slane %v15559_v20, %v16958_v31 }
 0x34d   : > { %v15563_v9 = vpop.eup %15562  ;;  %v2421_v54 = vrot.slane %v15561_v2, %v16958_v31  ;;  %v2446_v58 = vmul.f32 %v2417_v62, %v2382_v15  ;;  %v2454_v39 = vmul.f32 %v2417_v62, %v2390_v46  ;;  %v2496_v15 = vpop.permute.xlu1 %2495 }
 0x34e   : > { %v15565_v49 = vpop.eup %15564  ;;  %v2429_v52 = vrot.slane %v15563_v9, %v16958_v31  ;;  %v2448_v41 = vmul.f32 %v2425_v7, %v2384_v44  ;;  %v2456_v35 = vmul.f32 %v2425_v7, %v2392_v42 }
 0x34f   : > { %v15567_v63 = vpop.eup %15566  ;;  %v2433_v3 = vrot.slane %v15565_v49, %v16958_v31  ;;  %v2447_v57 = vmul.f32 %v2421_v54, %v2383_v6  ;;  %v2455_v4 = vmul.f32 %v2421_v54, %v2391_v24  ;;  %v2472_v0 = vmul.f32 %v17227_v18, %v2446_v58 }
 0x350   : > { %v15569_v59 = vpop.eup %15568  ;;  %v2441_v1 = vrot.slane %v15567_v63, %v16958_v31  ;;  %v2480_v10 = vmul.f32 %v17233_v30, %v2454_v39  ;;  %v2449_v11 = vmul.f32 %v2429_v52, %v2385_v25  ;;  %v2457_v12 = vmul.f32 %v2429_v52, %v2393_v5 }
 0x351   : > { %v2473_v46 = vmul.f32 %v17227_v18, %v2447_v57  ;;  %v2481_v32 = vmul.f32 %v17233_v30, %v2455_v4  ;;  %v2498_v44 = vadd.f32 %v2491_v61, %v2472_v0  ;;  %v2474_v42 = vmul.f32 %v17227_v18, %v2448_v41  ;;  %v15571_v20 = vpop.eup %15570 }
 0x352   : > { %v2506_v16 = vadd.f32 %v2496_v15, %v2480_v10  ;;  %v2475_v8 = vmul.f32 %v17227_v18, %v2449_v11  ;;  %v2483_v6 = vmul.f32 %v17233_v30, %v2457_v12  ;;  %v2482_v24 = vmul.f32 %v17233_v30, %v2456_v35 }
 0x353   : > { %v2499_v62 = vadd.f32 %v2491_v61, %v2473_v46  ;;  %v2507_v2 = vadd.f32 %v2496_v15, %v2481_v32  ;;  %v17265_v25 = vadd.f32 %v2491_v61, %v2474_v42  ;;  %v2437_v5 = vrot.slane %v15569_v59, %v16958_v31 }
 0x354   : > { %v14650_v7 = vpack.c.bf16 %v2506_v16, %v2498_v44  ;;  %v17268_v9 = vadd.f32 %v2491_v61, %v2475_v8  ;;  %v17270_v54 = vadd.f32 %v2496_v15, %v2483_v6  ;;  %v17272_v58 = vadd.f32 %v2496_v15, %v2482_v24 }
 0x355   : > { %v14648_v39 = vpack.c.bf16 %v2507_v2, %v2499_v62  ;;  %v2451_v49 = vmul.f32 %v2437_v5, %v2387_v53  ;;  %v2459_v52 = vmul.f32 %v2437_v5, %v2395_v14  ;;  %v2450_v41 = vmul.f32 %v2433_v3, %v2386_v21  ;;  %v17285_v21 = vld [vmem:[%s20906_s27] sm:$0xff]  ;;  %v17354_v2 = vld [vmem:[%s20906_s27 + $0x28] sm:$0xff]  ;;  %v17362_v5 = vld [vmem:[%s20906_s27 + $0x30] sm:$0xff] }
 0x356   : > { %v2458_v57 = vmul.f32 %v2433_v3, %v2394_v19  ;;  %v2445_v4 = vrot.slane %v15571_v20, %v16958_v31  ;;  %v2452_v11 = vmul.f32 %v2441_v1, %v2388_v23  ;;  %v2460_v3 = vmul.f32 %v2441_v1, %v2396_v56  ;;  %v17346_v62 = vld [vmem:[%s20906_s27 + $0x20] sm:$0xff] }
 0x357   : > { %14649 = vmatprep.subr.bf16.mxu0 %v14648_v39  ;;  %v2477_v0 = vmul.f32 %v17227_v18, %v2451_v49  ;;  %v2485_v59 = vmul.f32 %v17233_v30, %v2459_v52  ;;  %v2476_v10 = vmul.f32 %v17227_v18, %v2450_v41  ;;  %v17375_v39 = vpop.permute.xlu0 %2532 }
 0x358   : > { %14651 = vmatpush1.bf16.msra.mxu0 %v14650_v7  ;;  %v2484_v53 = vmul.f32 %v17233_v30, %v2458_v57  ;;  %v2453_v14 = vmul.f32 %v2445_v4, %v2389_v40  ;;  %v2461_v19 = vmul.f32 %v2445_v4, %v2397_v43  ;;  %v2478_v44 = vmul.f32 %v17227_v18, %v2452_v11  ;;  %v17310_v43 = vld [vmem:[%s20906_s27 + $0x8] sm:$0xff]  ;;  %v17370_v7 = vld [vmem:[%s20906_s27 + $0x38] sm:$0xff] }
 0x359   : > { %v17288_v12 = vadd.f32 %v2491_v61, %v2477_v0  ;;  %v17290_v46 = vadd.f32 %v2496_v15, %v2485_v59  ;;  %v17292_v32 = vadd.f32 %v2491_v61, %v2476_v10  ;;  %v2486_v8 = vmul.f32 %v17233_v30, %v2460_v3  ;;  %v17379_v0 = vpop.permute.xlu1 %2537 }
 0x35a   : > { %v17295_v23 = vadd.f32 %v2496_v15, %v2484_v53  ;;  %v2479_v42 = vmul.f32 %v17227_v18, %v2453_v14  ;;  %v2487_v16 = vmul.f32 %v17233_v30, %v2461_v19  ;;  %v17304_v40 = vadd.f32 %v2491_v61, %v2478_v44 }
 0x35b   : > { %14063 = vmatmul.mubr.msk.f32.vlgmr.msra.gmra.mrb[24].mxu0 %vm570_vm0, %v17285_v21  ;;  %v17318_v6 = vadd.f32 %v2496_v15, %v2486_v8  ;;  %v17383_v3 = vpop.permute.xlu0 %2542 }
 0x35c   : > { %20907 = vst [vmem:[#allocation31_spill] sm:$0xff] %v17304_v40  ;;  %2664 = vmatprep.mubr.f32.mxu0 %v20800_v17  ;;  %v17314_v1 = vadd.f32 %v2491_v61, %v2479_v42  ;;  %v17316_v30 = vadd.f32 %v2496_v15, %v2487_v16  ;;  %v17330_v61 = vld [vmem:[%s20906_s27 + $0x10] sm:$0xff]  ;;  %v17338_v15 = vld [vmem:[%s20906_s27 + $0x18] sm:$0xff] }
 0x35d   : > { %20908 = vst [vmem:[#allocation32_spill] sm:$0xff] %v17318_v6 }
 0x35f   : > { %14064 = vmatmul.mubr.msk.f32.gmra.mrb[26].mxu0 %vm570_vm0, %v17310_v43 }
 0x360   : > { %2670 = vmatprep.mubr.f32.mxu0 %v20800_v17 }
 0x363   : > { %14065 = vmatmul.mubr.msk.f32.gmra.mrb[28].mxu0 %vm570_vm0, %v17330_v61 }
 0x364   : > { %2676 = vmatprep.mubr.f32.mxu0 %v20800_v17 }
 0x367   : > { %14066 = vmatmul.mubr.msk.f32.gmra.mrb[30].mxu0 %vm570_vm0, %v17338_v15 }
 0x368   : > { %2682 = vmatprep.mubr.f32.mxu0 %v20800_v17 }
 0x36b   : > { %14067 = vmatmul.mubr.msk.f32.gmra.mrb[32].mxu0 %vm570_vm0, %v17346_v62 }
 0x36c   : > { %2688 = vmatprep.mubr.f32.mxu0 %v20800_v17 }
 0x36f   : > { %14068 = vmatmul.mubr.msk.f32.gmra.mrb[34].mxu0 %vm570_vm0, %v17354_v2 }
 0x370   : > { %2694 = vmatprep.mubr.f32.mxu0 %v20800_v17 }
 0x373   : > { %14069 = vmatmul.mubr.msk.f32.gmra.mrb[36].mxu0 %vm570_vm0, %v17362_v5 }
 0x374   : > { %2700 = vmatprep.mubr.f32.mxu0 %v20800_v17 }
 0x377   : > { %14070 = vmatmul.mubr.msk.f32.gmra.mrb[38].mxu0 %vm570_vm0, %v17370_v7 }
 0x378   : > { %3142 = vmatprep.mubr.f32.mxu0 %v20800_v17 }
 0x42e   : > { %v2660_v49 = vpop.f32.mrb[24].mxu0 }
 0x42f   : > { %v2661_v52 = vadd.f32 %v2660_v49, %v17375_v39  ;;  %v2662_v41 = vpop.f32.mrb[25].mxu0 }
 0x430   : > { %v2663_v57 = vadd.f32 %v2662_v41, %v17375_v39 }
 0x431   : > { %v2723_v4 = vmul.f32 0.70710677, %v2661_v52 }
 0x432   : > { %v2724_v59 = vmul.f32 0.70710677, %v2663_v57  ;;  %v2666_v10 = vpop.f32.mrb[26].mxu0  ;;  %v2708_v51 = vmul.f32 0.5, %v2663_v57 }
 0x433   : > { %15572 = verf.f32 %v2723_v4  ;;  %v2667_v11 = vadd.f32 %v2666_v10, %v17379_v0  ;;  %v2668_v53 = vpop.f32.mrb[27].mxu0  ;;  %v17389_v4 = vpop.permute.xlu1 %2547 }
 0x434   : > { %15574 = verf.f32 %v2724_v59  ;;  %v2669_v14 = vadd.f32 %v2668_v53, %v17379_v0 }
 0x435   : > { %v2725_v19 = vmul.f32 0.70710677, %v2667_v11  ;;  %v2709_v50 = vmul.f32 0.5, %v2667_v11 }
 0x436   : > { %v2726_v44 = vmul.f32 0.70710677, %v2669_v14  ;;  %v2672_v42 = vpop.f32.mrb[28].mxu0  ;;  %v2710_v48 = vmul.f32 0.5, %v2669_v14 }
 0x437   : > { %15576 = verf.f32 %v2725_v19  ;;  %v2673_v16 = vadd.f32 %v2672_v42, %v17383_v3  ;;  %v2674_v8 = vpop.f32.mrb[29].mxu0  ;;  %v17403_v31 = vpop.permute.xlu1 %2557 }
 0x438   : > { %15578 = verf.f32 %v2726_v44  ;;  %v17387_v49 = vadd.f32 %v2674_v8, %v17383_v3  ;;  %v17394_v44 = vpop.permute.xlu0 %2552 }
 0x439   : > { %v2727_v41 = vmul.f32 0.70710677, %v2673_v16 }
 0x43a   : > { %v2728_v59 = vmul.f32 0.70710677, %v17387_v49  ;;  %v2678_v10 = vpop.f32.mrb[30].mxu0 }
 0x43b   : > { %15580 = verf.f32 %v2727_v41  ;;  %v2679_v53 = vadd.f32 %v2678_v10, %v17389_v4  ;;  %v2680_v60 = vpop.f32.mrb[31].mxu0  ;;  %v2707_v10 = vmul.f32 0.5, %v2661_v52 }
 0x43c   : > { %15582 = verf.f32 %v2728_v59  ;;  %v2681_v19 = vadd.f32 %v2680_v60, %v17389_v4 }
 0x43d   : > { %v15573_v55 = vpop.eup %15572  ;;  %v2729_v42 = vmul.f32 0.70710677, %v2679_v53 }
 0x43e   : > { %v15575_v20 = vpop.eup %15574  ;;  %v2730_v8 = vmul.f32 0.70710677, %v2681_v19  ;;  %v2684_v24 = vpop.f32.mrb[32].mxu0  ;;  %v2755_v17 = vadd.f32 1.0, %v15573_v55 }
 0x43f   : > { %15584 = verf.f32 %v2729_v42  ;;  %v17397_v18 = vadd.f32 %v2684_v24, %v17394_v44  ;;  %v2686_v56 = vpop.f32.mrb[33].mxu0  ;;  %v2756_v60 = vadd.f32 1.0, %v15575_v20 }
 0x440   : > { %15586 = verf.f32 %v2730_v8  ;;  %v17400_v41 = vadd.f32 %v2686_v56, %v17394_v44  ;;  %v2771_v36 = vmul.f32 %v2755_v17, %v2707_v10 }
 0x441   : > { %v15577_v59 = vpop.eup %15576  ;;  %v2731_v63 = vmul.f32 0.70710677, %v17397_v18  ;;  %v2772_v26 = vmul.f32 %v2756_v60, %v2708_v51 }
 0x442   : > { %v15579_v35 = vpop.eup %15578  ;;  %v2757_v42 = vadd.f32 1.0, %v15577_v59  ;;  %v2732_v24 = vmul.f32 0.70710677, %v17400_v41  ;;  %v2690_v38 = vpop.f32.mrb[34].mxu0 }
 0x443   : > { %v2758_v55 = vadd.f32 1.0, %v15579_v35  ;;  %15588 = verf.f32 %v2731_v63  ;;  %v2691_v56 = vadd.f32 %v2690_v38, %v17403_v31  ;;  %v2692_v8 = vpop.f32.mrb[35].mxu0  ;;  %v17408_v59 = vpop.permute.xlu0 %2562 }
 0x444   : > { %v2773_v52 = vmul.f32 %v2757_v42, %v2709_v50  ;;  %15590 = verf.f32 %v2732_v24  ;;  %v2693_v20 = vadd.f32 %v2692_v8, %v17403_v31  ;;  %v2711_v42 = vmul.f32 0.5, %v2673_v16  ;;  %v17412_v24 = vpop.permute.xlu1 %2567 }
 0x445   : > { %v15581_v22 = vpop.eup %15580  ;;  %v2774_v27 = vmul.f32 %v2758_v55, %v2710_v48  ;;  %v2733_v57 = vmul.f32 0.70710677, %v2691_v56  ;;  %v2713_v55 = vmul.f32 0.5, %v2679_v53 }
 0x446   : > { %v15583_v11 = vpop.eup %15582  ;;  %v14654_v13 = vpack.c.bf16 %v2773_v52, %v2771_v36  ;;  %v2734_v37 = vmul.f32 0.70710677, %v2693_v20  ;;  %v2696_v14 = vpop.f32.mrb[36].mxu0  ;;  %v2759_v17 = vadd.f32 1.0, %v15581_v22  ;;  %v2712_v36 = vmul.f32 0.5, %v17387_v49 }
 0x447   : > { %15592 = verf.f32 %v2733_v57  ;;  %v2697_v35 = vadd.f32 %v2696_v14, %v17408_v59  ;;  %v2698_v38 = vpop.f32.mrb[37].mxu0  ;;  %v14652_v63 = vpack.c.bf16 %v2774_v27, %v2772_v26  ;;  %v2760_v51 = vadd.f32 1.0, %v15583_v11 }
 0x448   : > { %15594 = verf.f32 %v2734_v37  ;;  %v2699_v50 = vadd.f32 %v2698_v38, %v17408_v59  ;;  %v2714_v26 = vmul.f32 0.5, %v2681_v19  ;;  %v2775_v16 = vmul.f32 %v2759_v17, %v2711_v42 }
 0x449   : > { %v15585_v10 = vpop.eup %15584  ;;  %v2735_v48 = vmul.f32 0.70710677, %v2697_v35  ;;  %14653 = vmatprep.subr.bf16.mxu1 %v14652_v63  ;;  %v2776_v63 = vmul.f32 %v2760_v51, %v2712_v36  ;;  %v2715_v17 = vmul.f32 0.5, %v17397_v18  ;;  %v2717_v42 = vmul.f32 0.5, %v2691_v56 }
 0x44a   : > { %v15587_v60 = vpop.eup %15586  ;;  %v2761_v8 = vadd.f32 1.0, %v15585_v10  ;;  %v2736_v52 = vmul.f32 0.70710677, %v2699_v50  ;;  %v2702_v57 = vpop.f32.mrb[38].mxu0  ;;  %14655 = vmatpush1.bf16.msra.mxu1 %v14654_v13  ;;  %v2716_v51 = vmul.f32 0.5, %v17400_v41  ;;  %v2718_v36 = vmul.f32 0.5, %v2693_v20 }
 0x44b   : > { %v2762_v22 = vadd.f32 1.0, %v15587_v60  ;;  %15596 = verf.f32 %v2735_v48  ;;  %v2703_v27 = vadd.f32 %v2702_v57, %v17412_v24  ;;  %v2704_v37 = vpop.f32.mrb[39].mxu0  ;;  %v2719_v56 = vmul.f32 0.5, %v2697_v35 }
 0x44c   : > { %v2777_v11 = vmul.f32 %v2761_v8, %v2713_v55  ;;  %15598 = verf.f32 %v2736_v52  ;;  %v2705_v14 = vadd.f32 %v2704_v37, %v17412_v24  ;;  %v2720_v41 = vmul.f32 0.5, %v2699_v50 }
 0x44d   : > { %v15589_v38 = vpop.eup %15588  ;;  %v2778_v47 = vmul.f32 %v2762_v22, %v2714_v26  ;;  %v2737_v49 = vmul.f32 0.70710677, %v2703_v27  ;;  %v20910_v35 = vpack.c.bf16 %v17270_v54, %v17268_v9  ;;  %v20911_v50 = vpack.c.bf16 %v17272_v58, %v17265_v25 }
 0x44e   : > { %v15591_v53 = vpop.eup %15590  ;;  %v14658_v10 = vpack.c.bf16 %v2777_v11, %v2775_v16  ;;  %v2738_v45 = vmul.f32 0.70710677, %v2705_v14  ;;  %v2763_v19 = vadd.f32 1.0, %v15589_v38  ;;  %v2722_v20 = vmul.f32 0.5, %v2705_v14  ;;  %v17436_v14 = vld [vmem:[%s20909_s28 + $0x8] sm:$0xff] }
 0x44f   : > { %15600 = verf.f32 %v2737_v49  ;;  %v14656_v13 = vpack.c.bf16 %v2778_v47, %v2776_v63  ;;  %v2764_v60 = vadd.f32 1.0, %v15591_v53  ;;  %v2721_v53 = vmul.f32 0.5, %v2703_v27 }
 0x450   : > { %15602 = verf.f32 %v2738_v45  ;;  %v2779_v52 = vmul.f32 %v2763_v19, %v2715_v17  ;;  %v20912_v27 = vmov 0.0  }
 0x451   : > { %v15593_v48 = vpop.eup %15592  ;;  %14657 = vmatprep.subr.bf16.mxu1 %v14656_v13  ;;  %v2780_v37 = vmul.f32 %v2764_v60, %v2716_v51 }
 0x452   : > { %v15595_v57 = vpop.eup %15594  ;;  %v2765_v55 = vadd.f32 1.0, %v15593_v48  ;;  %14659 = vmatpush1.bf16.msra.mxu1 %v14658_v10 }
 0x453   : > { %v2766_v8 = vadd.f32 1.0, %v15595_v57 }
 0x454   : > { %v2781_v26 = vmul.f32 %v2765_v55, %v2717_v42  ;;  %v17422_v55 = vld [vmem:[%s20909_s28] sm:$0xff] }
 0x455   : > { %v15597_v22 = vpop.eup %15596  ;;  %v2782_v47 = vmul.f32 %v2766_v8, %v2718_v36 }
 0x456   : > { %v15599_v16 = vpop.eup %15598  ;;  %v14662_v45 = vpack.c.bf16 %v2781_v26, %v2779_v52  ;;  %v2767_v38 = vadd.f32 1.0, %v15597_v22 }
 0x457   : > { %v14660_v11 = vpack.c.bf16 %v2782_v47, %v2780_v37  ;;  %v2768_v49 = vadd.f32 1.0, %v15599_v16 }
 0x458   : > { %v2783_v19 = vmul.f32 %v2767_v38, %v2719_v56 }
 0x459   : > { %v15601_v63 = vpop.eup %15600  ;;  %14661 = vmatprep.subr.bf16.mxu1 %v14660_v11  ;;  %v2784_v57 = vmul.f32 %v2768_v49, %v2720_v41 }
 0x45a   : > { %v15603_v18 = vpop.eup %15602  ;;  %v2769_v10 = vadd.f32 1.0, %v15601_v63  ;;  %14663 = vmatpush1.bf16.msra.mxu1 %v14662_v45 }
 0x45b   : > { %v2770_v13 = vadd.f32 1.0, %v15603_v18 }
 0x45c   : > { %v2785_v48 = vmul.f32 %v2769_v10, %v2721_v53 }
 0x45d   : > { %v2786_v60 = vmul.f32 %v2770_v13, %v2722_v20 }
 0x45e   : > { %v14666_v17 = vpack.c.bf16 %v2785_v48, %v2783_v19 }
 0x45f   : > { %v14664_v42 = vpack.c.bf16 %v2786_v60, %v2784_v57 }
 0x461   : > { %14665 = vmatprep.subr.bf16.mxu1 %v14664_v42 }
 0x462   : > { %14667 = vmatpush1.bf16.msra.mxu1 %v14666_v17 }
 0x463   : > { %14669 = vmatprep.subr.bf16.mxu1 %v20910_v35 }
 0x465   : > { %14071 = vmatmul.mubr.msk.f32.vlgmr.msra.gmra.mrb[24].mxu1 %vm2801_vm1, %v17422_v55 }
 0x466   : > { %14671 = vmatpush1.bf16.msra.mxu1 %v20911_v50  ;;  %2878 = vmatprep.mubr.f32.mxu1 %v20912_v27 }
 0x469   : > { %14072 = vmatmul.mubr.msk.f32.gmra.mrb[26].mxu1 %vm2801_vm1, %v17436_v14 }
 0x46a   : > { %2949 = vmatprep.mubr.f32.mxu1 %v20912_v27 }
 0x46d   : > { %14073 = vmatmul.mubr.msk.f32.vlgmr.msra.gmra.mrb[28].mxu1 %vm570_vm0, %v17285_v21 }
 0x46e   : > { %2955 = vmatprep.mubr.f32.mxu1 %v20912_v27 }
 0x471   : > { %14074 = vmatmul.mubr.msk.f32.gmra.mrb[30].mxu1 %vm570_vm0, %v17310_v43 }
 0x472   : > { %2961 = vmatprep.mubr.f32.mxu1 %v20912_v27 }
 0x475   : > { %14075 = vmatmul.mubr.msk.f32.gmra.mrb[32].mxu1 %vm570_vm0, %v17330_v61 }
 0x476   : > { %2967 = vmatprep.mubr.f32.mxu1 %v20912_v27 }
 0x479   : > { %14076 = vmatmul.mubr.msk.f32.gmra.mrb[34].mxu1 %vm570_vm0, %v17338_v15 }
 0x47a   : > { %2973 = vmatprep.mubr.f32.mxu1 %v20912_v27 }
 0x47d   : > { %14077 = vmatmul.mubr.msk.f32.gmra.mrb[36].mxu1 %vm570_vm0, %v17346_v62 }
 0x47e   : > { %2979 = vmatprep.mubr.f32.mxu1 %v20912_v27 }
 0x481   : > { %14078 = vmatmul.mubr.msk.f32.gmra.mrb[38].mxu1 %vm570_vm0, %v17354_v2 }
 0x482   : > { %2985 = vmatprep.mubr.f32.mxu1 %v20912_v27 }
 0x485   : > { %14079 = vmatmul.mubr.msk.f32.gmra.mrb[40].mxu1 %vm570_vm0, %v17362_v5 }
 0x486   : > { %2991 = vmatprep.mubr.f32.mxu1 %v20912_v27 }
 0x489   : > { %14080 = vmatmul.mubr.msk.f32.gmra.mrb[42].mxu1 %vm570_vm0, %v17370_v7 }
 0x48a   : > { %3412 = vmatprep.mubr.f32.mxu1 %v20912_v27 }
 0x538   : > { %v17465_v25 = vpop.f32.mrb[24].mxu1 }
 0x539   : > { %v17467_v9 = vpop.f32.mrb[25].mxu1 }
 0x53c   : > { %v17469_v54 = vpop.f32.mrb[26].mxu1 }
 0x53d   : > { %v17471_v58 = vpop.f32.mrb[27].mxu1 }
 0x540   : > { %v2951_v51 = vpop.f32.mrb[28].mxu1 }
 0x541   : > { %v2952_v36 = vadd.f32 %v2951_v51, %v17375_v39  ;;  %v2953_v8 = vpop.f32.mrb[29].mxu1 }
 0x542   : > { %v2954_v52 = vadd.f32 %v2953_v8, %v17375_v39 }
 0x543   : > { %v3014_v26 = vmul.f32 0.70710677, %v2952_v36 }
 0x544   : > { %v3015_v22 = vmul.f32 0.70710677, %v2954_v52  ;;  %v2957_v37 = vpop.f32.mrb[30].mxu1 }
 0x545   : > { %15604 = verf.f32 %v3014_v26  ;;  %v2958_v47 = vadd.f32 %v2957_v37, %v17379_v0  ;;  %v2959_v16 = vpop.f32.mrb[31].mxu1 }
 0x546   : > { %15606 = verf.f32 %v3015_v22  ;;  %v2960_v45 = vadd.f32 %v2959_v16, %v17379_v0  ;;  %v2998_v22 = vmul.f32 0.5, %v2952_v36 }
 0x547   : > { %v3016_v11 = vmul.f32 0.70710677, %v2958_v47 }
 0x548   : > { %v3017_v38 = vmul.f32 0.70710677, %v2960_v45  ;;  %v2963_v63 = vpop.f32.mrb[32].mxu1 }
 0x549   : > { %15608 = verf.f32 %v3016_v11  ;;  %v2964_v49 = vadd.f32 %v2963_v63, %v17383_v3  ;;  %v2965_v18 = vpop.f32.mrb[33].mxu1  ;;  %v3000_v63 = vmul.f32 0.5, %v2958_v47 }
 0x54a   : > { %15610 = verf.f32 %v3017_v38  ;;  %v2966_v56 = vadd.f32 %v2965_v18, %v17383_v3  ;;  %v2999_v38 = vmul.f32 0.5, %v2954_v52 }
 0x54b   : > { %v3018_v53 = vmul.f32 0.70710677, %v2964_v49 }
 0x54c   : > { %v3019_v10 = vmul.f32 0.70710677, %v2966_v56  ;;  %v2969_v41 = vpop.f32.mrb[34].mxu1 }
 0x54d   : > { %15612 = verf.f32 %v3018_v53  ;;  %v2970_v20 = vadd.f32 %v2969_v41, %v17389_v4  ;;  %v2971_v13 = vpop.f32.mrb[35].mxu1  ;;  %v3001_v41 = vmul.f32 0.5, %v2960_v45 }
 0x54e   : > { %15614 = verf.f32 %v3019_v10  ;;  %v2972_v19 = vadd.f32 %v2971_v13, %v17389_v4 }
 0x54f   : > { %v15605_v48 = vpop.eup %15604  ;;  %v3020_v57 = vmul.f32 0.70710677, %v2970_v20 }
 0x550   : > { %v15607_v60 = vpop.eup %15606  ;;  %v3021_v17 = vmul.f32 0.70710677, %v2972_v19  ;;  %v2975_v42 = vpop.f32.mrb[36].mxu1  ;;  %v3046_v51 = vadd.f32 1.0, %v15605_v48 }
 0x551   : > { %15616 = verf.f32 %v3020_v57  ;;  %v17482_v35 = vadd.f32 %v2975_v42, %v17394_v44  ;;  %v2977_v50 = vpop.f32.mrb[37].mxu1  ;;  %v3047_v37 = vadd.f32 1.0, %v15607_v60 }
 0x552   : > { %15618 = verf.f32 %v3021_v17  ;;  %v17485_v8 = vadd.f32 %v2977_v50, %v17394_v44  ;;  %v3062_v17 = vmul.f32 %v3046_v51, %v2998_v22 }
 0x553   : > { %v15609_v26 = vpop.eup %15608  ;;  %v3022_v16 = vmul.f32 0.70710677, %v17482_v35  ;;  %v3063_v50 = vmul.f32 %v3047_v37, %v2999_v38  ;;  %v3003_v38 = vmul.f32 0.5, %v2966_v56 }
 0x554   : > { %v15611_v11 = vpop.eup %15610  ;;  %v3048_v18 = vadd.f32 1.0, %v15609_v26  ;;  %v3023_v53 = vmul.f32 0.70710677, %v17485_v8  ;;  %v2981_v10 = vpop.f32.mrb[38].mxu1 }
 0x555   : > { %v3049_v13 = vadd.f32 1.0, %v15611_v11  ;;  %15620 = verf.f32 %v3022_v16  ;;  %v2982_v48 = vadd.f32 %v2981_v10, %v17403_v31  ;;  %v2983_v57 = vpop.f32.mrb[39].mxu1 }
 0x556   : > { %v3064_v42 = vmul.f32 %v3048_v18, %v3000_v63  ;;  %15622 = verf.f32 %v3023_v53  ;;  %v2984_v36 = vadd.f32 %v2983_v57, %v17403_v31  ;;  %v3002_v63 = vmul.f32 0.5, %v2964_v49 }
 0x557   : > { %v15613_v60 = vpop.eup %15612  ;;  %v3065_v40 = vmul.f32 %v3049_v13, %v3001_v41  ;;  %v3024_v52 = vmul.f32 0.70710677, %v2982_v48  ;;  %v3004_v41 = vmul.f32 0.5, %v2970_v20 }
 0x558   : > { %v15615_v47 = vpop.eup %15614  ;;  %v14674_v26 = vpack.c.bf16 %v3064_v42, %v3062_v17  ;;  %v3025_v6 = vmul.f32 0.70710677, %v2984_v36  ;;  %v2987_v34 = vpop.f32.mrb[40].mxu1  ;;  %v3050_v10 = vadd.f32 1.0, %v15613_v60  ;;  %v3005_v42 = vmul.f32 0.5, %v2972_v19 }
 0x559   : > { %15624 = verf.f32 %v3024_v52  ;;  %v2988_v45 = vadd.f32 %v2987_v34, %v17408_v59  ;;  %v2989_v16 = vpop.f32.mrb[41].mxu1  ;;  %v14672_v11 = vpack.c.bf16 %v3065_v40, %v3063_v50  ;;  %v3051_v18 = vadd.f32 1.0, %v15615_v47 }
 0x55a   : > { %15626 = verf.f32 %v3025_v6  ;;  %v2990_v51 = vadd.f32 %v2989_v16, %v17408_v59  ;;  %v3066_v60 = vmul.f32 %v3050_v10, %v3002_v63  ;;  %v3006_v10 = vmul.f32 0.5, %v17482_v35 }
 0x55b   : > { %v15617_v22 = vpop.eup %15616  ;;  %v3026_v53 = vmul.f32 0.70710677, %v2988_v45  ;;  %14673 = vmatprep.subr.bf16.mxu0 %v14672_v11  ;;  %v3067_v47 = vmul.f32 %v3051_v18, %v3003_v38  ;;  %v3008_v63 = vmul.f32 0.5, %v2982_v48  ;;  %v3007_v18 = vmul.f32 0.5, %v17485_v8 }
 0x55c   : > { %v15619_v37 = vpop.eup %15618  ;;  %v3052_v13 = vadd.f32 1.0, %v15617_v22  ;;  %v3027_v57 = vmul.f32 0.70710677, %v2990_v51  ;;  %v2993_v17 = vpop.f32.mrb[42].mxu1  ;;  %14675 = vmatpush1.bf16.msra.mxu0 %v14674_v26  ;;  %v3009_v38 = vmul.f32 0.5, %v2984_v36  ;;  %v3010_v48 = vmul.f32 0.5, %v2988_v45 }
 0x55d   : > { %v3053_v34 = vadd.f32 1.0, %v15619_v37  ;;  %15628 = verf.f32 %v3026_v53  ;;  %v2994_v40 = vadd.f32 %v2993_v17, %v17412_v24  ;;  %v2995_v6 = vpop.f32.mrb[43].mxu1  ;;  %v3011_v8 = vmul.f32 0.5, %v2990_v51 }
 0x55e   : > { %v3068_v50 = vmul.f32 %v3052_v13, %v3004_v41  ;;  %15630 = verf.f32 %v3027_v57  ;;  %v2996_v49 = vadd.f32 %v2995_v6, %v17412_v24  ;;  %v20914_v45 = vpack.c.bf16 %v17295_v23, %v17292_v32 }
 0x55f   : > { %v15621_v52 = vpop.eup %15620  ;;  %v3069_v16 = vmul.f32 %v3053_v34, %v3005_v42  ;;  %v3028_v56 = vmul.f32 0.70710677, %v2994_v40 }
 0x560   : > { %v15623_v20 = vpop.eup %15622  ;;  %v14678_v11 = vpack.c.bf16 %v3068_v50, %v3066_v60  ;;  %v3029_v22 = vmul.f32 0.70710677, %v2996_v49  ;;  %v3054_v19 = vadd.f32 1.0, %v15621_v52  ;;  %v3013_v36 = vmul.f32 0.5, %v2996_v49 }
 0x561   : > { %15632 = verf.f32 %v3028_v56  ;;  %v14676_v26 = vpack.c.bf16 %v3069_v16, %v3067_v47  ;;  %v3055_v37 = vadd.f32 1.0, %v15623_v20 }
 0x562   : > { %15634 = verf.f32 %v3029_v22  ;;  %v3070_v57 = vmul.f32 %v3054_v19, %v3006_v10  ;;  %v3012_v22 = vmul.f32 0.5, %v2994_v40 }
 0x563   : > { %v15625_v53 = vpop.eup %15624  ;;  %14677 = vmatprep.subr.bf16.mxu0 %v14676_v26  ;;  %v3071_v6 = vmul.f32 %v3055_v37, %v3007_v18 }
 0x564   : > { %v15627_v17 = vpop.eup %15626  ;;  %v3056_v41 = vadd.f32 1.0, %v15625_v53  ;;  %14679 = vmatpush1.bf16.msra.mxu0 %v14678_v11 }
 0x565   : > { %v3057_v13 = vadd.f32 1.0, %v15627_v17 }
 0x566   : > { %v3072_v42 = vmul.f32 %v3056_v41, %v3008_v63  ;;  %v20913_v41 = vpack.c.bf16 %v17290_v46, %v17288_v12 }
 0x567   : > { %v15629_v34 = vpop.eup %15628  ;;  %v3073_v60 = vmul.f32 %v3057_v13, %v3009_v38 }
 0x568   : > { %v15631_v50 = vpop.eup %15630  ;;  %v14682_v52 = vpack.c.bf16 %v3072_v42, %v3070_v57  ;;  %v3058_v16 = vadd.f32 1.0, %v15629_v34 }
 0x569   : > { %v14680_v47 = vpack.c.bf16 %v3073_v60, %v3071_v6  ;;  %v3059_v20 = vadd.f32 1.0, %v15631_v50 }
 0x56a   : > { %v3074_v19 = vmul.f32 %v3058_v16, %v3010_v48 }
 0x56b   : > { %v15633_v56 = vpop.eup %15632  ;;  %14681 = vmatprep.subr.bf16.mxu0 %v14680_v47  ;;  %v3075_v17 = vmul.f32 %v3059_v20, %v3011_v8 }
 0x56c   : > { %v15635_v35 = vpop.eup %15634  ;;  %v3060_v11 = vadd.f32 1.0, %v15633_v56  ;;  %14683 = vmatpush1.bf16.msra.mxu0 %v14682_v52 }
 0x56d   : > { %v3061_v26 = vadd.f32 1.0, %v15635_v35 }
 0x56e   : > { %v3076_v53 = vmul.f32 %v3060_v11, %v3012_v22 }
 0x56f   : > { %v3077_v37 = vmul.f32 %v3061_v26, %v3013_v36 }
 0x570   : > { %v14686_v10 = vpack.c.bf16 %v3076_v53, %v3074_v19 }
 0x571   : > { %v14684_v63 = vpack.c.bf16 %v3077_v37, %v3075_v17 }
 0x573   : > { %14685 = vmatprep.subr.bf16.mxu0 %v14684_v63 }
 0x574   : > { %14687 = vmatpush1.bf16.msra.mxu0 %v14686_v10 }
 0x575   : > { %14689 = vmatprep.subr.bf16.mxu0 %v20913_v41 }
 0x577   : > { %14081 = vmatmul.mubr.msk.f32.vlgmr.msra.gmra.mrb[40].mxu0 %vm2801_vm1, %v17422_v55 }
 0x578   : > { %14691 = vmatpush1.bf16.msra.mxu0 %v20914_v45  ;;  %3148 = vmatprep.mubr.f32.mxu0 %v20912_v27 }
 0x57b   : > { %14082 = vmatmul.mubr.msk.f32.gmra.mrb[42].mxu0 %vm2801_vm1, %v17436_v14 }
 0x57c   : > { %3219 = vmatprep.mubr.f32.mxu0 %v20912_v27 }
 0x57f   : > { %14083 = vmatmul.mubr.msk.f32.vlgmr.msra.gmra.mrb[44].mxu0 %vm570_vm0, %v17285_v21 }
 0x580   : > { %3225 = vmatprep.mubr.f32.mxu0 %v20912_v27 }
 0x583   : > { %14084 = vmatmul.mubr.msk.f32.gmra.mrb[46].mxu0 %vm570_vm0, %v17310_v43 }
 0x584   : > { %3231 = vmatprep.mubr.f32.mxu0 %v20912_v27 }
 0x587   : > { %14085 = vmatmul.mubr.msk.f32.gmra.mrb[48].mxu0 %vm570_vm0, %v17330_v61 }
 0x588   : > { %3237 = vmatprep.mubr.f32.mxu0 %v20912_v27 }
 0x58b   : > { %14086 = vmatmul.mubr.msk.f32.gmra.mrb[50].mxu0 %vm570_vm0, %v17338_v15 }
 0x58c   : > { %3243 = vmatprep.mubr.f32.mxu0 %v20912_v27 }
 0x58f   : > { %14087 = vmatmul.mubr.msk.f32.gmra.mrb[52].mxu0 %vm570_vm0, %v17346_v62 }
 0x590   : > { %3249 = vmatprep.mubr.f32.mxu0 %v20912_v27 }
 0x593   : > { %14088 = vmatmul.mubr.msk.f32.gmra.mrb[54].mxu0 %vm570_vm0, %v17354_v2 }
 0x594   : > { %3255 = vmatprep.mubr.f32.mxu0 %v20912_v27 }
 0x597   : > { %14089 = vmatmul.mubr.msk.f32.gmra.mrb[56].mxu0 %vm570_vm0, %v17362_v5 }
 0x598   : > { %3261 = vmatprep.mubr.f32.mxu0 %v20912_v27 }
 0x59b   : > { %14090 = vmatmul.mubr.msk.f32.gmra.mrb[58].mxu0 %vm570_vm0, %v17370_v7 }
 0x59c   : > { %3682 = vmatprep.mubr.f32.mxu0 %v20912_v27 }
 0x64a   : > { %v17533_v21 = vpop.f32.mrb[40].mxu0 }
 0x64b   : > { %v17535_v12 = vpop.f32.mrb[41].mxu0 }
 0x64e   : > { %v17537_v46 = vpop.f32.mrb[42].mxu0 }
 0x64f   : > { %v17539_v32 = vpop.f32.mrb[43].mxu0 }
 0x652   : > { %v3221_v23 = vpop.f32.mrb[44].mxu0 }
 0x653   : > { %v3222_v43 = vadd.f32 %v3221_v23, %v17375_v39  ;;  %v3223_v61 = vpop.f32.mrb[45].mxu0 }
 0x654   : > { %v3224_v15 = vadd.f32 %v3223_v61, %v17375_v39 }
 0x655   : > { %v3284_v62 = vmul.f32 0.70710677, %v3222_v43  ;;  %v3268_v19 = vmul.f32 0.5, %v3222_v43 }
 0x656   : > { %v3285_v2 = vmul.f32 0.70710677, %v3224_v15  ;;  %v3227_v5 = vpop.f32.mrb[46].mxu0  ;;  %v3269_v10 = vmul.f32 0.5, %v3224_v15 }
 0x657   : > { %15636 = verf.f32 %v3284_v62  ;;  %v3228_v7 = vadd.f32 %v3227_v5, %v17379_v0  ;;  %v3229_v51 = vpop.f32.mrb[47].mxu0 }
 0x658   : > { %15638 = verf.f32 %v3285_v2  ;;  %v3230_v40 = vadd.f32 %v3229_v51, %v17379_v0 }
 0x659   : > { %v3286_v49 = vmul.f32 0.70710677, %v3228_v7  ;;  %v3270_v63 = vmul.f32 0.5, %v3228_v7 }
 0x65a   : > { %v3287_v18 = vmul.f32 0.70710677, %v3230_v40  ;;  %v3233_v38 = vpop.f32.mrb[48].mxu0  ;;  %v3271_v61 = vmul.f32 0.5, %v3230_v40 }
 0x65b   : > { %15640 = verf.f32 %v3286_v49  ;;  %v3234_v13 = vadd.f32 %v3233_v38, %v17383_v3  ;;  %v3235_v57 = vpop.f32.mrb[49].mxu0 }
 0x65c   : > { %15642 = verf.f32 %v3287_v18  ;;  %v3236_v42 = vadd.f32 %v3235_v57, %v17383_v3 }
 0x65d   : > { %v3288_v34 = vmul.f32 0.70710677, %v3234_v13 }
 0x65e   : > { %v3289_v6 = vmul.f32 0.70710677, %v3236_v42  ;;  %v3239_v60 = vpop.f32.mrb[50].mxu0 }
 0x65f   : > { %15644 = verf.f32 %v3288_v34  ;;  %v3240_v50 = vadd.f32 %v3239_v60, %v17389_v4  ;;  %v3241_v52 = vpop.f32.mrb[51].mxu0 }
 0x660   : > { %15646 = verf.f32 %v3289_v6  ;;  %v3242_v47 = vadd.f32 %v3241_v52, %v17389_v4 }
 0x661   : > { %v15637_v16 = vpop.eup %15636  ;;  %v3290_v56 = vmul.f32 0.70710677, %v3240_v50 }
 0x662   : > { %v15639_v20 = vpop.eup %15638  ;;  %v3291_v35 = vmul.f32 0.70710677, %v3242_v47  ;;  %v3245_v48 = vpop.f32.mrb[52].mxu0  ;;  %v3316_v8 = vadd.f32 1.0, %v15637_v16 }
 0x663   : > { %15648 = verf.f32 %v3290_v56  ;;  %v17550_v22 = vadd.f32 %v3245_v48, %v17394_v44  ;;  %v3247_v11 = vpop.f32.mrb[53].mxu0  ;;  %v3317_v53 = vadd.f32 1.0, %v15639_v20  ;;  %v3272_v48 = vmul.f32 0.5, %v3234_v13 }
 0x664   : > { %15650 = verf.f32 %v3291_v35  ;;  %v17553_v36 = vadd.f32 %v3247_v11, %v17394_v44  ;;  %v3332_v51 = vmul.f32 %v3316_v8, %v3268_v19  ;;  %v3273_v19 = vmul.f32 0.5, %v3236_v42 }
 0x665   : > { %v15641_v26 = vpop.eup %15640  ;;  %v3292_v17 = vmul.f32 0.70710677, %v17550_v22  ;;  %v3333_v38 = vmul.f32 %v3317_v53, %v3269_v10  ;;  %v3274_v53 = vmul.f32 0.5, %v3240_v50 }
 0x666   : > { %v15643_v37 = vpop.eup %15642  ;;  %v3318_v41 = vadd.f32 1.0, %v15641_v26  ;;  %v3293_v45 = vmul.f32 0.70710677, %v17553_v36  ;;  %v3251_v23 = vpop.f32.mrb[54].mxu0 }
 0x667   : > { %v3319_v62 = vadd.f32 1.0, %v15643_v37  ;;  %15652 = verf.f32 %v3292_v17  ;;  %v3252_v2 = vadd.f32 %v3251_v23, %v17403_v31  ;;  %v3253_v5 = vpop.f32.mrb[55].mxu0 }
 0x668   : > { %v3334_v49 = vmul.f32 %v3318_v41, %v3270_v63  ;;  %15654 = verf.f32 %v3293_v45  ;;  %v3254_v43 = vadd.f32 %v3253_v5, %v17403_v31  ;;  %v3275_v63 = vmul.f32 0.5, %v3242_v47 }
 0x669   : > { %v15645_v18 = vpop.eup %15644  ;;  %v3335_v57 = vmul.f32 %v3319_v62, %v3271_v61  ;;  %v3294_v15 = vmul.f32 0.70710677, %v3252_v2 }
 0x66a   : > { %v15647_v7 = vpop.eup %15646  ;;  %v14694_v34 = vpack.c.bf16 %v3334_v49, %v3332_v51  ;;  %v3295_v6 = vmul.f32 0.70710677, %v3254_v43  ;;  %v3257_v60 = vpop.f32.mrb[56].mxu0  ;;  %v3320_v56 = vadd.f32 1.0, %v15645_v18 }
 0x66b   : > { %15656 = verf.f32 %v3294_v15  ;;  %v17560_v40 = vadd.f32 %v3257_v60, %v17408_v59  ;;  %v3259_v52 = vpop.f32.mrb[57].mxu0  ;;  %v14692_v16 = vpack.c.bf16 %v3335_v57, %v3333_v38  ;;  %v3321_v11 = vadd.f32 1.0, %v15647_v7 }
 0x66c   : > { %15658 = verf.f32 %v3295_v6  ;;  %v17563_v20 = vadd.f32 %v3259_v52, %v17408_v59  ;;  %v3336_v61 = vmul.f32 %v3320_v56, %v3272_v48  ;;  %v3276_v6 = vmul.f32 0.5, %v17550_v22 }
 0x66d   : > { %v15649_v35 = vpop.eup %15648  ;;  %v3296_v8 = vmul.f32 0.70710677, %v17560_v40  ;;  %14693 = vmatprep.subr.bf16.mxu1 %v14692_v16  ;;  %v3337_v51 = vmul.f32 %v3321_v11, %v3273_v19  ;;  %v3278_v60 = vmul.f32 0.5, %v3252_v2  ;;  %v3277_v16 = vmul.f32 0.5, %v17553_v36 }
 0x66e   : > { %v15651_v26 = vpop.eup %15650  ;;  %v3322_v17 = vadd.f32 1.0, %v15649_v35  ;;  %v3297_v37 = vmul.f32 0.70710677, %v17563_v20  ;;  %v3263_v10 = vpop.f32.mrb[58].mxu0  ;;  %14695 = vmatpush1.bf16.msra.mxu1 %v14694_v34  ;;  %v3279_v56 = vmul.f32 0.5, %v3254_v43 }
 0x66f   : > { %v3323_v41 = vadd.f32 1.0, %v15651_v26  ;;  %15660 = verf.f32 %v3296_v8  ;;  %v3264_v45 = vadd.f32 %v3263_v10, %v17412_v24  ;;  %v3265_v23 = vpop.f32.mrb[59].mxu0  ;;  %v17571_v10 = vpop.permute.xlu1 %2798 }
 0x670   : > { %v3338_v13 = vmul.f32 %v3322_v17, %v3274_v53  ;;  %15662 = verf.f32 %v3297_v37  ;;  %v3266_v62 = vadd.f32 %v3265_v23, %v17412_v24  ;;  %v2883_v22 = vadd.f32 %v17471_v58, %v17571_v10  ;;  %v17575_v43 = vpop.permute.xlu0 %2793 }
 0x671   : > { %v15653_v5 = vpop.eup %15652  ;;  %v3339_v42 = vmul.f32 %v3323_v41, %v3275_v63  ;;  %v3298_v50 = vmul.f32 0.70710677, %v3264_v45  ;;  %v3280_v23 = vmul.f32 0.5, %v17560_v40 }
 0x672   : > { %v15655_v49 = vpop.eup %15654  ;;  %v14698_v18 = vpack.c.bf16 %v3338_v13, %v3336_v61  ;;  %v3299_v38 = vmul.f32 0.70710677, %v3266_v62  ;;  %v3324_v47 = vadd.f32 1.0, %v15653_v5  ;;  %v3282_v61 = vmul.f32 0.5, %v3264_v45 }
 0x673   : > { %15664 = verf.f32 %v3298_v50  ;;  %v14696_v57 = vpack.c.bf16 %v3339_v42, %v3337_v51  ;;  %v3325_v7 = vadd.f32 1.0, %v15655_v49  ;;  %v2877_v5 = vadd.f32 %v17467_v9, %v17575_v43 }
 0x674   : > { %15666 = verf.f32 %v3299_v38  ;;  %v3340_v48 = vmul.f32 %v3324_v47, %v3276_v6  ;;  %v3281_v51 = vmul.f32 0.5, %v17563_v20  ;;  %v3283_v42 = vmul.f32 0.5, %v3266_v62  ;;  %v20917_v6 = vld [vmem:[#allocation32_spill] sm:$0xff] }
 0x675   : > { %v15657_v15 = vpop.eup %15656  ;;  %14697 = vmatprep.subr.bf16.mxu1 %v14696_v57  ;;  %v3341_v26 = vmul.f32 %v3325_v7, %v3277_v16  ;;  %v17582_v58 = vadd.f32 %v2883_v22, %v17093_v28  ;;  %v17585_v40 = vadd.f32 %v2877_v5, %v17089_v33  ;;  %v2875_v20 = vadd.f32 %v17465_v25, %v17575_v43  ;;  %v20916_v7 = vld [vmem:[#allocation21_spill] sm:$0xff]  ;;  %v20918_v25 = vld [vmem:[#allocation31_spill] sm:$0xff]  ;;  %v16183_v16 = vld [vmem:[%s20906_s27 + $0x18] sm:$0xff] }
 0x676   : > { %v15659_v34 = vpop.eup %15658  ;;  %v3326_v52 = vadd.f32 1.0, %v15657_v15  ;;  %14699 = vmatpush1.bf16.msra.mxu1 %v14698_v18  ;;  %v2881_v15 = vadd.f32 %v17469_v54, %v17571_v10  ;;  %v20915_v28 = vpack.c.bf16 %v17316_v30, %v17314_v1  ;;  %v20921_v22 = vld [vmem:[#allocation25_spill] sm:$0xff] }
 0x677   : > { %v3327_v35 = vadd.f32 1.0, %v15659_v34  ;;  %v4010_v9 = vmul.f32 %v17582_v58, %v17582_v58  ;;  %v4002_v33 = vmul.f32 %v17585_v40, %v17585_v40  ;;  %v17604_v34 = vadd.f32 %v2875_v20, %v20916_v7 }
 0x678   : > { %v3342_v11 = vmul.f32 %v3326_v52, %v3278_v60  ;;  %v17599_v62 = vadd.f32 %v2881_v15, %v17085_v29  ;;  %v20919_v60 = vpack.c.bf16 %v20917_v6, %v20918_v25  ;;  %v16181_v52 = vld [vmem:[%s20906_s27 + $0x8] sm:$0xff] }
 0x679   : > { %v15661_v8 = vpop.eup %15660  ;;  %v3343_v19 = vmul.f32 %v3327_v35, %v3279_v56  ;;  %v14744_v54 = vpack.c.bf16 %v4010_v9, %v4002_v33  ;;  %v4001_v29 = vmul.f32 %v17604_v34, %v17604_v34  ;;  %v16184_v56 = vld [vmem:[%s20906_s27 + $0x20] sm:$0xff]  ;;  %v16185_v35 = vld [vmem:[%s20906_s27 + $0x28] sm:$0xff] }
 0x67a   : > { %v15663_v53 = vpop.eup %15662  ;;  %v14702_v17 = vpack.c.bf16 %v3342_v11, %v3340_v48  ;;  %v3328_v63 = vadd.f32 1.0, %v15661_v8  ;;  %v4009_v1 = vmul.f32 %v17599_v62, %v17599_v62  ;;  %v16186_v48 = vld [vmem:[%s20906_s27 + $0x30] sm:$0xff]  ;;  %v16187_v11 = vld [vmem:[%s20906_s27 + $0x38] sm:$0xff]  ;;  %v20920_v8 = vmov 1.0  }
 0x67b   : > { %v14700_v37 = vpack.c.bf16 %v3343_v19, %v3341_v26  ;;  %v3329_v2 = vadd.f32 1.0, %v15663_v53 }
 0x67c   : > { %v3344_v49 = vmul.f32 %v3328_v63, %v3280_v23  ;;  %v14746_v30 = vpack.c.bf16 %v4009_v1, %v4001_v29  ;;  %v20922_v23 = vld [vmem:[#allocation23_spill] sm:$0xff] }
 0x67d   : > { %v15665_v41 = vpop.eup %15664  ;;  %14701 = vmatprep.subr.bf16.mxu1 %v14700_v37  ;;  %v3345_v38 = vmul.f32 %v3329_v2, %v3281_v51  ;;  %v20924_v51 = vld [vmem:[#allocation27_spill] sm:$0xff] }
 0x67e   : > { %v15667_v36 = vpop.eup %15666  ;;  %v3330_v13 = vadd.f32 1.0, %v15665_v41  ;;  %14703 = vmatpush1.bf16.msra.mxu1 %v14702_v17 }
 0x67f   : > { %v3331_v50 = vadd.f32 1.0, %v15667_v36 }
 0x680   : > { %v3346_v18 = vmul.f32 %v3330_v13, %v3282_v61  ;;  %v20923_v13 = vld [vmem:[#allocation24_spill] sm:$0xff] }
 0x681   : > { %v3347_v57 = vmul.f32 %v3331_v50, %v3283_v42 }
 0x682   : > { %v14706_v47 = vpack.c.bf16 %v3346_v18, %v3344_v49 }
 0x683   : > { %v14704_v45 = vpack.c.bf16 %v3347_v57, %v3345_v38 }
 0x685   : > { %14705 = vmatprep.subr.bf16.mxu1 %v14704_v45 }
 0x686   : > { %14707 = vmatpush1.bf16.msra.mxu1 %v14706_v47 }
 0x687   : > { %14709 = vmatprep.subr.bf16.mxu1 %v20915_v28 }
 0x689   : > { %14091 = vmatmul.mubr.msk.f32.vlgmr.msra.gmra.mrb[44].mxu1 %vm2801_vm1, %v17422_v55  ;;  %v16180_v55 = vld [vmem:[%s20906_s27] sm:$0xff] }
 0x68a   : > { %14711 = vmatpush1.bf16.msra.mxu1 %v20919_v60  ;;  %3418 = vmatprep.mubr.f32.mxu1 %v20912_v27 }
 0x68b   : > { %14745 = vmatprep.subr.bf16.mxu1 %v14744_v54 }
 0x68d   : > { %14092 = vmatmul.mubr.msk.f32.gmra.mrb[46].mxu1 %vm2801_vm1, %v17436_v14  ;;  %v16182_v14 = vld [vmem:[%s20906_s27 + $0x10] sm:$0xff] }
 0x68e   : > { %3489 = vmatprep.mubr.f32.mxu1 %v20912_v27 }
 0x691   : > { %14093 = vmatmul.mubr.msk.f32.vlgmr.msra.gmra.mrb[48].mxu1 %vm570_vm0, %v16180_v55 }
 0x692   : > { %14747 = vmatpush1.bf16.msra.mxu1 %v14746_v30  ;;  %3495 = vmatprep.mubr.f32.mxu1 %v20912_v27 }
 0x695   : > { %14094 = vmatmul.mubr.msk.f32.gmra.mrb[50].mxu1 %vm570_vm0, %v16181_v52 }
 0x696   : > { %3501 = vmatprep.mubr.f32.mxu1 %v20912_v27 }
 0x699   : > { %14095 = vmatmul.mubr.msk.f32.gmra.mrb[52].mxu1 %vm570_vm0, %v16182_v14 }
 0x69a   : > { %3507 = vmatprep.mubr.f32.mxu1 %v20912_v27 }
 0x69d   : > { %14096 = vmatmul.mubr.msk.f32.gmra.mrb[54].mxu1 %vm570_vm0, %v16183_v16 }
 0x69e   : > { %3513 = vmatprep.mubr.f32.mxu1 %v20912_v27 }
 0x6a1   : > { %14097 = vmatmul.mubr.msk.f32.gmra.mrb[56].mxu1 %vm570_vm0, %v16184_v56 }
 0x6a2   : > { %3519 = vmatprep.mubr.f32.mxu1 %v20912_v27 }
 0x6a5   : > { %14098 = vmatmul.mubr.msk.f32.gmra.mrb[58].mxu1 %vm570_vm0, %v16185_v35 }
 0x6a6   : > { %3525 = vmatprep.mubr.f32.mxu1 %v20912_v27 }
 0x6a9   : > { %14099 = vmatmul.mubr.msk.f32.gmra.mrb[60].mxu1 %vm570_vm0, %v16186_v48 }
 0x6aa   : > { %3531 = vmatprep.mubr.f32.mxu1 %v20912_v27 }
 0x6ad   : > { %14100 = vmatmul.mubr.msk.f32.gmra.mrb[62].mxu1 %vm570_vm0, %v16187_v11 }
 0x6ae   : > { %4081 = vmatprep.mubr.f32.mxu1 %v20912_v27 }
 0x6b1   : > { %14111 = vmatmul.mubr.msk.f32.vlgmr.msra.gmra.mrb[64].mxu1 %vm570_vm0, %v20920_v8 }
 0x6b2   : > { %4223 = vmatprep.mubr.f32.mxu1 %v20912_v27 }
 0x75c   : > { %v3414_v26 = vpop.f32.mrb[44].mxu1 }
 0x75d   : > { %v3416_v19 = vpop.f32.mrb[45].mxu1  ;;  %v3415_v17 = vadd.f32 %v3414_v26, %v17575_v43 }
 0x75e   : > { %v3417_v53 = vadd.f32 %v3416_v19, %v17575_v43 }
 0x75f   : > { %v17668_v61 = vadd.f32 %v3415_v17, %v20922_v23 }
 0x760   : > { %v3420_v37 = vpop.f32.mrb[46].mxu1  ;;  %v17664_v2 = vadd.f32 %v3417_v53, %v20921_v22 }
 0x761   : > { %v3421_v63 = vadd.f32 %v3420_v37, %v17571_v10  ;;  %v3422_v41 = vpop.f32.mrb[47].mxu1  ;;  %v4005_v9 = vmul.f32 %v17668_v61, %v17668_v61 }
 0x762   : > { %v3423_v36 = vadd.f32 %v3422_v41, %v17571_v10  ;;  %v4006_v47 = vmul.f32 %v17664_v2, %v17664_v2 }
 0x763   : > { %v17671_v5 = vadd.f32 %v3421_v63, %v20923_v13 }
 0x764   : > { %v17674_v42 = vadd.f32 %v3423_v36, %v20924_v51  ;;  %v3491_v50 = vpop.f32.mrb[48].mxu1 }
 0x765   : > { %v3492_v49 = vadd.f32 %v3491_v50, %v17375_v39  ;;  %v3493_v18 = vpop.f32.mrb[49].mxu1  ;;  %v4013_v38 = vmul.f32 %v17671_v5, %v17671_v5 }
 0x766   : > { %v3494_v57 = vadd.f32 %v3493_v18, %v17375_v39  ;;  %v4014_v45 = vmul.f32 %v17674_v42, %v17674_v42 }
 0x767   : > { %v3554_v15 = vmul.f32 0.70710677, %v3492_v49  ;;  %v14754_v6 = vpack.c.bf16 %v4013_v38, %v4005_v9  ;;  %v3538_v22 = vmul.f32 0.5, %v3492_v49 }
 0x768   : > { %v3555_v20 = vmul.f32 0.70710677, %v3494_v57  ;;  %v3497_v28 = vpop.f32.mrb[50].mxu1  ;;  %v14752_v33 = vpack.c.bf16 %v4014_v45, %v4006_v47  ;;  %v3539_v13 = vmul.f32 0.5, %v3494_v57 }
 0x769   : > { %15668 = verf.f32 %v3554_v15  ;;  %v3498_v54 = vadd.f32 %v3497_v28, %v17379_v0  ;;  %v3499_v7 = vpop.f32.mrb[51].mxu1 }
 0x76a   : > { %15670 = verf.f32 %v3555_v20  ;;  %v3500_v39 = vadd.f32 %v3499_v7, %v17379_v0  ;;  %14753 = vmatprep.subr.bf16.mxu1 %v14752_v33 }
 0x76b   : > { %v3556_v25 = vmul.f32 0.70710677, %v3498_v54  ;;  %14755 = vmatpush1.bf16.msra.mxu1 %v14754_v6  ;;  %v3540_v51 = vmul.f32 0.5, %v3498_v54 }
 0x76c   : > { %v3557_v60 = vmul.f32 0.70710677, %v3500_v39  ;;  %v3503_v1 = vpop.f32.mrb[52].mxu1  ;;  %v3541_v47 = vmul.f32 0.5, %v3500_v39 }
 0x76d   : > { %15672 = verf.f32 %v3556_v25  ;;  %v3504_v29 = vadd.f32 %v3503_v1, %v17383_v3  ;;  %v3505_v30 = vpop.f32.mrb[53].mxu1 }
 0x76e   : > { %15674 = verf.f32 %v3557_v60  ;;  %v3506_v55 = vadd.f32 %v3505_v30, %v17383_v3  ;;  %14113 = vmatmul.mubr.msk.f32.vlgmr.msra.gmra.mrb[66].mxu1 %vm570_vm0, %v20920_v8 }
 0x76f   : > { %v3558_v52 = vmul.f32 0.70710677, %v3504_v29  ;;  %4578 = vmatprep.mubr.f32.mxu1 %v20912_v27 }
 0x770   : > { %v3559_v14 = vmul.f32 0.70710677, %v3506_v55  ;;  %v3509_v0 = vpop.f32.mrb[54].mxu1 }
 0x771   : > { %15676 = verf.f32 %v3558_v52  ;;  %v3510_v16 = vadd.f32 %v3509_v0, %v17389_v4  ;;  %v3511_v56 = vpop.f32.mrb[55].mxu1 }
 0x772   : > { %15678 = verf.f32 %v3559_v14  ;;  %v3512_v35 = vadd.f32 %v3511_v56, %v17389_v4  ;;  %v3542_v56 = vmul.f32 0.5, %v3504_v29 }
 0x773   : > { %v15669_v48 = vpop.eup %15668  ;;  %v3560_v11 = vmul.f32 0.70710677, %v3510_v16 }
 0x774   : > { %v15671_v26 = vpop.eup %15670  ;;  %v3561_v19 = vmul.f32 0.70710677, %v3512_v35  ;;  %v3515_v3 = vpop.f32.mrb[56].mxu1  ;;  %v3586_v37 = vadd.f32 1.0, %v15669_v48 }
 0x775   : > { %15680 = verf.f32 %v3560_v11  ;;  %v17696_v53 = vadd.f32 %v3515_v3, %v17394_v44  ;;  %v3517_v17 = vpop.f32.mrb[57].mxu1  ;;  %v3587_v36 = vadd.f32 1.0, %v15671_v26  ;;  %v3543_v26 = vmul.f32 0.5, %v3506_v55 }
 0x776   : > { %15682 = verf.f32 %v3561_v19  ;;  %v17699_v63 = vadd.f32 %v3517_v17, %v17394_v44  ;;  %v3602_v44 = vmul.f32 %v3586_v37, %v3538_v22  ;;  %v3544_v19 = vmul.f32 0.5, %v3510_v16 }
 0x777   : > { %v15673_v41 = vpop.eup %15672  ;;  %v3562_v4 = vmul.f32 0.70710677, %v17696_v53  ;;  %v3603_v33 = vmul.f32 %v3587_v36, %v3539_v13 }
 0x778   : > { %v15675_v23 = vpop.eup %15674  ;;  %v3588_v50 = vadd.f32 1.0, %v15673_v41  ;;  %v3563_v18 = vmul.f32 0.70710677, %v17699_v63  ;;  %v3521_v38 = vpop.f32.mrb[58].mxu1  ;;  %v3545_v41 = vmul.f32 0.5, %v3512_v35 }
 0x779   : > { %v3589_v45 = vadd.f32 1.0, %v15675_v23  ;;  %15684 = verf.f32 %v3562_v4  ;;  %v3522_v15 = vadd.f32 %v3521_v38, %v17403_v31  ;;  %v3523_v9 = vpop.f32.mrb[59].mxu1 }
 0x77a   : > { %v3604_v20 = vmul.f32 %v3588_v50, %v3540_v51  ;;  %15686 = verf.f32 %v3563_v18  ;;  %v3524_v49 = vadd.f32 %v3523_v9, %v17403_v31 }
 0x77b   : > { %v15677_v28 = vpop.eup %15676  ;;  %v3605_v7 = vmul.f32 %v3589_v45, %v3541_v47  ;;  %v3564_v57 = vmul.f32 0.70710677, %v3522_v15 }
 0x77c   : > { %v15679_v54 = vpop.eup %15678  ;;  %v14714_v6 = vpack.c.bf16 %v3604_v20, %v3602_v44  ;;  %v3565_v25 = vmul.f32 0.70710677, %v3524_v49  ;;  %v3527_v60 = vpop.f32.mrb[60].mxu1  ;;  %v3590_v52 = vadd.f32 1.0, %v15677_v28  ;;  %v3546_v20 = vmul.f32 0.5, %v17696_v53 }
 0x77d   : > { %15688 = verf.f32 %v3564_v57  ;;  %v3528_v39 = vadd.f32 %v3527_v60, %v17408_v59  ;;  %v3529_v1 = vpop.f32.mrb[61].mxu1  ;;  %v14712_v30 = vpack.c.bf16 %v3605_v7, %v3603_v33  ;;  %v3591_v31 = vadd.f32 1.0, %v15679_v54 }
 0x77e   : > { %15690 = verf.f32 %v3565_v25  ;;  %v3530_v14 = vadd.f32 %v3529_v1, %v17408_v59  ;;  %v3606_v23 = vmul.f32 %v3590_v52, %v3542_v56  ;;  %v3548_v28 = vmul.f32 0.5, %v3522_v15 }
 0x77f   : > { %v15681_v0 = vpop.eup %15680  ;;  %v3566_v48 = vmul.f32 0.70710677, %v3528_v39  ;;  %14713 = vmatprep.subr.bf16.mxu0 %v14712_v30  ;;  %v3607_v51 = vmul.f32 %v3591_v31, %v3543_v26  ;;  %v3549_v7 = vmul.f32 0.5, %v3524_v49  ;;  %v3550_v15 = vmul.f32 0.5, %v3528_v39 }
 0x780   : > { %v15683_v11 = vpop.eup %15682  ;;  %v3592_v3 = vadd.f32 1.0, %v15681_v0  ;;  %v3567_v17 = vmul.f32 0.70710677, %v3530_v14  ;;  %v3533_v37 = vpop.f32.mrb[62].mxu1  ;;  %14715 = vmatpush1.bf16.msra.mxu0 %v14714_v6 }
 0x781   : > { %v3593_v22 = vadd.f32 1.0, %v15683_v11  ;;  %15692 = verf.f32 %v3566_v48  ;;  %v3534_v36 = vadd.f32 %v3533_v37, %v17412_v24  ;;  %v3535_v4 = vpop.f32.mrb[63].mxu1  ;;  %v3153_v37 = vadd.f32 %v17539_v32, %v17571_v10 }
 0x782   : > { %v3608_v59 = vmul.f32 %v3592_v3, %v3544_v19  ;;  %15694 = verf.f32 %v3567_v17  ;;  %v3536_v29 = vadd.f32 %v3535_v4, %v17412_v24  ;;  %v3547_v24 = vmul.f32 0.5, %v17699_v63 }
 0x783   : > { %v15685_v13 = vpop.eup %15684  ;;  %v3609_v50 = vmul.f32 %v3593_v22, %v3545_v41  ;;  %v3568_v55 = vmul.f32 0.70710677, %v3534_v36  ;;  %v3552_v11 = vmul.f32 0.5, %v3534_v36  ;;  %v3551_v63 = vmul.f32 0.5, %v3530_v14  ;;  %v20926_v36 = vld [vmem:[#allocation19_spill] sm:$0xff] }
 0x784   : > { %v15687_v16 = vpop.eup %15686  ;;  %v14718_v18 = vpack.c.bf16 %v3608_v59, %v3606_v23  ;;  %v3569_v38 = vmul.f32 0.70710677, %v3536_v29  ;;  %v3594_v35 = vadd.f32 1.0, %v15685_v13  ;;  %v3553_v49 = vmul.f32 0.5, %v3536_v29  ;;  %v20925_v13 = vld [vmem:[#allocation20_spill] sm:$0xff] }
 0x785   : > { %15696 = verf.f32 %v3568_v55  ;;  %v14716_v47 = vpack.c.bf16 %v3609_v50, %v3607_v51  ;;  %v3595_v9 = vadd.f32 1.0, %v15687_v16  ;;  %v3147_v23 = vadd.f32 %v17535_v12, %v17575_v43  ;;  %v16188_v12 = vld [vmem:[%s20909_s28] sm:$0xff] }
 0x786   : > { %15698 = verf.f32 %v3569_v38  ;;  %v3610_v54 = vmul.f32 %v3594_v35, %v3546_v20  ;;  %v17716_v39 = vadd.f32 %v3153_v37, %v20925_v13  ;;  %v14728_v14 = vpack.c.bf16 %v17582_v58, %v17585_v40  ;;  %v20928_v38 = vld [vmem:[#allocation22_spill] sm:$0xff] }
 0x787   : > { %v15689_v45 = vpop.eup %15688  ;;  %14717 = vmatprep.subr.bf16.mxu0 %v14716_v47  ;;  %v3611_v60 = vmul.f32 %v3595_v9, %v3547_v24  ;;  %v17721_v29 = vadd.f32 %v3147_v23, %v20926_v36  ;;  %v3151_v32 = vadd.f32 %v17537_v46, %v17571_v10  ;;  %v14730_v51 = vpack.c.bf16 %v17599_v62, %v17604_v34  ;;  %v20927_v46 = vld [vmem:[#allocation18_spill] sm:$0xff]  ;;  %v4083_v9 = vpop.f32.mrb[64].mxu1 }
 0x788   : > { %v15691_v44 = vpop.eup %15690  ;;  %v3596_v33 = vadd.f32 1.0, %v15689_v45  ;;  %14719 = vmatpush1.bf16.msra.mxu0 %v14718_v18  ;;  %v3145_v55 = vadd.f32 %v17533_v21, %v17575_v43  ;;  %v16189_v18 = vld [vmem:[%s20909_s28 + $0x8] sm:$0xff]  ;;  %v14736_v35 = vpack.c.bf16 %v17674_v42, %v17664_v2  ;;  %v14738_v45 = vpack.c.bf16 %v17671_v5, %v17668_v61 }
 0x789   : > { %v3597_v57 = vadd.f32 1.0, %v15691_v44  ;;  %v14732_v50 = vpack.c.bf16 %v17716_v39, %v17721_v29  ;;  %v17737_v16 = vadd.f32 %v3151_v32, %v20927_v46  ;;  %v4085_v44 = vpop.f32.mrb[65].mxu1 }
 0x78a   : > { %v3612_v6 = vmul.f32 %v3596_v33, %v3548_v28  ;;  %v17744_v47 = vadd.f32 %v3145_v55, %v20928_v38 }
 0x78b   : > { %v15693_v25 = vpop.eup %15692  ;;  %v3613_v1 = vmul.f32 %v3597_v57, %v3549_v7 }
 0x78c   : > { %v15695_v30 = vpop.eup %15694  ;;  %v14722_v52 = vpack.c.bf16 %v3612_v6, %v3610_v54  ;;  %v3598_v56 = vadd.f32 1.0, %v15693_v25  ;;  %v14734_v21 = vpack.c.bf16 %v17737_v16, %v17744_v47  ;;  %v4003_v36 = vmul.f32 %v17744_v47, %v17744_v47 }
 0x78d   : > { %v14720_v0 = vpack.c.bf16 %v3613_v1, %v3611_v60  ;;  %v3599_v48 = vadd.f32 1.0, %v15695_v30  ;;  %v20929_v1 = vld [vmem:[#allocation26_spill] sm:$0xff] }
 0x78e   : > { %v3614_v3 = vmul.f32 %v3598_v56, %v3550_v15  ;;  %v20931_v56 = vld [vmem:[#allocation29_spill] sm:$0xff]  ;;  %v20932_v15 = vld [vmem:[#allocation30_spill] sm:$0xff] }
 0x78f   : > { %v15697_v31 = vpop.eup %15696  ;;  %14721 = vmatprep.subr.bf16.mxu0 %v14720_v0  ;;  %v3615_v41 = vmul.f32 %v3599_v48, %v3551_v63  ;;  %v4309_v63 = vmul.f32 0.0625, %v4083_v9 }
 0x790   : > { %v15699_v53 = vpop.eup %15698  ;;  %v3600_v26 = vadd.f32 1.0, %v15697_v31  ;;  %14723 = vmatpush1.bf16.msra.mxu0 %v14722_v52  ;;  %v20930_v52 = vld [vmem:[#allocation28_spill] sm:$0xff] }
 0x791   : > { %v3601_v19 = vadd.f32 1.0, %v15699_v53  ;;  %v4012_v53 = vmul.f32 %v17716_v39, %v17716_v39 }
 0x792   : > { %v3616_v17 = vmul.f32 %v3600_v26, %v3552_v11 }
 0x793   : > { %v3617_v22 = vmul.f32 %v3601_v19, %v3553_v49  ;;  %v4310_v49 = vmul.f32 0.0625, %v4085_v44 }
 0x794   : > { %v14726_v4 = vpack.c.bf16 %v3616_v17, %v3614_v3  ;;  %v4004_v3 = vmul.f32 %v17721_v29, %v17721_v29 }
 0x795   : > { %v14724_v59 = vpack.c.bf16 %v3617_v22, %v3615_v41  ;;  %v4011_v41 = vmul.f32 %v17737_v16, %v17737_v16 }
 0x796   : > { %v14748_v23 = vpack.c.bf16 %v4012_v53, %v4004_v3 }
 0x797   : > { %14725 = vmatprep.subr.bf16.mxu0 %v14724_v59 }
 0x798   : > { %14727 = vmatpush1.bf16.msra.mxu0 %v14726_v4 }
 0x799   : > { %14729 = vmatprep.subr.bf16.mxu0 %v14728_v14 }
 0x79b   : > { %14101 = vmatmul.mubr.msk.f32.vlgmr.msra.gmra.mrb[60].mxu0 %vm2801_vm1, %v16188_v12 }
 0x79c   : > { %14731 = vmatpush1.bf16.msra.mxu0 %v14730_v51  ;;  %3688 = vmatprep.mubr.f32.mxu0 %v20912_v27 }
 0x79d   : > { %14733 = vmatprep.subr.bf16.mxu0 %v14732_v50  ;;  %v14750_v50 = vpack.c.bf16 %v4011_v41, %v4003_v36 }
 0x79f   : > { %14102 = vmatmul.mubr.msk.f32.gmra.mrb[62].mxu0 %vm2801_vm1, %v16189_v18 }
 0x7a0   : > { %3781 = vmatprep.mubr.f32.mxu0 %v20912_v27 }
 0x7a3   : > { %14107 = vmatmul.mubr.msk.f32.vlgmr.msra.gmra.mrb[64].mxu0 %vm570_vm0, %v20920_v8 }
 0x7a4   : > { %14735 = vmatpush1.bf16.msra.mxu0 %v14734_v21  ;;  %3852 = vmatprep.mubr.f32.mxu0 %v20912_v27 }
 0x7a5   : > { %14737 = vmatprep.subr.bf16.mxu0 %v14736_v35 }
 0x7a7   : > { %14108 = vmatmul.mubr.msk.f32.vlgmr.msra.gmra.mrb[66].mxu0 %vm570_vm0, %v20920_v8 }
 0x7a8   : > { %14739 = vmatpush1.bf16.msra.mxu0 %v14738_v45  ;;  %3923 = vmatprep.mubr.f32.mxu0 %v20912_v27 }
 0x7ab   : > { %14109 = vmatmul.mubr.msk.f32.vlgmr.msra.gmra.mrb[68].mxu0 %vm570_vm0, %v20920_v8 }
 0x7ac   : > { %3994 = vmatprep.mubr.f32.mxu0 %v20912_v27 }
 0x841   : > { %v4225_v20 = vpop.f32.mrb[66].mxu1 }
 0x842   : > { %v4227_v28 = vpop.f32.mrb[67].mxu1  ;;  %v4313_v9 = vmul.f32 0.0625, %v4225_v20 }
 0x86e   : > { %v3684_v33 = vpop.f32.mrb[60].mxu0 }
 0x86f   : > { %v3686_v24 = vpop.f32.mrb[61].mxu0  ;;  %v3685_v54 = vadd.f32 %v3684_v33, %v17575_v43 }
 0x870   : > { %v3687_v7 = vadd.f32 %v3686_v24, %v17575_v43 }
 0x871   : > { %v17778_v43 = vadd.f32 %v3685_v54, %v20932_v15 }
 0x872   : > { %v3690_v57 = vpop.f32.mrb[62].mxu0  ;;  %v17770_v0 = vadd.f32 %v3687_v7, %v20930_v52  ;;  %v4314_v7 = vmul.f32 0.0625, %v4227_v28  ;;  %v20933_v52 = vld [vmem:[#allocation17_spill] sm:$0xff] }
 0x873   : > { %v3691_v6 = vadd.f32 %v3690_v57, %v17571_v10  ;;  %v3692_v25 = vpop.f32.mrb[63].mxu0  ;;  %v4007_v44 = vmul.f32 %v17778_v43, %v17778_v43 }
 0x874   : > { %v3693_v60 = vadd.f32 %v3692_v25, %v17571_v10  ;;  %v4008_v51 = vmul.f32 %v17770_v0, %v17770_v0 }
 0x875   : > { %v17767_v30 = vadd.f32 %v3691_v6, %v20929_v1 }
 0x876   : > { %v17773_v31 = vadd.f32 %v3693_v60, %v20931_v56  ;;  %v3783_v48 = vpop.f32.mrb[64].mxu0 }
 0x877   : > { %v4301_v11 = vmul.f32 0.0625, %v3783_v48  ;;  %v3785_v26 = vpop.f32.mrb[65].mxu0  ;;  %v14742_v37 = vpack.c.bf16 %v17767_v30, %v17778_v43  ;;  %v4015_v55 = vmul.f32 %v17767_v30, %v17767_v30 }
 0x878   : > { %v4302_v10 = vmul.f32 0.0625, %v3785_v26  ;;  %v14740_v19 = vpack.c.bf16 %v17773_v31, %v17770_v0  ;;  %v4016_v59 = vmul.f32 %v17773_v31, %v17773_v31  ;;  %v17813_v26 = vpop.permute.xlu1 %4460 }
 0x879   : > { %v4317_v17 = vmul.f32 %v4301_v11, %v4301_v11  ;;  %v14758_v54 = vpack.c.bf16 %v4015_v55, %v4007_v44  ;;  %v4344_v56 = vrot.slane %v4301_v11, %v20933_v52 }
 0x87a   : > { %v4318_v22 = vmul.f32 %v4302_v10, %v4302_v10  ;;  %v17788_v4 = vpop.f32.mrb[66].mxu0  ;;  %14741 = vmatprep.subr.bf16.mxu0 %v14740_v19  ;;  %v14756_v38 = vpack.c.bf16 %v4016_v59, %v4008_v51  ;;  %v4348_v53 = vrot.slane %v4302_v10, %v20933_v52 }
 0x87b   : > { %v4325_v13 = vsub.f32 %v4309_v63, %v4317_v17  ;;  %v17792_v14 = vpop.f32.mrb[67].mxu0  ;;  %14743 = vmatpush1.bf16.msra.mxu0 %v14742_v37  ;;  %v17815_v63 = vpop.permute.xlu0 %4455  ;;  %v4373_v19 = vsub.f32 %v17604_v34, %v4344_v56  ;;  %v4381_v3 = vsub.f32 %v17599_v62, %v4344_v56  ;;  %v17846_v56 = vld [vmem:[%s20771_s4 + $0x10] sm:$0xff] }
 0x87c   : > { %v4326_v32 = vsub.f32 %v4310_v49, %v4318_v22  ;;  %14749 = vmatprep.subr.bf16.mxu0 %v14748_v23  ;;  %v4374_v37 = vsub.f32 %v17585_v40, %v4348_v53  ;;  %v4382_v11 = vsub.f32 %v17582_v58, %v4348_v53  ;;  %v17826_v51 = vpop.permute.xlu1 %4486 }
 0x87d   : > { %v4333_v12 = vmax.f32 %v4325_v13, 0.0 }
 0x87e   : > { %v4334_v46 = vmax.f32 %v4326_v32, 0.0  ;;  %v3925_v18 = vpop.f32.mrb[68].mxu0  ;;  %14110 = vmatmul.mubr.msk.f32.vlgmr.msra.gmra.mrb[70].mxu0 %vm570_vm0, %v20920_v8 }
 0x87f   : > { %v4389_v21 = vadd.f32 1e-05, %v4333_v12  ;;  %v4305_v35 = vmul.f32 0.0625, %v3925_v18  ;;  %v3927_v45 = vpop.f32.mrb[69].mxu0  ;;  %14751 = vmatpush1.bf16.msra.mxu0 %v14750_v50  ;;  %4152 = vmatprep.mubr.f32.mxu0 %v20912_v27  ;;  %v17828_v12 = vpop.permute.xlu0 %4481 }
 0x880   : > { %v4390_v33 = vadd.f32 1e-05, %v4334_v46  ;;  %v4306_v24 = vmul.f32 0.0625, %v3927_v45  ;;  %14757 = vmatprep.subr.bf16.mxu0 %v14756_v38 }
 0x881   : > { %15700 = vrsqrt.f32 %v4389_v21  ;;  %v4321_v57 = vmul.f32 %v4305_v35, %v4305_v35  ;;  %v4360_v13 = vrot.slane %v4305_v35, %v20933_v52 }
 0x882   : > { %15702 = vrsqrt.f32 %v4390_v33  ;;  %v4322_v6 = vmul.f32 %v4306_v24, %v4306_v24  ;;  %14112 = vmatmul.mubr.msk.f32.vlgmr.msra.gmra.mrb[72].mxu0 %vm570_vm0, %v20920_v8  ;;  %v4364_v50 = vrot.slane %v4306_v24, %v20933_v52 }
 0x883   : > { %v4329_v25 = vsub.f32 %v4313_v9, %v4321_v57  ;;  %14759 = vmatpush1.bf16.msra.mxu0 %v14758_v54  ;;  %4294 = vmatprep.mubr.f32.mxu0 %v20912_v27  ;;  %v4377_v44 = vsub.f32 %v17668_v61, %v4360_v13  ;;  %v4385_v33 = vsub.f32 %v17671_v5, %v4360_v13  ;;  %v4304_v13 = vmul.f32 0.0625, %v17792_v14 }
 0x884   : > { %v4330_v20 = vsub.f32 %v4314_v7, %v4322_v6  ;;  %v4378_v57 = vsub.f32 %v17664_v2, %v4364_v50  ;;  %v4386_v54 = vsub.f32 %v17674_v42, %v4364_v50 }
 0x885   : > { %v4337_v60 = vmax.f32 %v4329_v25, 0.0 }
 0x886   : > { %v4338_v1 = vmax.f32 %v4330_v20, 0.0  ;;  %14114 = vmatmul.mubr.msk.f32.vlgmr.msra.gmra.mrb[74].mxu0 %vm570_vm0, %v20920_v8 }
 0x887   : > { %v4393_v28 = vadd.f32 1e-05, %v4337_v60  ;;  %4655 = vmatprep.mubr.f32.mxu0 %v20912_v27 }
 0x888   : > { %v4394_v48 = vadd.f32 1e-05, %v4338_v1 }
 0x889   : > { %15704 = vrsqrt.f32 %v4393_v28 }
 0x88a   : > { %15706 = vrsqrt.f32 %v4394_v48 }
 0x88b   : > { %v15701_v15 = vpop.eup %15700 }
 0x88c   : > { %v15703_v49 = vpop.eup %15702  ;;  %v4408_v17 = vrot.slane %v15701_v15, %v20933_v52 }
 0x88d   : > { %v4412_v10 = vrot.slane %v15703_v49, %v20933_v52 }
 0x88e   : > { %v4437_v41 = vmul.f32 %v4408_v17, %v4373_v19  ;;  %v4445_v22 = vmul.f32 %v4408_v17, %v4381_v3 }
 0x88f   : > { %v4438_v23 = vmul.f32 %v4412_v10, %v4374_v37  ;;  %v4446_v59 = vmul.f32 %v4412_v10, %v4382_v11  ;;  %v17862_v11 = vld [vmem:[%s20771_s4 + $0x18] sm:$0xff] }
 0x890   : > { %v4463_v36 = vmul.f32 %v17815_v63, %v4437_v41  ;;  %v4471_v32 = vmul.f32 %v17813_v26, %v4445_v22 }
 0x891   : > { %v4464_v55 = vmul.f32 %v17815_v63, %v4438_v23  ;;  %v4472_v46 = vmul.f32 %v17813_v26, %v4446_v59  ;;  %v4303_v23 = vmul.f32 0.0625, %v17788_v4 }
 0x892   : > { %v4489_v18 = vadd.f32 %v17828_v12, %v4463_v36  ;;  %v4497_v38 = vadd.f32 %v17826_v51, %v4471_v32 }
 0x893   : > { %v15705_v21 = vpop.eup %15704  ;;  %v4490_v35 = vadd.f32 %v17828_v12, %v4464_v55  ;;  %v4498_v45 = vadd.f32 %v17826_v51, %v4472_v46  ;;  %v4319_v32 = vmul.f32 %v4303_v23, %v4303_v23 }
 0x894   : > { %v15707_v9 = vpop.eup %15706  ;;  %v4424_v24 = vrot.slane %v15705_v21, %v20933_v52  ;;  %v14762_v7 = vpack.c.bf16 %v4497_v38, %v4489_v18  ;;  %v4320_v18 = vmul.f32 %v4304_v13, %v4304_v13 }
 0x895   : > { %v14760_v6 = vpack.c.bf16 %v4498_v45, %v4490_v35  ;;  %v4428_v25 = vrot.slane %v15707_v9, %v20933_v52 }
 0x896   : > { %v4441_v20 = vmul.f32 %v4424_v24, %v4377_v44  ;;  %v4449_v60 = vmul.f32 %v4424_v24, %v4385_v33 }
 0x897   : > { %14761 = vmatprep.subr.bf16.mxu1 %v14760_v6  ;;  %v4442_v1 = vmul.f32 %v4428_v25, %v4378_v57  ;;  %v4450_v28 = vmul.f32 %v4428_v25, %v4386_v54 }
 0x898   : > { %14763 = vmatpush1.bf16.msra.mxu1 %v14762_v7  ;;  %v4467_v48 = vmul.f32 %v17815_v63, %v4441_v20  ;;  %v4475_v53 = vmul.f32 %v17813_v26, %v4449_v60 }
 0x899   : > { %v4468_v15 = vmul.f32 %v17815_v63, %v4442_v1  ;;  %v4476_v49 = vmul.f32 %v17813_v26, %v4450_v28 }
 0x89a   : > { %v4493_v19 = vadd.f32 %v17828_v12, %v4467_v48  ;;  %v4501_v3 = vadd.f32 %v17826_v51, %v4475_v53  ;;  %v4352_v53 = vrot.slane %v4303_v23, %v20933_v52 }
 0x89b   : > { %14117 = vmatmul.mubr.msk.f32.vlgmr.msra.gmra.mrb[68].mxu1 %vm570_vm0, %v17846_v56  ;;  %v4494_v17 = vadd.f32 %v17828_v12, %v4468_v15  ;;  %v4502_v37 = vadd.f32 %v17826_v51, %v4476_v49  ;;  %v4356_v15 = vrot.slane %v4304_v13, %v20933_v52 }
 0x89c   : > { %4584 = vmatprep.mubr.f32.mxu1 %v20912_v27  ;;  %v14770_v10 = vpack.c.bf16 %v4501_v3, %v4493_v19 }
 0x89d   : > { %v14768_v41 = vpack.c.bf16 %v4502_v37, %v4494_v17  ;;  %v4375_v17 = vsub.f32 %v17744_v47, %v4352_v53  ;;  %v4383_v37 = vsub.f32 %v17737_v16, %v4352_v53 }
 0x89f   : > { %14118 = vmatmul.mubr.msk.f32.gmra.mrb[70].mxu1 %vm570_vm0, %v17862_v11  ;;  %14769 = vmatprep.subr.bf16.mxu1 %v14768_v41  ;;  %v4376_v41 = vsub.f32 %v17721_v29, %v4356_v15 }
 0x8a0   : > { %14771 = vmatpush1.bf16.msra.mxu1 %v14770_v10  ;;  %4732 = vmatprep.mubr.f32.mxu1 %v20912_v27 }
 0x8a3   : > { %14121 = vmatmul.mubr.msk.f32.vlgmr.msra.gmra.mrb[72].mxu1 %vm570_vm0, %v17846_v56 }
 0x8a4   : > { %4738 = vmatprep.mubr.f32.mxu1 %v20912_v27 }
 0x8a7   : > { %14122 = vmatmul.mubr.msk.f32.gmra.mrb[74].mxu1 %vm570_vm0, %v17862_v11 }
 0x8a8   : > { %4937 = vmatprep.mubr.f32.mxu1 %v20912_v27 }
 0x951   : > { %v3996_v22 = vpop.f32.mrb[70].mxu0 }
 0x952   : > { %v3998_v59 = vpop.f32.mrb[71].mxu0  ;;  %v4307_v50 = vmul.f32 0.0625, %v3996_v22  ;;  %v4384_v22 = vsub.f32 %v17716_v39, %v4356_v15 }
 0x953   : > { %v4308_v38 = vmul.f32 0.0625, %v3998_v59 }
 0x954   : > { %v4323_v35 = vmul.f32 %v4307_v50, %v4307_v50  ;;  %v4368_v19 = vrot.slane %v4307_v50, %v20933_v52 }
 0x955   : > { %v4154_v36 = vpop.f32.mrb[72].mxu0  ;;  %v4324_v9 = vmul.f32 %v4308_v38, %v4308_v38  ;;  %v4372_v59 = vrot.slane %v4308_v38, %v20933_v52 }
 0x956   : > { %v4311_v55 = vmul.f32 0.0625, %v4154_v36  ;;  %v4156_v46 = vpop.f32.mrb[73].mxu0  ;;  %v4379_v50 = vsub.f32 %v17778_v43, %v4368_v19 }
 0x957   : > { %v4312_v21 = vmul.f32 0.0625, %v4156_v46  ;;  %v4380_v38 = vsub.f32 %v17770_v0, %v4372_v59 }
 0x958   : > { %v4327_v45 = vsub.f32 %v4311_v55, %v4319_v32 }
 0x959   : > { %v4328_v44 = vsub.f32 %v4312_v21, %v4320_v18  ;;  %v4296_v33 = vpop.f32.mrb[74].mxu0  ;;  %v4387_v21 = vsub.f32 %v17767_v30, %v4368_v19 }
 0x95a   : > { %v4335_v24 = vmax.f32 %v4327_v45, 0.0  ;;  %v4315_v7 = vmul.f32 0.0625, %v4296_v33  ;;  %v4298_v57 = vpop.f32.mrb[75].mxu0 }
 0x95b   : > { %v4336_v4 = vmax.f32 %v4328_v44, 0.0  ;;  %v4316_v54 = vmul.f32 0.0625, %v4298_v57  ;;  %v4388_v57 = vsub.f32 %v17773_v31, %v4372_v59  ;;  %v17906_v59 = vpop.permute.xlu1 %4848 }
 0x95c   : > { %v4391_v6 = vadd.f32 1e-05, %v4335_v24  ;;  %v4331_v14 = vsub.f32 %v4315_v7, %v4323_v35 }
 0x95d   : > { %v4392_v25 = vadd.f32 1e-05, %v4336_v4  ;;  %v4332_v20 = vsub.f32 %v4316_v54, %v4324_v9 }
 0x95e   : > { %15708 = vrsqrt.f32 %v4391_v6  ;;  %v4339_v60 = vmax.f32 %v4331_v14, 0.0 }
 0x95f   : > { %15710 = vrsqrt.f32 %v4392_v25  ;;  %v4340_v1 = vmax.f32 %v4332_v20, 0.0 }
 0x960   : > { %v4395_v28 = vadd.f32 1e-05, %v4339_v60 }
 0x961   : > { %v4396_v48 = vadd.f32 1e-05, %v4340_v1 }
 0x962   : > { %15712 = vrsqrt.f32 %v4395_v28 }
 0x963   : > { %15714 = vrsqrt.f32 %v4396_v48 }
 0x968   : > { %v15709_v49 = vpop.eup %15708 }
 0x969   : > { %v15711_v3 = vpop.eup %15710  ;;  %v4416_v10 = vrot.slane %v15709_v49, %v20933_v52 }
 0x96a   : > { %v4420_v23 = vrot.slane %v15711_v3, %v20933_v52 }
 0x96b   : > { %v4439_v36 = vmul.f32 %v4416_v10, %v4375_v17  ;;  %v4447_v13 = vmul.f32 %v4416_v10, %v4383_v37 }
 0x96c   : > { %v15713_v32 = vpop.eup %15712  ;;  %v4440_v55 = vmul.f32 %v4420_v23, %v4376_v41  ;;  %v4448_v46 = vmul.f32 %v4420_v23, %v4384_v22 }
 0x96d   : > { %v15715_v18 = vpop.eup %15714  ;;  %v4432_v35 = vrot.slane %v15713_v32, %v20933_v52  ;;  %v4465_v45 = vmul.f32 %v17815_v63, %v4439_v36  ;;  %v4473_v9 = vmul.f32 %v17813_v26, %v4447_v13  ;;  %v17911_v13 = vpop.permute.xlu0 %4843 }
 0x96e   : > { %v4580_v44 = vpop.f32.mrb[68].mxu1  ;;  %v4466_v33 = vmul.f32 %v17815_v63, %v4440_v55  ;;  %v4474_v24 = vmul.f32 %v17813_v26, %v4448_v46  ;;  %v4436_v7 = vrot.slane %v15715_v18, %v20933_v52 }
 0x96f   : > { %v4582_v4 = vpop.f32.mrb[69].mxu1  ;;  %v4491_v54 = vadd.f32 %v17828_v12, %v4465_v45  ;;  %v4499_v6 = vadd.f32 %v17826_v51, %v4473_v9  ;;  %v4443_v14 = vmul.f32 %v4432_v35, %v4379_v50  ;;  %v4451_v48 = vmul.f32 %v4432_v35, %v4387_v21 }
 0x970   : > { %v4492_v25 = vadd.f32 %v17828_v12, %v4466_v33  ;;  %v4500_v20 = vadd.f32 %v17826_v51, %v4474_v24  ;;  %v4444_v60 = vmul.f32 %v4436_v7, %v4380_v38  ;;  %v4452_v28 = vmul.f32 %v4436_v7, %v4388_v57 }
 0x971   : > { %v14766_v1 = vpack.c.bf16 %v4499_v6, %v4491_v54  ;;  %v4823_v53 = vadd.f32 %v4582_v4, %v17585_v40  ;;  %v4469_v3 = vmul.f32 %v17815_v63, %v4443_v14  ;;  %v4822_v17 = vadd.f32 %v4580_v44, %v17604_v34 }
 0x972   : > { %v4586_v15 = vpop.f32.mrb[70].mxu1  ;;  %v14764_v49 = vpack.c.bf16 %v4500_v20, %v4492_v25  ;;  %v4470_v19 = vmul.f32 %v17815_v63, %v4444_v60  ;;  %v4478_v41 = vmul.f32 %v17813_v26, %v4452_v28  ;;  %v4477_v22 = vmul.f32 %v17813_v26, %v4451_v48 }
 0x973   : > { %v4830_v37 = vadd.f32 %v4586_v15, %v17599_v62  ;;  %v4588_v10 = vpop.f32.mrb[71].mxu1  ;;  %v4495_v36 = vadd.f32 %v17828_v12, %v4469_v3  ;;  %v17919_v26 = vadd.f32 %v17911_v13, %v4823_v53  ;;  %v17925_v50 = vadd.f32 %v17911_v13, %v4822_v17 }
 0x974   : > { %v4831_v23 = vadd.f32 %v4588_v10, %v17582_v58  ;;  %14765 = vmatprep.subr.bf16.mxu0 %v14764_v49  ;;  %v4496_v40 = vadd.f32 %v17828_v12, %v4470_v19  ;;  %v4504_v62 = vadd.f32 %v17826_v51, %v4478_v41  ;;  %v4503_v63 = vadd.f32 %v17826_v51, %v4477_v22 }
 0x975   : > { %v17914_v34 = vadd.f32 %v17906_v59, %v4830_v37  ;;  %14767 = vmatpush1.bf16.msra.mxu0 %v14766_v1  ;;  %20934 = vst [vmem:[#allocation21_spill] sm:$0xff] %v17925_v50  ;;  %v5158_v7 = vmul.f32 %v17919_v26, %v17919_v26 }
 0x976   : > { %v17922_v58 = vadd.f32 %v17906_v59, %v4831_v23  ;;  %v4734_v32 = vpop.f32.mrb[72].mxu1  ;;  %v14772_v55 = vpack.c.bf16 %v4504_v62, %v4496_v40  ;;  %v14774_v46 = vpack.c.bf16 %v4503_v63, %v4495_v36 }
 0x977   : > { %v4736_v12 = vpop.f32.mrb[73].mxu1  ;;  %v14778_v51 = vpack.c.bf16 %v17914_v34, %v17925_v50  ;;  %v4826_v45 = vadd.f32 %v4734_v32, %v17668_v61  ;;  %v5165_v4 = vmul.f32 %v17914_v34, %v17914_v34 }
 0x978   : > { %14119 = vmatmul.mubr.msk.f32.vlgmr.msra.gmra.mrb[76].mxu0 %vm570_vm0, %v17846_v56  ;;  %v14776_v18 = vpack.c.bf16 %v17922_v58, %v17919_v26  ;;  %14773 = vmatprep.subr.bf16.mxu0 %v14772_v55  ;;  %v4827_v21 = vadd.f32 %v4736_v12, %v17664_v2  ;;  %v5166_v61 = vmul.f32 %v17922_v58, %v17922_v58 }
 0x979   : > { %4661 = vmatprep.mubr.f32.mxu0 %v20912_v27  ;;  %14775 = vmatpush1.bf16.msra.mxu0 %v14774_v46 }
 0x97a   : > { %v4740_v35 = vpop.f32.mrb[74].mxu1  ;;  %14777 = vmatprep.subr.bf16.mxu1 %v14776_v18  ;;  %v17945_v2 = vadd.f32 %v17911_v13, %v4827_v21  ;;  %v14792_v54 = vpack.c.bf16 %v5166_v61, %v5158_v7 }
 0x97b   : > { %v4834_v9 = vadd.f32 %v4740_v35, %v17671_v5  ;;  %v4742_v38 = vpop.f32.mrb[75].mxu1  ;;  %14779 = vmatpush1.bf16.msra.mxu1 %v14778_v51  ;;  %v17955_v5 = vadd.f32 %v17911_v13, %v4826_v45 }
 0x97c   : > { %v4835_v44 = vadd.f32 %v4742_v38, %v17674_v42  ;;  %14120 = vmatmul.mubr.msk.f32.gmra.mrb[78].mxu0 %vm570_vm0, %v17862_v11  ;;  %20936 = vst [vmem:[#allocation31_spill] sm:$0xff] %v17945_v2  ;;  %v5162_v14 = vmul.f32 %v17945_v2, %v17945_v2 }
 0x97d   : > { %v17941_v33 = vadd.f32 %v17906_v59, %v4834_v9  ;;  %4809 = vmatprep.mubr.f32.mxu0 %v20912_v27  ;;  %20938 = vst [vmem:[#allocation23_spill] sm:$0xff] %v17955_v5 }
 0x97e   : > { %v17948_v24 = vadd.f32 %v17906_v59, %v4835_v44  ;;  %14131 = vmatmul.mubr.msk.f32.vlgmr.msra.gmra.mrb[76].mxu1 %vm570_vm0, %v20920_v8 }
 0x97f   : > { %20935 = vst [vmem:[#allocation32_spill] sm:$0xff] %v17941_v33  ;;  %5079 = vmatprep.mubr.f32.mxu1 %v20912_v27  ;;  %v14786_v57 = vpack.c.bf16 %v17941_v33, %v17955_v5  ;;  %v5169_v20 = vmul.f32 %v17941_v33, %v17941_v33 }
 0x980   : > { %20937 = vst [vmem:[#allocation25_spill] sm:$0xff] %v17948_v24  ;;  %14123 = vmatmul.mubr.msk.f32.vlgmr.msra.gmra.mrb[80].mxu0 %vm570_vm0, %v17846_v56  ;;  %v14784_v42 = vpack.c.bf16 %v17948_v24, %v17945_v2  ;;  %v5170_v6 = vmul.f32 %v17948_v24, %v17948_v24  ;;  %v5157_v56 = vmul.f32 %v17925_v50, %v17925_v50 }
 0x981   : > { %4815 = vmatprep.mubr.f32.mxu0 %v20912_v27 }
 0x982   : > { %14785 = vmatprep.subr.bf16.mxu1 %v14784_v42  ;;  %v14794_v25 = vpack.c.bf16 %v5165_v4, %v5157_v56  ;;  %v14800_v60 = vpack.c.bf16 %v5170_v6, %v5162_v14 }
 0x983   : > { %14787 = vmatpush1.bf16.msra.mxu1 %v14786_v57 }
 0x984   : > { %14124 = vmatmul.mubr.msk.f32.gmra.mrb[82].mxu0 %vm570_vm0, %v17862_v11  ;;  %14793 = vmatprep.subr.bf16.mxu1 %v14792_v54  ;;  %v5161_v11 = vmul.f32 %v17955_v5, %v17955_v5 }
 0x985   : > { %5008 = vmatprep.mubr.f32.mxu0 %v20912_v27 }
 0x986   : > { %14133 = vmatmul.mubr.msk.f32.vlgmr.msra.gmra.mrb[78].mxu1 %vm570_vm0, %v20920_v8  ;;  %v14802_v1 = vpack.c.bf16 %v5169_v20, %v5161_v11 }
 0x987   : > { %14795 = vmatpush1.bf16.msra.mxu1 %v14794_v25  ;;  %5237 = vmatprep.mubr.f32.mxu1 %v20912_v27 }
 0x988   : > { %14801 = vmatprep.subr.bf16.mxu1 %v14800_v60 }
 0x98a   : > { %14135 = vmatmul.mubr.msk.f32.vlgmr.msra.gmra.mrb[80].mxu1 %vm570_vm0, %v20920_v8 }
 0x98b   : > { %14803 = vmatpush1.bf16.msra.mxu1 %v14802_v1  ;;  %5379 = vmatprep.mubr.f32.mxu1 %v20912_v27 }
 0x98e   : > { %14137 = vmatmul.mubr.msk.f32.vlgmr.msra.gmra.mrb[82].mxu1 %vm570_vm0, %v20920_v8 }
 0x98f   : > { %5807 = vmatprep.mubr.f32.mxu1 %v20912_v27 }
 0xa4b   : > { %v4657_v28 = vpop.f32.mrb[76].mxu0 }
 0xa4c   : > { %v4659_v48 = vpop.f32.mrb[77].mxu0  ;;  %v4824_v49 = vadd.f32 %v4657_v28, %v17744_v47 }
 0xa4d   : > { %v4825_v53 = vadd.f32 %v4659_v48, %v17721_v29 }
 0xa4e   : > { %v18005_v40 = vadd.f32 %v17911_v13, %v4824_v49 }
 0xa4f   : > { %v4663_v15 = vpop.f32.mrb[78].mxu0  ;;  %v17999_v22 = vadd.f32 %v17911_v13, %v4825_v53 }
 0xa50   : > { %v4832_v19 = vadd.f32 %v4663_v15, %v17737_v16  ;;  %v4665_v3 = vpop.f32.mrb[79].mxu0  ;;  %20942 = vst [vmem:[#allocation19_spill] sm:$0xff] %v18005_v40  ;;  %v5159_v45 = vmul.f32 %v18005_v40, %v18005_v40 }
 0xa51   : > { %v4833_v17 = vadd.f32 %v4665_v3, %v17716_v39  ;;  %v4939_v37 = vpop.f32.mrb[76].mxu1  ;;  %20940 = vst [vmem:[#allocation27_spill] sm:$0xff] %v17999_v22  ;;  %v5160_v44 = vmul.f32 %v17999_v22, %v17999_v22 }
 0xa52   : > { %v17996_v10 = vadd.f32 %v17906_v59, %v4832_v19  ;;  %v4941_v41 = vpop.f32.mrb[77].mxu1  ;;  %v18018_v21 = vmul.f32 0.0625, %v4939_v37 }
 0xa53   : > { %v18002_v23 = vadd.f32 %v17906_v59, %v4833_v17  ;;  %v4811_v29 = vpop.f32.mrb[80].mxu0 }
 0xa54   : > { %20939 = vst [vmem:[#allocation24_spill] sm:$0xff] %v17996_v10  ;;  %v4813_v47 = vpop.f32.mrb[81].mxu0  ;;  %v14782_v39 = vpack.c.bf16 %v17996_v10, %v18005_v40  ;;  %v4828_v63 = vadd.f32 %v4811_v29, %v17778_v43  ;;  %v5473_v9 = vmul.f32 %v18018_v21, %v18018_v21  ;;  %v5167_v61 = vmul.f32 %v17996_v10, %v17996_v10 }
 0xa55   : > { %20941 = vst [vmem:[#allocation20_spill] sm:$0xff] %v18002_v23  ;;  %v14780_v16 = vpack.c.bf16 %v18002_v23, %v17999_v22  ;;  %v4829_v36 = vadd.f32 %v4813_v47, %v17770_v0 }
 0xa56   : > { %v18031_v43 = vadd.f32 %v17911_v13, %v4828_v63  ;;  %v14798_v11 = vpack.c.bf16 %v5167_v61, %v5159_v45  ;;  %v18068_v45 = vpop.permute.xlu0 %5611 }
 0xa57   : > { %v4817_v62 = vpop.f32.mrb[82].mxu0  ;;  %14781 = vmatprep.subr.bf16.mxu0 %v14780_v16  ;;  %v18021_v35 = vadd.f32 %v17911_v13, %v4829_v36 }
 0xa58   : > { %v4836_v32 = vadd.f32 %v4817_v62, %v17767_v30  ;;  %v4819_v12 = vpop.f32.mrb[83].mxu0  ;;  %14783 = vmatpush1.bf16.msra.mxu0 %v14782_v39  ;;  %v5168_v30 = vmul.f32 %v18002_v23, %v18002_v23  ;;  %20946 = vst [vmem:[#allocation28_spill] sm:$0xff] %v18031_v43  ;;  %v5163_v47 = vmul.f32 %v18031_v43, %v18031_v43 }
 0xa59   : > { %v4837_v55 = vadd.f32 %v4819_v12, %v17773_v31  ;;  %v5081_v46 = vpop.f32.mrb[78].mxu1  ;;  %20944 = vst [vmem:[#allocation22_spill] sm:$0xff] %v18021_v35  ;;  %v5458_v31 = vmul.f32 0.0625, %v4941_v41  ;;  %v5164_v1 = vmul.f32 %v18021_v35, %v18021_v35 }
 0xa5a   : > { %v18016_v18 = vadd.f32 %v17906_v59, %v4836_v32  ;;  %v5083_v51 = vpop.f32.mrb[79].mxu1  ;;  %v5461_v42 = vmul.f32 0.0625, %v5081_v46  ;;  %v14796_v56 = vpack.c.bf16 %v5168_v30, %v5160_v44  ;;  %v18066_v30 = vpop.permute.xlu1 %5616 }
 0xa5b   : > { %v18024_v0 = vadd.f32 %v17906_v59, %v4837_v55  ;;  %14132 = vmatmul.mubr.msk.f32.vlgmr.msra.gmra.mrb[84].mxu0 %vm570_vm0, %v20920_v8  ;;  %v5474_v13 = vmul.f32 %v5458_v31, %v5458_v31  ;;  %v5462_v54 = vmul.f32 0.0625, %v5083_v51  ;;  %v5500_v55 = vrot.slane %v18018_v21, %v20933_v52 }
 0xa5c   : > { %20943 = vst [vmem:[#allocation18_spill] sm:$0xff] %v18016_v18  ;;  %5150 = vmatprep.mubr.f32.mxu0 %v20912_v27  ;;  %v14790_v4 = vpack.c.bf16 %v18016_v18, %v18031_v43  ;;  %v5477_v28 = vmul.f32 %v5461_v42, %v5461_v42  ;;  %v5171_v49 = vmul.f32 %v18016_v18, %v18016_v18 }
 0xa5d   : > { %20945 = vst [vmem:[#allocation26_spill] sm:$0xff] %v18024_v0  ;;  %v5239_v59 = vpop.f32.mrb[80].mxu1  ;;  %v14788_v38 = vpack.c.bf16 %v18024_v0, %v18021_v35  ;;  %v5172_v14 = vmul.f32 %v18024_v0, %v18024_v0  ;;  %v5478_v19 = vmul.f32 %v5462_v54, %v5462_v54  ;;  %v5504_v46 = vrot.slane %v5458_v31, %v20933_v52 }
 0xa5e   : > { %v5465_v7 = vmul.f32 0.0625, %v5239_v59  ;;  %v5241_v57 = vpop.f32.mrb[81].mxu1  ;;  %v14806_v62 = vpack.c.bf16 %v5171_v49, %v5163_v47  ;;  %v5537_v44 = vsub.f32 %v17914_v34, %v5500_v55  ;;  %v5520_v61 = vrot.slane %v5462_v54, %v20933_v52 }
 0xa5f   : > { %v5466_v6 = vmul.f32 0.0625, %v5241_v57  ;;  %14789 = vmatprep.subr.bf16.mxu0 %v14788_v38  ;;  %v14804_v37 = vpack.c.bf16 %v5172_v14, %v5164_v1  ;;  %v5529_v38 = vsub.f32 %v17925_v50, %v5500_v55  ;;  %v5530_v21 = vsub.f32 %v17919_v26, %v5504_v46 }
 0xa60   : > { %v5481_v25 = vsub.f32 %v5465_v7, %v5473_v9  ;;  %14791 = vmatpush1.bf16.msra.mxu0 %v14790_v4  ;;  %v5516_v9 = vrot.slane %v5461_v42, %v20933_v52  ;;  %v5538_v31 = vsub.f32 %v17922_v58, %v5504_v46  ;;  %v5534_v54 = vsub.f32 %v17945_v2, %v5520_v61 }
 0xa61   : > { %v5482_v20 = vsub.f32 %v5466_v6, %v5474_v13  ;;  %14797 = vmatprep.subr.bf16.mxu0 %v14796_v56  ;;  %v5381_v60 = vpop.f32.mrb[82].mxu1 }
 0xa62   : > { %v5489_v48 = vmax.f32 %v5481_v25, 0.0  ;;  %v5469_v53 = vmul.f32 0.0625, %v5381_v60  ;;  %v5383_v15 = vpop.f32.mrb[83].mxu1  ;;  %v5533_v42 = vsub.f32 %v17955_v5, %v5516_v9  ;;  %v5541_v56 = vsub.f32 %v17941_v33, %v5516_v9 }
 0xa63   : > { %v5490_v3 = vmax.f32 %v5482_v20, 0.0  ;;  %v5470_v17 = vmul.f32 0.0625, %v5383_v15  ;;  %14134 = vmatmul.mubr.msk.f32.vlgmr.msra.gmra.mrb[86].mxu0 %vm570_vm0, %v20920_v8 }
 0xa64   : > { %v5545_v41 = vadd.f32 1e-05, %v5489_v48  ;;  %v5485_v29 = vsub.f32 %v5469_v53, %v5477_v28  ;;  %14799 = vmatpush1.bf16.msra.mxu0 %v14798_v11  ;;  %5308 = vmatprep.mubr.f32.mxu0 %v20912_v27  ;;  %v18084_v28 = vpop.permute.xlu1 %5642  ;;  %v18086_v48 = vpop.permute.xlu0 %5637  ;;  %v5542_v53 = vsub.f32 %v17948_v24, %v5520_v61 }
 0xa65   : > { %v5546_v16 = vadd.f32 1e-05, %v5490_v3  ;;  %v5486_v39 = vsub.f32 %v5470_v17, %v5478_v19  ;;  %14805 = vmatprep.subr.bf16.mxu0 %v14804_v37 }
 0xa66   : > { %15716 = vrsqrt.f32 %v5545_v41  ;;  %v5493_v36 = vmax.f32 %v5485_v29, 0.0 }
 0xa67   : > { %15718 = vrsqrt.f32 %v5546_v16  ;;  %v5494_v63 = vmax.f32 %v5486_v39, 0.0  ;;  %14136 = vmatmul.mubr.msk.f32.vlgmr.msra.gmra.mrb[88].mxu0 %vm570_vm0, %v20920_v8 }
 0xa68   : > { %v5549_v32 = vadd.f32 1e-05, %v5493_v36  ;;  %14807 = vmatpush1.bf16.msra.mxu0 %v14806_v62  ;;  %5450 = vmatprep.mubr.f32.mxu0 %v20912_v27 }
 0xa69   : > { %v5550_v12 = vadd.f32 1e-05, %v5494_v63 }
 0xa6a   : > { %15720 = vrsqrt.f32 %v5549_v32 }
 0xa6b   : > { %15722 = vrsqrt.f32 %v5550_v12  ;;  %14138 = vmatmul.mubr.msk.f32.vlgmr.msra.gmra.mrb[90].mxu0 %vm570_vm0, %v20920_v8 }
 0xa6c   : > { %6022 = vmatprep.mubr.f32.mxu0 %v20912_v27 }
 0xa70   : > { %v15717_v51 = vpop.eup %15716 }
 0xa71   : > { %v15719_v59 = vpop.eup %15718  ;;  %v5564_v13 = vrot.slane %v15717_v51, %v20933_v52 }
 0xa72   : > { %v5568_v7 = vrot.slane %v15719_v59, %v20933_v52 }
 0xa73   : > { %v5593_v57 = vmul.f32 %v5564_v13, %v5529_v38  ;;  %v5601_v4 = vmul.f32 %v5564_v13, %v5537_v44  ;;  %v18115_v38 = vld [vmem:[%s20906_s27 + $0x40] sm:$0xff]  ;;  %v18127_v13 = vld [vmem:[%s20906_s27 + $0x48] sm:$0xff] }
 0xa74   : > { %v15721_v6 = vpop.eup %15720  ;;  %v5594_v14 = vmul.f32 %v5568_v7, %v5530_v21  ;;  %v5602_v25 = vmul.f32 %v5568_v7, %v5538_v31  ;;  %v18135_v21 = vld [vmem:[%s20906_s27 + $0x50] sm:$0xff]  ;;  %v18143_v31 = vld [vmem:[%s20906_s27 + $0x58] sm:$0xff]  ;;  %v18151_v7 = vld [vmem:[%s20906_s27 + $0x60] sm:$0xff] }
 0xa75   : > { %v15723_v20 = vpop.eup %15722  ;;  %v5580_v60 = vrot.slane %v15721_v6, %v20933_v52  ;;  %v5619_v11 = vmul.f32 %v18068_v45, %v5593_v57  ;;  %v5627_v1 = vmul.f32 %v18066_v30, %v5601_v4  ;;  %v18159_v57 = vld [vmem:[%s20906_s27 + $0x68] sm:$0xff]  ;;  %v18167_v4 = vld [vmem:[%s20906_s27 + $0x70] sm:$0xff]  ;;  %v18175_v6 = vld [vmem:[%s20906_s27 + $0x78] sm:$0xff] }
 0xa76   : > { %v5620_v15 = vmul.f32 %v18068_v45, %v5594_v14  ;;  %v5628_v49 = vmul.f32 %v18066_v30, %v5602_v25  ;;  %v5584_v19 = vrot.slane %v15723_v20, %v20933_v52 }
 0xa77   : > { %v5645_v3 = vadd.f32 %v18086_v48, %v5619_v11  ;;  %v5653_v17 = vadd.f32 %v18084_v28, %v5627_v1  ;;  %v5597_v37 = vmul.f32 %v5580_v60, %v5533_v42  ;;  %v5605_v41 = vmul.f32 %v5580_v60, %v5541_v56 }
 0xa78   : > { %v5646_v29 = vadd.f32 %v18086_v48, %v5620_v15  ;;  %v5654_v47 = vadd.f32 %v18084_v28, %v5628_v49  ;;  %v5598_v16 = vmul.f32 %v5584_v19, %v5534_v54  ;;  %v5606_v39 = vmul.f32 %v5584_v19, %v5542_v53 }
 0xa79   : > { %v14810_v36 = vpack.c.bf16 %v5653_v17, %v5645_v3  ;;  %v5623_v62 = vmul.f32 %v18068_v45, %v5597_v37  ;;  %v5631_v63 = vmul.f32 %v18066_v30, %v5605_v41 }
 0xa7a   : > { %v14808_v32 = vpack.c.bf16 %v5654_v47, %v5646_v29  ;;  %v5624_v12 = vmul.f32 %v18068_v45, %v5598_v16  ;;  %v5632_v55 = vmul.f32 %v18066_v30, %v5606_v39 }
 0xa7b   : > { %v18101_v46 = vadd.f32 %v18086_v48, %v5623_v62  ;;  %v18104_v51 = vadd.f32 %v18084_v28, %v5631_v63 }
 0xa7c   : > { %14809 = vmatprep.subr.bf16.mxu1 %v14808_v32  ;;  %v18107_v9 = vadd.f32 %v18086_v48, %v5624_v12  ;;  %v18110_v59 = vadd.f32 %v18084_v28, %v5632_v55 }
 0xa7d   : > { %14811 = vmatpush1.bf16.msra.mxu1 %v14810_v36 }
 0xa80   : > { %14155 = vmatmul.mubr.msk.f32.vlgmr.msra.gmra.mrb[84].mxu1 %vm570_vm0, %v18115_v38 }
 0xa81   : > { %5813 = vmatprep.mubr.f32.mxu1 %v20912_v27 }
 0xa84   : > { %14156 = vmatmul.mubr.msk.f32.gmra.mrb[86].mxu1 %vm570_vm0, %v18127_v13 }
 0xa85   : > { %5819 = vmatprep.mubr.f32.mxu1 %v20912_v27 }
 0xa88   : > { %14157 = vmatmul.mubr.msk.f32.gmra.mrb[88].mxu1 %vm570_vm0, %v18135_v21 }
 0xa89   : > { %5825 = vmatprep.mubr.f32.mxu1 %v20912_v27 }
 0xa8c   : > { %14158 = vmatmul.mubr.msk.f32.gmra.mrb[90].mxu1 %vm570_vm0, %v18143_v31 }
 0xa8d   : > { %5831 = vmatprep.mubr.f32.mxu1 %v20912_v27 }
 0xa90   : > { %14159 = vmatmul.mubr.msk.f32.gmra.mrb[92].mxu1 %vm570_vm0, %v18151_v7 }
 0xa91   : > { %5837 = vmatprep.mubr.f32.mxu1 %v20912_v27 }
 0xa94   : > { %14160 = vmatmul.mubr.msk.f32.gmra.mrb[94].mxu1 %vm570_vm0, %v18159_v57 }
 0xa95   : > { %5843 = vmatprep.mubr.f32.mxu1 %v20912_v27 }
 0xa98   : > { %14161 = vmatmul.mubr.msk.f32.gmra.mrb[96].mxu1 %vm570_vm0, %v18167_v4 }
 0xa99   : > { %5849 = vmatprep.mubr.f32.mxu1 %v20912_v27 }
 0xa9c   : > { %14162 = vmatmul.mubr.msk.f32.gmra.mrb[98].mxu1 %vm570_vm0, %v18175_v6 }
 0xa9d   : > { %6292 = vmatprep.mubr.f32.mxu1 %v20912_v27 }
 0xb2e   : > { %v5010_v42 = vpop.f32.mrb[84].mxu0 }
 0xb2f   : > { %v5012_v56 = vpop.f32.mrb[85].mxu0  ;;  %v5459_v25 = vmul.f32 0.0625, %v5010_v42 }
 0xb30   : > { %v5460_v54 = vmul.f32 0.0625, %v5012_v56 }
 0xb31   : > { %v5475_v60 = vmul.f32 %v5459_v25, %v5459_v25 }
 0xb32   : > { %v5476_v11 = vmul.f32 %v5460_v54, %v5460_v54 }
 0xb36   : > { %v5152_v14 = vpop.f32.mrb[86].mxu0 }
 0xb37   : > { %v5154_v20 = vpop.f32.mrb[87].mxu0  ;;  %v5463_v53 = vmul.f32 0.0625, %v5152_v14 }
 0xb38   : > { %v5464_v19 = vmul.f32 0.0625, %v5154_v20 }
 0xb39   : > { %v5479_v17 = vmul.f32 %v5463_v53, %v5463_v53 }
 0xb3a   : > { %v5310_v1 = vpop.f32.mrb[88].mxu0  ;;  %v5480_v41 = vmul.f32 %v5464_v19, %v5464_v19 }
 0xb3b   : > { %v5467_v15 = vmul.f32 0.0625, %v5310_v1  ;;  %v5312_v49 = vpop.f32.mrb[89].mxu0 }
 0xb3c   : > { %v5468_v3 = vmul.f32 0.0625, %v5312_v49  ;;  %v5524_v49 = vrot.slane %v5463_v53, %v20933_v52 }
 0xb3d   : > { %v5483_v37 = vsub.f32 %v5467_v15, %v5475_v60  ;;  %v5508_v60 = vrot.slane %v5459_v25, %v20933_v52 }
 0xb3e   : > { %v5484_v29 = vsub.f32 %v5468_v3, %v5476_v11  ;;  %v5452_v47 = vpop.f32.mrb[90].mxu0  ;;  %v5512_v11 = vrot.slane %v5460_v54, %v20933_v52  ;;  %v5535_v53 = vsub.f32 %v18031_v43, %v5524_v49 }
 0xb3f   : > { %v5491_v16 = vmax.f32 %v5483_v37, 0.0  ;;  %v5471_v39 = vmul.f32 0.0625, %v5452_v47  ;;  %v5454_v36 = vpop.f32.mrb[91].mxu0  ;;  %v5539_v37 = vsub.f32 %v17996_v10, %v5508_v60 }
 0xb40   : > { %v5492_v62 = vmax.f32 %v5484_v29, 0.0  ;;  %v5472_v63 = vmul.f32 0.0625, %v5454_v36  ;;  %v5532_v47 = vsub.f32 %v17999_v22, %v5512_v11 }
 0xb41   : > { %v5547_v32 = vadd.f32 1e-05, %v5491_v16  ;;  %v5487_v12 = vsub.f32 %v5471_v39, %v5479_v17  ;;  %v5531_v17 = vsub.f32 %v18005_v40, %v5508_v60  ;;  %v5540_v16 = vsub.f32 %v18002_v23, %v5512_v11 }
 0xb42   : > { %v5548_v55 = vadd.f32 1e-05, %v5492_v62  ;;  %v5488_v42 = vsub.f32 %v5472_v63, %v5480_v41  ;;  %v5528_v41 = vrot.slane %v5464_v19, %v20933_v52 }
 0xb43   : > { %15724 = vrsqrt.f32 %v5547_v32  ;;  %v5495_v56 = vmax.f32 %v5487_v12, 0.0 }
 0xb44   : > { %15726 = vrsqrt.f32 %v5548_v55  ;;  %v5496_v14 = vmax.f32 %v5488_v42, 0.0  ;;  %v5536_v12 = vsub.f32 %v18021_v35, %v5528_v41 }
 0xb45   : > { %v5551_v20 = vadd.f32 1e-05, %v5495_v56  ;;  %v18195_v56 = vpop.permute.xlu0 %5681 }
 0xb46   : > { %v5552_v1 = vadd.f32 1e-05, %v5496_v14  ;;  %v5544_v14 = vsub.f32 %v18024_v0, %v5528_v41 }
 0xb47   : > { %15728 = vrsqrt.f32 %v5551_v20 }
 0xb48   : > { %15730 = vrsqrt.f32 %v5552_v1 }
 0xb4d   : > { %v15725_v15 = vpop.eup %15724 }
 0xb4e   : > { %v15727_v3 = vpop.eup %15726  ;;  %v5572_v29 = vrot.slane %v15725_v15, %v20933_v52 }
 0xb4f   : > { %v5576_v25 = vrot.slane %v15727_v3, %v20933_v52 }
 0xb50   : > { %v5595_v39 = vmul.f32 %v5572_v29, %v5531_v17  ;;  %v5603_v54 = vmul.f32 %v5572_v29, %v5539_v37 }
 0xb51   : > { %v15729_v36 = vpop.eup %15728  ;;  %v5596_v62 = vmul.f32 %v5576_v25, %v5532_v47  ;;  %v5604_v63 = vmul.f32 %v5576_v25, %v5540_v16 }
 0xb52   : > { %v15731_v32 = vpop.eup %15730  ;;  %v5588_v19 = vrot.slane %v15729_v36, %v20933_v52  ;;  %v5621_v55 = vmul.f32 %v18068_v45, %v5595_v39  ;;  %v5629_v42 = vmul.f32 %v18066_v30, %v5603_v54  ;;  %v5543_v39 = vsub.f32 %v18016_v18, %v5524_v49 }
 0xb53   : > { %v5809_v20 = vpop.f32.mrb[84].mxu1  ;;  %v5622_v1 = vmul.f32 %v18068_v45, %v5596_v62  ;;  %v5630_v60 = vmul.f32 %v18066_v30, %v5604_v63  ;;  %v5592_v11 = vrot.slane %v15731_v32, %v20933_v52  ;;  %v18223_v63 = vpop.permute.xlu1 %5686 }
 0xb54   : > { %v18202_v15 = vadd.f32 %v5809_v20, %v18195_v56  ;;  %v5811_v3 = vpop.f32.mrb[85].mxu1  ;;  %v18205_v17 = vadd.f32 %v18086_v48, %v5621_v55  ;;  %v18208_v37 = vadd.f32 %v18084_v28, %v5629_v42  ;;  %v5599_v29 = vmul.f32 %v5588_v19, %v5535_v53 }
 0xb55   : > { %v18211_v41 = vadd.f32 %v5811_v3, %v18195_v56  ;;  %v18214_v47 = vadd.f32 %v18086_v48, %v5622_v1  ;;  %v18217_v16 = vadd.f32 %v18084_v28, %v5630_v60  ;;  %v5600_v25 = vmul.f32 %v5592_v11, %v5536_v12 }
 0xb56   : > { %v5872_v54 = vmul.f32 0.70710677, %v18202_v15  ;;  %v5608_v62 = vmul.f32 %v5592_v11, %v5544_v14  ;;  %v5607_v1 = vmul.f32 %v5588_v19, %v5543_v39  ;;  %v5625_v11 = vmul.f32 %v18068_v45, %v5599_v29 }
 0xb57   : > { %v5873_v53 = vmul.f32 0.70710677, %v18211_v41  ;;  %v5815_v32 = vpop.f32.mrb[86].mxu1  ;;  %v5626_v42 = vmul.f32 %v18068_v45, %v5600_v25 }
 0xb58   : > { %15732 = verf.f32 %v5872_v54  ;;  %v5816_v12 = vadd.f32 %v5815_v32, %v18223_v63  ;;  %v5817_v49 = vpop.f32.mrb[87].mxu1  ;;  %v5634_v20 = vmul.f32 %v18066_v30, %v5608_v62  ;;  %v5633_v25 = vmul.f32 %v18066_v30, %v5607_v1  ;;  %v18240_v54 = vpop.permute.xlu0 %5691 }
 0xb59   : > { %15734 = verf.f32 %v5873_v53  ;;  %v5818_v14 = vadd.f32 %v5817_v49, %v18223_v63  ;;  %v18233_v60 = vadd.f32 %v18086_v48, %v5626_v42  ;;  %v18243_v19 = vadd.f32 %v18086_v48, %v5625_v11  ;;  %v18259_v42 = vpop.permute.xlu1 %5696 }
 0xb5a   : > { %v5874_v3 = vmul.f32 0.70710677, %v5816_v12  ;;  %v18237_v44 = vadd.f32 %v18084_v28, %v5634_v20  ;;  %v18251_v29 = vadd.f32 %v18084_v28, %v5633_v25  ;;  %v5858_v35 = vmul.f32 0.5, %v5816_v12 }
 0xb5b   : > { %v5875_v32 = vmul.f32 0.70710677, %v5818_v14  ;;  %v5821_v61 = vpop.f32.mrb[88].mxu1  ;;  %20947 = vst [vmem:[#allocation29_spill] sm:$0xff] %v18243_v19 }
 0xb5c   : > { %15736 = verf.f32 %v5874_v3  ;;  %v18246_v39 = vadd.f32 %v5821_v61, %v18240_v54  ;;  %v5823_v62 = vpop.f32.mrb[89].mxu1  ;;  %20948 = vst [vmem:[#allocation30_spill] sm:$0xff] %v18251_v29 }
 0xb5d   : > { %15738 = verf.f32 %v5875_v32  ;;  %v18254_v30 = vadd.f32 %v5823_v62, %v18240_v54  ;;  %v18264_v32 = vpop.permute.xlu0 %5701  ;;  %v18274_v0 = vpop.permute.xlu1 %5706 }
 0xb5e   : > { %v5876_v53 = vmul.f32 0.70710677, %v18246_v39 }
 0xb5f   : > { %v5877_v61 = vmul.f32 0.70710677, %v18254_v30  ;;  %v5827_v49 = vpop.f32.mrb[90].mxu1 }
 0xb60   : > { %15740 = verf.f32 %v5876_v53  ;;  %v5828_v20 = vadd.f32 %v5827_v49, %v18259_v42  ;;  %v5829_v1 = vpop.f32.mrb[91].mxu1  ;;  %v5856_v49 = vmul.f32 0.5, %v18202_v15 }
 0xb61   : > { %15742 = verf.f32 %v5877_v61  ;;  %v5830_v28 = vadd.f32 %v5829_v1, %v18259_v42 }
 0xb62   : > { %v15733_v11 = vpop.eup %15732  ;;  %v5878_v3 = vmul.f32 0.70710677, %v5828_v20 }
 0xb63   : > { %v15735_v25 = vpop.eup %15734  ;;  %v5879_v62 = vmul.f32 0.70710677, %v5830_v28  ;;  %v5833_v45 = vpop.f32.mrb[92].mxu1  ;;  %v5904_v55 = vadd.f32 1.0, %v15733_v11 }
 0xb64   : > { %15744 = verf.f32 %v5878_v3  ;;  %v18267_v48 = vadd.f32 %v5833_v45, %v18264_v32  ;;  %v5835_v36 = vpop.f32.mrb[93].mxu1  ;;  %v5905_v1 = vadd.f32 1.0, %v15735_v25  ;;  %v5857_v3 = vmul.f32 0.5, %v18211_v41 }
 0xb65   : > { %15746 = verf.f32 %v5879_v62  ;;  %v18270_v53 = vadd.f32 %v5835_v36, %v18264_v32  ;;  %v5859_v62 = vmul.f32 0.5, %v5818_v14  ;;  %v5920_v15 = vmul.f32 %v5904_v55, %v5856_v49 }
 0xb66   : > { %v15737_v61 = vpop.eup %15736  ;;  %v5880_v52 = vmul.f32 0.70710677, %v18267_v48  ;;  %v5921_v24 = vmul.f32 %v5905_v1, %v5857_v3  ;;  %v18285_v3 = vpop.permute.xlu1 %5716 }
 0xb67   : > { %v15739_v43 = vpop.eup %15738  ;;  %v5906_v45 = vadd.f32 1.0, %v15737_v61  ;;  %v5881_v18 = vmul.f32 0.70710677, %v18270_v53  ;;  %v5839_v11 = vpop.f32.mrb[94].mxu1 }
 0xb68   : > { %v5907_v40 = vadd.f32 1.0, %v15739_v43  ;;  %15748 = verf.f32 %v5880_v52  ;;  %v5840_v36 = vadd.f32 %v5839_v11, %v18274_v0  ;;  %v5841_v10 = vpop.f32.mrb[95].mxu1  ;;  %v18280_v61 = vpop.permute.xlu0 %5711 }
 0xb69   : > { %v5922_v25 = vmul.f32 %v5906_v45, %v5858_v35  ;;  %15750 = verf.f32 %v5881_v18  ;;  %v5842_v22 = vadd.f32 %v5841_v10, %v18274_v0  ;;  %v5860_v35 = vmul.f32 0.5, %v18246_v39 }
 0xb6a   : > { %v15741_v23 = vpop.eup %15740  ;;  %v5923_v33 = vmul.f32 %v5907_v40, %v5859_v62  ;;  %v5882_v41 = vmul.f32 0.70710677, %v5840_v36  ;;  %v5861_v45 = vmul.f32 0.5, %v18254_v30  ;;  %v5862_v62 = vmul.f32 0.5, %v5828_v20 }
 0xb6b   : > { %v15743_v12 = vpop.eup %15742  ;;  %v14814_v5 = vpack.c.bf16 %v5922_v25, %v5920_v15  ;;  %v5883_v2 = vmul.f32 0.70710677, %v5842_v22  ;;  %v5845_v14 = vpop.f32.mrb[96].mxu1  ;;  %v5908_v55 = vadd.f32 1.0, %v15741_v23 }
 0xb6c   : > { %15752 = verf.f32 %v5882_v41  ;;  %v5846_v52 = vadd.f32 %v5845_v14, %v18280_v61  ;;  %v5847_v43 = vpop.f32.mrb[97].mxu1  ;;  %v14812_v11 = vpack.c.bf16 %v5923_v33, %v5921_v24  ;;  %v5909_v40 = vadd.f32 1.0, %v15743_v12 }
 0xb6d   : > { %15754 = verf.f32 %v5883_v2  ;;  %v5848_v18 = vadd.f32 %v5847_v43, %v18280_v61  ;;  %v5863_v33 = vmul.f32 0.5, %v5830_v28  ;;  %v5924_v39 = vmul.f32 %v5908_v55, %v5860_v35 }
 0xb6e   : > { %v15745_v10 = vpop.eup %15744  ;;  %v5884_v49 = vmul.f32 0.70710677, %v5846_v52  ;;  %14813 = vmatprep.subr.bf16.mxu0 %v14812_v11  ;;  %v5925_v11 = vmul.f32 %v5909_v40, %v5861_v45  ;;  %v5864_v55 = vmul.f32 0.5, %v18267_v48  ;;  %v5866_v35 = vmul.f32 0.5, %v5840_v36 }
 0xb6f   : > { %v15747_v1 = vpop.eup %15746  ;;  %v5910_v15 = vadd.f32 1.0, %v15745_v10  ;;  %v5885_v25 = vmul.f32 0.70710677, %v5848_v18  ;;  %v5851_v41 = vpop.f32.mrb[98].mxu1  ;;  %14815 = vmatpush1.bf16.msra.mxu0 %v14814_v5  ;;  %v5865_v40 = vmul.f32 0.5, %v18270_v53  ;;  %v5867_v45 = vmul.f32 0.5, %v5842_v22 }
 0xb70   : > { %v5911_v2 = vadd.f32 1.0, %v15747_v1  ;;  %15756 = verf.f32 %v5884_v49  ;;  %v5852_v24 = vadd.f32 %v5851_v41, %v18285_v3  ;;  %v5853_v23 = vpop.f32.mrb[99].mxu1  ;;  %v5868_v36 = vmul.f32 0.5, %v5846_v52 }
 0xb71   : > { %v5926_v12 = vmul.f32 %v5910_v15, %v5862_v62  ;;  %15758 = verf.f32 %v5885_v25  ;;  %v5854_v14 = vadd.f32 %v5853_v23, %v18285_v3  ;;  %v5869_v53 = vmul.f32 0.5, %v5848_v18 }
 0xb72   : > { %v15749_v43 = vpop.eup %15748  ;;  %v5927_v8 = vmul.f32 %v5911_v2, %v5863_v33  ;;  %v5886_v30 = vmul.f32 0.70710677, %v5852_v24  ;;  %v20949_v52 = vpack.c.bf16 %v18217_v16, %v18214_v47  ;;  %v20950_v18 = vpack.c.bf16 %v18208_v37, %v18205_v17 }
 0xb73   : > { %v15751_v20 = vpop.eup %15750  ;;  %v14818_v10 = vpack.c.bf16 %v5926_v12, %v5924_v39  ;;  %v5887_v19 = vmul.f32 0.70710677, %v5854_v14  ;;  %v5912_v28 = vadd.f32 1.0, %v15749_v43  ;;  %v5871_v22 = vmul.f32 0.5, %v5854_v14 }
 0xb74   : > { %15760 = verf.f32 %v5886_v30  ;;  %v14816_v5 = vpack.c.bf16 %v5927_v8, %v5925_v11  ;;  %v5913_v1 = vadd.f32 1.0, %v15751_v20  ;;  %v5870_v20 = vmul.f32 0.5, %v5852_v24  ;;  %v18309_v24 = vld [vmem:[%s20909_s28 + $0x18] sm:$0xff] }
 0xb75   : > { %15762 = verf.f32 %v5887_v19  ;;  %v5928_v25 = vmul.f32 %v5912_v28, %v5864_v55 }
 0xb76   : > { %v15753_v49 = vpop.eup %15752  ;;  %14817 = vmatprep.subr.bf16.mxu0 %v14816_v5  ;;  %v5929_v23 = vmul.f32 %v5913_v1, %v5865_v40 }
 0xb77   : > { %v15755_v41 = vpop.eup %15754  ;;  %v5914_v62 = vadd.f32 1.0, %v15753_v49  ;;  %14819 = vmatpush1.bf16.msra.mxu0 %v14818_v10 }
 0xb78   : > { %v5915_v15 = vadd.f32 1.0, %v15755_v41 }
 0xb79   : > { %v5930_v33 = vmul.f32 %v5914_v62, %v5866_v35  ;;  %v18295_v62 = vld [vmem:[%s20909_s28 + $0x10] sm:$0xff] }
 0xb7a   : > { %v15757_v2 = vpop.eup %15756  ;;  %v5931_v8 = vmul.f32 %v5915_v15, %v5867_v45 }
 0xb7b   : > { %v15759_v39 = vpop.eup %15758  ;;  %v14822_v19 = vpack.c.bf16 %v5930_v33, %v5928_v25  ;;  %v5916_v43 = vadd.f32 1.0, %v15757_v2 }
 0xb7c   : > { %v14820_v12 = vpack.c.bf16 %v5931_v8, %v5929_v23  ;;  %v5917_v30 = vadd.f32 1.0, %v15759_v39 }
 0xb7d   : > { %v5932_v28 = vmul.f32 %v5916_v43, %v5868_v36 }
 0xb7e   : > { %v15761_v11 = vpop.eup %15760  ;;  %14821 = vmatprep.subr.bf16.mxu0 %v14820_v12  ;;  %v5933_v41 = vmul.f32 %v5917_v30, %v5869_v53 }
 0xb7f   : > { %v15763_v48 = vpop.eup %15762  ;;  %v5918_v10 = vadd.f32 1.0, %v15761_v11  ;;  %14823 = vmatpush1.bf16.msra.mxu0 %v14822_v19 }
 0xb80   : > { %v5919_v5 = vadd.f32 1.0, %v15763_v48 }
 0xb81   : > { %v5934_v49 = vmul.f32 %v5918_v10, %v5870_v20 }
 0xb82   : > { %v5935_v1 = vmul.f32 %v5919_v5, %v5871_v22 }
 0xb83   : > { %v14826_v55 = vpack.c.bf16 %v5934_v49, %v5932_v28 }
 0xb84   : > { %v14824_v35 = vpack.c.bf16 %v5935_v1, %v5933_v41 }
 0xb86   : > { %14825 = vmatprep.subr.bf16.mxu0 %v14824_v35 }
 0xb87   : > { %14827 = vmatpush1.bf16.msra.mxu0 %v14826_v55 }
 0xb88   : > { %14829 = vmatprep.subr.bf16.mxu0 %v20949_v52 }
 0xb8a   : > { %14167 = vmatmul.mubr.msk.f32.vlgmr.msra.gmra.mrb[92].mxu0 %vm2801_vm1, %v18295_v62 }
 0xb8b   : > { %14831 = vmatpush1.bf16.msra.mxu0 %v20950_v18  ;;  %6028 = vmatprep.mubr.f32.mxu0 %v20912_v27 }
 0xb8e   : > { %14168 = vmatmul.mubr.msk.f32.gmra.mrb[94].mxu0 %vm2801_vm1, %v18309_v24 }
 0xb8f   : > { %6099 = vmatprep.mubr.f32.mxu0 %v20912_v27 }
 0xb92   : > { %14169 = vmatmul.mubr.msk.f32.vlgmr.msra.gmra.mrb[96].mxu0 %vm570_vm0, %v18115_v38 }
 0xb93   : > { %6105 = vmatprep.mubr.f32.mxu0 %v20912_v27 }
 0xb96   : > { %14170 = vmatmul.mubr.msk.f32.gmra.mrb[98].mxu0 %vm570_vm0, %v18127_v13 }
 0xb97   : > { %6111 = vmatprep.mubr.f32.mxu0 %v20912_v27 }
 0xb9a   : > { %14171 = vmatmul.mubr.msk.f32.gmra.mrb[100].mxu0 %vm570_vm0, %v18135_v21 }
 0xb9b   : > { %6117 = vmatprep.mubr.f32.mxu0 %v20912_v27 }
 0xb9e   : > { %14172 = vmatmul.mubr.msk.f32.gmra.mrb[102].mxu0 %vm570_vm0, %v18143_v31 }
 0xb9f   : > { %6123 = vmatprep.mubr.f32.mxu0 %v20912_v27 }
 0xba2   : > { %14173 = vmatmul.mubr.msk.f32.gmra.mrb[104].mxu0 %vm570_vm0, %v18151_v7 }
 0xba3   : > { %6129 = vmatprep.mubr.f32.mxu0 %v20912_v27 }
 0xba6   : > { %14174 = vmatmul.mubr.msk.f32.gmra.mrb[106].mxu0 %vm570_vm0, %v18159_v57 }
 0xba7   : > { %6135 = vmatprep.mubr.f32.mxu0 %v20912_v27 }
 0xbaa   : > { %14175 = vmatmul.mubr.msk.f32.gmra.mrb[108].mxu0 %vm570_vm0, %v18167_v4 }
 0xbab   : > { %6141 = vmatprep.mubr.f32.mxu0 %v20912_v27 }
 0xbae   : > { %14176 = vmatmul.mubr.msk.f32.gmra.mrb[110].mxu0 %vm570_vm0, %v18175_v6 }
 0xbaf   : > { %6562 = vmatprep.mubr.f32.mxu0 %v20912_v27 }
 0xc5d   : > { %v18338_v17 = vpop.f32.mrb[92].mxu0 }
 0xc5e   : > { %v18340_v37 = vpop.f32.mrb[93].mxu0 }
 0xc61   : > { %v18342_v47 = vpop.f32.mrb[94].mxu0 }
 0xc62   : > { %v18344_v16 = vpop.f32.mrb[95].mxu0 }
 0xc65   : > { %v6101_v14 = vpop.f32.mrb[96].mxu0 }
 0xc66   : > { %v6102_v40 = vadd.f32 %v6101_v14, %v18195_v56  ;;  %v6103_v45 = vpop.f32.mrb[97].mxu0 }
 0xc67   : > { %v6104_v15 = vadd.f32 %v6103_v45, %v18195_v56 }
 0xc68   : > { %v6164_v25 = vmul.f32 0.70710677, %v6102_v40 }
 0xc69   : > { %v6165_v33 = vmul.f32 0.70710677, %v6104_v15  ;;  %v6107_v2 = vpop.f32.mrb[98].mxu0 }
 0xc6a   : > { %15764 = verf.f32 %v6164_v25  ;;  %v6108_v23 = vadd.f32 %v6107_v2, %v18223_v63  ;;  %v6109_v8 = vpop.f32.mrb[99].mxu0  ;;  %v6148_v25 = vmul.f32 0.5, %v6102_v40 }
 0xc6b   : > { %15766 = verf.f32 %v6165_v33  ;;  %v6110_v39 = vadd.f32 %v6109_v8, %v18223_v63 }
 0xc6c   : > { %v6166_v19 = vmul.f32 0.70710677, %v6108_v23 }
 0xc6d   : > { %v6167_v12 = vmul.f32 0.70710677, %v6110_v39  ;;  %v6113_v43 = vpop.f32.mrb[100].mxu0 }
 0xc6e   : > { %15768 = verf.f32 %v6166_v19  ;;  %v6114_v11 = vadd.f32 %v6113_v43, %v18240_v54  ;;  %v6115_v30 = vpop.f32.mrb[101].mxu0  ;;  %v6149_v19 = vmul.f32 0.5, %v6104_v15 }
 0xc6f   : > { %15770 = verf.f32 %v6167_v12  ;;  %v6116_v48 = vadd.f32 %v6115_v30, %v18240_v54  ;;  %v6150_v12 = vmul.f32 0.5, %v6108_v23 }
 0xc70   : > { %v6168_v36 = vmul.f32 0.70710677, %v6114_v11 }
 0xc71   : > { %v6169_v20 = vmul.f32 0.70710677, %v6116_v48  ;;  %v6119_v10 = vpop.f32.mrb[102].mxu0 }
 0xc72   : > { %15772 = verf.f32 %v6168_v36  ;;  %v6120_v53 = vadd.f32 %v6119_v10, %v18259_v42  ;;  %v6121_v22 = vpop.f32.mrb[103].mxu0 }
 0xc73   : > { %15774 = verf.f32 %v6169_v20  ;;  %v6122_v5 = vadd.f32 %v6121_v22, %v18259_v42  ;;  %v6151_v20 = vmul.f32 0.5, %v6110_v39 }
 0xc74   : > { %v15765_v28 = vpop.eup %15764  ;;  %v6170_v49 = vmul.f32 0.70710677, %v6120_v53 }
 0xc75   : > { %v15767_v41 = vpop.eup %15766  ;;  %v6171_v1 = vmul.f32 0.70710677, %v6122_v5  ;;  %v6125_v55 = vpop.f32.mrb[104].mxu0  ;;  %v6196_v18 = vadd.f32 1.0, %v15765_v28 }
 0xc76   : > { %15776 = verf.f32 %v6170_v49  ;;  %v18355_v35 = vadd.f32 %v6125_v55, %v18264_v32  ;;  %v6127_v52 = vpop.f32.mrb[105].mxu0  ;;  %v6197_v33 = vadd.f32 1.0, %v15767_v41 }
 0xc77   : > { %15778 = verf.f32 %v6171_v1  ;;  %v18358_v14 = vadd.f32 %v6127_v52, %v18264_v32  ;;  %v6212_v49 = vmul.f32 %v6196_v18, %v6148_v25 }
 0xc78   : > { %v15769_v45 = vpop.eup %15768  ;;  %v6172_v2 = vmul.f32 0.70710677, %v18355_v35  ;;  %v6213_v55 = vmul.f32 %v6197_v33, %v6149_v19  ;;  %v6153_v19 = vmul.f32 0.5, %v6116_v48 }
 0xc79   : > { %v15771_v8 = vpop.eup %15770  ;;  %v6198_v43 = vadd.f32 1.0, %v15769_v45  ;;  %v6173_v30 = vmul.f32 0.70710677, %v18358_v14  ;;  %v6131_v36 = vpop.f32.mrb[106].mxu0 }
 0xc7a   : > { %v6199_v10 = vadd.f32 1.0, %v15771_v8  ;;  %15780 = verf.f32 %v6172_v2  ;;  %v6132_v22 = vadd.f32 %v6131_v36, %v18274_v0  ;;  %v6133_v28 = vpop.f32.mrb[107].mxu0 }
 0xc7b   : > { %v6214_v1 = vmul.f32 %v6198_v43, %v6150_v12  ;;  %15782 = verf.f32 %v6173_v30  ;;  %v6134_v40 = vadd.f32 %v6133_v28, %v18274_v0  ;;  %v6152_v12 = vmul.f32 0.5, %v6114_v11 }
 0xc7c   : > { %v15773_v41 = vpop.eup %15772  ;;  %v6215_v52 = vmul.f32 %v6199_v10, %v6151_v20  ;;  %v6174_v15 = vmul.f32 0.70710677, %v6132_v22  ;;  %v6154_v20 = vmul.f32 0.5, %v6120_v53 }
 0xc7d   : > { %v15775_v23 = vpop.eup %15774  ;;  %v14834_v45 = vpack.c.bf16 %v6214_v1, %v6212_v49  ;;  %v6175_v29 = vmul.f32 0.70710677, %v6134_v40  ;;  %v6137_v50 = vpop.f32.mrb[108].mxu0  ;;  %v6200_v36 = vadd.f32 1.0, %v15773_v41  ;;  %v6155_v1 = vmul.f32 0.5, %v6122_v5 }
 0xc7e   : > { %15784 = verf.f32 %v6174_v15  ;;  %v6138_v39 = vadd.f32 %v6137_v50, %v18280_v61  ;;  %v6139_v2 = vpop.f32.mrb[109].mxu0  ;;  %v14832_v8 = vpack.c.bf16 %v6215_v52, %v6213_v55  ;;  %v6201_v43 = vadd.f32 1.0, %v15775_v23 }
 0xc7f   : > { %15786 = verf.f32 %v6175_v29  ;;  %v6140_v18 = vadd.f32 %v6139_v2, %v18280_v61  ;;  %v6216_v55 = vmul.f32 %v6200_v36, %v6152_v12  ;;  %v6156_v36 = vmul.f32 0.5, %v18355_v35 }
 0xc80   : > { %v15777_v25 = vpop.eup %15776  ;;  %v6176_v30 = vmul.f32 0.70710677, %v6138_v39  ;;  %14833 = vmatprep.subr.bf16.mxu1 %v14832_v8  ;;  %v6217_v23 = vmul.f32 %v6201_v43, %v6153_v19  ;;  %v6158_v12 = vmul.f32 0.5, %v6132_v22  ;;  %v6157_v43 = vmul.f32 0.5, %v18358_v14 }
 0xc81   : > { %v15779_v33 = vpop.eup %15778  ;;  %v6202_v10 = vadd.f32 1.0, %v15777_v25  ;;  %v6177_v28 = vmul.f32 0.70710677, %v6140_v18  ;;  %v6143_v49 = vpop.f32.mrb[110].mxu0  ;;  %14835 = vmatpush1.bf16.msra.mxu1 %v14834_v45  ;;  %v6159_v19 = vmul.f32 0.5, %v6134_v40  ;;  %v6160_v22 = vmul.f32 0.5, %v6138_v39 }
 0xc82   : > { %v6203_v50 = vadd.f32 1.0, %v15779_v33  ;;  %15788 = verf.f32 %v6176_v30  ;;  %v6144_v41 = vadd.f32 %v6143_v49, %v18285_v3  ;;  %v6145_v29 = vpop.f32.mrb[111].mxu0  ;;  %v6161_v14 = vmul.f32 0.5, %v6140_v18 }
 0xc83   : > { %v6218_v52 = vmul.f32 %v6202_v10, %v6154_v20  ;;  %15790 = verf.f32 %v6177_v28  ;;  %v6146_v11 = vadd.f32 %v6145_v29, %v18285_v3  ;;  %v20952_v39 = vpack.c.bf16 %v18104_v51, %v18101_v46 }
 0xc84   : > { %v15781_v15 = vpop.eup %15780  ;;  %v6219_v2 = vmul.f32 %v6203_v50, %v6155_v1  ;;  %v6178_v48 = vmul.f32 0.70710677, %v6144_v41 }
 0xc85   : > { %v15783_v53 = vpop.eup %15782  ;;  %v14838_v8 = vpack.c.bf16 %v6218_v52, %v6216_v55  ;;  %v6179_v25 = vmul.f32 0.70710677, %v6146_v11  ;;  %v6204_v5 = vadd.f32 1.0, %v15781_v15  ;;  %v6163_v40 = vmul.f32 0.5, %v6146_v11 }
 0xc86   : > { %15792 = verf.f32 %v6178_v48  ;;  %v14836_v45 = vpack.c.bf16 %v6219_v2, %v6217_v23  ;;  %v6205_v33 = vadd.f32 1.0, %v15783_v53 }
 0xc87   : > { %15794 = verf.f32 %v6179_v25  ;;  %v6220_v28 = vmul.f32 %v6204_v5, %v6156_v36  ;;  %v6162_v25 = vmul.f32 0.5, %v6144_v41 }
 0xc88   : > { %v15785_v30 = vpop.eup %15784  ;;  %14837 = vmatprep.subr.bf16.mxu1 %v14836_v45  ;;  %v6221_v29 = vmul.f32 %v6205_v33, %v6157_v43 }
 0xc89   : > { %v15787_v49 = vpop.eup %15786  ;;  %v6206_v20 = vadd.f32 1.0, %v15785_v30  ;;  %14839 = vmatpush1.bf16.msra.mxu1 %v14838_v8 }
 0xc8a   : > { %v6207_v10 = vadd.f32 1.0, %v15787_v49 }
 0xc8b   : > { %v6222_v1 = vmul.f32 %v6206_v20, %v6158_v12  ;;  %v20951_v20 = vpack.c.bf16 %v18110_v59, %v18107_v9 }
 0xc8c   : > { %v15789_v50 = vpop.eup %15788  ;;  %v6223_v55 = vmul.f32 %v6207_v10, %v6159_v19 }
 0xc8d   : > { %v15791_v52 = vpop.eup %15790  ;;  %v14842_v15 = vpack.c.bf16 %v6222_v1, %v6220_v28  ;;  %v6208_v2 = vadd.f32 1.0, %v15789_v50 }
 0xc8e   : > { %v14840_v23 = vpack.c.bf16 %v6223_v55, %v6221_v29  ;;  %v6209_v53 = vadd.f32 1.0, %v15791_v52 }
 0xc8f   : > { %v6224_v5 = vmul.f32 %v6208_v2, %v6160_v22 }
 0xc90   : > { %v15793_v48 = vpop.eup %15792  ;;  %14841 = vmatprep.subr.bf16.mxu1 %v14840_v23  ;;  %v6225_v49 = vmul.f32 %v6209_v53, %v6161_v14 }
 0xc91   : > { %v15795_v35 = vpop.eup %15794  ;;  %v6210_v8 = vadd.f32 1.0, %v15793_v48  ;;  %14843 = vmatpush1.bf16.msra.mxu1 %v14842_v15 }
 0xc92   : > { %v6211_v45 = vadd.f32 1.0, %v15795_v35 }
 0xc93   : > { %v6226_v30 = vmul.f32 %v6210_v8, %v6162_v25 }
 0xc94   : > { %v6227_v33 = vmul.f32 %v6211_v45, %v6163_v40 }
 0xc95   : > { %v14846_v36 = vpack.c.bf16 %v6226_v30, %v6224_v5 }
 0xc96   : > { %v14844_v12 = vpack.c.bf16 %v6227_v33, %v6225_v49 }
 0xc98   : > { %14845 = vmatprep.subr.bf16.mxu1 %v14844_v12 }
 0xc99   : > { %14847 = vmatpush1.bf16.msra.mxu1 %v14846_v36 }
 0xc9a   : > { %14849 = vmatprep.subr.bf16.mxu1 %v20951_v20 }
 0xc9c   : > { %14177 = vmatmul.mubr.msk.f32.vlgmr.msra.gmra.mrb[100].mxu1 %vm2801_vm1, %v18295_v62 }
 0xc9d   : > { %14851 = vmatpush1.bf16.msra.mxu1 %v20952_v39  ;;  %6298 = vmatprep.mubr.f32.mxu1 %v20912_v27 }
 0xca0   : > { %14178 = vmatmul.mubr.msk.f32.gmra.mrb[102].mxu1 %vm2801_vm1, %v18309_v24 }
 0xca1   : > { %6369 = vmatprep.mubr.f32.mxu1 %v20912_v27 }
 0xca4   : > { %14179 = vmatmul.mubr.msk.f32.vlgmr.msra.gmra.mrb[104].mxu1 %vm570_vm0, %v18115_v38 }
 0xca5   : > { %6375 = vmatprep.mubr.f32.mxu1 %v20912_v27 }
 0xca8   : > { %14180 = vmatmul.mubr.msk.f32.gmra.mrb[106].mxu1 %vm570_vm0, %v18127_v13 }
 0xca9   : > { %6381 = vmatprep.mubr.f32.mxu1 %v20912_v27 }
 0xcac   : > { %14181 = vmatmul.mubr.msk.f32.gmra.mrb[108].mxu1 %vm570_vm0, %v18135_v21 }
 0xcad   : > { %6387 = vmatprep.mubr.f32.mxu1 %v20912_v27 }
 0xcb0   : > { %14182 = vmatmul.mubr.msk.f32.gmra.mrb[110].mxu1 %vm570_vm0, %v18143_v31 }
 0xcb1   : > { %6393 = vmatprep.mubr.f32.mxu1 %v20912_v27 }
 0xcb4   : > { %14183 = vmatmul.mubr.msk.f32.gmra.mrb[112].mxu1 %vm570_vm0, %v18151_v7 }
 0xcb5   : > { %6399 = vmatprep.mubr.f32.mxu1 %v20912_v27 }
 0xcb8   : > { %14184 = vmatmul.mubr.msk.f32.gmra.mrb[114].mxu1 %vm570_vm0, %v18159_v57 }
 0xcb9   : > { %6405 = vmatprep.mubr.f32.mxu1 %v20912_v27 }
 0xcbc   : > { %14185 = vmatmul.mubr.msk.f32.gmra.mrb[116].mxu1 %vm570_vm0, %v18167_v4 }
 0xcbd   : > { %6411 = vmatprep.mubr.f32.mxu1 %v20912_v27 }
 0xcc0   : > { %14186 = vmatmul.mubr.msk.f32.gmra.mrb[118].mxu1 %vm570_vm0, %v18175_v6 }
 0xcc1   : > { %6832 = vmatprep.mubr.f32.mxu1 %v20912_v27 }
 0xd6f   : > { %v18406_v46 = vpop.f32.mrb[100].mxu1 }
 0xd70   : > { %v18408_v51 = vpop.f32.mrb[101].mxu1 }
 0xd73   : > { %v18410_v9 = vpop.f32.mrb[102].mxu1 }
 0xd74   : > { %v18412_v59 = vpop.f32.mrb[103].mxu1 }
 0xd77   : > { %v6371_v38 = vpop.f32.mrb[104].mxu1 }
 0xd78   : > { %v6372_v13 = vadd.f32 %v6371_v38, %v18195_v56  ;;  %v6373_v21 = vpop.f32.mrb[105].mxu1 }
 0xd79   : > { %v6374_v31 = vadd.f32 %v6373_v21, %v18195_v56 }
 0xd7a   : > { %v6434_v7 = vmul.f32 0.70710677, %v6372_v13  ;;  %v6418_v5 = vmul.f32 0.5, %v6372_v13 }
 0xd7b   : > { %v6435_v57 = vmul.f32 0.70710677, %v6374_v31  ;;  %v6377_v4 = vpop.f32.mrb[106].mxu1  ;;  %v6419_v36 = vmul.f32 0.5, %v6374_v31 }
 0xd7c   : > { %15796 = verf.f32 %v6434_v7  ;;  %v6378_v6 = vadd.f32 %v6377_v4, %v18223_v63  ;;  %v6379_v18 = vpop.f32.mrb[107].mxu1 }
 0xd7d   : > { %15798 = verf.f32 %v6435_v57  ;;  %v6380_v41 = vadd.f32 %v6379_v18, %v18223_v63 }
 0xd7e   : > { %v6436_v11 = vmul.f32 0.70710677, %v6378_v6  ;;  %v6420_v12 = vmul.f32 0.5, %v6378_v6 }
 0xd7f   : > { %v6437_v43 = vmul.f32 0.70710677, %v6380_v41  ;;  %v6383_v19 = vpop.f32.mrb[108].mxu1  ;;  %v6421_v21 = vmul.f32 0.5, %v6380_v41 }
 0xd80   : > { %15800 = verf.f32 %v6436_v11  ;;  %v6384_v10 = vadd.f32 %v6383_v19, %v18240_v54  ;;  %v6385_v28 = vpop.f32.mrb[109].mxu1 }
 0xd81   : > { %15802 = verf.f32 %v6437_v43  ;;  %v6386_v1 = vadd.f32 %v6385_v28, %v18240_v54 }
 0xd82   : > { %v6438_v50 = vmul.f32 0.70710677, %v6384_v10 }
 0xd83   : > { %v6439_v29 = vmul.f32 0.70710677, %v6386_v1  ;;  %v6389_v55 = vpop.f32.mrb[110].mxu1 }
 0xd84   : > { %15804 = verf.f32 %v6438_v50  ;;  %v6390_v52 = vadd.f32 %v6389_v55, %v18259_v42  ;;  %v6391_v15 = vpop.f32.mrb[111].mxu1 }
 0xd85   : > { %15806 = verf.f32 %v6439_v29  ;;  %v6392_v23 = vadd.f32 %v6391_v15, %v18259_v42 }
 0xd86   : > { %v15797_v2 = vpop.eup %15796  ;;  %v6440_v48 = vmul.f32 0.70710677, %v6390_v52 }
 0xd87   : > { %v15799_v53 = vpop.eup %15798  ;;  %v6441_v35 = vmul.f32 0.70710677, %v6392_v23  ;;  %v6395_v22 = vpop.f32.mrb[112].mxu1  ;;  %v6466_v14 = vadd.f32 1.0, %v15797_v2 }
 0xd88   : > { %15808 = verf.f32 %v6440_v48  ;;  %v18423_v25 = vadd.f32 %v6395_v22, %v18264_v32  ;;  %v6397_v8 = vpop.f32.mrb[113].mxu1  ;;  %v6467_v30 = vadd.f32 1.0, %v15799_v53  ;;  %v6422_v22 = vmul.f32 0.5, %v6384_v10 }
 0xd89   : > { %15810 = verf.f32 %v6441_v35  ;;  %v18426_v40 = vadd.f32 %v6397_v8, %v18264_v32  ;;  %v6482_v18 = vmul.f32 %v6466_v14, %v6418_v5  ;;  %v6423_v5 = vmul.f32 0.5, %v6386_v1 }
 0xd8a   : > { %v15801_v45 = vpop.eup %15800  ;;  %v6442_v49 = vmul.f32 0.70710677, %v18423_v25  ;;  %v6483_v19 = vmul.f32 %v6467_v30, %v6419_v36  ;;  %v6424_v30 = vmul.f32 0.5, %v6390_v52 }
 0xd8b   : > { %v15803_v33 = vpop.eup %15802  ;;  %v6468_v20 = vadd.f32 1.0, %v15801_v45  ;;  %v6443_v39 = vmul.f32 0.70710677, %v18426_v40  ;;  %v6401_v38 = vpop.f32.mrb[114].mxu1 }
 0xd8c   : > { %v6469_v7 = vadd.f32 1.0, %v15803_v33  ;;  %15812 = verf.f32 %v6442_v49  ;;  %v6402_v57 = vadd.f32 %v6401_v38, %v18274_v0  ;;  %v6403_v4 = vpop.f32.mrb[115].mxu1 }
 0xd8d   : > { %v6484_v11 = vmul.f32 %v6468_v20, %v6420_v12  ;;  %15814 = verf.f32 %v6443_v39  ;;  %v6404_v13 = vadd.f32 %v6403_v4, %v18274_v0  ;;  %v6425_v12 = vmul.f32 0.5, %v6392_v23 }
 0xd8e   : > { %v15805_v43 = vpop.eup %15804  ;;  %v6485_v28 = vmul.f32 %v6469_v7, %v6421_v21  ;;  %v6444_v31 = vmul.f32 0.70710677, %v6402_v57 }
 0xd8f   : > { %v15807_v6 = vpop.eup %15806  ;;  %v14854_v50 = vpack.c.bf16 %v6484_v11, %v6482_v18  ;;  %v6445_v29 = vmul.f32 0.70710677, %v6404_v13  ;;  %v6407_v55 = vpop.f32.mrb[116].mxu1  ;;  %v6470_v48 = vadd.f32 1.0, %v15805_v43 }
 0xd90   : > { %15816 = verf.f32 %v6444_v31  ;;  %v18433_v41 = vadd.f32 %v6407_v55, %v18280_v61  ;;  %v6409_v15 = vpop.f32.mrb[117].mxu1  ;;  %v14852_v2 = vpack.c.bf16 %v6485_v28, %v6483_v19  ;;  %v6471_v8 = vadd.f32 1.0, %v15807_v6 }
 0xd91   : > { %15818 = verf.f32 %v6445_v29  ;;  %v18436_v53 = vadd.f32 %v6409_v15, %v18280_v61  ;;  %v6486_v21 = vmul.f32 %v6470_v48, %v6422_v22  ;;  %v6426_v29 = vmul.f32 0.5, %v18423_v25 }
 0xd92   : > { %v15809_v35 = vpop.eup %15808  ;;  %v6446_v14 = vmul.f32 0.70710677, %v18433_v41  ;;  %14853 = vmatprep.subr.bf16.mxu0 %v14852_v2  ;;  %v6487_v18 = vmul.f32 %v6471_v8, %v6423_v5  ;;  %v6428_v55 = vmul.f32 0.5, %v6402_v57  ;;  %v6427_v2 = vmul.f32 0.5, %v18426_v40 }
 0xd93   : > { %v15811_v45 = vpop.eup %15810  ;;  %v6472_v49 = vadd.f32 1.0, %v15809_v35  ;;  %v6447_v33 = vmul.f32 0.70710677, %v18436_v53  ;;  %v6413_v36 = vpop.f32.mrb[118].mxu1  ;;  %14855 = vmatpush1.bf16.msra.mxu0 %v14854_v50  ;;  %v6429_v48 = vmul.f32 0.5, %v6404_v13 }
 0xd94   : > { %v6473_v20 = vadd.f32 1.0, %v15811_v45  ;;  %15820 = verf.f32 %v6446_v14  ;;  %v6414_v39 = vadd.f32 %v6413_v36, %v18285_v3  ;;  %v6415_v38 = vpop.f32.mrb[119].mxu1  ;;  %v18444_v36 = vpop.permute.xlu1 %5949 }
 0xd95   : > { %v6488_v10 = vmul.f32 %v6472_v49, %v6424_v30  ;;  %15822 = verf.f32 %v6447_v33  ;;  %v6416_v7 = vadd.f32 %v6415_v38, %v18285_v3  ;;  %v6033_v25 = vadd.f32 %v18344_v16, %v18444_v36  ;;  %v18448_v13 = vpop.permute.xlu0 %5944 }
 0xd96   : > { %v15813_v4 = vpop.eup %15812  ;;  %v6489_v1 = vmul.f32 %v6473_v20, %v6425_v12  ;;  %v6448_v52 = vmul.f32 0.70710677, %v6414_v39  ;;  %v6430_v38 = vmul.f32 0.5, %v18433_v41 }
 0xd97   : > { %v15815_v11 = vpop.eup %15814  ;;  %v14858_v43 = vpack.c.bf16 %v6488_v10, %v6486_v21  ;;  %v6449_v19 = vmul.f32 0.70710677, %v6416_v7  ;;  %v6474_v23 = vadd.f32 1.0, %v15813_v4  ;;  %v6432_v21 = vmul.f32 0.5, %v6414_v39 }
 0xd98   : > { %15824 = verf.f32 %v6448_v52  ;;  %v14856_v28 = vpack.c.bf16 %v6489_v1, %v6487_v18  ;;  %v6475_v6 = vadd.f32 1.0, %v15815_v11  ;;  %v6027_v4 = vadd.f32 %v18340_v37, %v18448_v13 }
 0xd99   : > { %15826 = verf.f32 %v6449_v19  ;;  %v6490_v22 = vmul.f32 %v6474_v23, %v6426_v29  ;;  %v6431_v18 = vmul.f32 0.5, %v18436_v53  ;;  %v6433_v1 = vmul.f32 0.5, %v6416_v7  ;;  %v20955_v29 = vld [vmem:[#allocation30_spill] sm:$0xff] }
 0xd9a   : > { %v15817_v31 = vpop.eup %15816  ;;  %14857 = vmatprep.subr.bf16.mxu0 %v14856_v28  ;;  %v6491_v45 = vmul.f32 %v6475_v6, %v6427_v2  ;;  %v18455_v16 = vadd.f32 %v6033_v25, %v17922_v58  ;;  %v18458_v41 = vadd.f32 %v6027_v4, %v17919_v26  ;;  %v6025_v53 = vadd.f32 %v18338_v17, %v18448_v13  ;;  %v20954_v6 = vld [vmem:[#allocation21_spill] sm:$0xff]  ;;  %v16193_v2 = vld [vmem:[%s20906_s27 + $0x58] sm:$0xff]  ;;  %v20959_v25 = vld [vmem:[#allocation31_spill] sm:$0xff] }
 0xd9b   : > { %v15819_v50 = vpop.eup %15818  ;;  %v6476_v15 = vadd.f32 1.0, %v15817_v31  ;;  %14859 = vmatpush1.bf16.msra.mxu0 %v14858_v43  ;;  %v6031_v31 = vadd.f32 %v18342_v47, %v18444_v36  ;;  %v20953_v58 = vpack.c.bf16 %v18237_v44, %v18233_v60  ;;  %v20956_v17 = vld [vmem:[#allocation29_spill] sm:$0xff] }
 0xd9c   : > { %v6477_v35 = vadd.f32 1.0, %v15819_v50  ;;  %v7160_v37 = vmul.f32 %v18455_v16, %v18455_v16  ;;  %v7152_v26 = vmul.f32 %v18458_v41, %v18458_v41  ;;  %v18477_v50 = vadd.f32 %v6025_v53, %v20954_v6 }
 0xd9d   : > { %v6492_v8 = vmul.f32 %v6476_v15, %v6428_v55  ;;  %v18472_v7 = vadd.f32 %v6031_v31, %v17914_v34  ;;  %v20957_v55 = vpack.c.bf16 %v20955_v29, %v20956_v17  ;;  %v16191_v15 = vld [vmem:[%s20906_s27 + $0x48] sm:$0xff] }
 0xd9e   : > { %v15821_v14 = vpop.eup %15820  ;;  %v6493_v5 = vmul.f32 %v6477_v35, %v6429_v48  ;;  %v14904_v47 = vpack.c.bf16 %v7160_v37, %v7152_v26  ;;  %v7151_v34 = vmul.f32 %v18477_v50, %v18477_v50  ;;  %v16194_v48 = vld [vmem:[%s20906_s27 + $0x60] sm:$0xff]  ;;  %v16195_v35 = vld [vmem:[%s20906_s27 + $0x68] sm:$0xff] }
 0xd9f   : > { %v15823_v30 = vpop.eup %15822  ;;  %v14862_v49 = vpack.c.bf16 %v6492_v8, %v6490_v22  ;;  %v6478_v12 = vadd.f32 1.0, %v15821_v14  ;;  %v7159_v44 = vmul.f32 %v18472_v7, %v18472_v7  ;;  %v16196_v22 = vld [vmem:[%s20906_s27 + $0x70] sm:$0xff]  ;;  %v16197_v8 = vld [vmem:[%s20906_s27 + $0x78] sm:$0xff]  ;;  %v20958_v14 = vmov 1.0  }
 0xda0   : > { %v14860_v33 = vpack.c.bf16 %v6493_v5, %v6491_v45  ;;  %v6479_v57 = vadd.f32 1.0, %v15823_v30 }
 0xda1   : > { %v6494_v11 = vmul.f32 %v6478_v12, %v6430_v38  ;;  %v14906_v60 = vpack.c.bf16 %v7159_v44, %v7151_v34  ;;  %v20960_v38 = vld [vmem:[#allocation23_spill] sm:$0xff] }
 0xda2   : > { %v15825_v20 = vpop.eup %15824  ;;  %14861 = vmatprep.subr.bf16.mxu0 %v14860_v33  ;;  %v6495_v19 = vmul.f32 %v6479_v57, %v6431_v18  ;;  %v20962_v18 = vld [vmem:[#allocation25_spill] sm:$0xff] }
 0xda3   : > { %v15827_v40 = vpop.eup %15826  ;;  %v6480_v10 = vadd.f32 1.0, %v15825_v20  ;;  %14863 = vmatpush1.bf16.msra.mxu0 %v14862_v49 }
 0xda4   : > { %v6481_v52 = vadd.f32 1.0, %v15827_v40 }
 0xda5   : > { %v6496_v43 = vmul.f32 %v6480_v10, %v6432_v21  ;;  %v20961_v10 = vld [vmem:[#allocation32_spill] sm:$0xff] }
 0xda6   : > { %v6497_v28 = vmul.f32 %v6481_v52, %v6433_v1 }
 0xda7   : > { %v14866_v23 = vpack.c.bf16 %v6496_v43, %v6494_v11 }
 0xda8   : > { %v14864_v39 = vpack.c.bf16 %v6497_v28, %v6495_v19 }
 0xdaa   : > { %14865 = vmatprep.subr.bf16.mxu0 %v14864_v39 }
 0xdab   : > { %14867 = vmatpush1.bf16.msra.mxu0 %v14866_v23 }
 0xdac   : > { %14869 = vmatprep.subr.bf16.mxu0 %v20953_v58 }
 0xdae   : > { %14187 = vmatmul.mubr.msk.f32.vlgmr.msra.gmra.mrb[112].mxu0 %vm2801_vm1, %v18295_v62  ;;  %v16190_v62 = vld [vmem:[%s20906_s27 + $0x40] sm:$0xff] }
 0xdaf   : > { %14871 = vmatpush1.bf16.msra.mxu0 %v20957_v55  ;;  %6568 = vmatprep.mubr.f32.mxu0 %v20912_v27 }
 0xdb0   : > { %14905 = vmatprep.subr.bf16.mxu0 %v14904_v47 }
 0xdb2   : > { %14188 = vmatmul.mubr.msk.f32.gmra.mrb[114].mxu0 %vm2801_vm1, %v18309_v24  ;;  %v16192_v24 = vld [vmem:[%s20906_s27 + $0x50] sm:$0xff] }
 0xdb3   : > { %6639 = vmatprep.mubr.f32.mxu0 %v20912_v27 }
 0xdb6   : > { %14189 = vmatmul.mubr.msk.f32.vlgmr.msra.gmra.mrb[116].mxu0 %vm570_vm0, %v16190_v62 }
 0xdb7   : > { %14907 = vmatpush1.bf16.msra.mxu0 %v14906_v60  ;;  %6645 = vmatprep.mubr.f32.mxu0 %v20912_v27 }
 0xdba   : > { %14190 = vmatmul.mubr.msk.f32.gmra.mrb[118].mxu0 %vm570_vm0, %v16191_v15 }
 0xdbb   : > { %6651 = vmatprep.mubr.f32.mxu0 %v20912_v27 }
 0xdbe   : > { %14191 = vmatmul.mubr.msk.f32.gmra.mrb[120].mxu0 %vm570_vm0, %v16192_v24 }
 0xdbf   : > { %6657 = vmatprep.mubr.f32.mxu0 %v20912_v27 }
 0xdc2   : > { %14192 = vmatmul.mubr.msk.f32.gmra.mrb[122].mxu0 %vm570_vm0, %v16193_v2 }
 0xdc3   : > { %6663 = vmatprep.mubr.f32.mxu0 %v20912_v27 }
 0xdc6   : > { %14193 = vmatmul.mubr.msk.f32.gmra.mrb[124].mxu0 %vm570_vm0, %v16194_v48 }
 0xdc7   : > { %6669 = vmatprep.mubr.f32.mxu0 %v20912_v27 }
 0xdca   : > { %14194 = vmatmul.mubr.msk.f32.gmra.mrb[126].mxu0 %vm570_vm0, %v16195_v35 }
 0xdcb   : > { %6675 = vmatprep.mubr.f32.mxu0 %v20912_v27 }
 0xdce   : > { %14195 = vmatmul.mubr.msk.f32.gmra.mrb[128].mxu0 %vm570_vm0, %v16196_v22 }
 0xdcf   : > { %6681 = vmatprep.mubr.f32.mxu0 %v20912_v27 }
 0xdd2   : > { %14196 = vmatmul.mubr.msk.f32.gmra.mrb[130].mxu0 %vm570_vm0, %v16197_v8 }
 0xdd3   : > { %7231 = vmatprep.mubr.f32.mxu0 %v20912_v27 }
 0xdd6   : > { %14207 = vmatmul.mubr.msk.f32.vlgmr.msra.gmra.mrb[132].mxu0 %vm570_vm0, %v20958_v14 }
 0xdd7   : > { %7373 = vmatprep.mubr.f32.mxu0 %v20912_v27 }
 0xe81   : > { %v6564_v45 = vpop.f32.mrb[112].mxu0 }
 0xe82   : > { %v6566_v5 = vpop.f32.mrb[113].mxu0  ;;  %v6565_v49 = vadd.f32 %v6564_v45, %v18448_v13 }
 0xe83   : > { %v6567_v30 = vadd.f32 %v6566_v5, %v18448_v13 }
 0xe84   : > { %v18541_v21 = vadd.f32 %v6565_v49, %v20960_v38 }
 0xe85   : > { %v6570_v33 = vpop.f32.mrb[114].mxu0  ;;  %v18537_v57 = vadd.f32 %v6567_v30, %v20959_v25 }
 0xe86   : > { %v6571_v12 = vadd.f32 %v6570_v33, %v18444_v36  ;;  %v6572_v20 = vpop.f32.mrb[115].mxu0  ;;  %v7155_v37 = vmul.f32 %v18541_v21, %v18541_v21 }
 0xe87   : > { %v6573_v40 = vadd.f32 %v6572_v20, %v18444_v36  ;;  %v7156_v23 = vmul.f32 %v18537_v57, %v18537_v57 }
 0xe88   : > { %v18544_v4 = vadd.f32 %v6571_v12, %v20961_v10 }
 0xe89   : > { %v18547_v1 = vadd.f32 %v6573_v40, %v20962_v18  ;;  %v6641_v52 = vpop.f32.mrb[116].mxu0 }
 0xe8a   : > { %v6642_v11 = vadd.f32 %v6641_v52, %v18195_v56  ;;  %v6643_v43 = vpop.f32.mrb[117].mxu0  ;;  %v7163_v19 = vmul.f32 %v18544_v4, %v18544_v4 }
 0xe8b   : > { %v6644_v28 = vadd.f32 %v6643_v43, %v18195_v56  ;;  %v7164_v39 = vmul.f32 %v18547_v1, %v18547_v1 }
 0xe8c   : > { %v6704_v31 = vmul.f32 0.70710677, %v6642_v11  ;;  %v14914_v29 = vpack.c.bf16 %v7163_v19, %v7155_v37  ;;  %v6688_v25 = vmul.f32 0.5, %v6642_v11 }
 0xe8d   : > { %v6705_v53 = vmul.f32 0.70710677, %v6644_v28  ;;  %v6647_v58 = vpop.f32.mrb[118].mxu0  ;;  %v14912_v26 = vpack.c.bf16 %v7164_v39, %v7156_v23  ;;  %v6689_v10 = vmul.f32 0.5, %v6644_v28 }
 0xe8e   : > { %15828 = verf.f32 %v6704_v31  ;;  %v6648_v47 = vadd.f32 %v6647_v58, %v18223_v63  ;;  %v6649_v6 = vpop.f32.mrb[119].mxu0 }
 0xe8f   : > { %15830 = verf.f32 %v6705_v53  ;;  %v6650_v56 = vadd.f32 %v6649_v6, %v18223_v63  ;;  %14913 = vmatprep.subr.bf16.mxu0 %v14912_v26 }
 0xe90   : > { %v6706_v17 = vmul.f32 0.70710677, %v6648_v47  ;;  %14915 = vmatpush1.bf16.msra.mxu0 %v14914_v29  ;;  %v6690_v18 = vmul.f32 0.5, %v6648_v47 }
 0xe91   : > { %v6707_v55 = vmul.f32 0.70710677, %v6650_v56  ;;  %v6653_v44 = vpop.f32.mrb[120].mxu0  ;;  %v6691_v23 = vmul.f32 0.5, %v6650_v56 }
 0xe92   : > { %15832 = verf.f32 %v6706_v17  ;;  %v6654_v34 = vadd.f32 %v6653_v44, %v18240_v54  ;;  %v6655_v60 = vpop.f32.mrb[121].mxu0 }
 0xe93   : > { %15834 = verf.f32 %v6707_v55  ;;  %v6656_v62 = vadd.f32 %v6655_v60, %v18240_v54  ;;  %14209 = vmatmul.mubr.msk.f32.vlgmr.msra.gmra.mrb[134].mxu0 %vm570_vm0, %v20958_v14 }
 0xe94   : > { %v6708_v15 = vmul.f32 0.70710677, %v6654_v34  ;;  %7728 = vmatprep.mubr.f32.mxu0 %v20912_v27 }
 0xe95   : > { %v6709_v24 = vmul.f32 0.70710677, %v6656_v62  ;;  %v6659_v63 = vpop.f32.mrb[122].mxu0 }
 0xe96   : > { %15836 = verf.f32 %v6708_v15  ;;  %v6660_v2 = vadd.f32 %v6659_v63, %v18259_v42  ;;  %v6661_v48 = vpop.f32.mrb[123].mxu0 }
 0xe97   : > { %15838 = verf.f32 %v6709_v24  ;;  %v6662_v35 = vadd.f32 %v6661_v48, %v18259_v42  ;;  %v6692_v48 = vmul.f32 0.5, %v6654_v34 }
 0xe98   : > { %v15829_v22 = vpop.eup %15828  ;;  %v6710_v8 = vmul.f32 0.70710677, %v6660_v2 }
 0xe99   : > { %v15831_v45 = vpop.eup %15830  ;;  %v6711_v5 = vmul.f32 0.70710677, %v6662_v35  ;;  %v6665_v54 = vpop.f32.mrb[124].mxu0  ;;  %v6736_v33 = vadd.f32 1.0, %v15829_v22 }
 0xe9a   : > { %15840 = verf.f32 %v6710_v8  ;;  %v18569_v30 = vadd.f32 %v6665_v54, %v18264_v32  ;;  %v6667_v49 = vpop.f32.mrb[125].mxu0  ;;  %v6737_v40 = vadd.f32 1.0, %v15831_v45  ;;  %v6693_v45 = vmul.f32 0.5, %v6656_v62 }
 0xe9b   : > { %15842 = verf.f32 %v6711_v5  ;;  %v18572_v12 = vadd.f32 %v6667_v49, %v18264_v32  ;;  %v6752_v32 = vmul.f32 %v6736_v33, %v6688_v25  ;;  %v6694_v5 = vmul.f32 0.5, %v6660_v2 }
 0xe9c   : > { %v15833_v20 = vpop.eup %15832  ;;  %v6712_v42 = vmul.f32 0.70710677, %v18569_v30  ;;  %v6753_v26 = vmul.f32 %v6737_v40, %v6689_v10 }
 0xe9d   : > { %v15835_v38 = vpop.eup %15834  ;;  %v6738_v52 = vadd.f32 1.0, %v15833_v20  ;;  %v6713_v43 = vmul.f32 0.70710677, %v18572_v12  ;;  %v6671_v19 = vpop.f32.mrb[126].mxu0  ;;  %v6695_v20 = vmul.f32 0.5, %v6662_v35 }
 0xe9e   : > { %v6739_v39 = vadd.f32 1.0, %v15835_v38  ;;  %15844 = verf.f32 %v6712_v42  ;;  %v6672_v31 = vadd.f32 %v6671_v19, %v18274_v0  ;;  %v6673_v37 = vpop.f32.mrb[127].mxu0 }
 0xe9f   : > { %v6754_v53 = vmul.f32 %v6738_v52, %v6690_v18  ;;  %15846 = verf.f32 %v6713_v43  ;;  %v6674_v11 = vadd.f32 %v6673_v37, %v18274_v0 }
 0xea0   : > { %v15837_v58 = vpop.eup %15836  ;;  %v6755_v6 = vmul.f32 %v6739_v39, %v6691_v23  ;;  %v6714_v28 = vmul.f32 0.70710677, %v6672_v31 }
 0xea1   : > { %v15839_v47 = vpop.eup %15838  ;;  %v14874_v29 = vpack.c.bf16 %v6754_v53, %v6752_v32  ;;  %v6715_v17 = vmul.f32 0.70710677, %v6674_v11  ;;  %v6677_v55 = vpop.f32.mrb[128].mxu0  ;;  %v6740_v15 = vadd.f32 1.0, %v15837_v58  ;;  %v6696_v53 = vmul.f32 0.5, %v18569_v30 }
 0xea2   : > { %15848 = verf.f32 %v6714_v28  ;;  %v6678_v56 = vadd.f32 %v6677_v55, %v18280_v61  ;;  %v6679_v44 = vpop.f32.mrb[129].mxu0  ;;  %v14872_v60 = vpack.c.bf16 %v6755_v6, %v6753_v26  ;;  %v6741_v0 = vadd.f32 1.0, %v15839_v47 }
 0xea3   : > { %15850 = verf.f32 %v6715_v17  ;;  %v6680_v24 = vadd.f32 %v6679_v44, %v18280_v61  ;;  %v6756_v38 = vmul.f32 %v6740_v15, %v6692_v48  ;;  %v6698_v58 = vmul.f32 0.5, %v6672_v31 }
 0xea4   : > { %v15841_v63 = vpop.eup %15840  ;;  %v6716_v22 = vmul.f32 0.70710677, %v6678_v56  ;;  %14873 = vmatprep.subr.bf16.mxu1 %v14872_v60  ;;  %v6757_v18 = vmul.f32 %v6741_v0, %v6693_v45  ;;  %v6699_v6 = vmul.f32 0.5, %v6674_v11  ;;  %v6700_v31 = vmul.f32 0.5, %v6678_v56 }
 0xea5   : > { %v15843_v8 = vpop.eup %15842  ;;  %v6742_v54 = vadd.f32 1.0, %v15841_v63  ;;  %v6717_v49 = vmul.f32 0.70710677, %v6680_v24  ;;  %v6683_v33 = vpop.f32.mrb[130].mxu0  ;;  %14875 = vmatpush1.bf16.msra.mxu1 %v14874_v29 }
 0xea6   : > { %v6743_v25 = vadd.f32 1.0, %v15843_v8  ;;  %15852 = verf.f32 %v6716_v22  ;;  %v6684_v40 = vadd.f32 %v6683_v33, %v18285_v3  ;;  %v6685_v42 = vpop.f32.mrb[131].mxu0  ;;  %v6303_v33 = vadd.f32 %v18412_v59, %v18444_v36 }
 0xea7   : > { %v6758_v61 = vmul.f32 %v6742_v54, %v6694_v5  ;;  %15854 = verf.f32 %v6717_v49  ;;  %v6686_v34 = vadd.f32 %v6685_v42, %v18285_v3  ;;  %v6697_v3 = vmul.f32 0.5, %v18572_v12 }
 0xea8   : > { %v15845_v10 = vpop.eup %15844  ;;  %v6759_v52 = vmul.f32 %v6743_v25, %v6695_v20  ;;  %v6718_v62 = vmul.f32 0.70710677, %v6684_v40  ;;  %v6702_v8 = vmul.f32 0.5, %v6684_v40  ;;  %v6701_v12 = vmul.f32 0.5, %v6680_v24  ;;  %v20964_v40 = vld [vmem:[#allocation27_spill] sm:$0xff] }
 0xea9   : > { %v15847_v2 = vpop.eup %15846  ;;  %v14878_v43 = vpack.c.bf16 %v6758_v61, %v6756_v38  ;;  %v6719_v19 = vmul.f32 0.70710677, %v6686_v34  ;;  %v6744_v35 = vadd.f32 1.0, %v15845_v10  ;;  %v6703_v11 = vmul.f32 0.5, %v6686_v34  ;;  %v20963_v10 = vld [vmem:[#allocation20_spill] sm:$0xff] }
 0xeaa   : > { %15856 = verf.f32 %v6718_v62  ;;  %v14876_v23 = vpack.c.bf16 %v6759_v52, %v6757_v18  ;;  %v6745_v37 = vadd.f32 1.0, %v15847_v2  ;;  %v6297_v38 = vadd.f32 %v18408_v51, %v18448_v13  ;;  %v16198_v51 = vld [vmem:[%s20909_s28 + $0x10] sm:$0xff] }
 0xeab   : > { %15858 = verf.f32 %v6719_v19  ;;  %v6760_v47 = vmul.f32 %v6744_v35, %v6696_v53  ;;  %v18589_v56 = vadd.f32 %v6303_v33, %v20963_v10  ;;  %v14888_v24 = vpack.c.bf16 %v18455_v16, %v18458_v41  ;;  %v20966_v19 = vld [vmem:[#allocation19_spill] sm:$0xff] }
 0xeac   : > { %v15849_v39 = vpop.eup %15848  ;;  %14877 = vmatprep.subr.bf16.mxu1 %v14876_v23  ;;  %v6761_v55 = vmul.f32 %v6745_v37, %v6697_v3  ;;  %v18594_v34 = vadd.f32 %v6297_v38, %v20964_v40  ;;  %v6301_v59 = vadd.f32 %v18410_v9, %v18444_v36  ;;  %v14890_v18 = vpack.c.bf16 %v18472_v7, %v18477_v50  ;;  %v20965_v9 = vld [vmem:[#allocation24_spill] sm:$0xff]  ;;  %v7233_v37 = vpop.f32.mrb[132].mxu0 }
 0xead   : > { %v15851_v32 = vpop.eup %15850  ;;  %v6746_v26 = vadd.f32 1.0, %v15849_v39  ;;  %14879 = vmatpush1.bf16.msra.mxu1 %v14878_v43  ;;  %v6295_v62 = vadd.f32 %v18406_v46, %v18448_v13  ;;  %v16199_v43 = vld [vmem:[%s20909_s28 + $0x18] sm:$0xff]  ;;  %v14896_v35 = vpack.c.bf16 %v18547_v1, %v18537_v57  ;;  %v14898_v39 = vpack.c.bf16 %v18544_v4, %v18541_v21 }
 0xeae   : > { %v6747_v28 = vadd.f32 1.0, %v15851_v32  ;;  %v14892_v52 = vpack.c.bf16 %v18589_v56, %v18594_v34  ;;  %v18610_v2 = vadd.f32 %v6301_v59, %v20965_v9  ;;  %v7235_v32 = vpop.f32.mrb[133].mxu0 }
 0xeaf   : > { %v6762_v29 = vmul.f32 %v6746_v26, %v6698_v58  ;;  %v18617_v23 = vadd.f32 %v6295_v62, %v20966_v19 }
 0xeb0   : > { %v15853_v17 = vpop.eup %15852  ;;  %v6763_v44 = vmul.f32 %v6747_v28, %v6699_v6 }
 0xeb1   : > { %v15855_v60 = vpop.eup %15854  ;;  %v14882_v15 = vpack.c.bf16 %v6762_v29, %v6760_v47  ;;  %v6748_v48 = vadd.f32 1.0, %v15853_v17  ;;  %v14894_v46 = vpack.c.bf16 %v18610_v2, %v18617_v23  ;;  %v7153_v40 = vmul.f32 %v18617_v23, %v18617_v23 }
 0xeb2   : > { %v14880_v63 = vpack.c.bf16 %v6763_v44, %v6761_v55  ;;  %v6749_v22 = vadd.f32 1.0, %v15855_v60  ;;  %v20967_v44 = vld [vmem:[#allocation18_spill] sm:$0xff] }
 0xeb3   : > { %v6764_v54 = vmul.f32 %v6748_v48, %v6700_v31  ;;  %v20969_v48 = vld [vmem:[#allocation26_spill] sm:$0xff]  ;;  %v20970_v31 = vld [vmem:[#allocation28_spill] sm:$0xff] }
 0xeb4   : > { %v15857_v0 = vpop.eup %15856  ;;  %14881 = vmatprep.subr.bf16.mxu1 %v14880_v63  ;;  %v6765_v20 = vmul.f32 %v6749_v22, %v6701_v12  ;;  %v7459_v12 = vmul.f32 0.0625, %v7233_v37 }
 0xeb5   : > { %v15859_v30 = vpop.eup %15858  ;;  %v6750_v45 = vadd.f32 1.0, %v15857_v0  ;;  %14883 = vmatpush1.bf16.msra.mxu1 %v14882_v15  ;;  %v20968_v15 = vld [vmem:[#allocation22_spill] sm:$0xff] }
 0xeb6   : > { %v6751_v5 = vadd.f32 1.0, %v15859_v30  ;;  %v7162_v30 = vmul.f32 %v18589_v56, %v18589_v56 }
 0xeb7   : > { %v6766_v49 = vmul.f32 %v6750_v45, %v6702_v8 }
 0xeb8   : > { %v6767_v25 = vmul.f32 %v6751_v5, %v6703_v11  ;;  %v7460_v11 = vmul.f32 0.0625, %v7235_v32 }
 0xeb9   : > { %v14886_v42 = vpack.c.bf16 %v6766_v49, %v6764_v54  ;;  %v7154_v54 = vmul.f32 %v18594_v34, %v18594_v34 }
 0xeba   : > { %v14884_v61 = vpack.c.bf16 %v6767_v25, %v6765_v20  ;;  %v7161_v20 = vmul.f32 %v18610_v2, %v18610_v2 }
 0xebb   : > { %v14908_v38 = vpack.c.bf16 %v7162_v30, %v7154_v54 }
 0xebc   : > { %14885 = vmatprep.subr.bf16.mxu1 %v14884_v61 }
 0xebd   : > { %14887 = vmatpush1.bf16.msra.mxu1 %v14886_v42 }
 0xebe   : > { %14889 = vmatprep.subr.bf16.mxu1 %v14888_v24 }
 0xec0   : > { %14197 = vmatmul.mubr.msk.f32.vlgmr.msra.gmra.mrb[120].mxu1 %vm2801_vm1, %v16198_v51 }
 0xec1   : > { %14891 = vmatpush1.bf16.msra.mxu1 %v14890_v18  ;;  %6838 = vmatprep.mubr.f32.mxu1 %v20912_v27 }
 0xec2   : > { %14893 = vmatprep.subr.bf16.mxu1 %v14892_v52  ;;  %v14910_v52 = vpack.c.bf16 %v7161_v20, %v7153_v40 }
 0xec4   : > { %14198 = vmatmul.mubr.msk.f32.gmra.mrb[122].mxu1 %vm2801_vm1, %v16199_v43 }
 0xec5   : > { %6931 = vmatprep.mubr.f32.mxu1 %v20912_v27 }
 0xec8   : > { %14203 = vmatmul.mubr.msk.f32.vlgmr.msra.gmra.mrb[124].mxu1 %vm570_vm0, %v20958_v14 }
 0xec9   : > { %14895 = vmatpush1.bf16.msra.mxu1 %v14894_v46  ;;  %7002 = vmatprep.mubr.f32.mxu1 %v20912_v27 }
 0xeca   : > { %14897 = vmatprep.subr.bf16.mxu1 %v14896_v35 }
 0xecc   : > { %14204 = vmatmul.mubr.msk.f32.vlgmr.msra.gmra.mrb[126].mxu1 %vm570_vm0, %v20958_v14 }
 0xecd   : > { %14899 = vmatpush1.bf16.msra.mxu1 %v14898_v39  ;;  %7073 = vmatprep.mubr.f32.mxu1 %v20912_v27 }
 0xed0   : > { %14205 = vmatmul.mubr.msk.f32.vlgmr.msra.gmra.mrb[128].mxu1 %vm570_vm0, %v20958_v14 }
 0xed1   : > { %7144 = vmatprep.mubr.f32.mxu1 %v20912_v27 }
 0xf66   : > { %v7375_v53 = vpop.f32.mrb[134].mxu0 }
 0xf67   : > { %v7377_v58 = vpop.f32.mrb[135].mxu0  ;;  %v7463_v37 = vmul.f32 0.0625, %v7375_v53 }
 0xf93   : > { %v6834_v26 = vpop.f32.mrb[120].mxu1 }
 0xf94   : > { %v6836_v3 = vpop.f32.mrb[121].mxu1  ;;  %v6835_v47 = vadd.f32 %v6834_v26, %v18448_v13 }
 0xf95   : > { %v6837_v6 = vadd.f32 %v6836_v3, %v18448_v13 }
 0xf96   : > { %v18651_v13 = vadd.f32 %v6835_v47, %v20970_v31 }
 0xf97   : > { %v6840_v28 = vpop.f32.mrb[122].mxu1  ;;  %v18643_v63 = vadd.f32 %v6837_v6, %v20968_v15  ;;  %v7464_v6 = vmul.f32 0.0625, %v7377_v58  ;;  %v20971_v15 = vld [vmem:[#allocation17_spill] sm:$0xff] }
 0xf98   : > { %v6841_v29 = vadd.f32 %v6840_v28, %v18444_v36  ;;  %v6842_v17 = vpop.f32.mrb[123].mxu1  ;;  %v7157_v32 = vmul.f32 %v18651_v13, %v18651_v13 }
 0xf99   : > { %v6843_v55 = vadd.f32 %v6842_v17, %v18444_v36  ;;  %v7158_v18 = vmul.f32 %v18643_v63, %v18643_v63 }
 0xf9a   : > { %v18640_v60 = vadd.f32 %v6841_v29, %v20967_v44 }
 0xf9b   : > { %v18646_v0 = vadd.f32 %v6843_v55, %v20969_v48  ;;  %v6933_v22 = vpop.f32.mrb[124].mxu1 }
 0xf9c   : > { %v7451_v8 = vmul.f32 0.0625, %v6933_v22  ;;  %v6935_v45 = vpop.f32.mrb[125].mxu1  ;;  %v14902_v33 = vpack.c.bf16 %v18640_v60, %v18651_v13  ;;  %v7165_v62 = vmul.f32 %v18640_v60, %v18640_v60 }
 0xf9d   : > { %v7452_v36 = vmul.f32 0.0625, %v6935_v45  ;;  %v14900_v5 = vpack.c.bf16 %v18646_v0, %v18643_v63  ;;  %v7166_v61 = vmul.f32 %v18646_v0, %v18646_v0  ;;  %v18686_v45 = vpop.permute.xlu1 %7610 }
 0xf9e   : > { %v7467_v49 = vmul.f32 %v7451_v8, %v7451_v8  ;;  %v14918_v47 = vpack.c.bf16 %v7165_v62, %v7157_v32  ;;  %v7494_v48 = vrot.slane %v7451_v8, %v20971_v15 }
 0xf9f   : > { %v7468_v25 = vmul.f32 %v7452_v36, %v7452_v36  ;;  %v18661_v42 = vpop.f32.mrb[126].mxu1  ;;  %14901 = vmatprep.subr.bf16.mxu1 %v14900_v5  ;;  %v14916_v19 = vpack.c.bf16 %v7166_v61, %v7158_v18  ;;  %v7498_v30 = vrot.slane %v7452_v36, %v20971_v15 }
 0xfa0   : > { %v7475_v10 = vsub.f32 %v7459_v12, %v7467_v49  ;;  %v18665_v24 = vpop.f32.mrb[127].mxu1  ;;  %14903 = vmatpush1.bf16.msra.mxu1 %v14902_v33  ;;  %v18688_v12 = vpop.permute.xlu0 %7605  ;;  %v7523_v5 = vsub.f32 %v18477_v50, %v7494_v48  ;;  %v7531_v54 = vsub.f32 %v18472_v7, %v7494_v48  ;;  %v18719_v48 = vld [vmem:[%s20771_s4 + $0x20] sm:$0xff] }
 0xfa1   : > { %v7476_v59 = vsub.f32 %v7460_v11, %v7468_v25  ;;  %14909 = vmatprep.subr.bf16.mxu1 %v14908_v38  ;;  %v7524_v33 = vsub.f32 %v18458_v41, %v7498_v30  ;;  %v7532_v8 = vsub.f32 %v18455_v16, %v7498_v30  ;;  %v18699_v18 = vpop.permute.xlu1 %7636 }
 0xfa2   : > { %v7483_v51 = vmax.f32 %v7475_v10, 0.0 }
 0xfa3   : > { %v7484_v9 = vmax.f32 %v7476_v59, 0.0  ;;  %v7075_v43 = vpop.f32.mrb[128].mxu1  ;;  %14206 = vmatmul.mubr.msk.f32.vlgmr.msra.gmra.mrb[130].mxu1 %vm570_vm0, %v20958_v14 }
 0xfa4   : > { %v7539_v46 = vadd.f32 1e-05, %v7483_v51  ;;  %v7455_v35 = vmul.f32 0.0625, %v7075_v43  ;;  %v7077_v39 = vpop.f32.mrb[129].mxu1  ;;  %14911 = vmatpush1.bf16.msra.mxu1 %v14910_v52  ;;  %7302 = vmatprep.mubr.f32.mxu1 %v20912_v27  ;;  %v18701_v51 = vpop.permute.xlu0 %7631 }
 0xfa5   : > { %v7540_v26 = vadd.f32 1e-05, %v7484_v9  ;;  %v7456_v3 = vmul.f32 0.0625, %v7077_v39  ;;  %14917 = vmatprep.subr.bf16.mxu1 %v14916_v19 }
 0xfa6   : > { %15860 = vrsqrt.f32 %v7539_v46  ;;  %v7471_v28 = vmul.f32 %v7455_v35, %v7455_v35  ;;  %v7510_v10 = vrot.slane %v7455_v35, %v20971_v15 }
 0xfa7   : > { %15862 = vrsqrt.f32 %v7540_v26  ;;  %v7472_v29 = vmul.f32 %v7456_v3, %v7456_v3  ;;  %14208 = vmatmul.mubr.msk.f32.vlgmr.msra.gmra.mrb[132].mxu1 %vm570_vm0, %v20958_v14  ;;  %v7514_v52 = vrot.slane %v7456_v3, %v20971_v15 }
 0xfa8   : > { %v7479_v17 = vsub.f32 %v7463_v37, %v7471_v28  ;;  %14919 = vmatpush1.bf16.msra.mxu1 %v14918_v47  ;;  %7444 = vmatprep.mubr.f32.mxu1 %v20912_v27  ;;  %v7527_v32 = vsub.f32 %v18541_v21, %v7510_v10  ;;  %v7535_v26 = vsub.f32 %v18544_v4, %v7510_v10  ;;  %v7454_v10 = vmul.f32 0.0625, %v18665_v24 }
 0xfa9   : > { %v7480_v53 = vsub.f32 %v7464_v6, %v7472_v29  ;;  %v7528_v28 = vsub.f32 %v18537_v57, %v7514_v52  ;;  %v7536_v47 = vsub.f32 %v18547_v1, %v7514_v52 }
 0xfaa   : > { %v7487_v55 = vmax.f32 %v7479_v17, 0.0 }
 0xfab   : > { %v7488_v44 = vmax.f32 %v7480_v53, 0.0  ;;  %14210 = vmatmul.mubr.msk.f32.vlgmr.msra.gmra.mrb[134].mxu1 %vm570_vm0, %v20958_v14 }
 0xfac   : > { %v7543_v58 = vadd.f32 1e-05, %v7487_v55  ;;  %7805 = vmatprep.mubr.f32.mxu1 %v20912_v27 }
 0xfad   : > { %v7544_v22 = vadd.f32 1e-05, %v7488_v44 }
 0xfae   : > { %15864 = vrsqrt.f32 %v7543_v58 }
 0xfaf   : > { %15866 = vrsqrt.f32 %v7544_v22 }
 0xfb0   : > { %v15861_v31 = vpop.eup %15860 }
 0xfb1   : > { %v15863_v11 = vpop.eup %15862  ;;  %v7558_v49 = vrot.slane %v15861_v31, %v20971_v15 }
 0xfb2   : > { %v7562_v36 = vrot.slane %v15863_v11, %v20971_v15 }
 0xfb3   : > { %v7587_v20 = vmul.f32 %v7558_v49, %v7523_v5  ;;  %v7595_v25 = vmul.f32 %v7558_v49, %v7531_v54 }
 0xfb4   : > { %v7588_v38 = vmul.f32 %v7562_v36, %v7524_v33  ;;  %v7596_v61 = vmul.f32 %v7562_v36, %v7532_v8  ;;  %v18735_v8 = vld [vmem:[%s20771_s4 + $0x28] sm:$0xff] }
 0xfb5   : > { %v7613_v40 = vmul.f32 %v18688_v12, %v7587_v20  ;;  %v7621_v59 = vmul.f32 %v18686_v45, %v7595_v25 }
 0xfb6   : > { %v7614_v62 = vmul.f32 %v18688_v12, %v7588_v38  ;;  %v7622_v9 = vmul.f32 %v18686_v45, %v7596_v61  ;;  %v7453_v38 = vmul.f32 0.0625, %v18661_v42 }
 0xfb7   : > { %v7639_v43 = vadd.f32 %v18701_v51, %v7613_v40  ;;  %v7647_v19 = vadd.f32 %v18699_v18, %v7621_v59 }
 0xfb8   : > { %v15865_v46 = vpop.eup %15864  ;;  %v7640_v35 = vadd.f32 %v18701_v51, %v7614_v62  ;;  %v7648_v39 = vadd.f32 %v18699_v18, %v7622_v9  ;;  %v7469_v59 = vmul.f32 %v7453_v38, %v7453_v38 }
 0xfb9   : > { %v15867_v37 = vpop.eup %15866  ;;  %v7574_v3 = vrot.slane %v15865_v46, %v20971_v15  ;;  %v14922_v6 = vpack.c.bf16 %v7647_v19, %v7639_v43  ;;  %v7470_v43 = vmul.f32 %v7454_v10, %v7454_v10 }
 0xfba   : > { %v14920_v29 = vpack.c.bf16 %v7648_v39, %v7640_v35  ;;  %v7578_v17 = vrot.slane %v15867_v37, %v20971_v15 }
 0xfbb   : > { %v7591_v53 = vmul.f32 %v7574_v3, %v7527_v32  ;;  %v7599_v55 = vmul.f32 %v7574_v3, %v7535_v26 }
 0xfbc   : > { %14921 = vmatprep.subr.bf16.mxu0 %v14920_v29  ;;  %v7592_v44 = vmul.f32 %v7578_v17, %v7528_v28  ;;  %v7600_v58 = vmul.f32 %v7578_v17, %v7536_v47 }
 0xfbd   : > { %14923 = vmatpush1.bf16.msra.mxu0 %v14922_v6  ;;  %v7617_v22 = vmul.f32 %v18688_v12, %v7591_v53  ;;  %v7625_v30 = vmul.f32 %v18686_v45, %v7599_v55 }
 0xfbe   : > { %v7618_v31 = vmul.f32 %v18688_v12, %v7592_v44  ;;  %v7626_v11 = vmul.f32 %v18686_v45, %v7600_v58 }
 0xfbf   : > { %v7643_v5 = vadd.f32 %v18701_v51, %v7617_v22  ;;  %v7651_v54 = vadd.f32 %v18699_v18, %v7625_v30  ;;  %v7502_v30 = vrot.slane %v7453_v38, %v20971_v15 }
 0xfc0   : > { %14213 = vmatmul.mubr.msk.f32.vlgmr.msra.gmra.mrb[136].mxu0 %vm570_vm0, %v18719_v48  ;;  %v7644_v49 = vadd.f32 %v18701_v51, %v7618_v31  ;;  %v7652_v33 = vadd.f32 %v18699_v18, %v7626_v11  ;;  %v7506_v31 = vrot.slane %v7454_v10, %v20971_v15 }
 0xfc1   : > { %7734 = vmatprep.mubr.f32.mxu0 %v20912_v27  ;;  %v14930_v36 = vpack.c.bf16 %v7651_v54, %v7643_v5 }
 0xfc2   : > { %v14928_v20 = vpack.c.bf16 %v7652_v33, %v7644_v49  ;;  %v7525_v49 = vsub.f32 %v18617_v23, %v7502_v30  ;;  %v7533_v33 = vsub.f32 %v18610_v2, %v7502_v30 }
 0xfc4   : > { %14214 = vmatmul.mubr.msk.f32.gmra.mrb[138].mxu0 %vm570_vm0, %v18735_v8  ;;  %14929 = vmatprep.subr.bf16.mxu0 %v14928_v20  ;;  %v7526_v20 = vsub.f32 %v18594_v34, %v7506_v31 }
 0xfc5   : > { %14931 = vmatpush1.bf16.msra.mxu0 %v14930_v36  ;;  %7882 = vmatprep.mubr.f32.mxu0 %v20912_v27 }
 0xfc8   : > { %14217 = vmatmul.mubr.msk.f32.vlgmr.msra.gmra.mrb[140].mxu0 %vm570_vm0, %v18719_v48 }
 0xfc9   : > { %7888 = vmatprep.mubr.f32.mxu0 %v20912_v27 }
 0xfcc   : > { %14218 = vmatmul.mubr.msk.f32.gmra.mrb[142].mxu0 %vm570_vm0, %v18735_v8 }
 0xfcd   : > { %8087 = vmatprep.mubr.f32.mxu0 %v20912_v27 }
0x1076   : > { %v7146_v25 = vpop.f32.mrb[130].mxu1 }
0x1077   : > { %v7148_v61 = vpop.f32.mrb[131].mxu1  ;;  %v7457_v52 = vmul.f32 0.0625, %v7146_v25  ;;  %v7534_v25 = vsub.f32 %v18589_v56, %v7506_v31 }
0x1078   : > { %v7458_v19 = vmul.f32 0.0625, %v7148_v61 }
0x1079   : > { %v7473_v35 = vmul.f32 %v7457_v52, %v7457_v52  ;;  %v7518_v5 = vrot.slane %v7457_v52, %v20971_v15 }
0x107a   : > { %v7304_v40 = vpop.f32.mrb[132].mxu1  ;;  %v7474_v37 = vmul.f32 %v7458_v19, %v7458_v19  ;;  %v7522_v61 = vrot.slane %v7458_v19, %v20971_v15 }
0x107b   : > { %v7461_v62 = vmul.f32 0.0625, %v7304_v40  ;;  %v7306_v9 = vpop.f32.mrb[133].mxu1  ;;  %v7529_v52 = vsub.f32 %v18651_v13, %v7518_v5 }
0x107c   : > { %v7462_v46 = vmul.f32 0.0625, %v7306_v9  ;;  %v7530_v19 = vsub.f32 %v18643_v63, %v7522_v61 }
0x107d   : > { %v7477_v39 = vsub.f32 %v7461_v62, %v7469_v59 }
0x107e   : > { %v7478_v32 = vsub.f32 %v7462_v46, %v7470_v43  ;;  %v7446_v26 = vpop.f32.mrb[134].mxu1  ;;  %v7537_v46 = vsub.f32 %v18640_v60, %v7518_v5 }
0x107f   : > { %v7485_v3 = vmax.f32 %v7477_v39, 0.0  ;;  %v7465_v6 = vmul.f32 0.0625, %v7446_v26  ;;  %v7448_v28 = vpop.f32.mrb[135].mxu1 }
0x1080   : > { %v7486_v42 = vmax.f32 %v7478_v32, 0.0  ;;  %v7466_v47 = vmul.f32 0.0625, %v7448_v28  ;;  %v7538_v28 = vsub.f32 %v18646_v0, %v7522_v61  ;;  %v18779_v61 = vpop.permute.xlu1 %7998 }
0x1081   : > { %v7541_v29 = vadd.f32 1e-05, %v7485_v3  ;;  %v7481_v24 = vsub.f32 %v7465_v6, %v7473_v35 }
0x1082   : > { %v7542_v17 = vadd.f32 1e-05, %v7486_v42  ;;  %v7482_v53 = vsub.f32 %v7466_v47, %v7474_v37 }
0x1083   : > { %15868 = vrsqrt.f32 %v7541_v29  ;;  %v7489_v55 = vmax.f32 %v7481_v24, 0.0 }
0x1084   : > { %15870 = vrsqrt.f32 %v7542_v17  ;;  %v7490_v44 = vmax.f32 %v7482_v53, 0.0 }
0x1085   : > { %v7545_v58 = vadd.f32 1e-05, %v7489_v55 }
0x1086   : > { %v7546_v22 = vadd.f32 1e-05, %v7490_v44 }
0x1087   : > { %15872 = vrsqrt.f32 %v7545_v58 }
0x1088   : > { %15874 = vrsqrt.f32 %v7546_v22 }
0x108d   : > { %v15869_v11 = vpop.eup %15868 }
0x108e   : > { %v15871_v54 = vpop.eup %15870  ;;  %v7566_v36 = vrot.slane %v15869_v11, %v20971_v15 }
0x108f   : > { %v7570_v38 = vrot.slane %v15871_v54, %v20971_v15 }
0x1090   : > { %v7589_v40 = vmul.f32 %v7566_v36, %v7525_v49  ;;  %v7597_v10 = vmul.f32 %v7566_v36, %v7533_v33 }
0x1091   : > { %v15873_v59 = vpop.eup %15872  ;;  %v7590_v62 = vmul.f32 %v7570_v38, %v7526_v20  ;;  %v7598_v9 = vmul.f32 %v7570_v38, %v7534_v25 }
0x1092   : > { %v15875_v43 = vpop.eup %15874  ;;  %v7582_v35 = vrot.slane %v15873_v59, %v20971_v15  ;;  %v7615_v39 = vmul.f32 %v18688_v12, %v7589_v40  ;;  %v7623_v37 = vmul.f32 %v18686_v45, %v7597_v10  ;;  %v18784_v10 = vpop.permute.xlu0 %7993 }
0x1093   : > { %v7730_v32 = vpop.f32.mrb[136].mxu0  ;;  %v7616_v26 = vmul.f32 %v18688_v12, %v7590_v62  ;;  %v7624_v3 = vmul.f32 %v18686_v45, %v7598_v9  ;;  %v7586_v6 = vrot.slane %v15875_v43, %v20971_v15 }
0x1094   : > { %v7732_v42 = vpop.f32.mrb[137].mxu0  ;;  %v7641_v47 = vadd.f32 %v18701_v51, %v7615_v39  ;;  %v7649_v29 = vadd.f32 %v18699_v18, %v7623_v37  ;;  %v7593_v24 = vmul.f32 %v7582_v35, %v7529_v52  ;;  %v7601_v22 = vmul.f32 %v7582_v35, %v7537_v46 }
0x1095   : > { %v7642_v17 = vadd.f32 %v18701_v51, %v7616_v26  ;;  %v7650_v53 = vadd.f32 %v18699_v18, %v7624_v3  ;;  %v7594_v55 = vmul.f32 %v7586_v6, %v7530_v19  ;;  %v7602_v58 = vmul.f32 %v7586_v6, %v7538_v28 }
0x1096   : > { %v14926_v44 = vpack.c.bf16 %v7649_v29, %v7641_v47  ;;  %v7973_v30 = vadd.f32 %v7732_v42, %v18458_v41  ;;  %v7619_v54 = vmul.f32 %v18688_v12, %v7593_v24  ;;  %v7972_v49 = vadd.f32 %v7730_v32, %v18477_v50 }
0x1097   : > { %v7736_v31 = vpop.f32.mrb[138].mxu0  ;;  %v14924_v11 = vpack.c.bf16 %v7650_v53, %v7642_v17  ;;  %v7620_v5 = vmul.f32 %v18688_v12, %v7594_v55  ;;  %v7628_v20 = vmul.f32 %v18686_v45, %v7602_v58  ;;  %v7627_v25 = vmul.f32 %v18686_v45, %v7601_v22 }
0x1098   : > { %v7980_v33 = vadd.f32 %v7736_v31, %v18472_v7  ;;  %v7738_v36 = vpop.f32.mrb[139].mxu0  ;;  %v7645_v40 = vadd.f32 %v18701_v51, %v7619_v54  ;;  %v18792_v45 = vadd.f32 %v18784_v10, %v7973_v30  ;;  %v18798_v52 = vadd.f32 %v18784_v10, %v7972_v49 }
0x1099   : > { %v7981_v38 = vadd.f32 %v7738_v36, %v18455_v16  ;;  %14925 = vmatprep.subr.bf16.mxu1 %v14924_v11  ;;  %v7646_v41 = vadd.f32 %v18701_v51, %v7620_v5  ;;  %v7654_v7 = vadd.f32 %v18699_v18, %v7628_v20  ;;  %v7653_v12 = vadd.f32 %v18699_v18, %v7627_v25 }
0x109a   : > { %v18787_v50 = vadd.f32 %v18779_v61, %v7980_v33  ;;  %14927 = vmatpush1.bf16.msra.mxu1 %v14926_v44  ;;  %20972 = vst [vmem:[#allocation21_spill] sm:$0xff] %v18798_v52  ;;  %v8308_v6 = vmul.f32 %v18792_v45, %v18792_v45 }
0x109b   : > { %v18795_v16 = vadd.f32 %v18779_v61, %v7981_v38  ;;  %v7884_v59 = vpop.f32.mrb[140].mxu0  ;;  %v14932_v62 = vpack.c.bf16 %v7654_v7, %v7646_v41  ;;  %v14934_v9 = vpack.c.bf16 %v7653_v12, %v7645_v40 }
0x109c   : > { %v7886_v51 = vpop.f32.mrb[141].mxu0  ;;  %v14938_v18 = vpack.c.bf16 %v18787_v50, %v18798_v52  ;;  %v7976_v39 = vadd.f32 %v7884_v59, %v18541_v21  ;;  %v8315_v42 = vmul.f32 %v18787_v50, %v18787_v50 }
0x109d   : > { %14215 = vmatmul.mubr.msk.f32.vlgmr.msra.gmra.mrb[136].mxu1 %vm570_vm0, %v18719_v48  ;;  %v14936_v43 = vpack.c.bf16 %v18795_v16, %v18792_v45  ;;  %14933 = vmatprep.subr.bf16.mxu1 %v14932_v62  ;;  %v7977_v46 = vadd.f32 %v7886_v51, %v18537_v57  ;;  %v8316_v21 = vmul.f32 %v18795_v16, %v18795_v16 }
0x109e   : > { %7811 = vmatprep.mubr.f32.mxu1 %v20912_v27  ;;  %14935 = vmatpush1.bf16.msra.mxu1 %v14934_v9 }
0x109f   : > { %v7890_v35 = vpop.f32.mrb[142].mxu0  ;;  %14937 = vmatprep.subr.bf16.mxu0 %v14936_v43  ;;  %v18818_v57 = vadd.f32 %v18784_v10, %v7977_v46  ;;  %v14952_v47 = vpack.c.bf16 %v8316_v21, %v8308_v6 }
0x10a0   : > { %v7984_v37 = vadd.f32 %v7890_v35, %v18544_v4  ;;  %v7892_v19 = vpop.f32.mrb[143].mxu0  ;;  %14939 = vmatpush1.bf16.msra.mxu0 %v14938_v18  ;;  %v18828_v4 = vadd.f32 %v18784_v10, %v7976_v39 }
0x10a1   : > { %v7985_v32 = vadd.f32 %v7892_v19, %v18547_v1  ;;  %14216 = vmatmul.mubr.msk.f32.gmra.mrb[138].mxu1 %vm570_vm0, %v18735_v8  ;;  %20974 = vst [vmem:[#allocation29_spill] sm:$0xff] %v18818_v57  ;;  %v8312_v24 = vmul.f32 %v18818_v57, %v18818_v57 }
0x10a2   : > { %v18814_v26 = vadd.f32 %v18779_v61, %v7984_v37  ;;  %7959 = vmatprep.mubr.f32.mxu1 %v20912_v27  ;;  %20976 = vst [vmem:[#allocation23_spill] sm:$0xff] %v18828_v4 }
0x10a3   : > { %v18821_v3 = vadd.f32 %v18779_v61, %v7985_v32  ;;  %14227 = vmatmul.mubr.msk.f32.vlgmr.msra.gmra.mrb[144].mxu0 %vm570_vm0, %v20958_v14 }
0x10a4   : > { %20973 = vst [vmem:[#allocation30_spill] sm:$0xff] %v18814_v26  ;;  %8229 = vmatprep.mubr.f32.mxu0 %v20912_v27  ;;  %v14946_v28 = vpack.c.bf16 %v18814_v26, %v18828_v4  ;;  %v8319_v53 = vmul.f32 %v18814_v26, %v18814_v26 }
0x10a5   : > { %20975 = vst [vmem:[#allocation31_spill] sm:$0xff] %v18821_v3  ;;  %14219 = vmatmul.mubr.msk.f32.vlgmr.msra.gmra.mrb[140].mxu1 %vm570_vm0, %v18719_v48  ;;  %v14944_v1 = vpack.c.bf16 %v18821_v3, %v18818_v57  ;;  %v8320_v29 = vmul.f32 %v18821_v3, %v18821_v3  ;;  %v8307_v48 = vmul.f32 %v18798_v52, %v18798_v52 }
0x10a6   : > { %7965 = vmatprep.mubr.f32.mxu1 %v20912_v27 }
0x10a7   : > { %14945 = vmatprep.subr.bf16.mxu0 %v14944_v1  ;;  %v14954_v17 = vpack.c.bf16 %v8315_v42, %v8307_v48  ;;  %v14960_v55 = vpack.c.bf16 %v8320_v29, %v8312_v24 }
0x10a8   : > { %14947 = vmatpush1.bf16.msra.mxu0 %v14946_v28 }
0x10a9   : > { %14220 = vmatmul.mubr.msk.f32.gmra.mrb[142].mxu1 %vm570_vm0, %v18735_v8  ;;  %14953 = vmatprep.subr.bf16.mxu0 %v14952_v47  ;;  %v8311_v8 = vmul.f32 %v18828_v4, %v18828_v4 }
0x10aa   : > { %8158 = vmatprep.mubr.f32.mxu1 %v20912_v27 }
0x10ab   : > { %14229 = vmatmul.mubr.msk.f32.vlgmr.msra.gmra.mrb[146].mxu0 %vm570_vm0, %v20958_v14  ;;  %v14962_v44 = vpack.c.bf16 %v8319_v53, %v8311_v8 }
0x10ac   : > { %14955 = vmatpush1.bf16.msra.mxu0 %v14954_v17  ;;  %8387 = vmatprep.mubr.f32.mxu0 %v20912_v27 }
0x10ad   : > { %14961 = vmatprep.subr.bf16.mxu0 %v14960_v55 }
0x10af   : > { %14231 = vmatmul.mubr.msk.f32.vlgmr.msra.gmra.mrb[148].mxu0 %vm570_vm0, %v20958_v14 }
0x10b0   : > { %14963 = vmatpush1.bf16.msra.mxu0 %v14962_v44  ;;  %8529 = vmatprep.mubr.f32.mxu0 %v20912_v27 }
0x10b3   : > { %14233 = vmatmul.mubr.msk.f32.vlgmr.msra.gmra.mrb[150].mxu0 %vm570_vm0, %v20958_v14 }
0x10b4   : > { %8957 = vmatprep.mubr.f32.mxu0 %v20912_v27 }
0x1170   : > { %v7807_v58 = vpop.f32.mrb[136].mxu1 }
0x1171   : > { %v7809_v22 = vpop.f32.mrb[137].mxu1  ;;  %v7974_v11 = vadd.f32 %v7807_v58, %v18617_v23 }
0x1172   : > { %v7975_v30 = vadd.f32 %v7809_v22, %v18594_v34 }
0x1173   : > { %v18878_v41 = vadd.f32 %v18784_v10, %v7974_v11 }
0x1174   : > { %v7813_v31 = vpop.f32.mrb[138].mxu1  ;;  %v18872_v25 = vadd.f32 %v18784_v10, %v7975_v30 }
0x1175   : > { %v7982_v5 = vadd.f32 %v7813_v31, %v18610_v2  ;;  %v7815_v54 = vpop.f32.mrb[139].mxu1  ;;  %20980 = vst [vmem:[#allocation27_spill] sm:$0xff] %v18878_v41  ;;  %v8309_v39 = vmul.f32 %v18878_v41, %v18878_v41 }
0x1176   : > { %v7983_v49 = vadd.f32 %v7815_v54, %v18589_v56  ;;  %v8089_v33 = vpop.f32.mrb[144].mxu0  ;;  %20978 = vst [vmem:[#allocation25_spill] sm:$0xff] %v18872_v25  ;;  %v8310_v32 = vmul.f32 %v18872_v25, %v18872_v25 }
0x1177   : > { %v18869_v36 = vadd.f32 %v18779_v61, %v7982_v5  ;;  %v8091_v20 = vpop.f32.mrb[145].mxu0  ;;  %v18891_v46 = vmul.f32 0.0625, %v8089_v33 }
0x1178   : > { %v18875_v38 = vadd.f32 %v18779_v61, %v7983_v49  ;;  %v7961_v34 = vpop.f32.mrb[140].mxu1 }
0x1179   : > { %20977 = vst [vmem:[#allocation32_spill] sm:$0xff] %v18869_v36  ;;  %v7963_v23 = vpop.f32.mrb[141].mxu1  ;;  %v14942_v56 = vpack.c.bf16 %v18869_v36, %v18878_v41  ;;  %v7978_v12 = vadd.f32 %v7961_v34, %v18651_v13  ;;  %v8623_v37 = vmul.f32 %v18891_v46, %v18891_v46  ;;  %v8317_v21 = vmul.f32 %v18869_v36, %v18869_v36 }
0x117a   : > { %20979 = vst [vmem:[#allocation20_spill] sm:$0xff] %v18875_v38  ;;  %v14940_v2 = vpack.c.bf16 %v18875_v38, %v18872_v25  ;;  %v7979_v40 = vadd.f32 %v7963_v23, %v18643_v63 }
0x117b   : > { %v18904_v13 = vadd.f32 %v18784_v10, %v7978_v12  ;;  %v14958_v8 = vpack.c.bf16 %v8317_v21, %v8309_v39  ;;  %v18941_v39 = vpop.permute.xlu0 %8761 }
0x117c   : > { %v7967_v7 = vpop.f32.mrb[142].mxu1  ;;  %14941 = vmatprep.subr.bf16.mxu1 %v14940_v2  ;;  %v18894_v35 = vadd.f32 %v18784_v10, %v7979_v40 }
0x117d   : > { %v7986_v59 = vadd.f32 %v7967_v7, %v18640_v60  ;;  %v7969_v51 = vpop.f32.mrb[143].mxu1  ;;  %14943 = vmatpush1.bf16.msra.mxu1 %v14942_v56  ;;  %v8318_v60 = vmul.f32 %v18875_v38, %v18875_v38  ;;  %20984 = vst [vmem:[#allocation22_spill] sm:$0xff] %v18904_v13  ;;  %v8313_v23 = vmul.f32 %v18904_v13, %v18904_v13 }
0x117e   : > { %v7987_v62 = vadd.f32 %v7969_v51, %v18646_v0  ;;  %v8231_v9 = vpop.f32.mrb[146].mxu0  ;;  %20982 = vst [vmem:[#allocation19_spill] sm:$0xff] %v18894_v35  ;;  %v8608_v0 = vmul.f32 0.0625, %v8091_v20  ;;  %v8314_v44 = vmul.f32 %v18894_v35, %v18894_v35 }
0x117f   : > { %v18889_v43 = vadd.f32 %v18779_v61, %v7986_v59  ;;  %v8233_v18 = vpop.f32.mrb[147].mxu0  ;;  %v8611_v1 = vmul.f32 0.0625, %v8231_v9  ;;  %v14956_v48 = vpack.c.bf16 %v8318_v60, %v8310_v32  ;;  %v18939_v60 = vpop.permute.xlu1 %8766 }
0x1180   : > { %v18897_v63 = vadd.f32 %v18779_v61, %v7987_v62  ;;  %14228 = vmatmul.mubr.msk.f32.vlgmr.msra.gmra.mrb[144].mxu1 %vm570_vm0, %v20958_v14  ;;  %v8624_v10 = vmul.f32 %v8608_v0, %v8608_v0  ;;  %v8612_v47 = vmul.f32 0.0625, %v8233_v18  ;;  %v8650_v62 = vrot.slane %v18891_v46, %v20971_v15 }
0x1181   : > { %20981 = vst [vmem:[#allocation24_spill] sm:$0xff] %v18889_v43  ;;  %8300 = vmatprep.mubr.f32.mxu1 %v20912_v27  ;;  %v14950_v42 = vpack.c.bf16 %v18889_v43, %v18904_v13  ;;  %v8627_v58 = vmul.f32 %v8611_v1, %v8611_v1  ;;  %v8321_v11 = vmul.f32 %v18889_v43, %v18889_v43 }
0x1182   : > { %20983 = vst [vmem:[#allocation18_spill] sm:$0xff] %v18897_v63  ;;  %v8389_v61 = vpop.f32.mrb[148].mxu0  ;;  %v14948_v19 = vpack.c.bf16 %v18897_v63, %v18894_v35  ;;  %v8322_v24 = vmul.f32 %v18897_v63, %v18897_v63  ;;  %v8628_v5 = vmul.f32 %v8612_v47, %v8612_v47  ;;  %v8654_v9 = vrot.slane %v8608_v0, %v20971_v15 }
0x1183   : > { %v8615_v6 = vmul.f32 0.0625, %v8389_v61  ;;  %v8391_v28 = vpop.f32.mrb[149].mxu0  ;;  %v14966_v7 = vpack.c.bf16 %v8321_v11, %v8313_v23  ;;  %v8687_v32 = vsub.f32 %v18787_v50, %v8650_v62  ;;  %v8670_v21 = vrot.slane %v8612_v47, %v20971_v15 }
0x1184   : > { %v8616_v29 = vmul.f32 0.0625, %v8391_v28  ;;  %14949 = vmatprep.subr.bf16.mxu1 %v14948_v19  ;;  %v14964_v33 = vpack.c.bf16 %v8322_v24, %v8314_v44  ;;  %v8679_v19 = vsub.f32 %v18798_v52, %v8650_v62  ;;  %v8680_v46 = vsub.f32 %v18792_v45, %v8654_v9 }
0x1185   : > { %v8631_v17 = vsub.f32 %v8615_v6, %v8623_v37  ;;  %14951 = vmatpush1.bf16.msra.mxu1 %v14950_v42  ;;  %v8666_v37 = vrot.slane %v8611_v1, %v20971_v15  ;;  %v8688_v0 = vsub.f32 %v18795_v16, %v8654_v9  ;;  %v8684_v47 = vsub.f32 %v18818_v57, %v8670_v21 }
0x1186   : > { %v8632_v53 = vsub.f32 %v8616_v29, %v8624_v10  ;;  %14957 = vmatprep.subr.bf16.mxu1 %v14956_v48  ;;  %v8531_v55 = vpop.f32.mrb[150].mxu0 }
0x1187   : > { %v8639_v22 = vmax.f32 %v8631_v17, 0.0  ;;  %v8619_v30 = vmul.f32 0.0625, %v8531_v55  ;;  %v8533_v31 = vpop.f32.mrb[151].mxu0  ;;  %v8683_v1 = vsub.f32 %v18828_v4, %v8666_v37  ;;  %v8691_v48 = vsub.f32 %v18814_v26, %v8666_v37 }
0x1188   : > { %v8640_v54 = vmax.f32 %v8632_v53, 0.0  ;;  %v8620_v49 = vmul.f32 0.0625, %v8533_v31  ;;  %14230 = vmatmul.mubr.msk.f32.vlgmr.msra.gmra.mrb[146].mxu1 %vm570_vm0, %v20958_v14 }
0x1189   : > { %v8695_v20 = vadd.f32 1e-05, %v8639_v22  ;;  %v8635_v34 = vsub.f32 %v8619_v30, %v8627_v58  ;;  %14959 = vmatpush1.bf16.msra.mxu1 %v14958_v8  ;;  %8458 = vmatprep.mubr.f32.mxu1 %v20912_v27  ;;  %v18957_v58 = vpop.permute.xlu1 %8792  ;;  %v18959_v22 = vpop.permute.xlu0 %8787  ;;  %v8692_v30 = vsub.f32 %v18821_v3, %v8670_v21 }
0x118a   : > { %v8696_v2 = vadd.f32 1e-05, %v8640_v54  ;;  %v8636_v56 = vsub.f32 %v8620_v49, %v8628_v5  ;;  %14965 = vmatprep.subr.bf16.mxu1 %v14964_v33 }
0x118b   : > { %15876 = vrsqrt.f32 %v8695_v20  ;;  %v8643_v40 = vmax.f32 %v8635_v34, 0.0 }
0x118c   : > { %15878 = vrsqrt.f32 %v8696_v2  ;;  %v8644_v12 = vmax.f32 %v8636_v56, 0.0  ;;  %14232 = vmatmul.mubr.msk.f32.vlgmr.msra.gmra.mrb[148].mxu1 %vm570_vm0, %v20958_v14 }
0x118d   : > { %v8699_v59 = vadd.f32 1e-05, %v8643_v40  ;;  %14967 = vmatpush1.bf16.msra.mxu1 %v14966_v7  ;;  %8600 = vmatprep.mubr.f32.mxu1 %v20912_v27 }
0x118e   : > { %v8700_v51 = vadd.f32 1e-05, %v8644_v12 }
0x118f   : > { %15880 = vrsqrt.f32 %v8699_v59 }
0x1190   : > { %15882 = vrsqrt.f32 %v8700_v51  ;;  %14234 = vmatmul.mubr.msk.f32.vlgmr.msra.gmra.mrb[150].mxu1 %vm570_vm0, %v20958_v14 }
0x1191   : > { %9172 = vmatprep.mubr.f32.mxu1 %v20912_v27 }
0x1195   : > { %v15877_v18 = vpop.eup %15876 }
0x1196   : > { %v15879_v61 = vpop.eup %15878  ;;  %v8714_v10 = vrot.slane %v15877_v18, %v20971_v15 }
0x1197   : > { %v8718_v6 = vrot.slane %v15879_v61, %v20971_v15 }
0x1198   : > { %v8743_v28 = vmul.f32 %v8714_v10, %v8679_v19  ;;  %v8751_v42 = vmul.f32 %v8714_v10, %v8687_v32  ;;  %v18988_v19 = vld [vmem:[%s20906_s27 + $0x80] sm:$0xff]  ;;  %v19000_v10 = vld [vmem:[%s20906_s27 + $0x88] sm:$0xff] }
0x1199   : > { %v15881_v29 = vpop.eup %15880  ;;  %v8744_v24 = vmul.f32 %v8718_v6, %v8680_v46  ;;  %v8752_v17 = vmul.f32 %v8718_v6, %v8688_v0  ;;  %v19008_v46 = vld [vmem:[%s20906_s27 + $0x90] sm:$0xff]  ;;  %v19016_v0 = vld [vmem:[%s20906_s27 + $0x98] sm:$0xff]  ;;  %v19024_v6 = vld [vmem:[%s20906_s27 + $0xa0] sm:$0xff] }
0x119a   : > { %v15883_v53 = vpop.eup %15882  ;;  %v8730_v55 = vrot.slane %v15881_v29, %v20971_v15  ;;  %v8769_v8 = vmul.f32 %v18941_v39, %v8743_v28  ;;  %v8777_v44 = vmul.f32 %v18939_v60, %v8751_v42  ;;  %v19032_v28 = vld [vmem:[%s20906_s27 + $0xa8] sm:$0xff]  ;;  %v19040_v42 = vld [vmem:[%s20906_s27 + $0xb0] sm:$0xff]  ;;  %v19048_v29 = vld [vmem:[%s20906_s27 + $0xb8] sm:$0xff] }
0x119b   : > { %v8770_v31 = vmul.f32 %v18941_v39, %v8744_v24  ;;  %v8778_v11 = vmul.f32 %v18939_v60, %v8752_v17  ;;  %v8734_v5 = vrot.slane %v15883_v53, %v20971_v15 }
0x119c   : > { %v8795_v54 = vadd.f32 %v18959_v22, %v8769_v8  ;;  %v8803_v49 = vadd.f32 %v18957_v58, %v8777_v44  ;;  %v8747_v33 = vmul.f32 %v8730_v55, %v8683_v1  ;;  %v8755_v20 = vmul.f32 %v8730_v55, %v8691_v48 }
0x119d   : > { %v8796_v34 = vadd.f32 %v18959_v22, %v8770_v31  ;;  %v8804_v23 = vadd.f32 %v18957_v58, %v8778_v11  ;;  %v8748_v2 = vmul.f32 %v8734_v5, %v8684_v47  ;;  %v8756_v56 = vmul.f32 %v8734_v5, %v8692_v30 }
0x119e   : > { %v14970_v40 = vpack.c.bf16 %v8803_v49, %v8795_v54  ;;  %v8773_v7 = vmul.f32 %v18941_v39, %v8747_v33  ;;  %v8781_v12 = vmul.f32 %v18939_v60, %v8755_v20 }
0x119f   : > { %v14968_v59 = vpack.c.bf16 %v8804_v23, %v8796_v34  ;;  %v8774_v51 = vmul.f32 %v18941_v39, %v8748_v2  ;;  %v8782_v62 = vmul.f32 %v18939_v60, %v8756_v56 }
0x11a0   : > { %v18974_v9 = vadd.f32 %v18959_v22, %v8773_v7  ;;  %v18977_v18 = vadd.f32 %v18957_v58, %v8781_v12 }
0x11a1   : > { %14969 = vmatprep.subr.bf16.mxu0 %v14968_v59  ;;  %v18980_v37 = vadd.f32 %v18959_v22, %v8774_v51  ;;  %v18983_v61 = vadd.f32 %v18957_v58, %v8782_v62 }
0x11a2   : > { %14971 = vmatpush1.bf16.msra.mxu0 %v14970_v40 }
0x11a5   : > { %14251 = vmatmul.mubr.msk.f32.vlgmr.msra.gmra.mrb[152].mxu0 %vm570_vm0, %v18988_v19 }
0x11a6   : > { %8963 = vmatprep.mubr.f32.mxu0 %v20912_v27 }
0x11a9   : > { %14252 = vmatmul.mubr.msk.f32.gmra.mrb[154].mxu0 %vm570_vm0, %v19000_v10 }
0x11aa   : > { %8969 = vmatprep.mubr.f32.mxu0 %v20912_v27 }
0x11ad   : > { %14253 = vmatmul.mubr.msk.f32.gmra.mrb[156].mxu0 %vm570_vm0, %v19008_v46 }
0x11ae   : > { %8975 = vmatprep.mubr.f32.mxu0 %v20912_v27 }
0x11b1   : > { %14254 = vmatmul.mubr.msk.f32.gmra.mrb[158].mxu0 %vm570_vm0, %v19016_v0 }
0x11b2   : > { %8981 = vmatprep.mubr.f32.mxu0 %v20912_v27 }
0x11b5   : > { %14255 = vmatmul.mubr.msk.f32.gmra.mrb[160].mxu0 %vm570_vm0, %v19024_v6 }
0x11b6   : > { %8987 = vmatprep.mubr.f32.mxu0 %v20912_v27 }
0x11b9   : > { %14256 = vmatmul.mubr.msk.f32.gmra.mrb[162].mxu0 %vm570_vm0, %v19032_v28 }
0x11ba   : > { %8993 = vmatprep.mubr.f32.mxu0 %v20912_v27 }
0x11bd   : > { %14257 = vmatmul.mubr.msk.f32.gmra.mrb[164].mxu0 %vm570_vm0, %v19040_v42 }
0x11be   : > { %8999 = vmatprep.mubr.f32.mxu0 %v20912_v27 }
0x11c1   : > { %14258 = vmatmul.mubr.msk.f32.gmra.mrb[166].mxu0 %vm570_vm0, %v19048_v29 }
0x11c2   : > { %9442 = vmatprep.mubr.f32.mxu0 %v20912_v27 }
0x1253   : > { %v8160_v1 = vpop.f32.mrb[144].mxu1 }
0x1254   : > { %v8162_v48 = vpop.f32.mrb[145].mxu1  ;;  %v8609_v17 = vmul.f32 0.0625, %v8160_v1 }
0x1255   : > { %v8610_v47 = vmul.f32 0.0625, %v8162_v48 }
0x1256   : > { %v8625_v55 = vmul.f32 %v8609_v17, %v8609_v17 }
0x1257   : > { %v8626_v8 = vmul.f32 %v8610_v47, %v8610_v47 }
0x125b   : > { %v8302_v24 = vpop.f32.mrb[146].mxu1 }
0x125c   : > { %v8304_v53 = vpop.f32.mrb[147].mxu1  ;;  %v8613_v30 = vmul.f32 0.0625, %v8302_v24 }
0x125d   : > { %v8614_v5 = vmul.f32 0.0625, %v8304_v53 }
0x125e   : > { %v8629_v49 = vmul.f32 %v8613_v30, %v8613_v30 }
0x125f   : > { %v8460_v44 = vpop.f32.mrb[148].mxu1  ;;  %v8630_v20 = vmul.f32 %v8614_v5, %v8614_v5 }
0x1260   : > { %v8617_v31 = vmul.f32 0.0625, %v8460_v44  ;;  %v8462_v11 = vpop.f32.mrb[149].mxu1 }
0x1261   : > { %v8618_v54 = vmul.f32 0.0625, %v8462_v11  ;;  %v8674_v11 = vrot.slane %v8613_v30, %v20971_v15 }
0x1262   : > { %v8633_v33 = vsub.f32 %v8617_v31, %v8625_v55  ;;  %v8658_v55 = vrot.slane %v8609_v17, %v20971_v15 }
0x1263   : > { %v8634_v34 = vsub.f32 %v8618_v54, %v8626_v8  ;;  %v8602_v23 = vpop.f32.mrb[150].mxu1  ;;  %v8662_v8 = vrot.slane %v8610_v47, %v20971_v15  ;;  %v8685_v30 = vsub.f32 %v18904_v13, %v8674_v11 }
0x1264   : > { %v8641_v2 = vmax.f32 %v8633_v33, 0.0  ;;  %v8621_v56 = vmul.f32 0.0625, %v8602_v23  ;;  %v8604_v40 = vpop.f32.mrb[151].mxu1  ;;  %v8689_v33 = vsub.f32 %v18869_v36, %v8658_v55 }
0x1265   : > { %v8642_v7 = vmax.f32 %v8634_v34, 0.0  ;;  %v8622_v12 = vmul.f32 0.0625, %v8604_v40  ;;  %v8682_v23 = vsub.f32 %v18872_v25, %v8662_v8 }
0x1266   : > { %v8697_v59 = vadd.f32 1e-05, %v8641_v2  ;;  %v8637_v51 = vsub.f32 %v8621_v56, %v8629_v49  ;;  %v8681_v49 = vsub.f32 %v18878_v41, %v8658_v55  ;;  %v8690_v2 = vsub.f32 %v18875_v38, %v8662_v8 }
0x1267   : > { %v8698_v62 = vadd.f32 1e-05, %v8642_v7  ;;  %v8638_v1 = vsub.f32 %v8622_v12, %v8630_v20  ;;  %v8678_v20 = vrot.slane %v8614_v5, %v20971_v15 }
0x1268   : > { %15884 = vrsqrt.f32 %v8697_v59  ;;  %v8645_v48 = vmax.f32 %v8637_v51, 0.0 }
0x1269   : > { %15886 = vrsqrt.f32 %v8698_v62  ;;  %v8646_v24 = vmax.f32 %v8638_v1, 0.0  ;;  %v8686_v51 = vsub.f32 %v18894_v35, %v8678_v20 }
0x126a   : > { %v8701_v53 = vadd.f32 1e-05, %v8645_v48  ;;  %v19068_v48 = vpop.permute.xlu0 %8831 }
0x126b   : > { %v8702_v44 = vadd.f32 1e-05, %v8646_v24  ;;  %v8694_v24 = vsub.f32 %v18897_v63, %v8678_v20 }
0x126c   : > { %15888 = vrsqrt.f32 %v8701_v53 }
0x126d   : > { %15890 = vrsqrt.f32 %v8702_v44 }
0x1272   : > { %v15885_v31 = vpop.eup %15884 }
0x1273   : > { %v15887_v54 = vpop.eup %15886  ;;  %v8722_v34 = vrot.slane %v15885_v31, %v20971_v15 }
0x1274   : > { %v8726_v17 = vrot.slane %v15887_v54, %v20971_v15 }
0x1275   : > { %v8745_v56 = vmul.f32 %v8722_v34, %v8681_v49  ;;  %v8753_v47 = vmul.f32 %v8722_v34, %v8689_v33 }
0x1276   : > { %v15889_v40 = vpop.eup %15888  ;;  %v8746_v7 = vmul.f32 %v8726_v17, %v8682_v23  ;;  %v8754_v12 = vmul.f32 %v8726_v17, %v8690_v2 }
0x1277   : > { %v15891_v59 = vpop.eup %15890  ;;  %v8738_v5 = vrot.slane %v15889_v40, %v20971_v15  ;;  %v8771_v62 = vmul.f32 %v18941_v39, %v8745_v56  ;;  %v8779_v1 = vmul.f32 %v18939_v60, %v8753_v47  ;;  %v8693_v56 = vsub.f32 %v18889_v43, %v8674_v11 }
0x1278   : > { %v8959_v53 = vpop.f32.mrb[152].mxu0  ;;  %v8772_v44 = vmul.f32 %v18941_v39, %v8746_v7  ;;  %v8780_v55 = vmul.f32 %v18939_v60, %v8754_v12  ;;  %v8742_v8 = vrot.slane %v15891_v59, %v20971_v15  ;;  %v19096_v12 = vpop.permute.xlu1 %8836 }
0x1279   : > { %v19075_v31 = vadd.f32 %v8959_v53, %v19068_v48  ;;  %v8961_v54 = vpop.f32.mrb[153].mxu0  ;;  %v19078_v49 = vadd.f32 %v18959_v22, %v8771_v62  ;;  %v19081_v33 = vadd.f32 %v18957_v58, %v8779_v1  ;;  %v8749_v34 = vmul.f32 %v8738_v5, %v8685_v30 }
0x127a   : > { %v19084_v20 = vadd.f32 %v8961_v54, %v19068_v48  ;;  %v19087_v23 = vadd.f32 %v18959_v22, %v8772_v44  ;;  %v19090_v2 = vadd.f32 %v18957_v58, %v8780_v55  ;;  %v8750_v17 = vmul.f32 %v8742_v8, %v8686_v51 }
0x127b   : > { %v9022_v47 = vmul.f32 0.70710677, %v19075_v31  ;;  %v8758_v7 = vmul.f32 %v8742_v8, %v8694_v24  ;;  %v8757_v44 = vmul.f32 %v8738_v5, %v8693_v56  ;;  %v8775_v8 = vmul.f32 %v18941_v39, %v8749_v34 }
0x127c   : > { %v9023_v30 = vmul.f32 0.70710677, %v19084_v20  ;;  %v8965_v59 = vpop.f32.mrb[154].mxu0  ;;  %v8776_v1 = vmul.f32 %v18941_v39, %v8750_v17 }
0x127d   : > { %15892 = verf.f32 %v9022_v47  ;;  %v8966_v51 = vadd.f32 %v8965_v59, %v19096_v12  ;;  %v8967_v11 = vpop.f32.mrb[155].mxu0  ;;  %v8784_v53 = vmul.f32 %v18939_v60, %v8758_v7  ;;  %v8783_v17 = vmul.f32 %v18939_v60, %v8757_v44  ;;  %v19113_v47 = vpop.permute.xlu0 %8841 }
0x127e   : > { %15894 = verf.f32 %v9023_v30  ;;  %v8968_v24 = vadd.f32 %v8967_v11, %v19096_v12  ;;  %v19106_v55 = vadd.f32 %v18959_v22, %v8776_v1  ;;  %v19116_v5 = vadd.f32 %v18959_v22, %v8775_v8  ;;  %v19132_v1 = vpop.permute.xlu1 %8846 }
0x127f   : > { %v9024_v54 = vmul.f32 0.70710677, %v8966_v51  ;;  %v19110_v32 = vadd.f32 %v18957_v58, %v8784_v53  ;;  %v19124_v34 = vadd.f32 %v18957_v58, %v8783_v17  ;;  %v9008_v35 = vmul.f32 0.5, %v8966_v51 }
0x1280   : > { %v9025_v59 = vmul.f32 0.70710677, %v8968_v24  ;;  %v8971_v21 = vpop.f32.mrb[156].mxu0  ;;  %20985 = vst [vmem:[#allocation26_spill] sm:$0xff] %v19116_v5 }
0x1281   : > { %15896 = verf.f32 %v9024_v54  ;;  %v19119_v56 = vadd.f32 %v8971_v21, %v19113_v47  ;;  %v8973_v7 = vpop.f32.mrb[157].mxu0  ;;  %20986 = vst [vmem:[#allocation28_spill] sm:$0xff] %v19124_v34 }
0x1282   : > { %15898 = verf.f32 %v9025_v59  ;;  %v19127_v60 = vadd.f32 %v8973_v7, %v19113_v47  ;;  %v19137_v59 = vpop.permute.xlu0 %8851  ;;  %v19147_v63 = vpop.permute.xlu1 %8856 }
0x1283   : > { %v9026_v30 = vmul.f32 0.70710677, %v19119_v56 }
0x1284   : > { %v9027_v21 = vmul.f32 0.70710677, %v19127_v60  ;;  %v8977_v11 = vpop.f32.mrb[158].mxu0 }
0x1285   : > { %15900 = verf.f32 %v9026_v30  ;;  %v8978_v53 = vadd.f32 %v8977_v11, %v19132_v1  ;;  %v8979_v44 = vpop.f32.mrb[159].mxu0  ;;  %v9006_v11 = vmul.f32 0.5, %v19075_v31 }
0x1286   : > { %15902 = verf.f32 %v9027_v21  ;;  %v8980_v58 = vadd.f32 %v8979_v44, %v19132_v1 }
0x1287   : > { %v15893_v8 = vpop.eup %15892  ;;  %v9028_v54 = vmul.f32 0.70710677, %v8978_v53 }
0x1288   : > { %v15895_v17 = vpop.eup %15894  ;;  %v9029_v7 = vmul.f32 0.70710677, %v8980_v58  ;;  %v8983_v39 = vpop.f32.mrb[160].mxu0  ;;  %v9054_v62 = vadd.f32 1.0, %v15893_v8 }
0x1289   : > { %15904 = verf.f32 %v9028_v54  ;;  %v19140_v22 = vadd.f32 %v8983_v39, %v19137_v59  ;;  %v8985_v40 = vpop.f32.mrb[161].mxu0  ;;  %v9055_v44 = vadd.f32 1.0, %v15895_v17  ;;  %v9007_v54 = vmul.f32 0.5, %v19084_v20 }
0x128a   : > { %15906 = verf.f32 %v9029_v7  ;;  %v19143_v30 = vadd.f32 %v8985_v40, %v19137_v59  ;;  %v9009_v7 = vmul.f32 0.5, %v8968_v24  ;;  %v9070_v31 = vmul.f32 %v9054_v62, %v9006_v11 }
0x128b   : > { %v15897_v21 = vpop.eup %15896  ;;  %v9030_v15 = vmul.f32 0.70710677, %v19140_v22  ;;  %v9071_v3 = vmul.f32 %v9055_v44, %v9007_v54  ;;  %v19158_v54 = vpop.permute.xlu1 %8866 }
0x128c   : > { %v15899_v13 = vpop.eup %15898  ;;  %v9056_v39 = vadd.f32 1.0, %v15897_v21  ;;  %v9031_v43 = vmul.f32 0.70710677, %v19143_v30  ;;  %v8989_v8 = vpop.f32.mrb[162].mxu0 }
0x128d   : > { %v9057_v41 = vadd.f32 1.0, %v15899_v13  ;;  %15908 = verf.f32 %v9030_v15  ;;  %v8990_v40 = vadd.f32 %v8989_v8, %v19147_v63  ;;  %v8991_v36 = vpop.f32.mrb[163].mxu0  ;;  %v19153_v21 = vpop.permute.xlu0 %8861 }
0x128e   : > { %v9072_v17 = vmul.f32 %v9056_v39, %v9008_v35  ;;  %15910 = verf.f32 %v9031_v43  ;;  %v8992_v25 = vadd.f32 %v8991_v36, %v19147_v63  ;;  %v9010_v35 = vmul.f32 0.5, %v19119_v56 }
0x128f   : > { %v15901_v38 = vpop.eup %15900  ;;  %v9073_v26 = vmul.f32 %v9057_v41, %v9009_v7  ;;  %v9032_v20 = vmul.f32 0.70710677, %v8990_v40  ;;  %v9011_v39 = vmul.f32 0.5, %v19127_v60  ;;  %v9012_v7 = vmul.f32 0.5, %v8978_v53 }
0x1290   : > { %v15903_v51 = vpop.eup %15902  ;;  %v14974_v4 = vpack.c.bf16 %v9072_v17, %v9070_v31  ;;  %v9033_v57 = vmul.f32 0.70710677, %v8992_v25  ;;  %v8995_v24 = vpop.f32.mrb[164].mxu0  ;;  %v9058_v62 = vadd.f32 1.0, %v15901_v38 }
0x1291   : > { %15912 = verf.f32 %v9032_v20  ;;  %v8996_v15 = vadd.f32 %v8995_v24, %v19153_v21  ;;  %v8997_v13 = vpop.f32.mrb[165].mxu0  ;;  %v14972_v8 = vpack.c.bf16 %v9073_v26, %v9071_v3  ;;  %v9059_v41 = vadd.f32 1.0, %v15903_v51 }
0x1292   : > { %15914 = verf.f32 %v9033_v57  ;;  %v8998_v43 = vadd.f32 %v8997_v13, %v19153_v21  ;;  %v9013_v26 = vmul.f32 0.5, %v8980_v58  ;;  %v9074_v56 = vmul.f32 %v9058_v62, %v9010_v35 }
0x1293   : > { %v15905_v36 = vpop.eup %15904  ;;  %v9034_v11 = vmul.f32 0.70710677, %v8996_v15  ;;  %14973 = vmatprep.subr.bf16.mxu1 %v14972_v8  ;;  %v9075_v8 = vmul.f32 %v9059_v41, %v9011_v39  ;;  %v9014_v62 = vmul.f32 0.5, %v19140_v22  ;;  %v9016_v35 = vmul.f32 0.5, %v8990_v40 }
0x1294   : > { %v15907_v44 = vpop.eup %15906  ;;  %v9060_v31 = vadd.f32 1.0, %v15905_v36  ;;  %v9035_v17 = vmul.f32 0.70710677, %v8998_v43  ;;  %v9001_v20 = vpop.f32.mrb[166].mxu0  ;;  %14975 = vmatpush1.bf16.msra.mxu1 %v14974_v4  ;;  %v9015_v41 = vmul.f32 0.5, %v19143_v30  ;;  %v9017_v39 = vmul.f32 0.5, %v8992_v25 }
0x1295   : > { %v9061_v57 = vadd.f32 1.0, %v15907_v44  ;;  %15916 = verf.f32 %v9034_v11  ;;  %v9002_v3 = vadd.f32 %v9001_v20, %v19158_v54  ;;  %v9003_v38 = vpop.f32.mrb[167].mxu0  ;;  %v9018_v40 = vmul.f32 0.5, %v8996_v15 }
0x1296   : > { %v9076_v51 = vmul.f32 %v9060_v31, %v9012_v7  ;;  %15918 = verf.f32 %v9035_v17  ;;  %v9004_v24 = vadd.f32 %v9003_v38, %v19158_v54  ;;  %v9019_v30 = vmul.f32 0.5, %v8998_v43 }
0x1297   : > { %v15909_v13 = vpop.eup %15908  ;;  %v9077_v14 = vmul.f32 %v9061_v57, %v9013_v26  ;;  %v9036_v60 = vmul.f32 0.70710677, %v9002_v3  ;;  %v20987_v15 = vpack.c.bf16 %v19090_v2, %v19087_v23  ;;  %v20988_v43 = vpack.c.bf16 %v19081_v33, %v19078_v49 }
0x1298   : > { %v15911_v53 = vpop.eup %15910  ;;  %v14978_v36 = vpack.c.bf16 %v9076_v51, %v9074_v56  ;;  %v9037_v5 = vmul.f32 0.70710677, %v9004_v24  ;;  %v9062_v58 = vadd.f32 1.0, %v15909_v13  ;;  %v9021_v25 = vmul.f32 0.5, %v9004_v24 }
0x1299   : > { %15920 = verf.f32 %v9036_v60  ;;  %v14976_v4 = vpack.c.bf16 %v9077_v14, %v9075_v8  ;;  %v9063_v44 = vadd.f32 1.0, %v15911_v53  ;;  %v9020_v53 = vmul.f32 0.5, %v9002_v3  ;;  %v19182_v3 = vld [vmem:[%s20909_s28 + $0x28] sm:$0xff] }
0x129a   : > { %15922 = verf.f32 %v9037_v5  ;;  %v9078_v17 = vmul.f32 %v9062_v58, %v9014_v62 }
0x129b   : > { %v15913_v11 = vpop.eup %15912  ;;  %14977 = vmatprep.subr.bf16.mxu1 %v14976_v4  ;;  %v9079_v38 = vmul.f32 %v9063_v44, %v9015_v41 }
0x129c   : > { %v15915_v20 = vpop.eup %15914  ;;  %v9064_v7 = vadd.f32 1.0, %v15913_v11  ;;  %14979 = vmatpush1.bf16.msra.mxu1 %v14978_v36 }
0x129d   : > { %v9065_v31 = vadd.f32 1.0, %v15915_v20 }
0x129e   : > { %v9080_v26 = vmul.f32 %v9064_v7, %v9016_v35  ;;  %v19168_v7 = vld [vmem:[%s20909_s28 + $0x20] sm:$0xff] }
0x129f   : > { %v15917_v57 = vpop.eup %15916  ;;  %v9081_v14 = vmul.f32 %v9065_v31, %v9017_v39 }
0x12a0   : > { %v15919_v56 = vpop.eup %15918  ;;  %v14982_v5 = vpack.c.bf16 %v9080_v26, %v9078_v17  ;;  %v9066_v13 = vadd.f32 1.0, %v15917_v57 }
0x12a1   : > { %v14980_v51 = vpack.c.bf16 %v9081_v14, %v9079_v38  ;;  %v9067_v60 = vadd.f32 1.0, %v15919_v56 }
0x12a2   : > { %v9082_v58 = vmul.f32 %v9066_v13, %v9018_v40 }
0x12a3   : > { %v15921_v8 = vpop.eup %15920  ;;  %14981 = vmatprep.subr.bf16.mxu1 %v14980_v51  ;;  %v9083_v20 = vmul.f32 %v9067_v60, %v9019_v30 }
0x12a4   : > { %v15923_v22 = vpop.eup %15922  ;;  %v9068_v36 = vadd.f32 1.0, %v15921_v8  ;;  %14983 = vmatpush1.bf16.msra.mxu1 %v14982_v5 }
0x12a5   : > { %v9069_v4 = vadd.f32 1.0, %v15923_v22 }
0x12a6   : > { %v9084_v11 = vmul.f32 %v9068_v36, %v9020_v53 }
0x12a7   : > { %v9085_v44 = vmul.f32 %v9069_v4, %v9021_v25 }
0x12a8   : > { %v14986_v62 = vpack.c.bf16 %v9084_v11, %v9082_v58 }
0x12a9   : > { %v14984_v35 = vpack.c.bf16 %v9085_v44, %v9083_v20 }
0x12ab   : > { %14985 = vmatprep.subr.bf16.mxu1 %v14984_v35 }
0x12ac   : > { %14987 = vmatpush1.bf16.msra.mxu1 %v14986_v62 }
0x12ad   : > { %14989 = vmatprep.subr.bf16.mxu1 %v20987_v15 }
0x12af   : > { %14263 = vmatmul.mubr.msk.f32.vlgmr.msra.gmra.mrb[152].mxu1 %vm2801_vm1, %v19168_v7 }
0x12b0   : > { %14991 = vmatpush1.bf16.msra.mxu1 %v20988_v43  ;;  %9178 = vmatprep.mubr.f32.mxu1 %v20912_v27 }
0x12b3   : > { %14264 = vmatmul.mubr.msk.f32.gmra.mrb[154].mxu1 %vm2801_vm1, %v19182_v3 }
0x12b4   : > { %9249 = vmatprep.mubr.f32.mxu1 %v20912_v27 }
0x12b7   : > { %14265 = vmatmul.mubr.msk.f32.vlgmr.msra.gmra.mrb[156].mxu1 %vm570_vm0, %v18988_v19 }
0x12b8   : > { %9255 = vmatprep.mubr.f32.mxu1 %v20912_v27 }
0x12bb   : > { %14266 = vmatmul.mubr.msk.f32.gmra.mrb[158].mxu1 %vm570_vm0, %v19000_v10 }
0x12bc   : > { %9261 = vmatprep.mubr.f32.mxu1 %v20912_v27 }
0x12bf   : > { %14267 = vmatmul.mubr.msk.f32.gmra.mrb[160].mxu1 %vm570_vm0, %v19008_v46 }
0x12c0   : > { %9267 = vmatprep.mubr.f32.mxu1 %v20912_v27 }
0x12c3   : > { %14268 = vmatmul.mubr.msk.f32.gmra.mrb[162].mxu1 %vm570_vm0, %v19016_v0 }
0x12c4   : > { %9273 = vmatprep.mubr.f32.mxu1 %v20912_v27 }
0x12c7   : > { %14269 = vmatmul.mubr.msk.f32.gmra.mrb[164].mxu1 %vm570_vm0, %v19024_v6 }
0x12c8   : > { %9279 = vmatprep.mubr.f32.mxu1 %v20912_v27 }
0x12cb   : > { %14270 = vmatmul.mubr.msk.f32.gmra.mrb[166].mxu1 %vm570_vm0, %v19032_v28 }
0x12cc   : > { %9285 = vmatprep.mubr.f32.mxu1 %v20912_v27 }
0x12cf   : > { %14271 = vmatmul.mubr.msk.f32.gmra.mrb[168].mxu1 %vm570_vm0, %v19040_v42 }
0x12d0   : > { %9291 = vmatprep.mubr.f32.mxu1 %v20912_v27 }
0x12d3   : > { %14272 = vmatmul.mubr.msk.f32.gmra.mrb[170].mxu1 %vm570_vm0, %v19048_v29 }
0x12d4   : > { %9712 = vmatprep.mubr.f32.mxu1 %v20912_v27 }
0x1382   : > { %v19211_v49 = vpop.f32.mrb[152].mxu1 }
0x1383   : > { %v19213_v33 = vpop.f32.mrb[153].mxu1 }
0x1386   : > { %v19215_v23 = vpop.f32.mrb[154].mxu1 }
0x1387   : > { %v19217_v2 = vpop.f32.mrb[155].mxu1 }
0x138a   : > { %v9251_v24 = vpop.f32.mrb[156].mxu1 }
0x138b   : > { %v9252_v41 = vadd.f32 %v9251_v24, %v19068_v48  ;;  %v9253_v39 = vpop.f32.mrb[157].mxu1 }
0x138c   : > { %v9254_v31 = vadd.f32 %v9253_v39, %v19068_v48 }
0x138d   : > { %v9314_v17 = vmul.f32 0.70710677, %v9252_v41 }
0x138e   : > { %v9315_v26 = vmul.f32 0.70710677, %v9254_v31  ;;  %v9257_v57 = vpop.f32.mrb[158].mxu1 }
0x138f   : > { %15924 = verf.f32 %v9314_v17  ;;  %v9258_v38 = vadd.f32 %v9257_v57, %v19096_v12  ;;  %v9259_v14 = vpop.f32.mrb[159].mxu1  ;;  %v9298_v17 = vmul.f32 0.5, %v9252_v41 }
0x1390   : > { %15926 = verf.f32 %v9315_v26  ;;  %v9260_v56 = vadd.f32 %v9259_v14, %v19096_v12 }
0x1391   : > { %v9316_v5 = vmul.f32 0.70710677, %v9258_v38 }
0x1392   : > { %v9317_v51 = vmul.f32 0.70710677, %v9260_v56  ;;  %v9263_v13 = vpop.f32.mrb[160].mxu1 }
0x1393   : > { %15928 = verf.f32 %v9316_v5  ;;  %v9264_v8 = vadd.f32 %v9263_v13, %v19113_v47  ;;  %v9265_v60 = vpop.f32.mrb[161].mxu1  ;;  %v9299_v5 = vmul.f32 0.5, %v9254_v31 }
0x1394   : > { %15930 = verf.f32 %v9317_v51  ;;  %v9266_v22 = vadd.f32 %v9265_v60, %v19113_v47  ;;  %v9300_v51 = vmul.f32 0.5, %v9258_v38 }
0x1395   : > { %v9318_v40 = vmul.f32 0.70710677, %v9264_v8 }
0x1396   : > { %v9319_v53 = vmul.f32 0.70710677, %v9266_v22  ;;  %v9269_v36 = vpop.f32.mrb[162].mxu1 }
0x1397   : > { %15932 = verf.f32 %v9318_v40  ;;  %v9270_v30 = vadd.f32 %v9269_v36, %v19132_v1  ;;  %v9271_v25 = vpop.f32.mrb[163].mxu1 }
0x1398   : > { %15934 = verf.f32 %v9319_v53  ;;  %v9272_v4 = vadd.f32 %v9271_v25, %v19132_v1  ;;  %v9301_v53 = vmul.f32 0.5, %v9260_v56 }
0x1399   : > { %v15925_v58 = vpop.eup %15924  ;;  %v9320_v11 = vmul.f32 0.70710677, %v9270_v30 }
0x139a   : > { %v15927_v20 = vpop.eup %15926  ;;  %v9321_v44 = vmul.f32 0.70710677, %v9272_v4  ;;  %v9275_v62 = vpop.f32.mrb[164].mxu1  ;;  %v9346_v43 = vadd.f32 1.0, %v15925_v58 }
0x139b   : > { %15936 = verf.f32 %v9320_v11  ;;  %v19228_v35 = vadd.f32 %v9275_v62, %v19137_v59  ;;  %v9277_v15 = vpop.f32.mrb[165].mxu1  ;;  %v9347_v26 = vadd.f32 1.0, %v15927_v20 }
0x139c   : > { %15938 = verf.f32 %v9321_v44  ;;  %v19231_v24 = vadd.f32 %v9277_v15, %v19137_v59  ;;  %v9362_v11 = vmul.f32 %v9346_v43, %v9298_v17 }
0x139d   : > { %v15929_v39 = vpop.eup %15928  ;;  %v9322_v57 = vmul.f32 0.70710677, %v19228_v35  ;;  %v9363_v62 = vmul.f32 %v9347_v26, %v9299_v5  ;;  %v9303_v5 = vmul.f32 0.5, %v9266_v22 }
0x139e   : > { %v15931_v14 = vpop.eup %15930  ;;  %v9348_v13 = vadd.f32 1.0, %v15929_v39  ;;  %v9323_v60 = vmul.f32 0.70710677, %v19231_v24  ;;  %v9281_v40 = vpop.f32.mrb[166].mxu1 }
0x139f   : > { %v9349_v36 = vadd.f32 1.0, %v15931_v14  ;;  %15940 = verf.f32 %v9322_v57  ;;  %v9282_v25 = vadd.f32 %v9281_v40, %v19147_v63  ;;  %v9283_v58 = vpop.f32.mrb[167].mxu1 }
0x13a0   : > { %v9364_v44 = vmul.f32 %v9348_v13, %v9300_v51  ;;  %15942 = verf.f32 %v9323_v60  ;;  %v9284_v41 = vadd.f32 %v9283_v58, %v19147_v63  ;;  %v9302_v51 = vmul.f32 0.5, %v9264_v8 }
0x13a1   : > { %v15933_v20 = vpop.eup %15932  ;;  %v9365_v15 = vmul.f32 %v9349_v36, %v9301_v53  ;;  %v9324_v31 = vmul.f32 0.70710677, %v9282_v25  ;;  %v9304_v53 = vmul.f32 0.5, %v9270_v30 }
0x13a2   : > { %v15935_v38 = vpop.eup %15934  ;;  %v14994_v39 = vpack.c.bf16 %v9364_v44, %v9362_v11  ;;  %v9325_v34 = vmul.f32 0.70710677, %v9284_v41  ;;  %v9287_v52 = vpop.f32.mrb[168].mxu1  ;;  %v9350_v40 = vadd.f32 1.0, %v15933_v20  ;;  %v9305_v44 = vmul.f32 0.5, %v9272_v4 }
0x13a3   : > { %15944 = verf.f32 %v9324_v31  ;;  %v9288_v56 = vadd.f32 %v9287_v52, %v19153_v21  ;;  %v9289_v57 = vpop.f32.mrb[169].mxu1  ;;  %v14992_v14 = vpack.c.bf16 %v9365_v15, %v9363_v62  ;;  %v9351_v13 = vadd.f32 1.0, %v15935_v38 }
0x13a4   : > { %15946 = verf.f32 %v9325_v34  ;;  %v9290_v43 = vadd.f32 %v9289_v57, %v19153_v21  ;;  %v9366_v62 = vmul.f32 %v9350_v40, %v9302_v51  ;;  %v9306_v40 = vmul.f32 0.5, %v19228_v35 }
0x13a5   : > { %v15937_v17 = vpop.eup %15936  ;;  %v9326_v60 = vmul.f32 0.70710677, %v9288_v56  ;;  %14993 = vmatprep.subr.bf16.mxu0 %v14992_v14  ;;  %v9367_v38 = vmul.f32 %v9351_v13, %v9303_v5  ;;  %v9308_v51 = vmul.f32 0.5, %v9282_v25  ;;  %v9307_v13 = vmul.f32 0.5, %v19231_v24 }
0x13a6   : > { %v15939_v26 = vpop.eup %15938  ;;  %v9352_v36 = vadd.f32 1.0, %v15937_v17  ;;  %v9327_v58 = vmul.f32 0.70710677, %v9290_v43  ;;  %v9293_v11 = vpop.f32.mrb[170].mxu1  ;;  %14995 = vmatpush1.bf16.msra.mxu0 %v14994_v39  ;;  %v9309_v5 = vmul.f32 0.5, %v9284_v41  ;;  %v9310_v25 = vmul.f32 0.5, %v9288_v56 }
0x13a7   : > { %v9353_v52 = vadd.f32 1.0, %v15939_v26  ;;  %15948 = verf.f32 %v9326_v60  ;;  %v9294_v20 = vadd.f32 %v9293_v11, %v19158_v54  ;;  %v9295_v34 = vpop.f32.mrb[171].mxu1  ;;  %v9311_v24 = vmul.f32 0.5, %v9290_v43 }
0x13a8   : > { %v9368_v15 = vmul.f32 %v9352_v36, %v9304_v53  ;;  %15950 = verf.f32 %v9327_v58  ;;  %v9296_v8 = vadd.f32 %v9295_v34, %v19158_v54  ;;  %v20990_v56 = vpack.c.bf16 %v18977_v18, %v18974_v9 }
0x13a9   : > { %v15941_v31 = vpop.eup %15940  ;;  %v9369_v57 = vmul.f32 %v9353_v52, %v9305_v44  ;;  %v9328_v22 = vmul.f32 0.70710677, %v9294_v20 }
0x13aa   : > { %v15943_v30 = vpop.eup %15942  ;;  %v14998_v14 = vpack.c.bf16 %v9368_v15, %v9366_v62  ;;  %v9329_v17 = vmul.f32 0.70710677, %v9296_v8  ;;  %v9354_v4 = vadd.f32 1.0, %v15941_v31  ;;  %v9313_v41 = vmul.f32 0.5, %v9296_v8 }
0x13ab   : > { %15952 = verf.f32 %v9328_v22  ;;  %v14996_v39 = vpack.c.bf16 %v9369_v57, %v9367_v38  ;;  %v9355_v26 = vadd.f32 1.0, %v15943_v30 }
0x13ac   : > { %15954 = verf.f32 %v9329_v17  ;;  %v9370_v58 = vmul.f32 %v9354_v4, %v9306_v40  ;;  %v9312_v17 = vmul.f32 0.5, %v9294_v20 }
0x13ad   : > { %v15945_v60 = vpop.eup %15944  ;;  %14997 = vmatprep.subr.bf16.mxu0 %v14996_v39  ;;  %v9371_v34 = vmul.f32 %v9355_v26, %v9307_v13 }
0x13ae   : > { %v15947_v11 = vpop.eup %15946  ;;  %v9356_v53 = vadd.f32 1.0, %v15945_v60  ;;  %14999 = vmatpush1.bf16.msra.mxu0 %v14998_v14 }
0x13af   : > { %v9357_v36 = vadd.f32 1.0, %v15947_v11 }
0x13b0   : > { %v9372_v44 = vmul.f32 %v9356_v53, %v9308_v51  ;;  %v20989_v53 = vpack.c.bf16 %v18983_v61, %v18980_v37 }
0x13b1   : > { %v15949_v52 = vpop.eup %15948  ;;  %v9373_v62 = vmul.f32 %v9357_v36, %v9309_v5 }
0x13b2   : > { %v15951_v15 = vpop.eup %15950  ;;  %v15002_v31 = vpack.c.bf16 %v9372_v44, %v9370_v58  ;;  %v9358_v57 = vadd.f32 1.0, %v15949_v52 }
0x13b3   : > { %v15000_v38 = vpack.c.bf16 %v9373_v62, %v9371_v34  ;;  %v9359_v30 = vadd.f32 1.0, %v15951_v15 }
0x13b4   : > { %v9374_v4 = vmul.f32 %v9358_v57, %v9310_v25 }
0x13b5   : > { %v15953_v22 = vpop.eup %15952  ;;  %15001 = vmatprep.subr.bf16.mxu0 %v15000_v38  ;;  %v9375_v11 = vmul.f32 %v9359_v30, %v9311_v24 }
0x13b6   : > { %v15955_v35 = vpop.eup %15954  ;;  %v9360_v14 = vadd.f32 1.0, %v15953_v22  ;;  %15003 = vmatpush1.bf16.msra.mxu0 %v15002_v31 }
0x13b7   : > { %v9361_v39 = vadd.f32 1.0, %v15955_v35 }
0x13b8   : > { %v9376_v60 = vmul.f32 %v9360_v14, %v9312_v17 }
0x13b9   : > { %v9377_v26 = vmul.f32 %v9361_v39, %v9313_v41 }
0x13ba   : > { %v15006_v40 = vpack.c.bf16 %v9376_v60, %v9374_v4 }
0x13bb   : > { %v15004_v51 = vpack.c.bf16 %v9377_v26, %v9375_v11 }
0x13bd   : > { %15005 = vmatprep.subr.bf16.mxu0 %v15004_v51 }
0x13be   : > { %15007 = vmatpush1.bf16.msra.mxu0 %v15006_v40 }
0x13bf   : > { %15009 = vmatprep.subr.bf16.mxu0 %v20989_v53 }
0x13c1   : > { %14273 = vmatmul.mubr.msk.f32.vlgmr.msra.gmra.mrb[168].mxu0 %vm2801_vm1, %v19168_v7 }
0x13c2   : > { %15011 = vmatpush1.bf16.msra.mxu0 %v20990_v56  ;;  %9448 = vmatprep.mubr.f32.mxu0 %v20912_v27 }
0x13c5   : > { %14274 = vmatmul.mubr.msk.f32.gmra.mrb[170].mxu0 %vm2801_vm1, %v19182_v3 }
0x13c6   : > { %9519 = vmatprep.mubr.f32.mxu0 %v20912_v27 }
0x13c9   : > { %14275 = vmatmul.mubr.msk.f32.vlgmr.msra.gmra.mrb[172].mxu0 %vm570_vm0, %v18988_v19 }
0x13ca   : > { %9525 = vmatprep.mubr.f32.mxu0 %v20912_v27 }
0x13cd   : > { %14276 = vmatmul.mubr.msk.f32.gmra.mrb[174].mxu0 %vm570_vm0, %v19000_v10 }
0x13ce   : > { %9531 = vmatprep.mubr.f32.mxu0 %v20912_v27 }
0x13d1   : > { %14277 = vmatmul.mubr.msk.f32.gmra.mrb[176].mxu0 %vm570_vm0, %v19008_v46 }
0x13d2   : > { %9537 = vmatprep.mubr.f32.mxu0 %v20912_v27 }
0x13d5   : > { %14278 = vmatmul.mubr.msk.f32.gmra.mrb[178].mxu0 %vm570_vm0, %v19016_v0 }
0x13d6   : > { %9543 = vmatprep.mubr.f32.mxu0 %v20912_v27 }
0x13d9   : > { %14279 = vmatmul.mubr.msk.f32.gmra.mrb[180].mxu0 %vm570_vm0, %v19024_v6 }
0x13da   : > { %9549 = vmatprep.mubr.f32.mxu0 %v20912_v27 }
0x13dd   : > { %14280 = vmatmul.mubr.msk.f32.gmra.mrb[182].mxu0 %vm570_vm0, %v19032_v28 }
0x13de   : > { %9555 = vmatprep.mubr.f32.mxu0 %v20912_v27 }
0x13e1   : > { %14281 = vmatmul.mubr.msk.f32.gmra.mrb[184].mxu0 %vm570_vm0, %v19040_v42 }
0x13e2   : > { %9561 = vmatprep.mubr.f32.mxu0 %v20912_v27 }
0x13e5   : > { %14282 = vmatmul.mubr.msk.f32.gmra.mrb[186].mxu0 %vm570_vm0, %v19048_v29 }
0x13e6   : > { %9982 = vmatprep.mubr.f32.mxu0 %v20912_v27 }
0x1494   : > { %v19279_v9 = vpop.f32.mrb[168].mxu0 }
0x1495   : > { %v19281_v18 = vpop.f32.mrb[169].mxu0 }
0x1498   : > { %v19283_v37 = vpop.f32.mrb[170].mxu0 }
0x1499   : > { %v19285_v61 = vpop.f32.mrb[171].mxu0 }
0x149c   : > { %v9521_v19 = vpop.f32.mrb[172].mxu0 }
0x149d   : > { %v9522_v10 = vadd.f32 %v9521_v19, %v19068_v48  ;;  %v9523_v46 = vpop.f32.mrb[173].mxu0 }
0x149e   : > { %v9524_v0 = vadd.f32 %v9523_v46, %v19068_v48 }
0x149f   : > { %v9584_v6 = vmul.f32 0.70710677, %v9522_v10  ;;  %v9568_v4 = vmul.f32 0.5, %v9522_v10 }
0x14a0   : > { %v9585_v28 = vmul.f32 0.70710677, %v9524_v0  ;;  %v9527_v42 = vpop.f32.mrb[174].mxu0  ;;  %v9569_v40 = vmul.f32 0.5, %v9524_v0 }
0x14a1   : > { %15956 = verf.f32 %v9584_v6  ;;  %v9528_v29 = vadd.f32 %v9527_v42, %v19096_v12  ;;  %v9529_v43 = vpop.f32.mrb[175].mxu0 }
0x14a2   : > { %15958 = verf.f32 %v9585_v28  ;;  %v9530_v20 = vadd.f32 %v9529_v43, %v19096_v12 }
0x14a3   : > { %v9586_v8 = vmul.f32 0.70710677, %v9528_v29  ;;  %v9570_v51 = vmul.f32 0.5, %v9528_v29 }
0x14a4   : > { %v9587_v13 = vmul.f32 0.70710677, %v9530_v20  ;;  %v9533_v5 = vpop.f32.mrb[176].mxu0  ;;  %v9571_v46 = vmul.f32 0.5, %v9530_v20 }
0x14a5   : > { %15960 = verf.f32 %v9586_v8  ;;  %v9534_v36 = vadd.f32 %v9533_v5, %v19113_v47  ;;  %v9535_v58 = vpop.f32.mrb[177].mxu0 }
0x14a6   : > { %15962 = verf.f32 %v9587_v13  ;;  %v9536_v44 = vadd.f32 %v9535_v58, %v19113_v47 }
0x14a7   : > { %v9588_v52 = vmul.f32 0.70710677, %v9534_v36 }
0x14a8   : > { %v9589_v34 = vmul.f32 0.70710677, %v9536_v44  ;;  %v9539_v62 = vpop.f32.mrb[178].mxu0 }
0x14a9   : > { %15964 = verf.f32 %v9588_v52  ;;  %v9540_v15 = vadd.f32 %v9539_v62, %v19132_v1  ;;  %v9541_v31 = vpop.f32.mrb[179].mxu0 }
0x14aa   : > { %15966 = verf.f32 %v9589_v34  ;;  %v9542_v38 = vadd.f32 %v9541_v31, %v19132_v1 }
0x14ab   : > { %v15957_v57 = vpop.eup %15956  ;;  %v9590_v22 = vmul.f32 0.70710677, %v9540_v15 }
0x14ac   : > { %v15959_v30 = vpop.eup %15958  ;;  %v9591_v35 = vmul.f32 0.70710677, %v9542_v38  ;;  %v9545_v25 = vpop.f32.mrb[180].mxu0  ;;  %v9616_v24 = vadd.f32 1.0, %v15957_v57 }
0x14ad   : > { %15968 = verf.f32 %v9590_v22  ;;  %v19296_v17 = vadd.f32 %v9545_v25, %v19137_v59  ;;  %v9547_v14 = vpop.f32.mrb[181].mxu0  ;;  %v9617_v60 = vadd.f32 1.0, %v15959_v30  ;;  %v9572_v25 = vmul.f32 0.5, %v9534_v36 }
0x14ae   : > { %15970 = verf.f32 %v9591_v35  ;;  %v19299_v41 = vadd.f32 %v9547_v14, %v19137_v59  ;;  %v9632_v43 = vmul.f32 %v9616_v24, %v9568_v4  ;;  %v9573_v4 = vmul.f32 0.5, %v9536_v44 }
0x14af   : > { %v15961_v39 = vpop.eup %15960  ;;  %v9592_v11 = vmul.f32 0.70710677, %v19296_v17  ;;  %v9633_v5 = vmul.f32 %v9617_v60, %v9569_v40  ;;  %v9574_v60 = vmul.f32 0.5, %v9540_v15 }
0x14b0   : > { %v15963_v26 = vpop.eup %15962  ;;  %v9618_v53 = vadd.f32 1.0, %v15961_v39  ;;  %v9593_v56 = vmul.f32 0.70710677, %v19299_v41  ;;  %v9551_v19 = vpop.f32.mrb[182].mxu0 }
0x14b1   : > { %v9619_v6 = vadd.f32 1.0, %v15963_v26  ;;  %15972 = verf.f32 %v9592_v11  ;;  %v9552_v28 = vadd.f32 %v9551_v19, %v19147_v63  ;;  %v9553_v42 = vpop.f32.mrb[183].mxu0 }
0x14b2   : > { %v9634_v8 = vmul.f32 %v9618_v53, %v9570_v51  ;;  %15974 = verf.f32 %v9593_v56  ;;  %v9554_v10 = vadd.f32 %v9553_v42, %v19147_v63  ;;  %v9575_v51 = vmul.f32 0.5, %v9542_v38 }
0x14b3   : > { %v15965_v13 = vpop.eup %15964  ;;  %v9635_v58 = vmul.f32 %v9619_v6, %v9571_v46  ;;  %v9594_v0 = vmul.f32 0.70710677, %v9552_v28 }
0x14b4   : > { %v15967_v29 = vpop.eup %15966  ;;  %v15014_v52 = vpack.c.bf16 %v9634_v8, %v9632_v43  ;;  %v9595_v34 = vmul.f32 0.70710677, %v9554_v10  ;;  %v9557_v62 = vpop.f32.mrb[184].mxu0  ;;  %v9620_v22 = vadd.f32 1.0, %v15965_v13 }
0x14b5   : > { %15976 = verf.f32 %v9594_v0  ;;  %v19306_v20 = vadd.f32 %v9557_v62, %v19153_v21  ;;  %v9559_v31 = vpop.f32.mrb[185].mxu0  ;;  %v15012_v57 = vpack.c.bf16 %v9635_v58, %v9633_v5  ;;  %v9621_v14 = vadd.f32 1.0, %v15967_v29 }
0x14b6   : > { %15978 = verf.f32 %v9595_v34  ;;  %v19309_v30 = vadd.f32 %v9559_v31, %v19153_v21  ;;  %v9636_v46 = vmul.f32 %v9620_v22, %v9572_v25  ;;  %v9576_v34 = vmul.f32 0.5, %v19296_v17 }
0x14b7   : > { %v15969_v35 = vpop.eup %15968  ;;  %v9596_v24 = vmul.f32 0.70710677, %v19306_v20  ;;  %15013 = vmatprep.subr.bf16.mxu1 %v15012_v57  ;;  %v9637_v43 = vmul.f32 %v9621_v14, %v9573_v4  ;;  %v9578_v62 = vmul.f32 0.5, %v9552_v28  ;;  %v9577_v57 = vmul.f32 0.5, %v19299_v41 }
0x14b8   : > { %v15971_v39 = vpop.eup %15970  ;;  %v9622_v11 = vadd.f32 1.0, %v15969_v35  ;;  %v9597_v26 = vmul.f32 0.70710677, %v19309_v30  ;;  %v9563_v40 = vpop.f32.mrb[186].mxu0  ;;  %15015 = vmatpush1.bf16.msra.mxu1 %v15014_v52  ;;  %v9579_v22 = vmul.f32 0.5, %v9554_v10 }
0x14b9   : > { %v9623_v53 = vadd.f32 1.0, %v15971_v39  ;;  %15980 = verf.f32 %v9596_v24  ;;  %v9564_v56 = vadd.f32 %v9563_v40, %v19158_v54  ;;  %v9565_v19 = vpop.f32.mrb[187].mxu0  ;;  %v19317_v40 = vpop.permute.xlu1 %9099 }
0x14ba   : > { %v9638_v36 = vmul.f32 %v9622_v11, %v9574_v60  ;;  %15982 = verf.f32 %v9597_v26  ;;  %v9566_v6 = vadd.f32 %v9565_v19, %v19158_v54  ;;  %v9183_v17 = vadd.f32 %v19217_v2, %v19317_v40  ;;  %v19321_v10 = vpop.permute.xlu0 %9094 }
0x14bb   : > { %v15973_v42 = vpop.eup %15972  ;;  %v9639_v44 = vmul.f32 %v9623_v53, %v9575_v51  ;;  %v9598_v15 = vmul.f32 0.70710677, %v9564_v56  ;;  %v9580_v19 = vmul.f32 0.5, %v19306_v20 }
0x14bc   : > { %v15975_v8 = vpop.eup %15974  ;;  %v15018_v13 = vpack.c.bf16 %v9638_v36, %v9636_v46  ;;  %v9599_v5 = vmul.f32 0.70710677, %v9566_v6  ;;  %v9624_v38 = vadd.f32 1.0, %v15973_v42  ;;  %v9582_v46 = vmul.f32 0.5, %v9564_v56 }
0x14bd   : > { %15984 = verf.f32 %v9598_v15  ;;  %v15016_v58 = vpack.c.bf16 %v9639_v44, %v9637_v43  ;;  %v9625_v29 = vadd.f32 1.0, %v15975_v8  ;;  %v9177_v42 = vadd.f32 %v19213_v33, %v19321_v10 }
0x14be   : > { %15986 = verf.f32 %v9599_v5  ;;  %v9640_v25 = vmul.f32 %v9624_v38, %v9576_v34  ;;  %v9581_v43 = vmul.f32 0.5, %v19309_v30  ;;  %v9583_v44 = vmul.f32 0.5, %v9566_v6  ;;  %v20993_v34 = vld [vmem:[#allocation28_spill] sm:$0xff] }
0x14bf   : > { %v15977_v0 = vpop.eup %15976  ;;  %15017 = vmatprep.subr.bf16.mxu1 %v15016_v58  ;;  %v9641_v39 = vmul.f32 %v9625_v29, %v9577_v57  ;;  %v19328_v2 = vadd.f32 %v9183_v17, %v18795_v16  ;;  %v19331_v20 = vadd.f32 %v9177_v42, %v18792_v45  ;;  %v9175_v30 = vadd.f32 %v19211_v49, %v19321_v10  ;;  %v20992_v29 = vld [vmem:[#allocation21_spill] sm:$0xff]  ;;  %v20994_v49 = vld [vmem:[#allocation26_spill] sm:$0xff]  ;;  %v16203_v57 = vld [vmem:[%s20906_s27 + $0x98] sm:$0xff] }
0x14c0   : > { %v15979_v52 = vpop.eup %15978  ;;  %v9626_v31 = vadd.f32 1.0, %v15977_v0  ;;  %15019 = vmatpush1.bf16.msra.mxu1 %v15018_v13  ;;  %v9181_v0 = vadd.f32 %v19215_v23, %v19317_v40  ;;  %v20991_v16 = vpack.c.bf16 %v19110_v32, %v19106_v55  ;;  %v20997_v17 = vld [vmem:[#allocation29_spill] sm:$0xff] }
0x14c1   : > { %v9627_v35 = vadd.f32 1.0, %v15979_v52  ;;  %v10310_v33 = vmul.f32 %v19328_v2, %v19328_v2  ;;  %v10302_v45 = vmul.f32 %v19331_v20, %v19331_v20  ;;  %v19350_v52 = vadd.f32 %v9175_v30, %v20992_v29 }
0x14c2   : > { %v9642_v14 = vmul.f32 %v9626_v31, %v9578_v62  ;;  %v19345_v6 = vadd.f32 %v9181_v0, %v18787_v50  ;;  %v20995_v62 = vpack.c.bf16 %v20993_v34, %v20994_v49  ;;  %v16201_v31 = vld [vmem:[%s20906_s27 + $0x88] sm:$0xff] }
0x14c3   : > { %v15981_v24 = vpop.eup %15980  ;;  %v9643_v4 = vmul.f32 %v9627_v35, %v9579_v22  ;;  %v15064_v23 = vpack.c.bf16 %v10310_v33, %v10302_v45  ;;  %v10301_v50 = vmul.f32 %v19350_v52, %v19350_v52  ;;  %v16204_v22 = vld [vmem:[%s20906_s27 + $0xa0] sm:$0xff]  ;;  %v16205_v35 = vld [vmem:[%s20906_s27 + $0xa8] sm:$0xff] }
0x14c4   : > { %v15983_v60 = vpop.eup %15982  ;;  %v15022_v11 = vpack.c.bf16 %v9642_v14, %v9640_v25  ;;  %v9628_v51 = vadd.f32 1.0, %v15981_v24  ;;  %v10309_v32 = vmul.f32 %v19345_v6, %v19345_v6  ;;  %v16206_v25 = vld [vmem:[%s20906_s27 + $0xb0] sm:$0xff]  ;;  %v16207_v14 = vld [vmem:[%s20906_s27 + $0xb8] sm:$0xff]  ;;  %v20996_v24 = vmov 1.0  }
0x14c5   : > { %v15020_v26 = vpack.c.bf16 %v9643_v4, %v9641_v39  ;;  %v9629_v28 = vadd.f32 1.0, %v15983_v60 }
0x14c6   : > { %v9644_v8 = vmul.f32 %v9628_v51, %v9580_v19  ;;  %v15066_v55 = vpack.c.bf16 %v10309_v32, %v10301_v50  ;;  %v20998_v19 = vld [vmem:[#allocation23_spill] sm:$0xff] }
0x14c7   : > { %v15985_v53 = vpop.eup %15984  ;;  %15021 = vmatprep.subr.bf16.mxu1 %v15020_v26  ;;  %v9645_v5 = vmul.f32 %v9629_v28, %v9581_v43  ;;  %v21000_v43 = vld [vmem:[#allocation31_spill] sm:$0xff] }
0x14c8   : > { %v15987_v41 = vpop.eup %15986  ;;  %v9630_v36 = vadd.f32 1.0, %v15985_v53  ;;  %15023 = vmatpush1.bf16.msra.mxu1 %v15022_v11 }
0x14c9   : > { %v9631_v15 = vadd.f32 1.0, %v15987_v41 }
0x14ca   : > { %v9646_v13 = vmul.f32 %v9630_v36, %v9582_v46  ;;  %v20999_v36 = vld [vmem:[#allocation30_spill] sm:$0xff] }
0x14cb   : > { %v9647_v58 = vmul.f32 %v9631_v15, %v9583_v44 }
0x14cc   : > { %v15026_v38 = vpack.c.bf16 %v9646_v13, %v9644_v8 }
0x14cd   : > { %v15024_v56 = vpack.c.bf16 %v9647_v58, %v9645_v5 }
0x14cf   : > { %15025 = vmatprep.subr.bf16.mxu1 %v15024_v56 }
0x14d0   : > { %15027 = vmatpush1.bf16.msra.mxu1 %v15026_v38 }
0x14d1   : > { %15029 = vmatprep.subr.bf16.mxu1 %v20991_v16 }
0x14d3   : > { %14283 = vmatmul.mubr.msk.f32.vlgmr.msra.gmra.mrb[172].mxu1 %vm2801_vm1, %v19168_v7  ;;  %v16200_v7 = vld [vmem:[%s20906_s27 + $0x80] sm:$0xff] }
0x14d4   : > { %15031 = vmatpush1.bf16.msra.mxu1 %v20995_v62  ;;  %9718 = vmatprep.mubr.f32.mxu1 %v20912_v27 }
0x14d5   : > { %15065 = vmatprep.subr.bf16.mxu1 %v15064_v23 }
0x14d7   : > { %14284 = vmatmul.mubr.msk.f32.gmra.mrb[174].mxu1 %vm2801_vm1, %v19182_v3  ;;  %v16202_v3 = vld [vmem:[%s20906_s27 + $0x90] sm:$0xff] }
0x14d8   : > { %9789 = vmatprep.mubr.f32.mxu1 %v20912_v27 }
0x14db   : > { %14285 = vmatmul.mubr.msk.f32.vlgmr.msra.gmra.mrb[176].mxu1 %vm570_vm0, %v16200_v7 }
0x14dc   : > { %15067 = vmatpush1.bf16.msra.mxu1 %v15066_v55  ;;  %9795 = vmatprep.mubr.f32.mxu1 %v20912_v27 }
0x14df   : > { %14286 = vmatmul.mubr.msk.f32.gmra.mrb[178].mxu1 %vm570_vm0, %v16201_v31 }
0x14e0   : > { %9801 = vmatprep.mubr.f32.mxu1 %v20912_v27 }
0x14e3   : > { %14287 = vmatmul.mubr.msk.f32.gmra.mrb[180].mxu1 %vm570_vm0, %v16202_v3 }
0x14e4   : > { %9807 = vmatprep.mubr.f32.mxu1 %v20912_v27 }
0x14e7   : > { %14288 = vmatmul.mubr.msk.f32.gmra.mrb[182].mxu1 %vm570_vm0, %v16203_v57 }
0x14e8   : > { %9813 = vmatprep.mubr.f32.mxu1 %v20912_v27 }
0x14eb   : > { %14289 = vmatmul.mubr.msk.f32.gmra.mrb[184].mxu1 %vm570_vm0, %v16204_v22 }
0x14ec   : > { %9819 = vmatprep.mubr.f32.mxu1 %v20912_v27 }
0x14ef   : > { %14290 = vmatmul.mubr.msk.f32.gmra.mrb[186].mxu1 %vm570_vm0, %v16205_v35 }
0x14f0   : > { %9825 = vmatprep.mubr.f32.mxu1 %v20912_v27 }
0x14f3   : > { %14291 = vmatmul.mubr.msk.f32.gmra.mrb[188].mxu1 %vm570_vm0, %v16206_v25 }
0x14f4   : > { %9831 = vmatprep.mubr.f32.mxu1 %v20912_v27 }
0x14f7   : > { %14292 = vmatmul.mubr.msk.f32.gmra.mrb[190].mxu1 %vm570_vm0, %v16207_v14 }
0x14f8   : > { %10381 = vmatprep.mubr.f32.mxu1 %v20912_v27 }
0x14fb   : > { %14303 = vmatmul.mubr.msk.f32.vlgmr.msra.gmra.mrb[192].mxu1 %vm570_vm0, %v20996_v24 }
0x14fc   : > { %10523 = vmatprep.mubr.f32.mxu1 %v20912_v27 }
0x15a6   : > { %v9714_v39 = vpop.f32.mrb[172].mxu1 }
0x15a7   : > { %v9716_v4 = vpop.f32.mrb[173].mxu1  ;;  %v9715_v11 = vadd.f32 %v9714_v39, %v19321_v10 }
0x15a8   : > { %v9717_v60 = vadd.f32 %v9716_v4, %v19321_v10 }
0x15a9   : > { %v19414_v46 = vadd.f32 %v9715_v11, %v20998_v19 }
0x15aa   : > { %v9720_v26 = vpop.f32.mrb[174].mxu1  ;;  %v19410_v28 = vadd.f32 %v9717_v60, %v20997_v17 }
0x15ab   : > { %v9721_v51 = vadd.f32 %v9720_v26, %v19317_v40  ;;  %v9722_v53 = vpop.f32.mrb[175].mxu1  ;;  %v10305_v33 = vmul.f32 %v19414_v46, %v19414_v46 }
0x15ac   : > { %v9723_v41 = vadd.f32 %v9722_v53, %v19317_v40  ;;  %v10306_v38 = vmul.f32 %v19410_v28, %v19410_v28 }
0x15ad   : > { %v19417_v42 = vadd.f32 %v9721_v51, %v20999_v36 }
0x15ae   : > { %v19420_v44 = vadd.f32 %v9723_v41, %v21000_v43  ;;  %v9791_v15 = vpop.f32.mrb[176].mxu1 }
0x15af   : > { %v9792_v8 = vadd.f32 %v9791_v15, %v19068_v48  ;;  %v9793_v13 = vpop.f32.mrb[177].mxu1  ;;  %v10313_v5 = vmul.f32 %v19417_v42, %v19417_v42 }
0x15b0   : > { %v9794_v58 = vadd.f32 %v9793_v13, %v19068_v48  ;;  %v10314_v56 = vmul.f32 %v19420_v44, %v19420_v44 }
0x15b1   : > { %v9854_v0 = vmul.f32 0.70710677, %v9792_v8  ;;  %v15074_v34 = vpack.c.bf16 %v10313_v5, %v10305_v33  ;;  %v9838_v17 = vmul.f32 0.5, %v9792_v8 }
0x15b2   : > { %v9855_v30 = vmul.f32 0.70710677, %v9794_v58  ;;  %v9797_v16 = vpop.f32.mrb[178].mxu1  ;;  %v15072_v45 = vpack.c.bf16 %v10314_v56, %v10306_v38  ;;  %v9839_v36 = vmul.f32 0.5, %v9794_v58 }
0x15b3   : > { %15988 = verf.f32 %v9854_v0  ;;  %v9798_v23 = vadd.f32 %v9797_v16, %v19096_v12  ;;  %v9799_v29 = vpop.f32.mrb[179].mxu1 }
0x15b4   : > { %15990 = verf.f32 %v9855_v30  ;;  %v9800_v48 = vadd.f32 %v9799_v29, %v19096_v12  ;;  %15073 = vmatprep.subr.bf16.mxu1 %v15072_v45 }
0x15b5   : > { %v9856_v49 = vmul.f32 0.70710677, %v9798_v23  ;;  %15075 = vmatpush1.bf16.msra.mxu1 %v15074_v34  ;;  %v9840_v43 = vmul.f32 0.5, %v9798_v23 }
0x15b6   : > { %v9857_v62 = vmul.f32 0.70710677, %v9800_v48  ;;  %v9803_v32 = vpop.f32.mrb[180].mxu1  ;;  %v9841_v38 = vmul.f32 0.5, %v9800_v48 }
0x15b7   : > { %15992 = verf.f32 %v9856_v49  ;;  %v9804_v50 = vadd.f32 %v9803_v32, %v19113_v47  ;;  %v9805_v55 = vpop.f32.mrb[181].mxu1 }
0x15b8   : > { %15994 = verf.f32 %v9857_v62  ;;  %v9806_v7 = vadd.f32 %v9805_v55, %v19113_v47  ;;  %14305 = vmatmul.mubr.msk.f32.vlgmr.msra.gmra.mrb[194].mxu1 %vm570_vm0, %v20996_v24 }
0x15b9   : > { %v9858_v31 = vmul.f32 0.70710677, %v9804_v50  ;;  %10878 = vmatprep.mubr.f32.mxu1 %v20912_v27 }
0x15ba   : > { %v9859_v3 = vmul.f32 0.70710677, %v9806_v7  ;;  %v9809_v12 = vpop.f32.mrb[182].mxu1 }
0x15bb   : > { %15996 = verf.f32 %v9858_v31  ;;  %v9810_v57 = vadd.f32 %v9809_v12, %v19132_v1  ;;  %v9811_v22 = vpop.f32.mrb[183].mxu1 }
0x15bc   : > { %15998 = verf.f32 %v9859_v3  ;;  %v9812_v35 = vadd.f32 %v9811_v22, %v19132_v1  ;;  %v9842_v22 = vmul.f32 0.5, %v9804_v50 }
0x15bd   : > { %v15989_v25 = vpop.eup %15988  ;;  %v9860_v14 = vmul.f32 0.70710677, %v9810_v57 }
0x15be   : > { %v15991_v39 = vpop.eup %15990  ;;  %v9861_v4 = vmul.f32 0.70710677, %v9812_v35  ;;  %v9815_v47 = vpop.f32.mrb[184].mxu1  ;;  %v9886_v26 = vadd.f32 1.0, %v15989_v25 }
0x15bf   : > { %16000 = verf.f32 %v9860_v14  ;;  %v19442_v60 = vadd.f32 %v9815_v47, %v19137_v59  ;;  %v9817_v11 = vpop.f32.mrb[185].mxu1  ;;  %v9887_v41 = vadd.f32 1.0, %v15991_v39  ;;  %v9843_v39 = vmul.f32 0.5, %v9806_v7 }
0x15c0   : > { %16002 = verf.f32 %v9861_v4  ;;  %v19445_v51 = vadd.f32 %v9817_v11, %v19137_v59  ;;  %v9902_v59 = vmul.f32 %v9886_v26, %v9838_v17  ;;  %v9844_v4 = vmul.f32 0.5, %v9810_v57 }
0x15c1   : > { %v15993_v53 = vpop.eup %15992  ;;  %v9862_v1 = vmul.f32 0.70710677, %v19442_v60  ;;  %v9903_v45 = vmul.f32 %v9887_v41, %v9839_v36 }
0x15c2   : > { %v15995_v19 = vpop.eup %15994  ;;  %v9888_v15 = vadd.f32 1.0, %v15993_v53  ;;  %v9863_v13 = vmul.f32 0.70710677, %v19445_v51  ;;  %v9821_v5 = vpop.f32.mrb[186].mxu1  ;;  %v9845_v53 = vmul.f32 0.5, %v9812_v35 }
0x15c3   : > { %v9889_v56 = vadd.f32 1.0, %v15995_v19  ;;  %16004 = verf.f32 %v9862_v1  ;;  %v9822_v0 = vadd.f32 %v9821_v5, %v19147_v63  ;;  %v9823_v33 = vpop.f32.mrb[187].mxu1 }
0x15c4   : > { %v9904_v30 = vmul.f32 %v9888_v15, %v9840_v43  ;;  %16006 = verf.f32 %v9863_v13  ;;  %v9824_v8 = vadd.f32 %v9823_v33, %v19147_v63 }
0x15c5   : > { %v15997_v16 = vpop.eup %15996  ;;  %v9905_v29 = vmul.f32 %v9889_v56, %v9841_v38  ;;  %v9864_v58 = vmul.f32 0.70710677, %v9822_v0 }
0x15c6   : > { %v15999_v23 = vpop.eup %15998  ;;  %v15034_v34 = vpack.c.bf16 %v9904_v30, %v9902_v59  ;;  %v9865_v49 = vmul.f32 0.70710677, %v9824_v8  ;;  %v9827_v62 = vpop.f32.mrb[188].mxu1  ;;  %v9890_v31 = vadd.f32 1.0, %v15997_v16  ;;  %v9846_v30 = vmul.f32 0.5, %v19442_v60 }
0x15c7   : > { %16008 = verf.f32 %v9864_v58  ;;  %v9828_v48 = vadd.f32 %v9827_v62, %v19153_v21  ;;  %v9829_v32 = vpop.f32.mrb[189].mxu1  ;;  %v15032_v55 = vpack.c.bf16 %v9905_v29, %v9903_v45  ;;  %v9891_v63 = vadd.f32 1.0, %v15999_v23 }
0x15c8   : > { %16010 = verf.f32 %v9865_v49  ;;  %v9830_v3 = vadd.f32 %v9829_v32, %v19153_v21  ;;  %v9906_v19 = vmul.f32 %v9890_v31, %v9842_v22  ;;  %v9848_v16 = vmul.f32 0.5, %v9822_v0 }
0x15c9   : > { %v16001_v12 = vpop.eup %16000  ;;  %v9866_v25 = vmul.f32 0.70710677, %v9828_v48  ;;  %15033 = vmatprep.subr.bf16.mxu0 %v15032_v55  ;;  %v9907_v43 = vmul.f32 %v9891_v63, %v9843_v39  ;;  %v9849_v29 = vmul.f32 0.5, %v9824_v8  ;;  %v9850_v0 = vmul.f32 0.5, %v9828_v48 }
0x15ca   : > { %v16003_v14 = vpop.eup %16002  ;;  %v9892_v47 = vadd.f32 1.0, %v16001_v12  ;;  %v9867_v11 = vmul.f32 0.70710677, %v9830_v3  ;;  %v9833_v26 = vpop.f32.mrb[190].mxu1  ;;  %15035 = vmatpush1.bf16.msra.mxu0 %v15034_v34 }
0x15cb   : > { %v9893_v17 = vadd.f32 1.0, %v16003_v14  ;;  %16012 = verf.f32 %v9866_v25  ;;  %v9834_v41 = vadd.f32 %v9833_v26, %v19158_v54  ;;  %v9835_v1 = vpop.f32.mrb[191].mxu1  ;;  %v9453_v26 = vadd.f32 %v19285_v61, %v19317_v40 }
0x15cc   : > { %v9908_v21 = vmul.f32 %v9892_v47, %v9844_v4  ;;  %16014 = verf.f32 %v9867_v11  ;;  %v9836_v50 = vadd.f32 %v9835_v1, %v19158_v54  ;;  %v9847_v54 = vmul.f32 0.5, %v19445_v51 }
0x15cd   : > { %v16005_v36 = vpop.eup %16004  ;;  %v9909_v15 = vmul.f32 %v9893_v17, %v9845_v53  ;;  %v9868_v7 = vmul.f32 0.70710677, %v9834_v41  ;;  %v9852_v14 = vmul.f32 0.5, %v9834_v41  ;;  %v9851_v51 = vmul.f32 0.5, %v9830_v3  ;;  %v21002_v41 = vld [vmem:[#allocation25_spill] sm:$0xff] }
0x15ce   : > { %v16007_v57 = vpop.eup %16006  ;;  %v15038_v13 = vpack.c.bf16 %v9908_v21, %v9906_v19  ;;  %v9869_v5 = vmul.f32 0.70710677, %v9836_v50  ;;  %v9894_v35 = vadd.f32 1.0, %v16005_v36  ;;  %v9853_v8 = vmul.f32 0.5, %v9836_v50  ;;  %v21001_v36 = vld [vmem:[#allocation20_spill] sm:$0xff] }
0x15cf   : > { %16016 = verf.f32 %v9868_v7  ;;  %v15036_v38 = vpack.c.bf16 %v9909_v15, %v9907_v43  ;;  %v9895_v33 = vadd.f32 1.0, %v16007_v57  ;;  %v9447_v19 = vadd.f32 %v19281_v18, %v19321_v10  ;;  %v16208_v18 = vld [vmem:[%s20909_s28 + $0x20] sm:$0xff] }
0x15d0   : > { %16018 = verf.f32 %v9869_v5  ;;  %v9910_v23 = vmul.f32 %v9894_v35, %v9846_v30  ;;  %v19462_v48 = vadd.f32 %v9453_v26, %v21001_v36  ;;  %v15048_v3 = vpack.c.bf16 %v19328_v2, %v19331_v20  ;;  %v21004_v5 = vld [vmem:[#allocation27_spill] sm:$0xff] }
0x15d1   : > { %v16009_v56 = vpop.eup %16008  ;;  %15037 = vmatprep.subr.bf16.mxu0 %v15036_v38  ;;  %v9911_v62 = vmul.f32 %v9895_v33, %v9847_v54  ;;  %v19467_v50 = vadd.f32 %v9447_v19, %v21002_v41  ;;  %v9451_v61 = vadd.f32 %v19283_v37, %v19317_v40  ;;  %v15050_v43 = vpack.c.bf16 %v19345_v6, %v19350_v52  ;;  %v21003_v37 = vld [vmem:[#allocation32_spill] sm:$0xff]  ;;  %v10383_v33 = vpop.f32.mrb[192].mxu1 }
0x15d2   : > { %v16011_v59 = vpop.eup %16010  ;;  %v9896_v45 = vadd.f32 1.0, %v16009_v56  ;;  %15039 = vmatpush1.bf16.msra.mxu0 %v15038_v13  ;;  %v9445_v7 = vadd.f32 %v19279_v9, %v19321_v10  ;;  %v16209_v13 = vld [vmem:[%s20909_s28 + $0x28] sm:$0xff]  ;;  %v15056_v35 = vpack.c.bf16 %v19420_v44, %v19410_v28  ;;  %v15058_v56 = vpack.c.bf16 %v19417_v42, %v19414_v46 }
0x15d3   : > { %v9897_v58 = vadd.f32 1.0, %v16011_v59  ;;  %v15052_v15 = vpack.c.bf16 %v19462_v48, %v19467_v50  ;;  %v19483_v57 = vadd.f32 %v9451_v61, %v21003_v37  ;;  %v10385_v59 = vpop.f32.mrb[193].mxu1 }
0x15d4   : > { %v9912_v34 = vmul.f32 %v9896_v45, %v9848_v16  ;;  %v19490_v38 = vadd.f32 %v9445_v7, %v21004_v5 }
0x15d5   : > { %v16013_v49 = vpop.eup %16012  ;;  %v9913_v32 = vmul.f32 %v9897_v58, %v9849_v29 }
0x15d6   : > { %v16015_v55 = vpop.eup %16014  ;;  %v15042_v31 = vpack.c.bf16 %v9912_v34, %v9910_v23  ;;  %v9898_v22 = vadd.f32 1.0, %v16013_v49  ;;  %v15054_v9 = vpack.c.bf16 %v19483_v57, %v19490_v38  ;;  %v10303_v41 = vmul.f32 %v19490_v38, %v19490_v38 }
0x15d7   : > { %v15040_v12 = vpack.c.bf16 %v9913_v32, %v9911_v62  ;;  %v9899_v25 = vadd.f32 1.0, %v16015_v55  ;;  %v21005_v32 = vld [vmem:[#allocation24_spill] sm:$0xff] }
0x15d8   : > { %v9914_v47 = vmul.f32 %v9898_v22, %v9850_v0  ;;  %v21007_v22 = vld [vmem:[#allocation18_spill] sm:$0xff] }
0x15d9   : > { %v16017_v63 = vpop.eup %16016  ;;  %15041 = vmatprep.subr.bf16.mxu0 %v15040_v12  ;;  %v9915_v53 = vmul.f32 %v9899_v25, %v9851_v51  ;;  %v21008_v0 = vld [vmem:[#allocation22_spill] sm:$0xff]  ;;  %v10609_v51 = vmul.f32 0.0625, %v10383_v33 }
0x15da   : > { %v16019_v60 = vpop.eup %16018  ;;  %v9900_v39 = vadd.f32 1.0, %v16017_v63  ;;  %15043 = vmatpush1.bf16.msra.mxu0 %v15042_v31  ;;  %v21006_v31 = vld [vmem:[#allocation19_spill] sm:$0xff] }
0x15db   : > { %v9901_v4 = vadd.f32 1.0, %v16019_v60  ;;  %v10312_v60 = vmul.f32 %v19462_v48, %v19462_v48 }
0x15dc   : > { %v9916_v11 = vmul.f32 %v9900_v39, %v9852_v14 }
0x15dd   : > { %v9917_v17 = vmul.f32 %v9901_v4, %v9853_v8  ;;  %v10610_v8 = vmul.f32 0.0625, %v10385_v59 }
0x15de   : > { %v15046_v1 = vpack.c.bf16 %v9916_v11, %v9914_v47  ;;  %v10304_v47 = vmul.f32 %v19467_v50, %v19467_v50 }
0x15df   : > { %v15044_v21 = vpack.c.bf16 %v9917_v17, %v9915_v53  ;;  %v10311_v53 = vmul.f32 %v19483_v57, %v19483_v57 }
0x15e0   : > { %v15068_v19 = vpack.c.bf16 %v10312_v60, %v10304_v47 }
0x15e1   : > { %15045 = vmatprep.subr.bf16.mxu0 %v15044_v21 }
0x15e2   : > { %15047 = vmatpush1.bf16.msra.mxu0 %v15046_v1 }
0x15e3   : > { %15049 = vmatprep.subr.bf16.mxu0 %v15048_v3 }
0x15e5   : > { %14293 = vmatmul.mubr.msk.f32.vlgmr.msra.gmra.mrb[188].mxu0 %vm2801_vm1, %v16208_v18 }
0x15e6   : > { %15051 = vmatpush1.bf16.msra.mxu0 %v15050_v43  ;;  %9988 = vmatprep.mubr.f32.mxu0 %v20912_v27 }
0x15e7   : > { %15053 = vmatprep.subr.bf16.mxu0 %v15052_v15  ;;  %v15070_v15 = vpack.c.bf16 %v10311_v53, %v10303_v41 }
0x15e9   : > { %14294 = vmatmul.mubr.msk.f32.gmra.mrb[190].mxu0 %vm2801_vm1, %v16209_v13 }
0x15ea   : > { %10081 = vmatprep.mubr.f32.mxu0 %v20912_v27 }
0x15ed   : > { %14299 = vmatmul.mubr.msk.f32.vlgmr.msra.gmra.mrb[192].mxu0 %vm570_vm0, %v20996_v24 }
0x15ee   : > { %15055 = vmatpush1.bf16.msra.mxu0 %v15054_v9  ;;  %10152 = vmatprep.mubr.f32.mxu0 %v20912_v27 }
0x15ef   : > { %15057 = vmatprep.subr.bf16.mxu0 %v15056_v35 }
0x15f1   : > { %14300 = vmatmul.mubr.msk.f32.vlgmr.msra.gmra.mrb[194].mxu0 %vm570_vm0, %v20996_v24 }
0x15f2   : > { %15059 = vmatpush1.bf16.msra.mxu0 %v15058_v56  ;;  %10223 = vmatprep.mubr.f32.mxu0 %v20912_v27 }
0x15f5   : > { %14301 = vmatmul.mubr.msk.f32.vlgmr.msra.gmra.mrb[196].mxu0 %vm570_vm0, %v20996_v24 }
0x15f6   : > { %10294 = vmatprep.mubr.f32.mxu0 %v20912_v27 }
0x168b   : > { %v10525_v30 = vpop.f32.mrb[194].mxu1 }
0x168c   : > { %v10527_v16 = vpop.f32.mrb[195].mxu1  ;;  %v10613_v33 = vmul.f32 0.0625, %v10525_v30 }
0x16b8   : > { %v9984_v45 = vpop.f32.mrb[188].mxu0 }
0x16b9   : > { %v9986_v54 = vpop.f32.mrb[189].mxu0  ;;  %v9985_v23 = vadd.f32 %v9984_v45, %v19321_v10 }
0x16ba   : > { %v9987_v29 = vadd.f32 %v9986_v54, %v19321_v10 }
0x16bb   : > { %v19524_v10 = vadd.f32 %v9985_v23, %v21008_v0 }
0x16bc   : > { %v9990_v58 = vpop.f32.mrb[190].mxu0  ;;  %v19516_v12 = vadd.f32 %v9987_v29, %v21006_v31  ;;  %v10614_v29 = vmul.f32 0.0625, %v10527_v16  ;;  %v21009_v31 = vld [vmem:[#allocation17_spill] sm:$0xff] }
0x16bd   : > { %v9991_v34 = vadd.f32 %v9990_v58, %v19317_v40  ;;  %v9992_v49 = vpop.f32.mrb[191].mxu0  ;;  %v10307_v59 = vmul.f32 %v19524_v10, %v19524_v10 }
0x16be   : > { %v9993_v62 = vadd.f32 %v9992_v49, %v19317_v40  ;;  %v10308_v43 = vmul.f32 %v19516_v12, %v19516_v12 }
0x16bf   : > { %v19513_v55 = vadd.f32 %v9991_v34, %v21005_v32 }
0x16c0   : > { %v19519_v63 = vadd.f32 %v9993_v62, %v21007_v22  ;;  %v10083_v25 = vpop.f32.mrb[192].mxu0 }
0x16c1   : > { %v10601_v14 = vmul.f32 0.0625, %v10083_v25  ;;  %v10085_v39 = vpop.f32.mrb[193].mxu0  ;;  %v15062_v26 = vpack.c.bf16 %v19513_v55, %v19524_v10  ;;  %v10315_v7 = vmul.f32 %v19513_v55, %v19513_v55 }
0x16c2   : > { %v10602_v40 = vmul.f32 0.0625, %v10085_v39  ;;  %v15060_v4 = vpack.c.bf16 %v19519_v63, %v19516_v12  ;;  %v10316_v21 = vmul.f32 %v19519_v63, %v19519_v63  ;;  %v19559_v39 = vpop.permute.xlu1 %10760 }
0x16c3   : > { %v10617_v11 = vmul.f32 %v10601_v14, %v10601_v14  ;;  %v15078_v23 = vpack.c.bf16 %v10315_v7, %v10307_v59  ;;  %v10644_v22 = vrot.slane %v10601_v14, %v21009_v31 }
0x16c4   : > { %v10618_v17 = vmul.f32 %v10602_v40, %v10602_v40  ;;  %v19534_v1 = vpop.f32.mrb[194].mxu0  ;;  %15061 = vmatprep.subr.bf16.mxu0 %v15060_v4  ;;  %v15076_v5 = vpack.c.bf16 %v10316_v21, %v10308_v43  ;;  %v10648_v60 = vrot.slane %v10602_v40, %v21009_v31 }
0x16c5   : > { %v10625_v36 = vsub.f32 %v10609_v51, %v10617_v11  ;;  %v19538_v3 = vpop.f32.mrb[195].mxu0  ;;  %15063 = vmatpush1.bf16.msra.mxu0 %v15062_v26  ;;  %v19561_v51 = vpop.permute.xlu0 %10755  ;;  %v10673_v4 = vsub.f32 %v19350_v52, %v10644_v22  ;;  %v10681_v47 = vsub.f32 %v19345_v6, %v10644_v22  ;;  %v19592_v22 = vld [vmem:[%s20771_s4 + $0x30] sm:$0xff] }
0x16c6   : > { %v10626_v61 = vsub.f32 %v10610_v8, %v10618_v17  ;;  %15069 = vmatprep.subr.bf16.mxu0 %v15068_v19  ;;  %v10674_v26 = vsub.f32 %v19331_v20, %v10648_v60  ;;  %v10682_v14 = vsub.f32 %v19328_v2, %v10648_v60  ;;  %v19572_v43 = vpop.permute.xlu1 %10786 }
0x16c7   : > { %v10633_v18 = vmax.f32 %v10625_v36, 0.0 }
0x16c8   : > { %v10634_v37 = vmax.f32 %v10626_v61, 0.0  ;;  %v10225_v13 = vpop.f32.mrb[196].mxu0  ;;  %14302 = vmatmul.mubr.msk.f32.vlgmr.msra.gmra.mrb[198].mxu0 %vm570_vm0, %v20996_v24 }
0x16c9   : > { %v10689_v9 = vadd.f32 1e-05, %v10633_v18  ;;  %v10605_v35 = vmul.f32 0.0625, %v10225_v13  ;;  %v10227_v56 = vpop.f32.mrb[197].mxu0  ;;  %15071 = vmatpush1.bf16.msra.mxu0 %v15070_v15  ;;  %10452 = vmatprep.mubr.f32.mxu0 %v20912_v27  ;;  %v19574_v18 = vpop.permute.xlu0 %10781 }
0x16ca   : > { %v10690_v45 = vadd.f32 1e-05, %v10634_v37  ;;  %v10606_v54 = vmul.f32 0.0625, %v10227_v56  ;;  %15077 = vmatprep.subr.bf16.mxu0 %v15076_v5 }
0x16cb   : > { %16020 = vrsqrt.f32 %v10689_v9  ;;  %v10621_v58 = vmul.f32 %v10605_v35, %v10605_v35  ;;  %v10660_v36 = vrot.slane %v10605_v35, %v21009_v31 }
0x16cc   : > { %16022 = vrsqrt.f32 %v10690_v45  ;;  %v10622_v34 = vmul.f32 %v10606_v54, %v10606_v54  ;;  %14304 = vmatmul.mubr.msk.f32.vlgmr.msra.gmra.mrb[200].mxu0 %vm570_vm0, %v20996_v24  ;;  %v10664_v15 = vrot.slane %v10606_v54, %v21009_v31 }
0x16cd   : > { %v10629_v49 = vsub.f32 %v10613_v33, %v10621_v58  ;;  %15079 = vmatpush1.bf16.msra.mxu0 %v15078_v23  ;;  %10594 = vmatprep.mubr.f32.mxu0 %v20912_v27  ;;  %v10677_v59 = vsub.f32 %v19414_v46, %v10660_v36  ;;  %v10685_v45 = vsub.f32 %v19417_v42, %v10660_v36  ;;  %v10604_v36 = vmul.f32 0.0625, %v19538_v3 }
0x16ce   : > { %v10630_v30 = vsub.f32 %v10614_v29, %v10622_v34  ;;  %v10678_v58 = vsub.f32 %v19410_v28, %v10664_v15  ;;  %v10686_v23 = vsub.f32 %v19420_v44, %v10664_v15 }
0x16cf   : > { %v10637_v62 = vmax.f32 %v10629_v49, 0.0 }
0x16d0   : > { %v10638_v32 = vmax.f32 %v10630_v30, 0.0  ;;  %14306 = vmatmul.mubr.msk.f32.vlgmr.msra.gmra.mrb[202].mxu0 %vm570_vm0, %v20996_v24 }
0x16d1   : > { %v10693_v16 = vadd.f32 1e-05, %v10637_v62  ;;  %10955 = vmatprep.mubr.f32.mxu0 %v20912_v27 }
0x16d2   : > { %v10694_v25 = vadd.f32 1e-05, %v10638_v32 }
0x16d3   : > { %16024 = vrsqrt.f32 %v10693_v16 }
0x16d4   : > { %16026 = vrsqrt.f32 %v10694_v25 }
0x16d5   : > { %v16021_v0 = vpop.eup %16020 }
0x16d6   : > { %v16023_v8 = vpop.eup %16022  ;;  %v10708_v11 = vrot.slane %v16021_v0, %v21009_v31 }
0x16d7   : > { %v10712_v40 = vrot.slane %v16023_v8, %v21009_v31 }
0x16d8   : > { %v10737_v53 = vmul.f32 %v10708_v11, %v10673_v4  ;;  %v10745_v17 = vmul.f32 %v10708_v11, %v10681_v47 }
0x16d9   : > { %v10738_v19 = vmul.f32 %v10712_v40, %v10674_v26  ;;  %v10746_v21 = vmul.f32 %v10712_v40, %v10682_v14  ;;  %v19608_v14 = vld [vmem:[%s20771_s4 + $0x38] sm:$0xff] }
0x16da   : > { %v10763_v41 = vmul.f32 %v19561_v51, %v10737_v53  ;;  %v10771_v61 = vmul.f32 %v19559_v39, %v10745_v17 }
0x16db   : > { %v10764_v7 = vmul.f32 %v19561_v51, %v10738_v19  ;;  %v10772_v37 = vmul.f32 %v19559_v39, %v10746_v21  ;;  %v10603_v19 = vmul.f32 0.0625, %v19534_v1 }
0x16dc   : > { %v10789_v13 = vadd.f32 %v19574_v18, %v10763_v41  ;;  %v10797_v5 = vadd.f32 %v19572_v43, %v10771_v61 }
0x16dd   : > { %v16025_v9 = vpop.eup %16024  ;;  %v10790_v35 = vadd.f32 %v19574_v18, %v10764_v7  ;;  %v10798_v56 = vadd.f32 %v19572_v43, %v10772_v37  ;;  %v10619_v61 = vmul.f32 %v10603_v19, %v10603_v19 }
0x16de   : > { %v16027_v33 = vpop.eup %16026  ;;  %v10724_v54 = vrot.slane %v16025_v9, %v21009_v31  ;;  %v15082_v29 = vpack.c.bf16 %v10797_v5, %v10789_v13  ;;  %v10620_v13 = vmul.f32 %v10604_v36, %v10604_v36 }
0x16df   : > { %v15080_v34 = vpack.c.bf16 %v10798_v56, %v10790_v35  ;;  %v10728_v49 = vrot.slane %v16027_v33, %v21009_v31 }
0x16e0   : > { %v10741_v30 = vmul.f32 %v10724_v54, %v10677_v59  ;;  %v10749_v62 = vmul.f32 %v10724_v54, %v10685_v45 }
0x16e1   : > { %15081 = vmatprep.subr.bf16.mxu1 %v15080_v34  ;;  %v10742_v32 = vmul.f32 %v10728_v49, %v10678_v58  ;;  %v10750_v16 = vmul.f32 %v10728_v49, %v10686_v23 }
0x16e2   : > { %15083 = vmatpush1.bf16.msra.mxu1 %v15082_v29  ;;  %v10767_v25 = vmul.f32 %v19561_v51, %v10741_v30  ;;  %v10775_v60 = vmul.f32 %v19559_v39, %v10749_v62 }
0x16e3   : > { %v10768_v0 = vmul.f32 %v19561_v51, %v10742_v32  ;;  %v10776_v8 = vmul.f32 %v19559_v39, %v10750_v16 }
0x16e4   : > { %v10793_v4 = vadd.f32 %v19574_v18, %v10767_v25  ;;  %v10801_v47 = vadd.f32 %v19572_v43, %v10775_v60  ;;  %v10652_v60 = vrot.slane %v10603_v19, %v21009_v31 }
0x16e5   : > { %14309 = vmatmul.mubr.msk.f32.vlgmr.msra.gmra.mrb[196].mxu1 %vm570_vm0, %v19592_v22  ;;  %v10794_v11 = vadd.f32 %v19574_v18, %v10768_v0  ;;  %v10802_v26 = vadd.f32 %v19572_v43, %v10776_v8  ;;  %v10656_v0 = vrot.slane %v10604_v36, %v21009_v31 }
0x16e6   : > { %10884 = vmatprep.mubr.f32.mxu1 %v20912_v27  ;;  %v15090_v40 = vpack.c.bf16 %v10801_v47, %v10793_v4 }
0x16e7   : > { %v15088_v53 = vpack.c.bf16 %v10802_v26, %v10794_v11  ;;  %v10675_v11 = vsub.f32 %v19490_v38, %v10652_v60  ;;  %v10683_v26 = vsub.f32 %v19483_v57, %v10652_v60 }
0x16e9   : > { %14310 = vmatmul.mubr.msk.f32.gmra.mrb[198].mxu1 %vm570_vm0, %v19608_v14  ;;  %15089 = vmatprep.subr.bf16.mxu1 %v15088_v53  ;;  %v10676_v53 = vsub.f32 %v19467_v50, %v10656_v0 }
0x16ea   : > { %15091 = vmatpush1.bf16.msra.mxu1 %v15090_v40  ;;  %11032 = vmatprep.mubr.f32.mxu1 %v20912_v27 }
0x16ed   : > { %14313 = vmatmul.mubr.msk.f32.vlgmr.msra.gmra.mrb[200].mxu1 %vm570_vm0, %v19592_v22 }
0x16ee   : > { %11038 = vmatprep.mubr.f32.mxu1 %v20912_v27 }
0x16f1   : > { %14314 = vmatmul.mubr.msk.f32.gmra.mrb[202].mxu1 %vm570_vm0, %v19608_v14 }
0x16f2   : > { %11237 = vmatprep.mubr.f32.mxu1 %v20912_v27 }
0x179b   : > { %v10296_v17 = vpop.f32.mrb[198].mxu0 }
0x179c   : > { %v10298_v21 = vpop.f32.mrb[199].mxu0  ;;  %v10607_v15 = vmul.f32 0.0625, %v10296_v17  ;;  %v10684_v17 = vsub.f32 %v19462_v48, %v10656_v0 }
0x179d   : > { %v10608_v5 = vmul.f32 0.0625, %v10298_v21 }
0x179e   : > { %v10623_v35 = vmul.f32 %v10607_v15, %v10607_v15  ;;  %v10668_v4 = vrot.slane %v10607_v15, %v21009_v31 }
0x179f   : > { %v10454_v41 = vpop.f32.mrb[200].mxu0  ;;  %v10624_v33 = vmul.f32 %v10608_v5, %v10608_v5  ;;  %v10672_v21 = vrot.slane %v10608_v5, %v21009_v31 }
0x17a0   : > { %v10611_v7 = vmul.f32 0.0625, %v10454_v41  ;;  %v10456_v37 = vpop.f32.mrb[201].mxu0  ;;  %v10679_v15 = vsub.f32 %v19524_v10, %v10668_v4 }
0x17a1   : > { %v10612_v9 = vmul.f32 0.0625, %v10456_v37  ;;  %v10680_v5 = vsub.f32 %v19516_v12, %v10672_v21 }
0x17a2   : > { %v10627_v56 = vsub.f32 %v10611_v7, %v10619_v61 }
0x17a3   : > { %v10628_v59 = vsub.f32 %v10612_v9, %v10620_v13  ;;  %v10596_v45 = vpop.f32.mrb[202].mxu0  ;;  %v10687_v9 = vsub.f32 %v19513_v55, %v10668_v4 }
0x17a4   : > { %v10635_v54 = vmax.f32 %v10627_v56, 0.0  ;;  %v10615_v29 = vmul.f32 0.0625, %v10596_v45  ;;  %v10598_v58 = vpop.f32.mrb[203].mxu0 }
0x17a5   : > { %v10636_v1 = vmax.f32 %v10628_v59, 0.0  ;;  %v10616_v23 = vmul.f32 0.0625, %v10598_v58  ;;  %v10688_v58 = vsub.f32 %v19519_v63, %v10672_v21  ;;  %v19652_v21 = vpop.permute.xlu1 %11148 }
0x17a6   : > { %v10691_v34 = vadd.f32 1e-05, %v10635_v54  ;;  %v10631_v3 = vsub.f32 %v10615_v29, %v10623_v35 }
0x17a7   : > { %v10692_v49 = vadd.f32 1e-05, %v10636_v1  ;;  %v10632_v30 = vsub.f32 %v10616_v23, %v10624_v33 }
0x17a8   : > { %16028 = vrsqrt.f32 %v10691_v34  ;;  %v10639_v62 = vmax.f32 %v10631_v3, 0.0 }
0x17a9   : > { %16030 = vrsqrt.f32 %v10692_v49  ;;  %v10640_v32 = vmax.f32 %v10632_v30, 0.0 }
0x17aa   : > { %v10695_v16 = vadd.f32 1e-05, %v10639_v62 }
0x17ab   : > { %v10696_v25 = vadd.f32 1e-05, %v10640_v32 }
0x17ac   : > { %16032 = vrsqrt.f32 %v10695_v16 }
0x17ad   : > { %16034 = vrsqrt.f32 %v10696_v25 }
0x17b2   : > { %v16029_v8 = vpop.eup %16028 }
0x17b3   : > { %v16031_v47 = vpop.eup %16030  ;;  %v10716_v40 = vrot.slane %v16029_v8, %v21009_v31 }
0x17b4   : > { %v10720_v19 = vrot.slane %v16031_v47, %v21009_v31 }
0x17b5   : > { %v10739_v41 = vmul.f32 %v10716_v40, %v10675_v11  ;;  %v10747_v36 = vmul.f32 %v10716_v40, %v10683_v26 }
0x17b6   : > { %v16033_v61 = vpop.eup %16032  ;;  %v10740_v7 = vmul.f32 %v10720_v19, %v10676_v53  ;;  %v10748_v37 = vmul.f32 %v10720_v19, %v10684_v17 }
0x17b7   : > { %v16035_v13 = vpop.eup %16034  ;;  %v10732_v35 = vrot.slane %v16033_v61, %v21009_v31  ;;  %v10765_v56 = vmul.f32 %v19561_v51, %v10739_v41  ;;  %v10773_v33 = vmul.f32 %v19559_v39, %v10747_v36  ;;  %v19657_v36 = vpop.permute.xlu0 %11143 }
0x17b8   : > { %v10880_v59 = vpop.f32.mrb[196].mxu1  ;;  %v10766_v45 = vmul.f32 %v19561_v51, %v10740_v7  ;;  %v10774_v54 = vmul.f32 %v19559_v39, %v10748_v37  ;;  %v10736_v29 = vrot.slane %v16035_v13, %v21009_v31 }
0x17b9   : > { %v10882_v1 = vpop.f32.mrb[197].mxu1  ;;  %v10791_v23 = vadd.f32 %v19574_v18, %v10765_v56  ;;  %v10799_v34 = vadd.f32 %v19572_v43, %v10773_v33  ;;  %v10743_v3 = vmul.f32 %v10732_v35, %v10679_v15  ;;  %v10751_v25 = vmul.f32 %v10732_v35, %v10687_v9 }
0x17ba   : > { %v10792_v49 = vadd.f32 %v19574_v18, %v10766_v45  ;;  %v10800_v30 = vadd.f32 %v19572_v43, %v10774_v54  ;;  %v10744_v62 = vmul.f32 %v10736_v29, %v10680_v5  ;;  %v10752_v16 = vmul.f32 %v10736_v29, %v10688_v58 }
0x17bb   : > { %v15086_v32 = vpack.c.bf16 %v10799_v34, %v10791_v23  ;;  %v11123_v60 = vadd.f32 %v10882_v1, %v19331_v20  ;;  %v10769_v47 = vmul.f32 %v19561_v51, %v10743_v3  ;;  %v11122_v11 = vadd.f32 %v10880_v59, %v19350_v52 }
0x17bc   : > { %v10886_v0 = vpop.f32.mrb[198].mxu1  ;;  %v15084_v8 = vpack.c.bf16 %v10800_v30, %v10792_v49  ;;  %v10770_v4 = vmul.f32 %v19561_v51, %v10744_v62  ;;  %v10778_v53 = vmul.f32 %v19559_v39, %v10752_v16  ;;  %v10777_v17 = vmul.f32 %v19559_v39, %v10751_v25 }
0x17bd   : > { %v11130_v26 = vadd.f32 %v10886_v0, %v19345_v6  ;;  %v10888_v40 = vpop.f32.mrb[199].mxu1  ;;  %v10795_v41 = vadd.f32 %v19574_v18, %v10769_v47  ;;  %v19665_v39 = vadd.f32 %v19657_v36, %v11123_v60  ;;  %v19671_v15 = vadd.f32 %v19657_v36, %v11122_v11 }
0x17be   : > { %v11131_v19 = vadd.f32 %v10888_v40, %v19328_v2  ;;  %15085 = vmatprep.subr.bf16.mxu0 %v15084_v8  ;;  %v10796_v20 = vadd.f32 %v19574_v18, %v10770_v4  ;;  %v10804_v6 = vadd.f32 %v19572_v43, %v10778_v53  ;;  %v10803_v51 = vadd.f32 %v19572_v43, %v10777_v17 }
0x17bf   : > { %v19660_v52 = vadd.f32 %v19652_v21, %v11130_v26  ;;  %15087 = vmatpush1.bf16.msra.mxu0 %v15086_v32  ;;  %21012 = vst [vmem:[#allocation26_spill] sm:$0xff] %v19671_v15  ;;  %v11458_v29 = vmul.f32 %v19665_v39, %v19665_v39 }
0x17c0   : > { %v19668_v2 = vadd.f32 %v19652_v21, %v11131_v19  ;;  %v11034_v61 = vpop.f32.mrb[200].mxu1  ;;  %v15092_v7 = vpack.c.bf16 %v10804_v6, %v10796_v20  ;;  %v15094_v37 = vpack.c.bf16 %v10803_v51, %v10795_v41 }
0x17c1   : > { %21010 = vst [vmem:[#allocation21_spill] sm:$0xff] %v19660_v52  ;;  %v11036_v18 = vpop.f32.mrb[201].mxu1  ;;  %v15098_v43 = vpack.c.bf16 %v19660_v52, %v19671_v15  ;;  %v11126_v56 = vadd.f32 %v11034_v61, %v19414_v46  ;;  %v11465_v1 = vmul.f32 %v19660_v52, %v19660_v52 }
0x17c2   : > { %21011 = vst [vmem:[#allocation28_spill] sm:$0xff] %v19668_v2  ;;  %14311 = vmatmul.mubr.msk.f32.vlgmr.msra.gmra.mrb[204].mxu0 %vm570_vm0, %v19592_v22  ;;  %v15096_v13 = vpack.c.bf16 %v19668_v2, %v19665_v39  ;;  %15093 = vmatprep.subr.bf16.mxu0 %v15092_v7  ;;  %v11127_v9 = vadd.f32 %v11036_v18, %v19410_v28 }
0x17c3   : > { %10961 = vmatprep.mubr.f32.mxu0 %v20912_v27  ;;  %15095 = vmatpush1.bf16.msra.mxu0 %v15094_v37  ;;  %v11466_v46 = vmul.f32 %v19668_v2, %v19668_v2 }
0x17c4   : > { %v11040_v35 = vpop.f32.mrb[202].mxu1  ;;  %15097 = vmatprep.subr.bf16.mxu1 %v15096_v13  ;;  %v19691_v28 = vadd.f32 %v19657_v36, %v11127_v9 }
0x17c5   : > { %v11134_v33 = vadd.f32 %v11040_v35, %v19417_v42  ;;  %v11042_v5 = vpop.f32.mrb[203].mxu1  ;;  %15099 = vmatpush1.bf16.msra.mxu1 %v15098_v43  ;;  %v19701_v42 = vadd.f32 %v19657_v36, %v11126_v56  ;;  %v15112_v23 = vpack.c.bf16 %v11466_v46, %v11458_v29 }
0x17c6   : > { %v11135_v59 = vadd.f32 %v11042_v5, %v19420_v44  ;;  %14312 = vmatmul.mubr.msk.f32.gmra.mrb[206].mxu0 %vm570_vm0, %v19608_v14  ;;  %21014 = vst [vmem:[#allocation23_spill] sm:$0xff] %v19691_v28  ;;  %v11462_v3 = vmul.f32 %v19691_v28, %v19691_v28 }
0x17c7   : > { %v19687_v45 = vadd.f32 %v19652_v21, %v11134_v33  ;;  %11109 = vmatprep.mubr.f32.mxu0 %v20912_v27  ;;  %21016 = vst [vmem:[#allocation31_spill] sm:$0xff] %v19701_v42 }
0x17c8   : > { %v19694_v54 = vadd.f32 %v19652_v21, %v11135_v59  ;;  %14323 = vmatmul.mubr.msk.f32.vlgmr.msra.gmra.mrb[204].mxu1 %vm570_vm0, %v20996_v24 }
0x17c9   : > { %21013 = vst [vmem:[#allocation29_spill] sm:$0xff] %v19687_v45  ;;  %11379 = vmatprep.mubr.f32.mxu1 %v20912_v27  ;;  %v15106_v58 = vpack.c.bf16 %v19687_v45, %v19701_v42  ;;  %v11469_v30 = vmul.f32 %v19687_v45, %v19687_v45 }
0x17ca   : > { %21015 = vst [vmem:[#allocation30_spill] sm:$0xff] %v19694_v54  ;;  %14315 = vmatmul.mubr.msk.f32.vlgmr.msra.gmra.mrb[208].mxu0 %vm570_vm0, %v19592_v22  ;;  %v15104_v44 = vpack.c.bf16 %v19694_v54, %v19691_v28  ;;  %v11470_v34 = vmul.f32 %v19694_v54, %v19694_v54  ;;  %v11457_v22 = vmul.f32 %v19671_v15, %v19671_v15 }
0x17cb   : > { %11115 = vmatprep.mubr.f32.mxu0 %v20912_v27 }
0x17cc   : > { %15105 = vmatprep.subr.bf16.mxu1 %v15104_v44  ;;  %v15114_v49 = vpack.c.bf16 %v11465_v1, %v11457_v22  ;;  %v15120_v62 = vpack.c.bf16 %v11470_v34, %v11462_v3 }
0x17cd   : > { %15107 = vmatpush1.bf16.msra.mxu1 %v15106_v58 }
0x17ce   : > { %14316 = vmatmul.mubr.msk.f32.gmra.mrb[210].mxu0 %vm570_vm0, %v19608_v14  ;;  %15113 = vmatprep.subr.bf16.mxu1 %v15112_v23  ;;  %v11461_v14 = vmul.f32 %v19701_v42, %v19701_v42 }
0x17cf   : > { %11308 = vmatprep.mubr.f32.mxu0 %v20912_v27 }
0x17d0   : > { %14325 = vmatmul.mubr.msk.f32.vlgmr.msra.gmra.mrb[206].mxu1 %vm570_vm0, %v20996_v24  ;;  %v15122_v32 = vpack.c.bf16 %v11469_v30, %v11461_v14 }
0x17d1   : > { %15115 = vmatpush1.bf16.msra.mxu1 %v15114_v49  ;;  %11537 = vmatprep.mubr.f32.mxu1 %v20912_v27 }
0x17d2   : > { %15121 = vmatprep.subr.bf16.mxu1 %v15120_v62 }
0x17d4   : > { %14327 = vmatmul.mubr.msk.f32.vlgmr.msra.gmra.mrb[208].mxu1 %vm570_vm0, %v20996_v24 }
0x17d5   : > { %15123 = vmatpush1.bf16.msra.mxu1 %v15122_v32  ;;  %11679 = vmatprep.mubr.f32.mxu1 %v20912_v27 }
0x17d8   : > { %14329 = vmatmul.mubr.msk.f32.vlgmr.msra.gmra.mrb[210].mxu1 %vm570_vm0, %v20996_v24 }
0x17d9   : > { %12107 = vmatprep.mubr.f32.mxu1 %v20912_v27 }
0x1895   : > { %v10957_v16 = vpop.f32.mrb[204].mxu0 }
0x1896   : > { %v10959_v25 = vpop.f32.mrb[205].mxu0  ;;  %v11124_v8 = vadd.f32 %v10957_v16, %v19490_v38 }
0x1897   : > { %v11125_v60 = vadd.f32 %v10959_v25, %v19467_v50 }
0x1898   : > { %v19751_v20 = vadd.f32 %v19657_v36, %v11124_v8 }
0x1899   : > { %v10963_v0 = vpop.f32.mrb[206].mxu0  ;;  %v19745_v17 = vadd.f32 %v19657_v36, %v11125_v60 }
0x189a   : > { %v11132_v4 = vadd.f32 %v10963_v0, %v19483_v57  ;;  %v10965_v47 = vpop.f32.mrb[207].mxu0  ;;  %v11459_v56 = vmul.f32 %v19751_v20, %v19751_v20 }
0x189b   : > { %v11133_v11 = vadd.f32 %v10965_v47, %v19462_v48  ;;  %v11239_v26 = vpop.f32.mrb[204].mxu1  ;;  %v11460_v59 = vmul.f32 %v19745_v17, %v19745_v17 }
0x189c   : > { %v19742_v40 = vadd.f32 %v19652_v21, %v11132_v4  ;;  %v11241_v53 = vpop.f32.mrb[205].mxu1  ;;  %v19764_v9 = vmul.f32 0.0625, %v11239_v26 }
0x189d   : > { %v19748_v19 = vadd.f32 %v19652_v21, %v11133_v11  ;;  %v11111_v50 = vpop.f32.mrb[208].mxu0 }
0x189e   : > { %21017 = vst [vmem:[#allocation20_spill] sm:$0xff] %v19742_v40  ;;  %v11113_v38 = vpop.f32.mrb[209].mxu0  ;;  %v15102_v48 = vpack.c.bf16 %v19742_v40, %v19751_v20  ;;  %v11128_v51 = vadd.f32 %v11111_v50, %v19524_v10  ;;  %v11773_v33 = vmul.f32 %v19764_v9, %v19764_v9  ;;  %v11467_v46 = vmul.f32 %v19742_v40, %v19742_v40 }
0x189f   : > { %21018 = vst [vmem:[#allocation25_spill] sm:$0xff] %v19748_v19  ;;  %v15100_v57 = vpack.c.bf16 %v19748_v19, %v19745_v17  ;;  %v11129_v41 = vadd.f32 %v11113_v38, %v19516_v12 }
0x18a0   : > { %v19777_v10 = vadd.f32 %v19657_v36, %v11128_v51  ;;  %v15118_v14 = vpack.c.bf16 %v11467_v46, %v11459_v56  ;;  %v19814_v56 = vpop.permute.xlu0 %11911 }
0x18a1   : > { %v11117_v6 = vpop.f32.mrb[210].mxu0  ;;  %15101 = vmatprep.subr.bf16.mxu0 %v15100_v57  ;;  %v19767_v35 = vadd.f32 %v19657_v36, %v11129_v41 }
0x18a2   : > { %v11136_v61 = vadd.f32 %v11117_v6, %v19513_v55  ;;  %v11119_v18 = vpop.f32.mrb[211].mxu0  ;;  %15103 = vmatpush1.bf16.msra.mxu0 %v15102_v48  ;;  %v11468_v55 = vmul.f32 %v19748_v19, %v19748_v19  ;;  %21022 = vst [vmem:[#allocation19_spill] sm:$0xff] %v19777_v10  ;;  %v11463_v38 = vmul.f32 %v19777_v10, %v19777_v10 }
0x18a3   : > { %v11137_v7 = vadd.f32 %v11119_v18, %v19519_v63  ;;  %v11381_v37 = vpop.f32.mrb[206].mxu1  ;;  %21020 = vst [vmem:[#allocation27_spill] sm:$0xff] %v19767_v35  ;;  %v11758_v63 = vmul.f32 0.0625, %v11241_v53  ;;  %v11464_v32 = vmul.f32 %v19767_v35, %v19767_v35 }
0x18a4   : > { %v19762_v13 = vadd.f32 %v19652_v21, %v11136_v61  ;;  %v11383_v43 = vpop.f32.mrb[207].mxu1  ;;  %v11761_v44 = vmul.f32 0.0625, %v11381_v37  ;;  %v15116_v22 = vpack.c.bf16 %v11468_v55, %v11460_v59  ;;  %v19812_v55 = vpop.permute.xlu1 %11916 }
0x18a5   : > { %v19770_v12 = vadd.f32 %v19652_v21, %v11137_v7  ;;  %14324 = vmatmul.mubr.msk.f32.vlgmr.msra.gmra.mrb[212].mxu0 %vm570_vm0, %v20996_v24  ;;  %v11774_v36 = vmul.f32 %v11758_v63, %v11758_v63  ;;  %v11762_v23 = vmul.f32 0.0625, %v11383_v43  ;;  %v11800_v7 = vrot.slane %v19764_v9, %v21009_v31 }
0x18a6   : > { %21019 = vst [vmem:[#allocation32_spill] sm:$0xff] %v19762_v13  ;;  %11450 = vmatprep.mubr.f32.mxu0 %v20912_v27  ;;  %v15110_v1 = vpack.c.bf16 %v19762_v13, %v19777_v10  ;;  %v11777_v16 = vmul.f32 %v11761_v44, %v11761_v44  ;;  %v11471_v8 = vmul.f32 %v19762_v13, %v19762_v13 }
0x18a7   : > { %21021 = vst [vmem:[#allocation24_spill] sm:$0xff] %v19770_v12  ;;  %v11539_v21 = vpop.f32.mrb[208].mxu1  ;;  %v15108_v5 = vpack.c.bf16 %v19770_v12, %v19767_v35  ;;  %v11472_v3 = vmul.f32 %v19770_v12, %v19770_v12  ;;  %v11778_v4 = vmul.f32 %v11762_v23, %v11762_v23  ;;  %v11804_v37 = vrot.slane %v11758_v63, %v21009_v31 }
0x18a8   : > { %v11765_v29 = vmul.f32 0.0625, %v11539_v21  ;;  %v11541_v58 = vpop.f32.mrb[209].mxu1  ;;  %v15126_v6 = vpack.c.bf16 %v11471_v8, %v11463_v38  ;;  %v11837_v59 = vsub.f32 %v19660_v52, %v11800_v7 }
0x18a9   : > { %v11766_v34 = vmul.f32 0.0625, %v11541_v58  ;;  %15109 = vmatprep.subr.bf16.mxu0 %v15108_v5  ;;  %v15124_v26 = vpack.c.bf16 %v11472_v3, %v11464_v32  ;;  %v11829_v5 = vsub.f32 %v19671_v15, %v11800_v7  ;;  %v11830_v9 = vsub.f32 %v19665_v39, %v11804_v37  ;;  %v19830_v32 = vpop.permute.xlu1 %11942 }
0x18aa   : > { %v11781_v49 = vsub.f32 %v11765_v29, %v11773_v33  ;;  %15111 = vmatpush1.bf16.msra.mxu0 %v15110_v1  ;;  %v11816_v33 = vrot.slane %v11761_v44, %v21009_v31  ;;  %v11838_v63 = vsub.f32 %v19668_v2, %v11804_v37 }
0x18ab   : > { %v11782_v30 = vsub.f32 %v11766_v34, %v11774_v36  ;;  %15117 = vmatprep.subr.bf16.mxu0 %v15116_v22  ;;  %v11681_v62 = vpop.f32.mrb[210].mxu1 }
0x18ac   : > { %v11789_v25 = vmax.f32 %v11781_v49, 0.0  ;;  %v11769_v60 = vmul.f32 0.0625, %v11681_v62  ;;  %v11683_v0 = vpop.f32.mrb[211].mxu1  ;;  %v11833_v44 = vsub.f32 %v19701_v42, %v11816_v33  ;;  %v11841_v34 = vsub.f32 %v19687_v45, %v11816_v33 }
0x18ad   : > { %v11790_v47 = vmax.f32 %v11782_v30, 0.0  ;;  %v11770_v11 = vmul.f32 0.0625, %v11683_v0  ;;  %14326 = vmatmul.mubr.msk.f32.vlgmr.msra.gmra.mrb[214].mxu0 %vm570_vm0, %v20996_v24 }
0x18ae   : > { %v11845_v53 = vadd.f32 1e-05, %v11789_v25  ;;  %v11785_v50 = vsub.f32 %v11769_v60, %v11777_v16  ;;  %15119 = vmatpush1.bf16.msra.mxu0 %v15118_v14  ;;  %11608 = vmatprep.mubr.f32.mxu0 %v20912_v27  ;;  %v19832_v16 = vpop.permute.xlu0 %11937 }
0x18af   : > { %v11846_v57 = vadd.f32 1e-05, %v11790_v47  ;;  %v11786_v48 = vsub.f32 %v11770_v11, %v11778_v4  ;;  %15125 = vmatprep.subr.bf16.mxu0 %v15124_v26 }
0x18b0   : > { %16036 = vrsqrt.f32 %v11845_v53  ;;  %v11793_v41 = vmax.f32 %v11785_v50, 0.0 }
0x18b1   : > { %16038 = vrsqrt.f32 %v11846_v57  ;;  %v11794_v51 = vmax.f32 %v11786_v48, 0.0  ;;  %14328 = vmatmul.mubr.msk.f32.vlgmr.msra.gmra.mrb[216].mxu0 %vm570_vm0, %v20996_v24 }
0x18b2   : > { %v11849_v61 = vadd.f32 1e-05, %v11793_v41  ;;  %15127 = vmatpush1.bf16.msra.mxu0 %v15126_v6  ;;  %11750 = vmatprep.mubr.f32.mxu0 %v20912_v27 }
0x18b3   : > { %v11850_v18 = vadd.f32 1e-05, %v11794_v51 }
0x18b4   : > { %16040 = vrsqrt.f32 %v11849_v61 }
0x18b5   : > { %16042 = vrsqrt.f32 %v11850_v18  ;;  %14330 = vmatmul.mubr.msk.f32.vlgmr.msra.gmra.mrb[218].mxu0 %vm570_vm0, %v20996_v24  ;;  %v11820_v24 = vrot.slane %v11762_v23, %v21009_v31 }
0x18b6   : > { %12322 = vmatprep.mubr.f32.mxu0 %v20912_v27 }
0x18b7   : > { %v11834_v23 = vsub.f32 %v19691_v28, %v11820_v24  ;;  %v11842_v25 = vsub.f32 %v19694_v54, %v11820_v24  ;;  %v19873_v24 = vld [vmem:[%s20906_s27 + $0xc8] sm:$0xff] }
0x18ba   : > { %v16037_v43 = vpop.eup %16036 }
0x18bb   : > { %v16039_v21 = vpop.eup %16038  ;;  %v11864_v46 = vrot.slane %v16037_v43, %v21009_v31 }
0x18bc   : > { %v11868_v36 = vrot.slane %v16039_v21, %v21009_v31  ;;  %v19861_v21 = vld [vmem:[%s20906_s27 + $0xc0] sm:$0xff] }
0x18bd   : > { %v11893_v29 = vmul.f32 %v11864_v46, %v11829_v5  ;;  %v11901_v58 = vmul.f32 %v11864_v46, %v11837_v59  ;;  %v19881_v46 = vld [vmem:[%s20906_s27 + $0xd0] sm:$0xff] }
0x18be   : > { %v16041_v1 = vpop.eup %16040  ;;  %v11894_v22 = vmul.f32 %v11868_v36, %v11830_v9  ;;  %v11902_v3 = vmul.f32 %v11868_v36, %v11838_v63  ;;  %v19889_v9 = vld [vmem:[%s20906_s27 + $0xd8] sm:$0xff]  ;;  %v19897_v63 = vld [vmem:[%s20906_s27 + $0xe0] sm:$0xff]  ;;  %v19905_v36 = vld [vmem:[%s20906_s27 + $0xe8] sm:$0xff] }
0x18bf   : > { %v16043_v49 = vpop.eup %16042  ;;  %v11880_v30 = vrot.slane %v16041_v1, %v21009_v31  ;;  %v11919_v62 = vmul.f32 %v19814_v56, %v11893_v29  ;;  %v11927_v14 = vmul.f32 %v19812_v55, %v11901_v58  ;;  %v19913_v29 = vld [vmem:[%s20906_s27 + $0xf0] sm:$0xff]  ;;  %v19921_v58 = vld [vmem:[%s20906_s27 + $0xf8] sm:$0xff] }
0x18c0   : > { %v11920_v60 = vmul.f32 %v19814_v56, %v11894_v22  ;;  %v11928_v0 = vmul.f32 %v19812_v55, %v11902_v3  ;;  %v11884_v8 = vrot.slane %v16043_v49, %v21009_v31 }
0x18c1   : > { %v11945_v4 = vadd.f32 %v19832_v16, %v11919_v62  ;;  %v11953_v47 = vadd.f32 %v19830_v32, %v11927_v14  ;;  %v11897_v11 = vmul.f32 %v11880_v30, %v11833_v44  ;;  %v11905_v26 = vmul.f32 %v11880_v30, %v11841_v34 }
0x18c2   : > { %v11946_v53 = vadd.f32 %v19832_v16, %v11920_v60  ;;  %v11954_v50 = vadd.f32 %v19830_v32, %v11928_v0  ;;  %v11898_v38 = vmul.f32 %v11884_v8, %v11834_v23  ;;  %v11906_v57 = vmul.f32 %v11884_v8, %v11842_v25 }
0x18c3   : > { %v15130_v48 = vpack.c.bf16 %v11953_v47, %v11945_v4  ;;  %v11923_v41 = vmul.f32 %v19814_v56, %v11897_v11  ;;  %v11931_v6 = vmul.f32 %v19812_v55, %v11905_v26 }
0x18c4   : > { %v15128_v51 = vpack.c.bf16 %v11954_v50, %v11946_v53  ;;  %v11924_v61 = vmul.f32 %v19814_v56, %v11898_v38  ;;  %v11932_v18 = vmul.f32 %v19812_v55, %v11906_v57 }
0x18c5   : > { %v19847_v7 = vadd.f32 %v19832_v16, %v11923_v41  ;;  %v19850_v37 = vadd.f32 %v19830_v32, %v11931_v6 }
0x18c6   : > { %15129 = vmatprep.subr.bf16.mxu1 %v15128_v51  ;;  %v19853_v43 = vadd.f32 %v19832_v16, %v11924_v61  ;;  %v19856_v33 = vadd.f32 %v19830_v32, %v11932_v18 }
0x18c7   : > { %15131 = vmatpush1.bf16.msra.mxu1 %v15130_v48 }
0x18ca   : > { %14347 = vmatmul.mubr.msk.f32.vlgmr.msra.gmra.mrb[212].mxu1 %vm570_vm0, %v19861_v21 }
0x18cb   : > { %12113 = vmatprep.mubr.f32.mxu1 %v20912_v27 }
0x18ce   : > { %14348 = vmatmul.mubr.msk.f32.gmra.mrb[214].mxu1 %vm570_vm0, %v19873_v24 }
0x18cf   : > { %12119 = vmatprep.mubr.f32.mxu1 %v20912_v27 }
0x18d2   : > { %14349 = vmatmul.mubr.msk.f32.gmra.mrb[216].mxu1 %vm570_vm0, %v19881_v46 }
0x18d3   : > { %12125 = vmatprep.mubr.f32.mxu1 %v20912_v27 }
0x18d6   : > { %14350 = vmatmul.mubr.msk.f32.gmra.mrb[218].mxu1 %vm570_vm0, %v19889_v9 }
0x18d7   : > { %12131 = vmatprep.mubr.f32.mxu1 %v20912_v27 }
0x18da   : > { %14351 = vmatmul.mubr.msk.f32.gmra.mrb[220].mxu1 %vm570_vm0, %v19897_v63 }
0x18db   : > { %12137 = vmatprep.mubr.f32.mxu1 %v20912_v27 }
0x18de   : > { %14352 = vmatmul.mubr.msk.f32.gmra.mrb[222].mxu1 %vm570_vm0, %v19905_v36 }
0x18df   : > { %12143 = vmatprep.mubr.f32.mxu1 %v20912_v27 }
0x18e2   : > { %14353 = vmatmul.mubr.msk.f32.gmra.mrb[224].mxu1 %vm570_vm0, %v19913_v29 }
0x18e3   : > { %12149 = vmatprep.mubr.f32.mxu1 %v20912_v27 }
0x18e6   : > { %14354 = vmatmul.mubr.msk.f32.gmra.mrb[226].mxu1 %vm570_vm0, %v19921_v58 }
0x18e7   : > { %12592 = vmatprep.mubr.f32.mxu1 %v20912_v27 }
0x1978   : > { %v11310_v1 = vpop.f32.mrb[212].mxu0 }
0x1979   : > { %v11312_v44 = vpop.f32.mrb[213].mxu0  ;;  %v11759_v22 = vmul.f32 0.0625, %v11310_v1 }
0x197a   : > { %v11760_v49 = vmul.f32 0.0625, %v11312_v44 }
0x197b   : > { %v11775_v23 = vmul.f32 %v11759_v22, %v11759_v22 }
0x197c   : > { %v11776_v30 = vmul.f32 %v11760_v49, %v11760_v49 }
0x1980   : > { %v11452_v34 = vpop.f32.mrb[214].mxu0 }
0x1981   : > { %v11454_v3 = vpop.f32.mrb[215].mxu0  ;;  %v11763_v14 = vmul.f32 0.0625, %v11452_v34 }
0x1982   : > { %v11764_v0 = vmul.f32 0.0625, %v11454_v3 }
0x1983   : > { %v11779_v4 = vmul.f32 %v11763_v14, %v11763_v14 }
0x1984   : > { %v11610_v62 = vpop.f32.mrb[216].mxu0  ;;  %v11780_v11 = vmul.f32 %v11764_v0, %v11764_v0 }
0x1985   : > { %v11767_v25 = vmul.f32 0.0625, %v11610_v62  ;;  %v11612_v60 = vpop.f32.mrb[217].mxu0 }
0x1986   : > { %v11768_v8 = vmul.f32 0.0625, %v11612_v60 }
0x1987   : > { %v11783_v47 = vsub.f32 %v11767_v25, %v11775_v23  ;;  %v11808_v23 = vrot.slane %v11759_v22, %v21009_v31  ;;  %v11824_v25 = vrot.slane %v11763_v14, %v21009_v31 }
0x1988   : > { %v11784_v26 = vsub.f32 %v11768_v8, %v11776_v30  ;;  %v11752_v53 = vpop.f32.mrb[218].mxu0  ;;  %v11812_v30 = vrot.slane %v11760_v49, %v21009_v31 }
0x1989   : > { %v11791_v50 = vmax.f32 %v11783_v47, 0.0  ;;  %v11771_v38 = vmul.f32 0.0625, %v11752_v53  ;;  %v11754_v57 = vpop.f32.mrb[219].mxu0  ;;  %v11831_v8 = vsub.f32 %v19751_v20, %v11808_v23  ;;  %v11828_v47 = vrot.slane %v11764_v0, %v21009_v31 }
0x198a   : > { %v11792_v48 = vmax.f32 %v11784_v26, 0.0  ;;  %v11772_v41 = vmul.f32 0.0625, %v11754_v57  ;;  %v11832_v26 = vsub.f32 %v19745_v17, %v11812_v30  ;;  %v11840_v53 = vsub.f32 %v19748_v19, %v11812_v30 }
0x198b   : > { %v11847_v6 = vadd.f32 1e-05, %v11791_v50  ;;  %v11787_v51 = vsub.f32 %v11771_v38, %v11779_v4  ;;  %v11839_v4 = vsub.f32 %v19742_v40, %v11808_v23  ;;  %v11835_v14 = vsub.f32 %v19777_v10, %v11824_v25 }
0x198c   : > { %v11848_v61 = vadd.f32 1e-05, %v11792_v48  ;;  %v11788_v18 = vsub.f32 %v11772_v41, %v11780_v11 }
0x198d   : > { %16044 = vrsqrt.f32 %v11847_v6  ;;  %v11795_v1 = vmax.f32 %v11787_v51, 0.0  ;;  %v11836_v6 = vsub.f32 %v19767_v35, %v11828_v47 }
0x198e   : > { %16046 = vrsqrt.f32 %v11848_v61  ;;  %v11796_v44 = vmax.f32 %v11788_v18, 0.0  ;;  %v19941_v18 = vpop.permute.xlu0 %11981 }
0x198f   : > { %v11851_v34 = vadd.f32 1e-05, %v11795_v1  ;;  %v11844_v1 = vsub.f32 %v19770_v12, %v11828_v47 }
0x1990   : > { %v11852_v3 = vadd.f32 1e-05, %v11796_v44 }
0x1991   : > { %16048 = vrsqrt.f32 %v11851_v34 }
0x1992   : > { %16050 = vrsqrt.f32 %v11852_v3 }
0x1997   : > { %v16045_v62 = vpop.eup %16044 }
0x1998   : > { %v16047_v60 = vpop.eup %16046  ;;  %v11872_v11 = vrot.slane %v16045_v62, %v21009_v31 }
0x1999   : > { %v11876_v22 = vrot.slane %v16047_v60, %v21009_v31 }
0x199a   : > { %v11895_v50 = vmul.f32 %v11872_v11, %v11831_v8  ;;  %v11903_v49 = vmul.f32 %v11872_v11, %v11839_v4 }
0x199b   : > { %v16049_v38 = vpop.eup %16048  ;;  %v11896_v57 = vmul.f32 %v11876_v22, %v11832_v26  ;;  %v11904_v48 = vmul.f32 %v11876_v22, %v11840_v53  ;;  %v11843_v53 = vsub.f32 %v19762_v13, %v11824_v25 }
0x199c   : > { %v16051_v41 = vpop.eup %16050  ;;  %v11888_v0 = vrot.slane %v16049_v38, %v21009_v31  ;;  %v11921_v51 = vmul.f32 %v19814_v56, %v11895_v50  ;;  %v11929_v61 = vmul.f32 %v19812_v55, %v11903_v49  ;;  %v19969_v38 = vpop.permute.xlu1 %11986 }
0x199d   : > { %v12109_v44 = vpop.f32.mrb[212].mxu1  ;;  %v11922_v34 = vmul.f32 %v19814_v56, %v11896_v57  ;;  %v11930_v3 = vmul.f32 %v19812_v55, %v11904_v48  ;;  %v11892_v23 = vrot.slane %v16051_v41, %v21009_v31 }
0x199e   : > { %v19948_v30 = vadd.f32 %v12109_v44, %v19941_v18  ;;  %v12111_v62 = vpop.f32.mrb[213].mxu1  ;;  %v19951_v60 = vadd.f32 %v19832_v16, %v11921_v51  ;;  %v19954_v8 = vadd.f32 %v19830_v32, %v11929_v61  ;;  %v11899_v4 = vmul.f32 %v11888_v0, %v11835_v14 }
0x199f   : > { %v19957_v47 = vadd.f32 %v12111_v62, %v19941_v18  ;;  %v19960_v11 = vadd.f32 %v19832_v16, %v11922_v34  ;;  %v19963_v26 = vadd.f32 %v19830_v32, %v11930_v3  ;;  %v11900_v31 = vmul.f32 %v11892_v23, %v11836_v6 }
0x19a0   : > { %v12172_v22 = vmul.f32 0.70710677, %v19948_v30  ;;  %v11908_v49 = vmul.f32 %v11892_v23, %v11844_v1  ;;  %v11907_v61 = vmul.f32 %v11888_v0, %v11843_v53  ;;  %v11925_v34 = vmul.f32 %v19814_v56, %v11899_v4 }
0x19a1   : > { %v12173_v14 = vmul.f32 0.70710677, %v19957_v47  ;;  %v12115_v57 = vpop.f32.mrb[214].mxu1  ;;  %v11926_v41 = vmul.f32 %v19814_v56, %v11900_v31  ;;  %v19986_v31 = vpop.permute.xlu0 %11991 }
0x19a2   : > { %16052 = verf.f32 %v12172_v22  ;;  %v12116_v6 = vadd.f32 %v12115_v57, %v19969_v38  ;;  %v12117_v25 = vpop.f32.mrb[215].mxu1  ;;  %v11934_v51 = vmul.f32 %v19812_v55, %v11908_v49  ;;  %v11933_v62 = vmul.f32 %v19812_v55, %v11907_v61 }
0x19a3   : > { %16054 = verf.f32 %v12173_v14  ;;  %v12118_v1 = vadd.f32 %v12117_v25, %v19969_v38  ;;  %v19979_v44 = vadd.f32 %v19832_v16, %v11926_v41  ;;  %v19989_v0 = vadd.f32 %v19832_v16, %v11925_v34  ;;  %v20005_v41 = vpop.permute.xlu1 %11996 }
0x19a4   : > { %v12174_v3 = vmul.f32 0.70710677, %v12116_v6  ;;  %v19983_v23 = vadd.f32 %v19830_v32, %v11934_v51  ;;  %v19997_v4 = vadd.f32 %v19830_v32, %v11933_v62  ;;  %v12158_v13 = vmul.f32 0.5, %v12116_v6 }
0x19a5   : > { %v12175_v22 = vmul.f32 0.70710677, %v12118_v1  ;;  %v12121_v57 = vpop.f32.mrb[216].mxu1 }
0x19a6   : > { %16056 = verf.f32 %v12174_v3  ;;  %v19992_v53 = vadd.f32 %v12121_v57, %v19986_v31  ;;  %v12123_v49 = vpop.f32.mrb[217].mxu1  ;;  %v20010_v57 = vpop.permute.xlu0 %12001 }
0x19a7   : > { %16058 = verf.f32 %v12175_v22  ;;  %v20000_v55 = vadd.f32 %v12123_v49, %v19986_v31  ;;  %v20020_v12 = vpop.permute.xlu1 %12006 }
0x19a8   : > { %v12176_v14 = vmul.f32 0.70710677, %v19992_v53 }
0x19a9   : > { %v12177_v25 = vmul.f32 0.70710677, %v20000_v55  ;;  %v12127_v51 = vpop.f32.mrb[218].mxu1 }
0x19aa   : > { %16060 = verf.f32 %v12176_v14  ;;  %v12128_v61 = vadd.f32 %v12127_v51, %v20005_v41  ;;  %v12129_v34 = vpop.f32.mrb[219].mxu1  ;;  %v12156_v51 = vmul.f32 0.5, %v19948_v30 }
0x19ab   : > { %16062 = verf.f32 %v12177_v25  ;;  %v12130_v32 = vadd.f32 %v12129_v34, %v20005_v41 }
0x19ac   : > { %v16053_v3 = vpop.eup %16052  ;;  %v12178_v62 = vmul.f32 0.70710677, %v12128_v61 }
0x19ad   : > { %v16055_v22 = vpop.eup %16054  ;;  %v12179_v49 = vmul.f32 0.70710677, %v12130_v32  ;;  %v12133_v56 = vpop.f32.mrb[220].mxu1  ;;  %v12204_v59 = vadd.f32 1.0, %v16053_v3 }
0x19ae   : > { %16064 = verf.f32 %v12178_v62  ;;  %v20013_v16 = vadd.f32 %v12133_v56, %v20010_v57  ;;  %v12135_v5 = vpop.f32.mrb[221].mxu1  ;;  %v12205_v34 = vadd.f32 1.0, %v16055_v22  ;;  %v12157_v62 = vmul.f32 0.5, %v19957_v47 }
0x19af   : > { %16066 = verf.f32 %v12179_v49  ;;  %v20016_v14 = vadd.f32 %v12135_v5, %v20010_v57  ;;  %v12159_v49 = vmul.f32 0.5, %v12118_v1  ;;  %v12220_v30 = vmul.f32 %v12204_v59, %v12156_v51 }
0x19b0   : > { %v16057_v25 = vpop.eup %16056  ;;  %v12180_v50 = vmul.f32 0.70710677, %v20013_v16  ;;  %v12221_v54 = vmul.f32 %v12205_v34, %v12157_v62  ;;  %v20031_v62 = vpop.permute.xlu1 %12016 }
0x19b1   : > { %v16059_v48 = vpop.eup %16058  ;;  %v12206_v56 = vadd.f32 1.0, %v16057_v25  ;;  %v12181_v19 = vmul.f32 0.70710677, %v20016_v14  ;;  %v12139_v3 = vpop.f32.mrb[222].mxu1 }
0x19b2   : > { %v12207_v35 = vadd.f32 1.0, %v16059_v48  ;;  %16068 = verf.f32 %v12180_v50  ;;  %v12140_v5 = vadd.f32 %v12139_v3, %v20020_v12  ;;  %v12141_v10 = vpop.f32.mrb[223].mxu1  ;;  %v20026_v25 = vpop.permute.xlu0 %12011 }
0x19b3   : > { %v12222_v22 = vmul.f32 %v12206_v56, %v12158_v13  ;;  %16070 = verf.f32 %v12181_v19  ;;  %v12142_v45 = vadd.f32 %v12141_v10, %v20020_v12  ;;  %v12160_v10 = vmul.f32 0.5, %v19992_v53 }
0x19b4   : > { %v16061_v52 = vpop.eup %16060  ;;  %v12223_v2 = vmul.f32 %v12207_v35, %v12159_v49  ;;  %v12182_v47 = vmul.f32 0.70710677, %v12140_v5  ;;  %v12161_v56 = vmul.f32 0.5, %v20000_v55  ;;  %v12162_v49 = vmul.f32 0.5, %v12128_v61 }
0x19b5   : > { %v16063_v6 = vpop.eup %16062  ;;  %v15134_v40 = vpack.c.bf16 %v12222_v22, %v12220_v30  ;;  %v12183_v28 = vmul.f32 0.70710677, %v12142_v45  ;;  %v12145_v1 = vpop.f32.mrb[224].mxu1  ;;  %v12208_v59 = vadd.f32 1.0, %v16061_v52  ;;  %v12163_v52 = vmul.f32 0.5, %v12130_v32 }
0x19b6   : > { %16072 = verf.f32 %v12182_v47  ;;  %v12146_v50 = vadd.f32 %v12145_v1, %v20026_v25  ;;  %v12147_v48 = vpop.f32.mrb[225].mxu1  ;;  %v15132_v3 = vpack.c.bf16 %v12223_v2, %v12221_v54  ;;  %v12209_v35 = vadd.f32 1.0, %v16063_v6 }
0x19b7   : > { %16074 = verf.f32 %v12183_v28  ;;  %v12148_v19 = vadd.f32 %v12147_v48, %v20026_v25  ;;  %v12224_v53 = vmul.f32 %v12208_v59, %v12160_v10  ;;  %v12164_v59 = vmul.f32 0.5, %v20013_v16 }
0x19b8   : > { %v16065_v13 = vpop.eup %16064  ;;  %v12184_v51 = vmul.f32 0.70710677, %v12146_v50  ;;  %15133 = vmatprep.subr.bf16.mxu0 %v15132_v3  ;;  %v12225_v3 = vmul.f32 %v12209_v35, %v12161_v56  ;;  %v12166_v10 = vmul.f32 0.5, %v12140_v5  ;;  %v12165_v35 = vmul.f32 0.5, %v20016_v14 }
0x19b9   : > { %v16067_v34 = vpop.eup %16066  ;;  %v12210_v30 = vadd.f32 1.0, %v16065_v13  ;;  %v12185_v22 = vmul.f32 0.70710677, %v12148_v19  ;;  %v12151_v47 = vpop.f32.mrb[226].mxu1  ;;  %15135 = vmatpush1.bf16.msra.mxu0 %v15134_v40  ;;  %v12167_v56 = vmul.f32 0.5, %v12142_v45  ;;  %v12168_v5 = vmul.f32 0.5, %v12146_v50 }
0x19ba   : > { %v12211_v2 = vadd.f32 1.0, %v16067_v34  ;;  %16076 = verf.f32 %v12184_v51  ;;  %v12152_v28 = vadd.f32 %v12151_v47, %v20031_v62  ;;  %v12153_v54 = vpop.f32.mrb[227].mxu1  ;;  %v12169_v14 = vmul.f32 0.5, %v12148_v19 }
0x19bb   : > { %v12226_v6 = vmul.f32 %v12210_v30, %v12162_v49  ;;  %16078 = verf.f32 %v12185_v22  ;;  %v12154_v1 = vadd.f32 %v12153_v54, %v20031_v62  ;;  %v21023_v50 = vpack.c.bf16 %v19963_v26, %v19960_v11 }
0x19bc   : > { %v16069_v48 = vpop.eup %16068  ;;  %v12227_v15 = vmul.f32 %v12211_v2, %v12163_v52  ;;  %v12186_v55 = vmul.f32 0.70710677, %v12152_v28  ;;  %v21024_v19 = vpack.c.bf16 %v19954_v8, %v19951_v60 }
0x19bd   : > { %v16071_v61 = vpop.eup %16070  ;;  %v15138_v13 = vpack.c.bf16 %v12226_v6, %v12224_v53  ;;  %v12187_v42 = vmul.f32 0.70710677, %v12154_v1  ;;  %v12212_v32 = vadd.f32 1.0, %v16069_v48  ;;  %v12171_v45 = vmul.f32 0.5, %v12154_v1 }
0x19be   : > { %16080 = verf.f32 %v12186_v55  ;;  %v15136_v40 = vpack.c.bf16 %v12227_v15, %v12225_v3  ;;  %v12213_v34 = vadd.f32 1.0, %v16071_v61  ;;  %v12170_v61 = vmul.f32 0.5, %v12152_v28  ;;  %v20055_v28 = vld [vmem:[%s20909_s28 + $0x38] sm:$0xff] }
0x19bf   : > { %16082 = verf.f32 %v12187_v42  ;;  %v12228_v22 = vmul.f32 %v12212_v32, %v12164_v59 }
0x19c0   : > { %v16073_v51 = vpop.eup %16072  ;;  %15137 = vmatprep.subr.bf16.mxu0 %v15136_v40  ;;  %v12229_v54 = vmul.f32 %v12213_v34, %v12165_v35 }
0x19c1   : > { %v16075_v47 = vpop.eup %16074  ;;  %v12214_v49 = vadd.f32 1.0, %v16073_v51  ;;  %15139 = vmatpush1.bf16.msra.mxu0 %v15138_v13 }
0x19c2   : > { %v12215_v30 = vadd.f32 1.0, %v16075_v47 }
0x19c3   : > { %v12230_v52 = vmul.f32 %v12214_v49, %v12166_v10  ;;  %v20041_v49 = vld [vmem:[%s20909_s28 + $0x30] sm:$0xff] }
0x19c4   : > { %v16077_v2 = vpop.eup %16076  ;;  %v12231_v15 = vmul.f32 %v12215_v30, %v12167_v56 }
0x19c5   : > { %v16079_v53 = vpop.eup %16078  ;;  %v15142_v42 = vpack.c.bf16 %v12230_v52, %v12228_v22  ;;  %v12216_v48 = vadd.f32 1.0, %v16077_v2 }
0x19c6   : > { %v15140_v6 = vpack.c.bf16 %v12231_v15, %v12229_v54  ;;  %v12217_v55 = vadd.f32 1.0, %v16079_v53 }
0x19c7   : > { %v12232_v32 = vmul.f32 %v12216_v48, %v12168_v5 }
0x19c8   : > { %v16081_v3 = vpop.eup %16080  ;;  %15141 = vmatprep.subr.bf16.mxu0 %v15140_v6  ;;  %v12233_v47 = vmul.f32 %v12217_v55, %v12169_v14 }
0x19c9   : > { %v16083_v16 = vpop.eup %16082  ;;  %v12218_v13 = vadd.f32 1.0, %v16081_v3  ;;  %15143 = vmatpush1.bf16.msra.mxu0 %v15142_v42 }
0x19ca   : > { %v12219_v40 = vadd.f32 1.0, %v16083_v16 }
0x19cb   : > { %v12234_v51 = vmul.f32 %v12218_v13, %v12170_v61 }
0x19cc   : > { %v12235_v34 = vmul.f32 %v12219_v40, %v12171_v45 }
0x19cd   : > { %v15146_v59 = vpack.c.bf16 %v12234_v51, %v12232_v32 }
0x19ce   : > { %v15144_v10 = vpack.c.bf16 %v12235_v34, %v12233_v47 }
0x19d0   : > { %15145 = vmatprep.subr.bf16.mxu0 %v15144_v10 }
0x19d1   : > { %15147 = vmatpush1.bf16.msra.mxu0 %v15146_v59 }
0x19d2   : > { %15149 = vmatprep.subr.bf16.mxu0 %v21023_v50 }
0x19d4   : > { %14359 = vmatmul.mubr.msk.f32.vlgmr.msra.gmra.mrb[220].mxu0 %vm2801_vm1, %v20041_v49 }
0x19d5   : > { %15151 = vmatpush1.bf16.msra.mxu0 %v21024_v19  ;;  %12328 = vmatprep.mubr.f32.mxu0 %v20912_v27 }
0x19d8   : > { %14360 = vmatmul.mubr.msk.f32.gmra.mrb[222].mxu0 %vm2801_vm1, %v20055_v28 }
0x19d9   : > { %12399 = vmatprep.mubr.f32.mxu0 %v20912_v27 }
0x19dc   : > { %14361 = vmatmul.mubr.msk.f32.vlgmr.msra.gmra.mrb[224].mxu0 %vm570_vm0, %v19861_v21 }
0x19dd   : > { %12405 = vmatprep.mubr.f32.mxu0 %v20912_v27 }
0x19e0   : > { %14362 = vmatmul.mubr.msk.f32.gmra.mrb[226].mxu0 %vm570_vm0, %v19873_v24 }
0x19e1   : > { %12411 = vmatprep.mubr.f32.mxu0 %v20912_v27 }
0x19e4   : > { %14363 = vmatmul.mubr.msk.f32.gmra.mrb[228].mxu0 %vm570_vm0, %v19881_v46 }
0x19e5   : > { %12417 = vmatprep.mubr.f32.mxu0 %v20912_v27 }
0x19e8   : > { %14364 = vmatmul.mubr.msk.f32.gmra.mrb[230].mxu0 %vm570_vm0, %v19889_v9 }
0x19e9   : > { %12423 = vmatprep.mubr.f32.mxu0 %v20912_v27 }
0x19ec   : > { %14365 = vmatmul.mubr.msk.f32.gmra.mrb[232].mxu0 %vm570_vm0, %v19897_v63 }
0x19ed   : > { %12429 = vmatprep.mubr.f32.mxu0 %v20912_v27 }
0x19f0   : > { %14366 = vmatmul.mubr.msk.f32.gmra.mrb[234].mxu0 %vm570_vm0, %v19905_v36 }
0x19f1   : > { %12435 = vmatprep.mubr.f32.mxu0 %v20912_v27 }
0x19f4   : > { %14367 = vmatmul.mubr.msk.f32.gmra.mrb[236].mxu0 %vm570_vm0, %v19913_v29 }
0x19f5   : > { %12441 = vmatprep.mubr.f32.mxu0 %v20912_v27 }
0x19f8   : > { %14368 = vmatmul.mubr.msk.f32.gmra.mrb[238].mxu0 %vm570_vm0, %v19921_v58 }
0x19f9   : > { %12862 = vmatprep.mubr.f32.mxu0 %v20912_v27 }
0x1aa7   : > { %v20084_v60 = vpop.f32.mrb[220].mxu0 }
0x1aa8   : > { %v20086_v8 = vpop.f32.mrb[221].mxu0 }
0x1aab   : > { %v20088_v11 = vpop.f32.mrb[222].mxu0 }
0x1aac   : > { %21025 = vst [vmem:[#allocation18_spill] sm:$0xff] %v20088_v11  ;;  %v20090_v26 = vpop.f32.mrb[223].mxu0 }
0x1aad   : > { %21026 = vst [vmem:[#allocation22_spill] sm:$0xff] %v20090_v26 }
0x1aaf   : > { %v12401_v1 = vpop.f32.mrb[224].mxu0 }
0x1ab0   : > { %v12402_v35 = vadd.f32 %v12401_v1, %v19941_v18  ;;  %v12403_v56 = vpop.f32.mrb[225].mxu0 }
0x1ab1   : > { %v12404_v30 = vadd.f32 %v12403_v56, %v19941_v18 }
0x1ab2   : > { %v12464_v22 = vmul.f32 0.70710677, %v12402_v35 }
0x1ab3   : > { %v12465_v52 = vmul.f32 0.70710677, %v12404_v30  ;;  %v12407_v2 = vpop.f32.mrb[226].mxu0 }
0x1ab4   : > { %16084 = verf.f32 %v12464_v22  ;;  %v12408_v54 = vadd.f32 %v12407_v2, %v19969_v38  ;;  %v12409_v15 = vpop.f32.mrb[227].mxu0  ;;  %v12448_v22 = vmul.f32 0.5, %v12402_v35 }
0x1ab5   : > { %16086 = verf.f32 %v12465_v52  ;;  %v12410_v53 = vadd.f32 %v12409_v15, %v19969_v38 }
0x1ab6   : > { %v12466_v42 = vmul.f32 0.70710677, %v12408_v54 }
0x1ab7   : > { %v12467_v6 = vmul.f32 0.70710677, %v12410_v53  ;;  %v12413_v48 = vpop.f32.mrb[228].mxu0 }
0x1ab8   : > { %16088 = verf.f32 %v12466_v42  ;;  %v12414_v3 = vadd.f32 %v12413_v48, %v19986_v31  ;;  %v12415_v55 = vpop.f32.mrb[229].mxu0  ;;  %v12449_v42 = vmul.f32 0.5, %v12404_v30 }
0x1ab9   : > { %16090 = verf.f32 %v12467_v6  ;;  %v12416_v16 = vadd.f32 %v12415_v55, %v19986_v31  ;;  %v12450_v6 = vmul.f32 0.5, %v12408_v54 }
0x1aba   : > { %v12468_v5 = vmul.f32 0.70710677, %v12414_v3 }
0x1abb   : > { %v12469_v61 = vmul.f32 0.70710677, %v12416_v16  ;;  %v12419_v13 = vpop.f32.mrb[230].mxu0 }
0x1abc   : > { %16092 = verf.f32 %v12468_v5  ;;  %v12420_v14 = vadd.f32 %v12419_v13, %v20005_v41  ;;  %v12421_v45 = vpop.f32.mrb[231].mxu0 }
0x1abd   : > { %16094 = verf.f32 %v12469_v61  ;;  %v12422_v40 = vadd.f32 %v12421_v45, %v20005_v41  ;;  %v12451_v61 = vmul.f32 0.5, %v12410_v53 }
0x1abe   : > { %v16085_v32 = vpop.eup %16084  ;;  %v12470_v51 = vmul.f32 0.70710677, %v12420_v14 }
0x1abf   : > { %v16087_v47 = vpop.eup %16086  ;;  %v12471_v34 = vmul.f32 0.70710677, %v12422_v40  ;;  %v12425_v59 = vpop.f32.mrb[232].mxu0  ;;  %v12496_v19 = vadd.f32 1.0, %v16085_v32 }
0x1ac0   : > { %16096 = verf.f32 %v12470_v51  ;;  %v20101_v10 = vadd.f32 %v12425_v59, %v20010_v57  ;;  %v12427_v50 = vpop.f32.mrb[233].mxu0  ;;  %v12497_v52 = vadd.f32 1.0, %v16087_v47 }
0x1ac1   : > { %16098 = verf.f32 %v12471_v34  ;;  %v20104_v1 = vadd.f32 %v12427_v50, %v20010_v57  ;;  %v12512_v51 = vmul.f32 %v12496_v19, %v12448_v22 }
0x1ac2   : > { %v16089_v56 = vpop.eup %16088  ;;  %v12472_v2 = vmul.f32 0.70710677, %v20101_v10  ;;  %v12513_v59 = vmul.f32 %v12497_v52, %v12449_v42  ;;  %v12453_v42 = vmul.f32 0.5, %v12416_v16 }
0x1ac3   : > { %v16091_v15 = vpop.eup %16090  ;;  %v12498_v48 = vadd.f32 1.0, %v16089_v56  ;;  %v12473_v55 = vmul.f32 0.70710677, %v20104_v1  ;;  %v12431_v5 = vpop.f32.mrb[234].mxu0 }
0x1ac4   : > { %v12499_v13 = vadd.f32 1.0, %v16091_v15  ;;  %16100 = verf.f32 %v12472_v2  ;;  %v12432_v45 = vadd.f32 %v12431_v5, %v20020_v12  ;;  %v12433_v32 = vpop.f32.mrb[235].mxu0 }
0x1ac5   : > { %v12514_v34 = vmul.f32 %v12498_v48, %v12450_v6  ;;  %16102 = verf.f32 %v12473_v55  ;;  %v12434_v35 = vadd.f32 %v12433_v32, %v20020_v12  ;;  %v12452_v6 = vmul.f32 0.5, %v12414_v3 }
0x1ac6   : > { %v16093_v47 = vpop.eup %16092  ;;  %v12515_v50 = vmul.f32 %v12499_v13, %v12451_v61  ;;  %v12474_v30 = vmul.f32 0.70710677, %v12432_v45  ;;  %v12454_v61 = vmul.f32 0.5, %v12420_v14 }
0x1ac7   : > { %v16095_v54 = vpop.eup %16094  ;;  %v15154_v56 = vpack.c.bf16 %v12514_v34, %v12512_v51  ;;  %v12475_v11 = vmul.f32 0.70710677, %v12434_v35  ;;  %v12437_v26 = vpop.f32.mrb[236].mxu0  ;;  %v12500_v5 = vadd.f32 1.0, %v16093_v47  ;;  %v12455_v34 = vmul.f32 0.5, %v12422_v40 }
0x1ac8   : > { %16104 = verf.f32 %v12474_v30  ;;  %v12438_v53 = vadd.f32 %v12437_v26, %v20026_v25  ;;  %v12439_v2 = vpop.f32.mrb[237].mxu0  ;;  %v15152_v15 = vpack.c.bf16 %v12515_v50, %v12513_v59  ;;  %v12501_v48 = vadd.f32 1.0, %v16095_v54 }
0x1ac9   : > { %16106 = verf.f32 %v12475_v11  ;;  %v12440_v19 = vadd.f32 %v12439_v2, %v20026_v25  ;;  %v12516_v59 = vmul.f32 %v12500_v5, %v12452_v6  ;;  %v12456_v5 = vmul.f32 0.5, %v20101_v10 }
0x1aca   : > { %v16097_v22 = vpop.eup %16096  ;;  %v12476_v55 = vmul.f32 0.70710677, %v12438_v53  ;;  %15153 = vmatprep.subr.bf16.mxu1 %v15152_v15  ;;  %v12517_v54 = vmul.f32 %v12501_v48, %v12453_v42  ;;  %v12458_v6 = vmul.f32 0.5, %v12432_v45  ;;  %v12457_v48 = vmul.f32 0.5, %v20104_v1 }
0x1acb   : > { %v16099_v52 = vpop.eup %16098  ;;  %v12502_v13 = vadd.f32 1.0, %v16097_v22  ;;  %v12477_v32 = vmul.f32 0.70710677, %v12440_v19  ;;  %v12443_v51 = vpop.f32.mrb[238].mxu0  ;;  %15155 = vmatpush1.bf16.msra.mxu1 %v15154_v56  ;;  %v12459_v42 = vmul.f32 0.5, %v12434_v35  ;;  %v12460_v45 = vmul.f32 0.5, %v12438_v53 }
0x1acc   : > { %v12503_v26 = vadd.f32 1.0, %v16099_v52  ;;  %16108 = verf.f32 %v12476_v55  ;;  %v12444_v47 = vadd.f32 %v12443_v51, %v20031_v62  ;;  %v12445_v11 = vpop.f32.mrb[239].mxu0  ;;  %v12461_v1 = vmul.f32 0.5, %v12440_v19 }
0x1acd   : > { %v12518_v50 = vmul.f32 %v12502_v13, %v12454_v61  ;;  %16110 = verf.f32 %v12477_v32  ;;  %v12446_v3 = vadd.f32 %v12445_v11, %v20031_v62  ;;  %v21028_v53 = vpack.c.bf16 %v19850_v37, %v19847_v7  ;;  %v20152_v7 = vpop.permute.xlu0 %12244 }
0x1ace   : > { %v16101_v30 = vpop.eup %16100  ;;  %v12519_v2 = vmul.f32 %v12503_v26, %v12455_v34  ;;  %v12478_v16 = vmul.f32 0.70710677, %v12444_v47  ;;  %v12327_v37 = vadd.f32 %v20086_v8, %v20152_v7 }
0x1acf   : > { %v16103_v14 = vpop.eup %16102  ;;  %v15158_v15 = vpack.c.bf16 %v12518_v50, %v12516_v59  ;;  %v12479_v22 = vmul.f32 0.70710677, %v12446_v3  ;;  %v12504_v40 = vadd.f32 1.0, %v16101_v30  ;;  %v12463_v35 = vmul.f32 0.5, %v12446_v3 }
0x1ad0   : > { %16112 = verf.f32 %v12478_v16  ;;  %v15156_v56 = vpack.c.bf16 %v12519_v2, %v12517_v54  ;;  %v12505_v52 = vadd.f32 1.0, %v16103_v14 }
0x1ad1   : > { %16114 = verf.f32 %v12479_v22  ;;  %v12520_v32 = vmul.f32 %v12504_v40, %v12456_v5  ;;  %v12462_v22 = vmul.f32 0.5, %v12444_v47 }
0x1ad2   : > { %v16105_v55 = vpop.eup %16104  ;;  %15157 = vmatprep.subr.bf16.mxu1 %v15156_v56  ;;  %v12521_v11 = vmul.f32 %v12505_v52, %v12457_v48 }
0x1ad3   : > { %v16107_v51 = vpop.eup %16106  ;;  %v12506_v61 = vadd.f32 1.0, %v16105_v55  ;;  %15159 = vmatpush1.bf16.msra.mxu1 %v15158_v15 }
0x1ad4   : > { %v12507_v13 = vadd.f32 1.0, %v16107_v51 }
0x1ad5   : > { %v12522_v34 = vmul.f32 %v12506_v61, %v12458_v6  ;;  %v21027_v61 = vpack.c.bf16 %v19856_v33, %v19853_v43 }
0x1ad6   : > { %v16109_v26 = vpop.eup %16108  ;;  %v12523_v59 = vmul.f32 %v12507_v13, %v12459_v42 }
0x1ad7   : > { %v16111_v50 = vpop.eup %16110  ;;  %v15162_v30 = vpack.c.bf16 %v12522_v34, %v12520_v32  ;;  %v12508_v2 = vadd.f32 1.0, %v16109_v26 }
0x1ad8   : > { %v15160_v54 = vpack.c.bf16 %v12523_v59, %v12521_v11  ;;  %v12509_v14 = vadd.f32 1.0, %v16111_v50 }
0x1ad9   : > { %v12524_v40 = vmul.f32 %v12508_v2, %v12460_v45 }
0x1ada   : > { %v16113_v16 = vpop.eup %16112  ;;  %15161 = vmatprep.subr.bf16.mxu1 %v15160_v54  ;;  %v12525_v51 = vmul.f32 %v12509_v14, %v12461_v1 }
0x1adb   : > { %v16115_v10 = vpop.eup %16114  ;;  %v12510_v15 = vadd.f32 1.0, %v16113_v16  ;;  %15163 = vmatpush1.bf16.msra.mxu1 %v15162_v30 }
0x1adc   : > { %v12511_v56 = vadd.f32 1.0, %v16115_v10 }
0x1add   : > { %v12526_v55 = vmul.f32 %v12510_v15, %v12462_v22 }
0x1ade   : > { %v12527_v52 = vmul.f32 %v12511_v56, %v12463_v35 }
0x1adf   : > { %v15166_v5 = vpack.c.bf16 %v12526_v55, %v12524_v40 }
0x1ae0   : > { %v15164_v6 = vpack.c.bf16 %v12527_v52, %v12525_v51 }
0x1ae2   : > { %15165 = vmatprep.subr.bf16.mxu1 %v15164_v6 }
0x1ae3   : > { %15167 = vmatpush1.bf16.msra.mxu1 %v15166_v5 }
0x1ae4   : > { %15169 = vmatprep.subr.bf16.mxu1 %v21027_v61 }
0x1ae6   : > { %14369 = vmatmul.mubr.msk.f32.vlgmr.msra.gmra.mrb[228].mxu1 %vm2801_vm1, %v20041_v49 }
0x1ae7   : > { %15171 = vmatpush1.bf16.msra.mxu1 %v21028_v53  ;;  %12598 = vmatprep.mubr.f32.mxu1 %v20912_v27 }
0x1aea   : > { %14370 = vmatmul.mubr.msk.f32.gmra.mrb[230].mxu1 %vm2801_vm1, %v20055_v28 }
0x1aeb   : > { %12669 = vmatprep.mubr.f32.mxu1 %v20912_v27 }
0x1aee   : > { %14371 = vmatmul.mubr.msk.f32.vlgmr.msra.gmra.mrb[232].mxu1 %vm570_vm0, %v19861_v21 }
0x1aef   : > { %12675 = vmatprep.mubr.f32.mxu1 %v20912_v27 }
0x1af2   : > { %14372 = vmatmul.mubr.msk.f32.gmra.mrb[234].mxu1 %vm570_vm0, %v19873_v24  ;;  %v20160_v24 = vadd.f32 %v12327_v37, %v19665_v39 }
0x1af3   : > { %12681 = vmatprep.mubr.f32.mxu1 %v20912_v27 }
0x1af6   : > { %14373 = vmatmul.mubr.msk.f32.gmra.mrb[236].mxu1 %vm570_vm0, %v19881_v46 }
0x1af7   : > { %12687 = vmatprep.mubr.f32.mxu1 %v20912_v27 }
0x1afa   : > { %14374 = vmatmul.mubr.msk.f32.gmra.mrb[238].mxu1 %vm570_vm0, %v19889_v9 }
0x1afb   : > { %12693 = vmatprep.mubr.f32.mxu1 %v20912_v27 }
0x1afe   : > { %14375 = vmatmul.mubr.msk.f32.gmra.mrb[240].mxu1 %vm570_vm0, %v19897_v63 }
0x1aff   : > { %12699 = vmatprep.mubr.f32.mxu1 %v20912_v27 }
0x1b02   : > { %14376 = vmatmul.mubr.msk.f32.gmra.mrb[242].mxu1 %vm570_vm0, %v19905_v36 }
0x1b03   : > { %12705 = vmatprep.mubr.f32.mxu1 %v20912_v27 }
0x1b06   : > { %14377 = vmatmul.mubr.msk.f32.gmra.mrb[244].mxu1 %vm570_vm0, %v19913_v29 }
0x1b07   : > { %12711 = vmatprep.mubr.f32.mxu1 %v20912_v27 }
0x1b0a   : > { %14378 = vmatmul.mubr.msk.f32.gmra.mrb[246].mxu1 %vm570_vm0, %v19921_v58 }
0x1b0b   : > { %13132 = vmatprep.mubr.f32.mxu1 %v20912_v27 }
0x1bb9   : > { %v12594_v43 = vpop.f32.mrb[228].mxu1 }
0x1bba   : > { %v12595_v33 = vadd.f32 %v12594_v43, %v20152_v7  ;;  %v20157_v21 = vpop.f32.mrb[229].mxu1 }
0x1bbc   : > { %v20163_v46 = vadd.f32 %v12595_v33, %v19751_v20 }
0x1bbd   : > { %v20165_v9 = vpop.f32.mrb[230].mxu1 }
0x1bbe   : > { %v20167_v63 = vpop.f32.mrb[231].mxu1  ;;  %v15435_v36 = vpack.i.bf16 %v20163_v46, %v20160_v24 }
0x1bc0   : > { %15436 = vrot.lane.b32.xlu0 %v15435_v36, %s16354_s25 }
0x1bc1   : > { %v12671_v29 = vpop.f32.mrb[232].mxu1 }
0x1bc2   : > { %v12672_v58 = vadd.f32 %v12671_v29, %v19941_v18  ;;  %v12673_v8 = vpop.f32.mrb[233].mxu1 }
0x1bc3   : > { %v12674_v39 = vadd.f32 %v12673_v8, %v19941_v18 }
0x1bc4   : > { %v12734_v19 = vmul.f32 0.70710677, %v12672_v58  ;;  %v12718_v52 = vmul.f32 0.5, %v12672_v58 }
0x1bc5   : > { %v12735_v47 = vmul.f32 0.70710677, %v12674_v39  ;;  %v12677_v20 = vpop.f32.mrb[234].mxu1  ;;  %v12719_v53 = vmul.f32 0.5, %v12674_v39 }
0x1bc6   : > { %16116 = verf.f32 %v12734_v19  ;;  %v12678_v3 = vadd.f32 %v12677_v20, %v19969_v38  ;;  %v12679_v48 = vpop.f32.mrb[235].mxu1 }
0x1bc7   : > { %16118 = verf.f32 %v12735_v47  ;;  %v12680_v42 = vadd.f32 %v12679_v48, %v19969_v38 }
0x1bc8   : > { %v12736_v13 = vmul.f32 0.70710677, %v12678_v3  ;;  %v12720_v37 = vmul.f32 0.5, %v12678_v3 }
0x1bc9   : > { %v12737_v32 = vmul.f32 0.70710677, %v12680_v42  ;;  %v12683_v34 = vpop.f32.mrb[236].mxu1  ;;  %v12721_v29 = vmul.f32 0.5, %v12680_v42 }
0x1bca   : > { %16120 = verf.f32 %v12736_v13  ;;  %v12684_v26 = vadd.f32 %v12683_v34, %v19986_v31  ;;  %v12685_v11 = vpop.f32.mrb[237].mxu1 }
0x1bcb   : > { %16122 = verf.f32 %v12737_v32  ;;  %v12686_v59 = vadd.f32 %v12685_v11, %v19986_v31 }
0x1bcc   : > { %v12738_v50 = vmul.f32 0.70710677, %v12684_v26 }
0x1bcd   : > { %v12739_v30 = vmul.f32 0.70710677, %v12686_v59  ;;  %v12689_v54 = vpop.f32.mrb[238].mxu1 }
0x1bce   : > { %16124 = verf.f32 %v12738_v50  ;;  %v12690_v2 = vadd.f32 %v12689_v54, %v20005_v41  ;;  %v12691_v16 = vpop.f32.mrb[239].mxu1 }
0x1bcf   : > { %16126 = verf.f32 %v12739_v30  ;;  %v12692_v14 = vadd.f32 %v12691_v16, %v20005_v41 }
0x1bd0   : > { %v16117_v10 = vpop.eup %16116  ;;  %v12740_v45 = vmul.f32 0.70710677, %v12690_v2 }
0x1bd1   : > { %v16119_v22 = vpop.eup %16118  ;;  %v12741_v15 = vmul.f32 0.70710677, %v12692_v14  ;;  %v12695_v1 = vpop.f32.mrb[240].mxu1  ;;  %v12766_v40 = vadd.f32 1.0, %v16117_v10 }
0x1bd2   : > { %16128 = verf.f32 %v12740_v45  ;;  %v20181_v35 = vadd.f32 %v12695_v1, %v20010_v57  ;;  %v12697_v56 = vpop.f32.mrb[241].mxu1  ;;  %v12767_v5 = vadd.f32 1.0, %v16119_v22 }
0x1bd3   : > { %16130 = verf.f32 %v12741_v15  ;;  %v20184_v55 = vadd.f32 %v12697_v56, %v20010_v57  ;;  %v12782_v20 = vmul.f32 %v12766_v40, %v12718_v52  ;;  %v12722_v15 = vmul.f32 0.5, %v12684_v26 }
0x1bd4   : > { %v16121_v51 = vpop.eup %16120  ;;  %v12742_v6 = vmul.f32 0.70710677, %v20181_v35  ;;  %v12783_v32 = vmul.f32 %v12767_v5, %v12719_v53  ;;  %v12724_v52 = vmul.f32 0.5, %v12690_v2  ;;  %v12725_v53 = vmul.f32 0.5, %v12692_v14 }
0x1bd5   : > { %v16123_v61 = vpop.eup %16122  ;;  %v12768_v43 = vadd.f32 1.0, %v16121_v51  ;;  %v12743_v33 = vmul.f32 0.70710677, %v20184_v55  ;;  %v12701_v36 = vpop.f32.mrb[242].mxu1  ;;  %v12723_v51 = vmul.f32 0.5, %v12686_v59 }
0x1bd6   : > { %v12769_v8 = vadd.f32 1.0, %v16123_v61  ;;  %16132 = verf.f32 %v12742_v6  ;;  %v12702_v19 = vadd.f32 %v12701_v36, %v20020_v12  ;;  %v12703_v47 = vpop.f32.mrb[243].mxu1 }
0x1bd7   : > { %v12784_v48 = vmul.f32 %v12768_v43, %v12720_v37  ;;  %16134 = verf.f32 %v12743_v33  ;;  %v12704_v58 = vadd.f32 %v12703_v47, %v20020_v12 }
0x1bd8   : > { %v16125_v13 = vpop.eup %16124  ;;  %v12785_v34 = vmul.f32 %v12769_v8, %v12721_v29  ;;  %v12744_v39 = vmul.f32 0.70710677, %v12702_v19 }
0x1bd9   : > { %v16127_v3 = vpop.eup %16126  ;;  %v15174_v11 = vpack.c.bf16 %v12784_v48, %v12782_v20  ;;  %v12745_v50 = vmul.f32 0.70710677, %v12704_v58  ;;  %v12707_v30 = vpop.f32.mrb[244].mxu1  ;;  %v12770_v10 = vadd.f32 1.0, %v16125_v13 }
0x1bda   : > { %16136 = verf.f32 %v12744_v39  ;;  %v12708_v42 = vadd.f32 %v12707_v30, %v20026_v25  ;;  %v12709_v54 = vpop.f32.mrb[245].mxu1  ;;  %v15172_v16 = vpack.c.bf16 %v12785_v34, %v12783_v32  ;;  %v12771_v1 = vadd.f32 1.0, %v16127_v3 }
0x1bdb   : > { %16138 = verf.f32 %v12745_v50  ;;  %v12710_v45 = vadd.f32 %v12709_v54, %v20026_v25  ;;  %v12786_v36 = vmul.f32 %v12770_v10, %v12722_v15  ;;  %v12728_v50 = vmul.f32 0.5, %v12702_v19 }
0x1bdc   : > { %v16129_v22 = vpop.eup %16128  ;;  %v12746_v56 = vmul.f32 0.70710677, %v12708_v42  ;;  %15173 = vmatprep.subr.bf16.mxu0 %v15172_v16  ;;  %v12787_v47 = vmul.f32 %v12771_v1, %v12723_v51  ;;  %v12727_v54 = vmul.f32 0.5, %v20184_v55  ;;  %v12729_v16 = vmul.f32 0.5, %v12704_v58 }
0x1bdd   : > { %v16131_v40 = vpop.eup %16130  ;;  %v12772_v5 = vadd.f32 1.0, %v16129_v22  ;;  %v12747_v6 = vmul.f32 0.70710677, %v12710_v45  ;;  %v12713_v61 = vpop.f32.mrb[246].mxu1  ;;  %15175 = vmatpush1.bf16.msra.mxu0 %v15174_v11  ;;  %v12726_v11 = vmul.f32 0.5, %v20181_v35  ;;  %v12730_v19 = vmul.f32 0.5, %v12708_v42 }
0x1bde   : > { %v12773_v37 = vadd.f32 1.0, %v16131_v40  ;;  %16140 = verf.f32 %v12746_v56  ;;  %v12714_v43 = vadd.f32 %v12713_v61, %v20031_v62  ;;  %v12715_v33 = vpop.f32.mrb[247].mxu1  ;;  %v12731_v55 = vmul.f32 0.5, %v12710_v45  ;;  %v16210_v45 = vld [vmem:[%s20906_s27 + $0xc0] sm:$0xff] }
0x1bdf   : > { %v12788_v29 = vmul.f32 %v12772_v5, %v12724_v52  ;;  %16142 = verf.f32 %v12747_v6  ;;  %v12716_v26 = vadd.f32 %v12715_v33, %v20031_v62  ;;  %v21030_v42 = vpack.c.bf16 %v19997_v4, %v19989_v0  ;;  %v16213_v0 = vld [vmem:[%s20906_s27 + $0xd8] sm:$0xff]  ;;  %v16214_v4 = vld [vmem:[%s20906_s27 + $0xe0] sm:$0xff] }
0x1be0   : > { %v16133_v8 = vpop.eup %16132  ;;  %v12789_v20 = vmul.f32 %v12773_v37, %v12725_v53  ;;  %v12748_v59 = vmul.f32 0.70710677, %v12714_v43  ;;  %v12732_v37 = vmul.f32 0.5, %v12714_v43  ;;  %v16217_v43 = vld [vmem:[%s20906_s27 + $0xf8] sm:$0xff] }
0x1be1   : > { %v16135_v2 = vpop.eup %16134  ;;  %v15178_v48 = vpack.c.bf16 %v12788_v29, %v12786_v36  ;;  %v12749_v13 = vmul.f32 0.70710677, %v12716_v26  ;;  %v12774_v14 = vadd.f32 1.0, %v16133_v8  ;;  %v12733_v58 = vmul.f32 0.5, %v12716_v26 }
0x1be2   : > { %16144 = verf.f32 %v12748_v59  ;;  %v15176_v32 = vpack.c.bf16 %v12789_v20, %v12787_v47  ;;  %v12775_v39 = vadd.f32 1.0, %v16135_v2  ;;  %v12597_v26 = vadd.f32 %v20157_v21, %v20152_v7  ;;  %v21032_v21 = vld [vmem:[#allocation26_spill] sm:$0xff] }
0x1be3   : > { %16146 = verf.f32 %v12749_v13  ;;  %v12790_v22 = vmul.f32 %v12774_v14, %v12726_v11  ;;  %v12325_v13 = vadd.f32 %v20084_v60, %v20152_v7  ;;  %v20251_v14 = vpop.permute.xlu1 %12249  ;;  %v21033_v60 = vld [vmem:[#allocation22_spill] sm:$0xff] }
0x1be4   : > { %v16137_v34 = vpop.eup %16136  ;;  %15177 = vmatprep.subr.bf16.mxu0 %v15176_v32  ;;  %v12791_v56 = vmul.f32 %v12775_v39, %v12727_v54 }
0x1be5   : > { %v16139_v3 = vpop.eup %16138  ;;  %v12776_v30 = vadd.f32 1.0, %v16137_v34  ;;  %15179 = vmatpush1.bf16.msra.mxu0 %v15178_v48  ;;  %v21029_v48 = vpack.c.bf16 %v19983_v23, %v19979_v44  ;;  %v16211_v44 = vld [vmem:[%s20906_s27 + $0xc8] sm:$0xff]  ;;  %v16212_v23 = vld [vmem:[%s20906_s27 + $0xd0] sm:$0xff] }
0x1be6   : > { %v12777_v10 = vadd.f32 1.0, %v16139_v3  ;;  %v12601_v3 = vadd.f32 %v20165_v9, %v20251_v14 }
0x1be7   : > { %v12792_v15 = vmul.f32 %v12776_v30, %v12728_v50  ;;  %v20258_v50 = vadd.f32 %v12597_v26, %v19745_v17  ;;  %v21031_v30 = vld [vmem:[#allocation31_spill] sm:$0xff]  ;;  %v21035_v17 = vld [vmem:[#allocation20_spill] sm:$0xff] }
0x1be8   : > { %v16141_v1 = vpop.eup %16140  ;;  %v12793_v40 = vmul.f32 %v12777_v10, %v12729_v16  ;;  %v20264_v16 = vadd.f32 %v12325_v13, %v21032_v21  ;;  %v12333_v10 = vadd.f32 %v21033_v60, %v20251_v14 }
0x1be9   : > { %v16143_v51 = vpop.eup %16142  ;;  %v15182_v52 = vpack.c.bf16 %v12792_v15, %v12790_v22  ;;  %v12778_v6 = vadd.f32 1.0, %v16141_v1  ;;  %v21034_v22 = vld [vmem:[#allocation23_spill] sm:$0xff] }
0x1bea   : > { %v15180_v5 = vpack.c.bf16 %v12793_v40, %v12791_v56  ;;  %v12779_v53 = vadd.f32 1.0, %v16143_v51  ;;  %v20276_v40 = vadd.f32 %v12601_v3, %v21035_v17 }
0x1beb   : > { %v12794_v29 = vmul.f32 %v12778_v6, %v12730_v19 }
0x1bec   : > { %v16145_v61 = vpop.eup %16144  ;;  %15181 = vmatprep.subr.bf16.mxu0 %v15180_v5  ;;  %v12795_v47 = vmul.f32 %v12779_v53, %v12731_v55  ;;  %v21036_v5 = vld [vmem:[#allocation18_spill] sm:$0xff] }
0x1bed   : > { %v16147_v35 = vpop.eup %16146  ;;  %v12780_v33 = vadd.f32 1.0, %v16145_v61  ;;  %15183 = vmatpush1.bf16.msra.mxu0 %v15182_v52  ;;  %v12331_v6 = vadd.f32 %v21036_v5, %v20251_v14  ;;  %v21037_v61 = vld [vmem:[#allocation28_spill] sm:$0xff] }
0x1bee   : > { %v12781_v36 = vadd.f32 1.0, %v16147_v35  ;;  %v20285_v53 = vadd.f32 %v12333_v10, %v21037_v61 }
0x1bef   : > { %v12796_v8 = vmul.f32 %v12780_v33, %v12732_v37  ;;  %v21038_v33 = vld [vmem:[#allocation30_spill] sm:$0xff] }
0x1bf0   : > { %v12797_v20 = vmul.f32 %v12781_v36, %v12733_v58  ;;  %v15450_v36 = vpack.i.bf16 %v20276_v40, %v20285_v53 }
0x1bf1   : > { %v15186_v59 = vpack.c.bf16 %v12796_v8, %v12794_v29  ;;  %v21039_v8 = vld [vmem:[#allocation21_spill] sm:$0xff] }
0x1bf2   : > { %v15184_v2 = vpack.c.bf16 %v12797_v20, %v12795_v47  ;;  %v20296_v47 = vadd.f32 %v12331_v6, %v21039_v8 }
0x1bf4   : > { %15185 = vmatprep.subr.bf16.mxu0 %v15184_v2 }
0x1bf5   : > { %15187 = vmatpush1.bf16.msra.mxu0 %v15186_v59 }
0x1bf6   : > { %15189 = vmatprep.subr.bf16.mxu0 %v21029_v48 }
0x1bf8   : > { %14379 = vmatmul.mubr.msk.f32.vlgmr.msra.gmra.mrb[240].mxu0 %vm2801_vm1, %v20041_v49  ;;  %v16215_v49 = vld [vmem:[%s20906_s27 + $0xe8] sm:$0xff] }
0x1bf9   : > { %15191 = vmatpush1.bf16.msra.mxu0 %v21030_v42  ;;  %12868 = vmatprep.mubr.f32.mxu0 %v20912_v27 }
0x1bfc   : > { %14380 = vmatmul.mubr.msk.f32.gmra.mrb[242].mxu0 %vm2801_vm1, %v20055_v28  ;;  %v16216_v28 = vld [vmem:[%s20906_s27 + $0xf0] sm:$0xff] }
0x1bfd   : > { %12939 = vmatprep.mubr.f32.mxu0 %v20912_v27 }
0x1c00   : > { %14381 = vmatmul.mubr.msk.f32.vlgmr.msra.gmra.mrb[244].mxu0 %vm570_vm0, %v16210_v45 }
0x1c01   : > { %12945 = vmatprep.mubr.f32.mxu0 %v20912_v27 }
0x1c04   : > { %14382 = vmatmul.mubr.msk.f32.gmra.mrb[246].mxu0 %vm570_vm0, %v16211_v44 }
0x1c05   : > { %12951 = vmatprep.mubr.f32.mxu0 %v20912_v27 }
0x1c08   : > { %14383 = vmatmul.mubr.msk.f32.gmra.mrb[248].mxu0 %vm570_vm0, %v16212_v23 }
0x1c09   : > { %12957 = vmatprep.mubr.f32.mxu0 %v20912_v27 }
0x1c0c   : > { %14384 = vmatmul.mubr.msk.f32.gmra.mrb[250].mxu0 %vm570_vm0, %v16213_v0 }
0x1c0d   : > { %12963 = vmatprep.mubr.f32.mxu0 %v20912_v27 }
0x1c10   : > { %14385 = vmatmul.mubr.msk.f32.gmra.mrb[252].mxu0 %vm570_vm0, %v16214_v4 }
0x1c11   : > { %12969 = vmatprep.mubr.f32.mxu0 %v20912_v27 }
0x1c14   : > { %14386 = vmatmul.mubr.msk.f32.gmra.mrb[254].mxu0 %vm570_vm0, %v16215_v49 }
0x1c15   : > { %12975 = vmatprep.mubr.f32.mxu0 %v20912_v27 }
0x1c18   : > { %14387 = vmatmul.mubr.msk.f32.gmra.mrb[0].mxu0 %vm570_vm0, %v16216_v28 }
0x1c19   : > { %12981 = vmatprep.mubr.f32.mxu0 %v20912_v27 }
0x1c1c   : > { %14388 = vmatmul.mubr.msk.f32.gmra.mrb[2].mxu0 %vm570_vm0, %v16217_v43 }
0x1ccb   : > { %v12864_v32 = vpop.f32.mrb[240].mxu0 }
0x1ccc   : > { %v12865_v34 = vadd.f32 %v12864_v32, %v20152_v7  ;;  %v12866_v39 = vpop.f32.mrb[241].mxu0 }
0x1ccd   : > { %v12867_v11 = vadd.f32 %v12866_v39, %v20152_v7 }
0x1cce   : > { %v20261_v54 = vadd.f32 %v12865_v34, %v21031_v30 }
0x1ccf   : > { %v20269_v15 = vadd.f32 %v12867_v11, %v21034_v22  ;;  %v20271_v1 = vpop.f32.mrb[242].mxu0 }
0x1cd0   : > { %v12872_v9 = vpop.f32.mrb[243].mxu0  ;;  %v15440_v56 = vpack.i.bf16 %v20261_v54, %v20258_v50 }
0x1cd1   : > { %v12873_v51 = vadd.f32 %v12872_v9, %v20251_v14  ;;  %v15445_v52 = vpack.i.bf16 %v20269_v15, %v20264_v16 }
0x1cd2   : > { %15441 = vrot.lane.b32.xlu1 %v15440_v56, %s16354_s25 }
0x1cd3   : > { %15446 = vrot.lane.b32.xlu0 %v15445_v52, %s16354_s25  ;;  %v12941_v35 = vpop.f32.mrb[244].mxu0  ;;  %v20290_v55 = vadd.f32 %v12873_v51, %v21038_v33 }
0x1cd4   : > { %v12942_v19 = vadd.f32 %v12941_v35, %v19941_v18  ;;  %v12943_v37 = vpop.f32.mrb[245].mxu0 }
0x1cd5   : > { %v12944_v58 = vadd.f32 %v12943_v37, %v19941_v18  ;;  %v15460_v18 = vpack.i.bf16 %v20290_v55, %v20296_v47 }
0x1cd6   : > { %v13004_v29 = vmul.f32 0.70710677, %v12942_v19  ;;  %v12988_v9 = vmul.f32 0.5, %v12942_v19 }
0x1cd7   : > { %v13005_v20 = vmul.f32 0.70710677, %v12944_v58  ;;  %15451 = vrot.lane.b32.xlu0 %v15450_v36, %s16354_s25  ;;  %v12947_v59 = vpop.f32.mrb[246].mxu0  ;;  %v12989_v51 = vmul.f32 0.5, %v12944_v58 }
0x1cd8   : > { %16148 = verf.f32 %v13004_v29  ;;  %v12948_v2 = vadd.f32 %v12947_v59, %v19969_v38  ;;  %v12949_v48 = vpop.f32.mrb[247].mxu0 }
0x1cd9   : > { %16150 = verf.f32 %v13005_v20  ;;  %v12950_v42 = vadd.f32 %v12949_v48, %v19969_v38 }
0x1cda   : > { %v13006_v45 = vmul.f32 0.70710677, %v12948_v2  ;;  %v12990_v52 = vmul.f32 0.5, %v12948_v2 }
0x1cdb   : > { %v13007_v44 = vmul.f32 0.70710677, %v12950_v42  ;;  %15461 = vrot.lane.b32.xlu0 %v15460_v18, %s16354_s25  ;;  %v12953_v23 = vpop.f32.mrb[248].mxu0  ;;  %v12991_v35 = vmul.f32 0.5, %v12950_v42 }
0x1cdc   : > { %16152 = verf.f32 %v13006_v45  ;;  %v12954_v0 = vadd.f32 %v12953_v23, %v19986_v31  ;;  %v12955_v4 = vpop.f32.mrb[249].mxu0 }
0x1cdd   : > { %16154 = verf.f32 %v13007_v44  ;;  %v12956_v49 = vadd.f32 %v12955_v4, %v19986_v31 }
0x1cde   : > { %v13008_v28 = vmul.f32 0.70710677, %v12954_v0 }
0x1cdf   : > { %v13009_v43 = vmul.f32 0.70710677, %v12956_v49  ;;  %v12959_v26 = vpop.f32.mrb[250].mxu0 }
0x1ce0   : > { %16156 = verf.f32 %v13008_v28  ;;  %v12960_v38 = vadd.f32 %v12959_v26, %v20005_v41  ;;  %v12961_v13 = vpop.f32.mrb[251].mxu0  ;;  %v12992_v26 = vmul.f32 0.5, %v12954_v0 }
0x1ce1   : > { %16158 = verf.f32 %v13009_v43  ;;  %v12962_v32 = vadd.f32 %v12961_v13, %v20005_v41 }
0x1ce2   : > { %v16149_v34 = vpop.eup %16148  ;;  %v13010_v39 = vmul.f32 0.70710677, %v12960_v38 }
0x1ce3   : > { %v16151_v3 = vpop.eup %16150  ;;  %v13011_v11 = vmul.f32 0.70710677, %v12962_v32  ;;  %v12965_v30 = vpop.f32.mrb[252].mxu0  ;;  %v13036_v60 = vadd.f32 1.0, %v16149_v34 }
0x1ce4   : > { %16160 = verf.f32 %v13010_v39  ;;  %v20309_v21 = vadd.f32 %v12965_v30, %v20010_v57  ;;  %v12967_v31 = vpop.f32.mrb[253].mxu0  ;;  %v13037_v56 = vadd.f32 1.0, %v16151_v3  ;;  %v12993_v39 = vmul.f32 0.5, %v12956_v49 }
0x1ce5   : > { %16162 = verf.f32 %v13011_v11  ;;  %v20312_v10 = vadd.f32 %v12967_v31, %v20010_v57  ;;  %v13052_v57 = vmul.f32 %v13036_v60, %v12988_v9  ;;  %v12994_v3 = vmul.f32 0.5, %v12960_v38 }
0x1ce6   : > { %v16153_v22 = vpop.eup %16152  ;;  %v13012_v41 = vmul.f32 0.70710677, %v20309_v21  ;;  %v13053_v20 = vmul.f32 %v13037_v56, %v12989_v51  ;;  %v12995_v60 = vmul.f32 0.5, %v12962_v32 }
0x1ce7   : > { %v16155_v17 = vpop.eup %16154  ;;  %v13038_v5 = vadd.f32 1.0, %v16153_v22  ;;  %v13013_v6 = vmul.f32 0.70710677, %v20312_v10  ;;  %v12971_v61 = vpop.f32.mrb[254].mxu0 }
0x1ce8   : > { %v13039_v37 = vadd.f32 1.0, %v16155_v17  ;;  %16164 = verf.f32 %v13012_v41  ;;  %v12972_v33 = vadd.f32 %v12971_v61, %v20020_v12  ;;  %v12973_v36 = vpop.f32.mrb[255].mxu0 }
0x1ce9   : > { %v13054_v29 = vmul.f32 %v13038_v5, %v12990_v52  ;;  %16166 = verf.f32 %v13013_v6  ;;  %v12974_v19 = vadd.f32 %v12973_v36, %v20020_v12 }
0x1cea   : > { %v16157_v8 = vpop.eup %16156  ;;  %v13055_v59 = vmul.f32 %v13039_v37, %v12991_v35  ;;  %v13014_v58 = vmul.f32 0.70710677, %v12972_v33 }
0x1ceb   : > { %v16159_v2 = vpop.eup %16158  ;;  %v15194_v48 = vpack.c.bf16 %v13054_v29, %v13052_v57  ;;  %v13015_v18 = vmul.f32 0.70710677, %v12974_v19  ;;  %v12977_v45 = vpop.f32.mrb[0].mxu0  ;;  %v13040_v4 = vadd.f32 1.0, %v16157_v8  ;;  %v12996_v57 = vmul.f32 0.5, %v20309_v21 }
0x1cec   : > { %16168 = verf.f32 %v13014_v58  ;;  %v12978_v42 = vadd.f32 %v12977_v45, %v20026_v25  ;;  %v12979_v44 = vpop.f32.mrb[1].mxu0  ;;  %v15192_v23 = vpack.c.bf16 %v13055_v59, %v13053_v20  ;;  %v13041_v12 = vadd.f32 1.0, %v16159_v2 }
0x1ced   : > { %16170 = verf.f32 %v13015_v18  ;;  %v12980_v28 = vadd.f32 %v12979_v44, %v20026_v25  ;;  %v13056_v41 = vmul.f32 %v13040_v4, %v12992_v26  ;;  %v12998_v29 = vmul.f32 0.5, %v12972_v33 }
0x1cee   : > { %v16161_v43 = vpop.eup %16160  ;;  %v13016_v13 = vmul.f32 0.70710677, %v12978_v42  ;;  %15193 = vmatprep.subr.bf16.mxu1 %v15192_v23  ;;  %v13057_v51 = vmul.f32 %v13041_v12, %v12993_v39  ;;  %v12999_v20 = vmul.f32 0.5, %v12974_v19  ;;  %v13000_v33 = vmul.f32 0.5, %v12978_v42  ;;  %v16219_v42 = vld [vmem:[%s20909_s28 + $0x38] sm:$0xff] }
0x1cef   : > { %v16163_v34 = vpop.eup %16162  ;;  %v13042_v11 = vadd.f32 1.0, %v16161_v43  ;;  %v13017_v30 = vmul.f32 0.70710677, %v12980_v28  ;;  %v12983_v31 = vpop.f32.mrb[2].mxu0  ;;  %15195 = vmatpush1.bf16.msra.mxu1 %v15194_v48 }
0x1cf0   : > { %v13043_v22 = vadd.f32 1.0, %v16163_v34  ;;  %16172 = verf.f32 %v13016_v13  ;;  %v12984_v9 = vadd.f32 %v12983_v31, %v20031_v62  ;;  %v12985_v56 = vpop.f32.mrb[3].mxu0 }
0x1cf1   : > { %v13058_v25 = vmul.f32 %v13042_v11, %v12994_v3  ;;  %16174 = verf.f32 %v13017_v30  ;;  %v12986_v0 = vadd.f32 %v12985_v56, %v20031_v62  ;;  %v12997_v62 = vmul.f32 0.5, %v20312_v10  ;;  %v16218_v56 = vld [vmem:[%s20909_s28 + $0x30] sm:$0xff] }
0x1cf2   : > { %v16165_v17 = vpop.eup %16164  ;;  %v13059_v52 = vmul.f32 %v13043_v22, %v12995_v60  ;;  %v13018_v49 = vmul.f32 0.70710677, %v12984_v9  ;;  %v13002_v13 = vmul.f32 0.5, %v12984_v9  ;;  %v13001_v10 = vmul.f32 0.5, %v12980_v28  ;;  %v15437_v28 = vpop.permute.xlu0 %15436 }
0x1cf3   : > { %v16167_v38 = vpop.eup %16166  ;;  %v15198_v5 = vpack.c.bf16 %v13058_v25, %v13056_v41  ;;  %v13019_v6 = vmul.f32 0.70710677, %v12986_v0  ;;  %v13044_v32 = vadd.f32 1.0, %v16165_v17  ;;  %v13003_v19 = vmul.f32 0.5, %v12986_v0 }
0x1cf4   : > { %16176 = verf.f32 %v13018_v49  ;;  %v15196_v61 = vpack.c.bf16 %v13059_v52, %v13057_v51  ;;  %v13045_v37 = vadd.f32 1.0, %v16167_v38  ;;  %v21040_v9 = vlaneseq }
0x1cf5   : > { %16178 = verf.f32 %v13019_v6  ;;  %v13060_v58 = vmul.f32 %v13044_v32, %v12996_v57  ;;  %v15439_v49 = vunpack.i.h.bf16 %v15437_v28  ;;  %v15438_v38 = vunpack.i.l.bf16 %v15437_v28 }
0x1cf6   : > { %v16169_v35 = vpop.eup %16168  ;;  %15197 = vmatprep.subr.bf16.mxu1 %v15196_v61  ;;  %v13061_v18 = vmul.f32 %v13045_v37, %v12997_v62  ;;  %v20334_v41 = vand.u32 127, %v21040_v9  ;;  %v12603_v61 = vadd.f32 %v20167_v63, %v20251_v14  ;;  %v21042_v62 = vld [vmem:[#allocation19_spill] sm:$0xff] }
0x1cf7   : > { %v16171_v36 = vpop.eup %16170  ;;  %v13046_v8 = vadd.f32 1.0, %v16169_v35  ;;  %15199 = vmatpush1.bf16.msra.mxu1 %v15198_v5  ;;  %v12871_v5 = vadd.f32 %v20271_v1, %v20251_v14 }
0x1cf8   : > { %v13047_v59 = vadd.f32 1.0, %v16171_v36  ;;  %vm13323_vm2 = vcmp.lt.s32.totalorder %v20334_v41, 127  ;;  %vm13388_vm3 = vcmp.lt.s32.totalorder %v20334_v41, 126  ;;  %vm13453_vm4 = vcmp.lt.s32.totalorder %v20334_v41, 124 }
0x1cf9   : > { %v13062_v2 = vmul.f32 %v13046_v8, %v12998_v29  ;;  %v13334_v57 = vsel %vm13323_vm2, %v15438_v38, %v15439_v49  ;;  %v21041_v29 = vld [vmem:[#allocation29_spill] sm:$0xff] }
0x1cfa   : > { %v16173_v48 = vpop.eup %16172  ;;  %v13063_v45 = vmul.f32 %v13047_v59, %v12999_v20  ;;  %v20353_v8 = vadd.f32 %v12871_v5, %v21041_v29  ;;  %v21043_v20 = vld [vmem:[#allocation27_spill] sm:$0xff] }
0x1cfb   : > { %v16175_v44 = vpop.eup %16174  ;;  %v15202_v23 = vpack.c.bf16 %v13062_v2, %v13060_v58  ;;  %v13048_v43 = vadd.f32 1.0, %v16173_v48  ;;  %v21044_v2 = vld [vmem:[#allocation25_spill] sm:$0xff] }
0x1cfc   : > { %v15200_v4 = vpack.c.bf16 %v13063_v45, %v13061_v18  ;;  %v13049_v12 = vadd.f32 1.0, %v16175_v44  ;;  %v13156_v48 = vadd.f32 %v12603_v61, %v21044_v2 }
0x1cfd   : > { %v13064_v3 = vmul.f32 %v13048_v43, %v13000_v33 }
0x1cfe   : > { %v16177_v26 = vpop.eup %16176  ;;  %15201 = vmatprep.subr.bf16.mxu1 %v15200_v4  ;;  %v13065_v30 = vmul.f32 %v13049_v12, %v13001_v10  ;;  %v15455_v44 = vpack.i.bf16 %v20353_v8, %v13156_v48  ;;  %v21045_v4 = vld [vmem:[#allocation32_spill] sm:$0xff] }
0x1cff   : > { %v16179_v21 = vpop.eup %16178  ;;  %v13050_v34 = vadd.f32 1.0, %v16177_v26  ;;  %15203 = vmatpush1.bf16.msra.mxu1 %v15202_v23 }
0x1d00   : > { %v13051_v39 = vadd.f32 1.0, %v16179_v21  ;;  %v21046_v21 = vld [vmem:[#allocation24_spill] sm:$0xff] }
0x1d01   : > { %v13066_v11 = vmul.f32 %v13050_v34, %v13002_v13 }
0x1d02   : > { %v13067_v31 = vmul.f32 %v13051_v39, %v13003_v19 }
0x1d03   : > { %v15206_v60 = vpack.c.bf16 %v13066_v11, %v13064_v3 }
0x1d04   : > { %v15204_v22 = vpack.c.bf16 %v13067_v31, %v13065_v30 }
0x1d06   : > { %15205 = vmatprep.subr.bf16.mxu1 %v15204_v22 }
0x1d07   : > { %15207 = vmatpush1.bf16.msra.mxu1 %v15206_v60 }
0x1d0a   : > { %14389 = vmatmul.mubr.msk.f32.vlgmr.msra.gmra.mrb[248].mxu1 %vm2801_vm1, %v16218_v56 }
0x1d0b   : > { %13138 = vmatprep.mubr.f32.mxu1 %v20912_v27 }
0x1d0e   : > { %14390 = vmatmul.mubr.msk.f32.gmra.mrb[250].mxu1 %vm2801_vm1, %v16219_v42 }
0x1d44   : > { %v15442_v25 = vpop.permute.xlu1 %15441 }
0x1d45   : > { %v15444_v0 = vunpack.i.h.bf16 %v15442_v25  ;;  %v20336_v17 = vpop.permute.xlu0 %15446  ;;  %v15443_v52 = vunpack.i.l.bf16 %v15442_v25 }
0x1d46   : > { %v15449_v51 = vunpack.i.h.bf16 %v20336_v17  ;;  %v15448_v23 = vunpack.i.l.bf16 %v20336_v17 }
0x1d47   : > { %v13332_v32 = vsel %vm13323_vm2, %v15439_v49, %v15443_v52 }
0x1d48   : > { %v13328_v27 = vsel %vm13323_vm2, %v15444_v0, %v15449_v51  ;;  %v20358_v63 = vmax.f32 %v20163_v46, %v13332_v32  ;;  %v13336_v12 = vsel %vm13323_vm2, %v15448_v23, %v15438_v38 }
0x1d49   : > { %v20382_v13 = vmax.f32 %v20264_v16, %v13336_v12  ;;  %v15452_v10 = vpop.permute.xlu0 %15451 }
0x1d4a   : > { %v15454_v3 = vunpack.i.h.bf16 %v15452_v10  ;;  %v15453_v11 = vunpack.i.l.bf16 %v15452_v10 }
0x1d4c   : > { %v13335_v42 = vsel %vm13323_vm2, %v15453_v11, %v15454_v3 }
0x1d4d   : > { %v15462_v19 = vpop.permute.xlu0 %15461 }
0x1d4e   : > { %v15463_v30 = vunpack.i.l.bf16 %v15462_v19 }
0x1d50   : > { %v13337_v28 = vsel %vm13323_vm2, %v15463_v30, %v15453_v11  ;;  %v13180_v11 = vld [vmem:[#allocation3 + $0x98] sm:$0xff] }
0x1d51   : > { %v20421_v38 = vmax.f32 %v20296_v47, %v13337_v28  ;;  %v13195_v28 = vld [vmem:[#allocation3 + $0x110] sm:$0xff] }
0x1ddd   : > { %v13134_v6 = vpop.f32.mrb[248].mxu1 }
0x1dde   : > { %v13135_v35 = vadd.f32 %v13134_v6, %v20152_v7  ;;  %v13136_v37 = vpop.f32.mrb[249].mxu1 }
0x1ddf   : > { %v13137_v36 = vadd.f32 %v13136_v37, %v20152_v7  ;;  %v20364_v7 = vmax.f32 %v20160_v24, %v13334_v57  ;;  %v13330_v24 = vsel %vm13323_vm2, %v15443_v52, %v15444_v0  ;;  %v20415_v52 = vmax.f32 %v20285_v53, %v13335_v42  ;;  %v13212_v42 = vld [vmem:[#allocation3 + $0x198] sm:$0xff] }
0x1de0   : > { %v13151_v1 = vadd.f32 %v13135_v35, %v21042_v62  ;;  %v20385_v34 = vmax.f32 %v20258_v50, %v13330_v24  ;;  %v20397_v50 = vmax.f32 %v20261_v54, %v13328_v27  ;;  %v15464_v54 = vunpack.i.h.bf16 %v15462_v19  ;;  %v13161_v24 = vld [vmem:[#allocation3] sm:$0xff] }
0x1de1   : > { %v13152_v59 = vadd.f32 %v13137_v36, %v21043_v20  ;;  %v13140_v58 = vpop.f32.mrb[250].mxu1  ;;  %v15465_v46 = vpack.i.bf16 %v20358_v63, %v20364_v7  ;;  %v13193_v19 = vld [vmem:[#allocation3 + $0x100] sm:$0xff] }
0x1de2   : > { %v13142_v18 = vpop.f32.mrb[251].mxu1  ;;  %13313 = vrot.lane.b32.xlu1 %v13151_v1, %s16354_s25  ;;  %v13141_v45 = vadd.f32 %v13140_v58, %v20251_v14 }
0x1de3   : > { %13317 = vrot.lane.b32.xlu0 %v13152_v59, %s16354_s25  ;;  %v13143_v26 = vadd.f32 %v13142_v18, %v20251_v14  ;;  %v15470_v14 = vpack.i.bf16 %v20382_v13, %v20385_v34 }
0x1de4   : > { %v13159_v43 = vadd.f32 %v13141_v45, %v21045_v4 }
0x1de5   : > { %v13160_v33 = vadd.f32 %v13143_v26, %v21046_v21  ;;  %v13178_v26 = vld [vmem:[#allocation3 + $0x88] sm:$0xff] }
0x1de6   : > { %15456 = vrot.lane.b32.xlu1 %v15455_v44, %s16354_s25  ;;  %v13162_v21 = vld [vmem:[#allocation3 + $0x8] sm:$0xff] }
0x1de7   : > { %15466 = vrot.lane.b32.xlu0 %v15465_v46, %s16355_s26 }
0x1dea   : > { %13315 = vrot.lane.b32.xlu1 %v13159_v43, %s16354_s25 }
0x1dee   : > { %13319 = vrot.lane.b32.xlu1 %v13160_v33, %s16354_s25  ;;  %s16356_s25 = smov 124  }
0x1df2   : > { %15471 = vrot.lane.b32.xlu1 %v15470_v14, %s16355_s26  ;;  %v13210_v14 = vld [vmem:[#allocation3 + $0x188] sm:$0xff] }
0x1e54   : > { %v13314_v39 = vpop.permute.xlu1 %13313 }
0x1e55   : > { %v13326_v16 = vsel %vm13323_vm2, %v15449_v51, %v13314_v39  ;;  %v13318_v60 = vpop.permute.xlu0 %13317 }
0x1e56   : > { %v20394_v31 = vmax.f32 %v20269_v15, %v13326_v16  ;;  %v13324_v15 = vsel %vm13323_vm2, %v13314_v39, %v13318_v60  ;;  %v13338_v0 = vsel %vm13323_vm2, %v13318_v60, %v15448_v23  ;;  %v13179_v39 = vld [vmem:[#allocation3 + $0x90] sm:$0xff]  ;;  %v13164_v16 = vld [vmem:[#allocation3 + $0x18] sm:$0xff] }
0x1e57   : > { %v20425_v6 = vmax.f32 %v13151_v1, %v13324_v15  ;;  %v20431_v35 = vmax.f32 %v13152_v59, %v13338_v0  ;;  %v15212_v60 = vpack.c.bf16 %v13180_v11, %v13179_v39  ;;  %v13181_v15 = vld [vmem:[#allocation3 + $0xa0] sm:$0xff]  ;;  %v13170_v39 = vld [vmem:[#allocation3 + $0x48] sm:$0xff] }
0x1e58   : > { %v15457_v22 = vpop.permute.xlu1 %15456  ;;  %v15475_v56 = vpack.i.bf16 %v20394_v31, %v20397_v50 }
0x1e59   : > { %v15459_v9 = vunpack.i.h.bf16 %v15457_v22  ;;  %v15458_v25 = vunpack.i.l.bf16 %v15457_v22  ;;  %v20433_v53 = vpop.permute.xlu0 %15466 }
0x1e5a   : > { %15476 = vrot.lane.b32.xlu0 %v15475_v56, %s16355_s26  ;;  %v15469_v29 = vunpack.i.h.bf16 %v20433_v53  ;;  %v13211_v56 = vld [vmem:[#allocation3 + $0x190] sm:$0xff] }
0x1e5b   : > { %v13331_v17 = vsel %vm13323_vm2, %v15458_v25, %v15459_v9  ;;  %v13333_v51 = vsel %vm13323_vm2, %v15454_v3, %v15458_v25  ;;  %v13329_v61 = vsel %vm13323_vm2, %v15459_v9, %v15464_v54  ;;  %v15244_v9 = vpack.c.bf16 %v13212_v42, %v13211_v56  ;;  %v13196_v25 = vld [vmem:[#allocation3 + $0x118] sm:$0xff] }
0x1e5c   : > { %v13316_v27 = vpop.permute.xlu1 %13315  ;;  %v20418_v49 = vmax.f32 %v20276_v40, %v13333_v51  ;;  %v20423_v5 = vmax.f32 %v13156_v48, %v13331_v17  ;;  %v20446_v57 = vmax.f32 %v20353_v8, %v13329_v61  ;;  %v15495_v8 = vpack.i.bf16 %v20431_v35, %v20425_v6  ;;  %v13165_v51 = vld [vmem:[#allocation3 + $0x20] sm:$0xff]  ;;  %v13220_v56 = vld [vmem:[#allocation3 + $0x1d8] sm:$0xff] }
0x1e5d   : > { %v13327_v32 = vsel %vm13323_vm2, %v15464_v54, %v13316_v27  ;;  %v13182_v54 = vld [vmem:[#allocation3 + $0xa8] sm:$0xff]  ;;  %v15246_v0 = vpack.c.bf16 %v13196_v25, %v13195_v28  ;;  %v13213_v61 = vld [vmem:[#allocation3 + $0x1a0] sm:$0xff]  ;;  %v13171_v25 = vld [vmem:[#allocation3 + $0x50] sm:$0xff] }
0x1e5e   : > { %v20436_v40 = vmax.f32 %v20290_v55, %v13327_v32  ;;  %v15480_v47 = vpack.i.bf16 %v20418_v49, %v20415_v52  ;;  %v15485_v37 = vpack.i.bf16 %v20421_v38, %v20423_v5  ;;  %v15468_v55 = vunpack.i.l.bf16 %v20433_v53  ;;  %v13214_v32 = vld [vmem:[#allocation3 + $0x1a8] sm:$0xff] }
0x1e5f   : > { %v15216_v17 = vpack.c.bf16 %v13182_v54, %v13181_v15  ;;  %v13172_v15 = vld [vmem:[#allocation3 + $0x58] sm:$0xff]  ;;  %v13203_v54 = vld [vmem:[#allocation3 + $0x150] sm:$0xff] }
0x1e60   : > { %v13320_v36 = vpop.permute.xlu1 %13319  ;;  %15481 = vrot.lane.b32.xlu1 %v15480_v47, %s16355_s26  ;;  %15486 = vrot.lane.b32.xlu0 %v15485_v37, %s16355_s26  ;;  %v15490_v58 = vpack.i.bf16 %v20436_v40, %v20446_v57  ;;  %v13399_v48 = vsel %vm13388_vm3, %v15468_v55, %v15469_v29  ;;  %v13197_v47 = vld [vmem:[#allocation3 + $0x120] sm:$0xff]  ;;  %v13198_v37 = vld [vmem:[#allocation3 + $0x128] sm:$0xff] }
0x1e61   : > { %v13325_v62 = vsel %vm13323_vm2, %v13316_v27, %v13320_v36  ;;  %v13339_v1 = vsel %vm13323_vm2, %v13320_v36, %v15463_v30  ;;  %v20478_v23 = vmax.f32 %v20364_v7, %v13399_v48  ;;  %v15210_v7 = vpack.c.bf16 %v13162_v21, %v13161_v24  ;;  %v13163_v30 = vld [vmem:[#allocation3 + $0x10] sm:$0xff]  ;;  %v13166_v27 = vld [vmem:[#allocation3 + $0x28] sm:$0xff]  ;;  %v13200_v24 = vld [vmem:[#allocation3 + $0x138] sm:$0xff] }
0x1e62   : > { %v20454_v20 = vmax.f32 %v13159_v43, %v13325_v62  ;;  %v20456_v59 = vmax.f32 %v13160_v33, %v13339_v1  ;;  %v13177_v43 = vld [vmem:[#allocation3 + $0x80] sm:$0xff]  ;;  %v15214_v22 = vpack.c.bf16 %v13164_v16, %v13163_v30  ;;  %v15218_v36 = vpack.c.bf16 %v13166_v27, %v13165_v51  ;;  %v13183_v62 = vld [vmem:[#allocation3 + $0xb0] sm:$0xff]  ;;  %v13184_v1 = vld [vmem:[#allocation3 + $0xb8] sm:$0xff] }
0x1e63   : > { %v15208_v12 = vpack.c.bf16 %v13178_v26, %v13177_v43  ;;  %v13209_v33 = vld [vmem:[#allocation3 + $0x180] sm:$0xff]  ;;  %v15220_v48 = vpack.c.bf16 %v13184_v1, %v13183_v62  ;;  %v13199_v26 = vld [vmem:[#allocation3 + $0x130] sm:$0xff]  ;;  %v13186_v21 = vld [vmem:[#allocation3 + $0xc8] sm:$0xff] }
0x1e64   : > { %v20462_v2 = vpop.permute.xlu1 %15471  ;;  %15491 = vrot.lane.b32.xlu1 %v15490_v58, %s16355_s26  ;;  %15496 = vrot.lane.b32.xlu0 %v15495_v8, %s16355_s26  ;;  %v15500_v45 = vpack.i.bf16 %v20456_v59, %v20454_v20  ;;  %v15240_v10 = vpack.c.bf16 %v13210_v14, %v13209_v33  ;;  %v13167_v58 = vld [vmem:[#allocation3 + $0x30] sm:$0xff]  ;;  %v15250_v8 = vpack.c.bf16 %v13198_v37, %v13197_v47  ;;  %v13217_v14 = vld [vmem:[#allocation3 + $0x1c0] sm:$0xff]  ;;  %v13202_v30 = vld [vmem:[#allocation3 + $0x148] sm:$0xff] }
0x1e65   : > { %v15473_v18 = vunpack.i.l.bf16 %v20462_v2  ;;  %15209 = vmatprep.subr.bf16.mxu0 %v15208_v12  ;;  %v13185_v12 = vld [vmem:[#allocation3 + $0xc0] sm:$0xff]  ;;  %v13187_v16 = vld [vmem:[#allocation3 + $0xd0] sm:$0xff]  ;;  %v13190_v27 = vld [vmem:[#allocation3 + $0xe8] sm:$0xff]  ;;  %v15230_v47 = vpack.c.bf16 %v13172_v15, %v13171_v25 }
0x1e66   : > { %15211 = vmatpush3.bf16.msra.mxu0 %v15210_v7  ;;  %15241 = vmatprep.subr.bf16.mxu1 %v15240_v10  ;;  %v13218_v7 = vld [vmem:[#allocation3 + $0x1c8] sm:$0xff]  ;;  %v15254_v10 = vpack.c.bf16 %v13200_v24, %v13199_v26  ;;  %v13189_v51 = vld [vmem:[#allocation3 + $0xe0] sm:$0xff]  ;;  %v13175_v26 = vld [vmem:[#allocation3 + $0x70] sm:$0xff] }
0x1e67   : > { %v13397_v44 = vsel %vm13388_vm3, %v15469_v29, %v15473_v18  ;;  %15213 = vmatprep.subr.bf16.mxu0 %v15212_v60  ;;  %v15248_v29 = vpack.c.bf16 %v13214_v32, %v13213_v61  ;;  %v15256_v11 = vpack.c.bf16 %v13218_v7, %v13217_v14  ;;  %v13188_v60 = vld [vmem:[#allocation3 + $0xd8] sm:$0xff]  ;;  %v13221_v61 = vld [vmem:[#allocation3 + $0x1e0] sm:$0xff]  ;;  %v13222_v32 = vld [vmem:[#allocation3 + $0x1e8] sm:$0xff] }
0x1e68   : > { %v20481_v46 = vmax.f32 %v20358_v63, %v13397_v44  ;;  %15501 = vrot.lane.b32.xlu1 %v15500_v45, %s16355_s26  ;;  %v13194_v63 = vld [vmem:[#allocation3 + $0x108] sm:$0xff]  ;;  %v13168_v45 = vld [vmem:[#allocation3 + $0x38] sm:$0xff]  ;;  %v13215_v44 = vld [vmem:[#allocation3 + $0x1b0] sm:$0xff]  ;;  %v15264_v1 = vpack.c.bf16 %v13222_v32, %v13221_v61  ;;  %s21048_s26 = sld [smem:[#allocation37_spill]] }
0x1e69   : > { %v15242_v3 = vpack.c.bf16 %v13194_v63, %v13193_v19  ;;  %v15222_v33 = vpack.c.bf16 %v13168_v45, %v13167_v58  ;;  %v15224_v19 = vpack.c.bf16 %v13186_v21, %v13185_v12  ;;  %v13169_v63 = vld [vmem:[#allocation3 + $0x40] sm:$0xff]  ;;  %v13174_v62 = vld [vmem:[#allocation3 + $0x68] sm:$0xff]  ;;  %v13176_v12 = vld [vmem:[#allocation3 + $0x78] sm:$0xff] }
0x1e6a   : > { %v15505_v4 = vpack.i.bf16 %v20481_v46, %v20478_v23  ;;  %15215 = vmatpush3.bf16.msra.mxu0 %v15214_v22  ;;  %v13219_v22 = vld [vmem:[#allocation3 + $0x1d0] sm:$0xff]  ;;  %v15226_v42 = vpack.c.bf16 %v13170_v39, %v13169_v63  ;;  %v15238_v7 = vpack.c.bf16 %v13176_v12, %v13175_v26  ;;  %v13208_v63 = vld [vmem:[#allocation3 + $0x178] sm:$0xff]  ;;  %v13241_v39 = vld [vmem:[#allocation3 + $0x280] sm:$0xff] }
0x1e6b   : > { %15243 = vmatpush3.bf16.msra.mxu1 %v15242_v3  ;;  %15217 = vmatprep.subr.bf16.mxu0 %v15216_v17  ;;  %v13201_v3 = vld [vmem:[#allocation3 + $0x140] sm:$0xff]  ;;  %v13204_v17 = vld [vmem:[#allocation3 + $0x158] sm:$0xff]  ;;  %v13223_v21 = vld [vmem:[#allocation3 + $0x1f0] sm:$0xff] }
0x1e6c   : > { %15506 = vrot.lane.b32.xlu0 %v15505_v4, %s16356_s25  ;;  %15245 = vmatprep.subr.bf16.mxu1 %v15244_v9  ;;  %v13216_v4 = vld [vmem:[#allocation3 + $0x1b8] sm:$0xff]  ;;  %v15258_v28 = vpack.c.bf16 %v13202_v30, %v13201_v3  ;;  %v15228_v9 = vpack.c.bf16 %v13188_v60, %v13187_v16  ;;  %v15262_v37 = vpack.c.bf16 %v13204_v17, %v13203_v54  ;;  %v13242_v60 = vld [vmem:[#allocation3 + $0x288] sm:$0xff] }
0x1e6d   : > { %v15252_v43 = vpack.c.bf16 %v13216_v4, %v13215_v44  ;;  %v15474_v44 = vunpack.i.h.bf16 %v20462_v2  ;;  %v13191_v4 = vld [vmem:[#allocation3 + $0xf0] sm:$0xff] }
0x1e6e   : > { %15219 = vmatpush3.bf16.msra.mxu0 %v15218_v36  ;;  %v15232_v36 = vpack.c.bf16 %v13190_v27, %v13189_v51 }
0x1e6f   : > { %15247 = vmatpush3.bf16.msra.mxu1 %v15246_v0  ;;  %15221 = vmatprep.subr.bf16.mxu0 %v15220_v48  ;;  %v15260_v0 = vpack.c.bf16 %v13220_v56, %v13219_v22  ;;  %v13206_v48 = vld [vmem:[#allocation3 + $0x168] sm:$0xff]  ;;  %v13401_v3 = vsel %vm13388_vm3, %v15474_v44, %v15468_v55  ;;  %v15272_v22 = vpack.c.bf16 %v13242_v60, %v13241_v39  ;;  %v13273_v56 = vld [vmem:[#allocation3 + $0x380] sm:$0xff] }
0x1e70   : > { %15249 = vmatprep.subr.bf16.mxu1 %v15248_v29  ;;  %v13173_v29 = vld [vmem:[#allocation3 + $0x60] sm:$0xff] }
0x1e71   : > { %v15234_v58 = vpack.c.bf16 %v13174_v62, %v13173_v29  ;;  %v13225_v60 = vld [vmem:[#allocation3 + $0x200] sm:$0xff] }
0x1e72   : > { %15223 = vmatpush3.bf16.msra.mxu0 %v15222_v33  ;;  %v13224_v33 = vld [vmem:[#allocation3 + $0x1f8] sm:$0xff] }
0x1e73   : > { %15251 = vmatpush3.bf16.msra.mxu1 %v15250_v8  ;;  %15225 = vmatprep.subr.bf16.mxu0 %v15224_v19  ;;  %v13205_v8 = vld [vmem:[#allocation3 + $0x160] sm:$0xff]  ;;  %v13207_v19 = vld [vmem:[#allocation3 + $0x170] sm:$0xff] }
0x1e74   : > { %15253 = vmatprep.subr.bf16.mxu1 %v15252_v43  ;;  %v15266_v45 = vpack.c.bf16 %v13206_v48, %v13205_v8  ;;  %v13192_v43 = vld [vmem:[#allocation3 + $0xf8] sm:$0xff]  ;;  %v15270_v16 = vpack.c.bf16 %v13208_v63, %v13207_v19 }
0x1e75   : > { %v15236_v24 = vpack.c.bf16 %v13192_v43, %v13191_v4 }
0x1e76   : > { %15227 = vmatpush3.bf16.msra.mxu0 %v15226_v42  ;;  %v13274_v42 = vld [vmem:[#allocation3 + $0x388] sm:$0xff] }
0x1e77   : > { %15255 = vmatpush3.bf16.msra.mxu1 %v15254_v10  ;;  %15229 = vmatprep.subr.bf16.mxu0 %v15228_v9  ;;  %v15268_v10 = vpack.c.bf16 %v13224_v33, %v13223_v21  ;;  %v15304_v55 = vpack.c.bf16 %v13274_v42, %v13273_v56  ;;  %v20499_v9 = vmax.f32 %v20382_v13, %v13401_v3  ;;  %v13257_v42 = vld [vmem:[#allocation3 + $0x300] sm:$0xff] }
0x1e78   : > { %15257 = vmatprep.subr.bf16.mxu1 %v15256_v11 }
0x1e7a   : > { %15231 = vmatpush3.bf16.msra.mxu0 %v15230_v47 }
0x1e7b   : > { %15259 = vmatpush3.bf16.msra.mxu1 %v15258_v28  ;;  %15233 = vmatprep.subr.bf16.mxu0 %v15232_v36 }
0x1e7c   : > { %15261 = vmatprep.subr.bf16.mxu1 %v15260_v0 }
0x1e7e   : > { %15235 = vmatpush3.bf16.msra.mxu0 %v15234_v58 }
0x1e7f   : > { %15263 = vmatpush3.bf16.msra.mxu1 %v15262_v37  ;;  %15237 = vmatprep.subr.bf16.mxu0 %v15236_v24 }
0x1e80   : > { %15265 = vmatprep.subr.bf16.mxu1 %v15264_v1 }
0x1e82   : > { %15239 = vmatpush3.bf16.msra.mxu0 %v15238_v7 }
0x1e83   : > { %15267 = vmatpush3.bf16.msra.mxu1 %v15266_v45  ;;  %15273 = vmatprep.subr.bf16.mxu0 %v15272_v22  ;;  %v13226_v22 = vld [vmem:[#allocation3 + $0x208] sm:$0xff] }
0x1e84   : > { %15269 = vmatprep.subr.bf16.mxu1 %v15268_v10 }
0x1e87   : > { %15271 = vmatpush3.bf16.msra.mxu1 %v15270_v16  ;;  %v13791_v16 = vld [vmem:[%s21047_s14 + $0x8] sm:$0xff] }
0x1e88   : > { %15305 = vmatprep.subr.bf16.mxu1 %v15304_v55 }
0x1ecc   : > { %v15477_v14 = vpop.permute.xlu0 %15476 }
0x1ecd   : > { %v15479_v11 = vunpack.i.h.bf16 %v15477_v14  ;;  %v15478_v30 = vunpack.i.l.bf16 %v15477_v14 }
0x1ecf   : > { %v13393_v28 = vsel %vm13388_vm3, %v15478_v30, %v15479_v11  ;;  %v13395_v53 = vsel %vm13388_vm3, %v15473_v18, %v15478_v30  ;;  %v13790_v30 = vld [vmem:[%s21047_s14] sm:$0xff] }
0x1ed0   : > { %v20502_v25 = vmax.f32 %v20385_v34, %v13395_v53  ;;  %v20505_v15 = vmax.f32 %v20397_v50, %v13393_v28  ;;  %v13258_v28 = vld [vmem:[#allocation3 + $0x308] sm:$0xff] }
0x1ed2   : > { %v15482_v54 = vpop.permute.xlu1 %15481  ;;  %13437 = vrot.lane.b32.xlu0 %v20505_v15, %s16356_s25  ;;  %v15487_v2 = vpop.permute.xlu0 %15486  ;;  %v15510_v18 = vpack.i.bf16 %v20502_v25, %v20499_v9 }
0x1ed3   : > { %v15484_v0 = vunpack.i.h.bf16 %v15482_v54  ;;  %v15483_v17 = vunpack.i.l.bf16 %v15482_v54  ;;  %v15489_v13 = vunpack.i.h.bf16 %v15487_v2  ;;  %v15488_v51 = vunpack.i.l.bf16 %v15487_v2  ;;  %v13243_v54 = vld [vmem:[#allocation3 + $0x290] sm:$0xff]  ;;  %v13244_v2 = vld [vmem:[#allocation3 + $0x298] sm:$0xff] }
0x1ed4   : > { %15511 = vrot.lane.b32.xlu1 %v15510_v18, %s16356_s25 }
0x1ed5   : > { %v13400_v34 = vsel %vm13388_vm3, %v15483_v17, %v15484_v0  ;;  %v13398_v50 = vsel %vm13388_vm3, %v15484_v0, %v15488_v51  ;;  %v13402_v61 = vsel %vm13388_vm3, %v15489_v13, %v15483_v17  ;;  %v15274_v0 = vpack.c.bf16 %v13226_v22, %v13225_v60  ;;  %v13275_v17 = vld [vmem:[#allocation3 + $0x390] sm:$0xff] }
0x1ed6   : > { %v20517_v27 = vmax.f32 %v20415_v52, %v13400_v34  ;;  %v20522_v32 = vmax.f32 %v20418_v49, %v13398_v50  ;;  %v15492_v47 = vpop.permute.xlu1 %15491  ;;  %v15497_v37 = vpop.permute.xlu0 %15496  ;;  %v20535_v45 = vmax.f32 %v20421_v38, %v13402_v61  ;;  %v15306_v61 = vpack.c.bf16 %v13258_v28, %v13257_v42  ;;  %v13279_v22 = vld [vmem:[#allocation3 + $0x3b0] sm:$0xff]  ;;  %v13280_v42 = vld [vmem:[#allocation3 + $0x3b8] sm:$0xff] }
0x1ed7   : > { %v15494_v36 = vunpack.i.h.bf16 %v15492_v47  ;;  %v15493_v29 = vunpack.i.l.bf16 %v15492_v47  ;;  %v15499_v62 = vunpack.i.h.bf16 %v15497_v37  ;;  %v15498_v1 = vunpack.i.l.bf16 %v15497_v37 }
0x1ed8   : > { %v15515_v58 = vpack.i.bf16 %v20522_v32, %v20517_v27 }
0x1ed9   : > { %v13394_v8 = vsel %vm13388_vm3, %v15493_v29, %v15494_v36  ;;  %v13396_v52 = vsel %vm13388_vm3, %v15488_v51, %v15493_v29  ;;  %v13403_v48 = vsel %vm13388_vm3, %v15499_v62, %v15474_v44  ;;  %v13389_v49 = vsel %vm13388_vm3, %v15498_v1, %v15499_v62  ;;  %v13227_v62 = vld [vmem:[#allocation3 + $0x210] sm:$0xff] }
0x1eda   : > { %v20538_v4 = vmax.f32 %v20423_v5, %v13396_v52  ;;  %v20541_v43 = vmax.f32 %v20446_v57, %v13394_v8  ;;  %v13391_v26 = vsel %vm13388_vm3, %v15479_v11, %v15498_v1  ;;  %v15502_v24 = vpop.permute.xlu1 %15501  ;;  %15516 = vrot.lane.b32.xlu1 %v15515_v58, %s16356_s25  ;;  %v20550_v38 = vmax.f32 %v20431_v35, %v13403_v48  ;;  %v13228_v1 = vld [vmem:[#allocation3 + $0x218] sm:$0xff]  ;;  %v13259_v8 = vld [vmem:[#allocation3 + $0x310] sm:$0xff]  ;;  %v13245_v48 = vld [vmem:[#allocation3 + $0x2a0] sm:$0xff] }
0x1edb   : > { %v20547_v44 = vmax.f32 %v20394_v31, %v13391_v26  ;;  %v15504_v12 = vunpack.i.h.bf16 %v15502_v24  ;;  %v15503_v21 = vunpack.i.l.bf16 %v15502_v24  ;;  %v20553_v5 = vmax.f32 %v20425_v6, %v13389_v49  ;;  %v13260_v52 = vld [vmem:[#allocation3 + $0x318] sm:$0xff]  ;;  %v13246_v26 = vld [vmem:[#allocation3 + $0x2a8] sm:$0xff]  ;;  %v13277_v24 = vld [vmem:[#allocation3 + $0x3a0] sm:$0xff] }
0x1edc   : > { %v15520_v57 = vpack.i.bf16 %v20538_v4, %v20535_v45  ;;  %v15276_v29 = vpack.c.bf16 %v13244_v2, %v13243_v54 }
0x1edd   : > { %v13390_v33 = vsel %vm13388_vm3, %v15503_v21, %v15504_v12  ;;  %v13392_v14 = vsel %vm13388_vm3, %v15494_v36, %v15503_v21  ;;  %v15525_v31 = vpack.i.bf16 %v20547_v44, %v20541_v43  ;;  %v15530_v39 = vpack.i.bf16 %v20550_v38, %v20553_v5 }
0x1ede   : > { %v20564_v7 = vmax.f32 %v20436_v40, %v13392_v14  ;;  %v20567_v35 = vmax.f32 %v20454_v20, %v13390_v33  ;;  %v15507_v6 = vpop.permute.xlu0 %15506  ;;  %15521 = vrot.lane.b32.xlu0 %v15520_v57, %s16356_s25  ;;  %v13404_v40 = vsel %vm13388_vm3, %v15504_v12, %v15489_v13  ;;  %v13276_v13 = vld [vmem:[#allocation3 + $0x398] sm:$0xff]  ;;  %v13278_v12 = vld [vmem:[#allocation3 + $0x3a8] sm:$0xff]  ;;  %v13229_v57 = vld [vmem:[#allocation3 + $0x220] sm:$0xff] }
0x1edf   : > { %v15509_v10 = vunpack.i.h.bf16 %v15507_v6  ;;  %v15508_v19 = vunpack.i.l.bf16 %v15507_v6  ;;  %15526 = vrot.lane.b32.xlu1 %v15525_v31, %s16356_s25  ;;  %v20584_v11 = vmax.f32 %v20456_v59, %v13404_v40  ;;  %v13793_v59 = vld [vmem:[%s21047_s14 + $0x18] sm:$0xff]  ;;  %v15308_v58 = vpack.c.bf16 %v13276_v13, %v13275_v17  ;;  %v13230_v33 = vld [vmem:[#allocation3 + $0x228] sm:$0xff]  ;;  %v13261_v14 = vld [vmem:[#allocation3 + $0x320] sm:$0xff] }
0x1ee0   : > { %v15535_v63 = vpack.i.bf16 %v20567_v35, %v20564_v7  ;;  %v15280_v6 = vpack.c.bf16 %v13246_v26, %v13245_v48  ;;  %v15282_v60 = vpack.c.bf16 %v13230_v33, %v13229_v57  ;;  %v13263_v17 = vld [vmem:[#allocation3 + $0x330] sm:$0xff]  ;;  %v13264_v13 = vld [vmem:[#allocation3 + $0x338] sm:$0xff]  ;;  %v13233_v48 = vld [vmem:[#allocation3 + $0x240] sm:$0xff] }
0x1ee1   : > { %v13464_v20 = vsel %vm13453_vm4, %v15508_v19, %v15509_v10  ;;  %v13283_v57 = vld [vmem:[#allocation3 + $0x3d0] sm:$0xff]  ;;  %v13284_v33 = vld [vmem:[#allocation3 + $0x3d8] sm:$0xff] }
0x1ee2   : > { %15531 = vrot.lane.b32.xlu0 %v15530_v39, %s16356_s25  ;;  %v13471_v3 = vmax.f32 %v20478_v23, %v13464_v20  ;;  %v13792_v23 = vld [vmem:[%s21047_s14 + $0x10] sm:$0xff]  ;;  %v13248_v39 = vld [vmem:[#allocation3 + $0x2b8] sm:$0xff] }
0x1ee3   : > { %15536 = vrot.lane.b32.xlu1 %v15535_v63, %s16356_s25  ;;  %v13247_v63 = vld [vmem:[#allocation3 + $0x2b0] sm:$0xff] }
0x1ee4   : > { %13550 = vmatprep.mubr.f32.mxu0 %v13471_v3  ;;  %v13231_v3 = vld [vmem:[#allocation3 + $0x230] sm:$0xff]  ;;  %v15284_v54 = vpack.c.bf16 %v13248_v39, %v13247_v63  ;;  %v15324_v63 = vpack.c.bf16 %v13284_v33, %v13283_v57  ;;  %v13268_v39 = vld [vmem:[#allocation3 + $0x358] sm:$0xff] }
0x1ee6   : > { %13451 = vrot.lane.b32.xlu0 %v20584_v11, %s16356_s25  ;;  %s21049_s25 = sld [smem:[#allocation11_spill]] }
0x1ee7   : > { %13796 = vperm.xlu1 %15434, %v13790_v30   ;;  %v13232_v30 = vld [vmem:[#allocation3 + $0x238] sm:$0xff] }
0x1eea   : > { %13801 = vperm.xlu0 %15433, %v13791_v16  }
0x1eeb   : > { %13806 = vperm.xlu1 %15434, %v13792_v23  }
0x1eec   : > { %s14396_s22 = sshll.u32 %s21049_s25, 3 }
0x1eed   : > { %s13927_s12 = sadd.s32 %s21050_s29, %s14396_s22  ;;  %s16248_s22 = scalar_lea.vmem %s20708_s16, 512 }
0x1eee   : > { %13811 = vperm.xlu0 %15433, %v13793_v59   ;;  %s14397_s24 = sshll.u32 %s13927_s12, 7  ;;  %p16249_p9 = scmp.ne.s32.totalorder %s20708_s16, %s16248_s22 }
0x1eef   : > { %s20713_s13 = scalar_lea.hbm %s21052_s10, %s14397_s24  ;;  %s16357_s12 = smov [#allocation6]  }
0x1ef0   : > { %p16250_p0 = pnand %p16249_p9, %p21053_p13  ;;  %s16252_s0 = sshll.u32 %s16357_s12, 4  ;;  %s16253_s0 = int_to_ptr.vmem [resolvable:$false] %s16252_s0 }
0x1ef1   : > { %s16254_s1 = scalar_lea.vmem %s16253_s0, 1024  ;;  %p16255_p5 = scmp.lt.s32.totalorder %s20708_s16, %s16253_s0 }
0x1ef2   : > { %p16251_p2 = pneg %p16250_p0  ;;  %p16256_p7 = scmp.lt.s32.totalorder %s16254_s1, %s16248_s22 }
0x1ef4   : > { %p16257_p10 = por %p16256_p7, %p16255_p5 }
0x1ef6   : > { %p16258_p11 = pnand %p16257_p10, %p16251_p2 }
0x1f44   : > { %v20604_v18 = vpop.permute.xlu0 %13437 }
0x1f46   : > { %v20600_v56 = vpop.permute.xlu1 %15511 }
0x1f47   : > { %v15514_v53 = vunpack.i.h.bf16 %v20600_v56  ;;  %v15513_v55 = vunpack.i.l.bf16 %v20600_v56 }
0x1f49   : > { %v13462_v51 = vsel %vm13453_vm4, %v15509_v10, %v15514_v53  ;;  %v13466_v34 = vsel %vm13453_vm4, %v15513_v55, %v15508_v19  ;;  %v13460_v50 = vsel %vm13453_vm4, %v15514_v53, %v20604_v18  ;;  %v15312_v10 = vpack.c.bf16 %v13278_v12, %v13277_v24  ;;  %v13262_v19 = vld [vmem:[#allocation3 + $0x328] sm:$0xff] }
0x1f4a   : > { %v13470_v47 = vmax.f32 %v20499_v9, %v13466_v34  ;;  %v13472_v37 = vmax.f32 %v20481_v46, %v13462_v51  ;;  %v13473_v36 = vmax.f32 %v20502_v25, %v13460_v50  ;;  %v15278_v46 = vpack.c.bf16 %v13228_v1, %v13227_v62  ;;  %v13266_v12 = vld [vmem:[#allocation3 + $0x348] sm:$0xff] }
0x1f4b   : > { %v15310_v25 = vpack.c.bf16 %v13260_v52, %v13259_v8  ;;  %v15314_v53 = vpack.c.bf16 %v13262_v19, %v13261_v14  ;;  %v13282_v8 = vld [vmem:[#allocation3 + $0x3c8] sm:$0xff]  ;;  %v15318_v52 = vpack.c.bf16 %v13264_v13, %v13263_v17  ;;  %v13267_v19 = vld [vmem:[#allocation3 + $0x350] sm:$0xff]  ;;  %v13288_v13 = vld [vmem:[#allocation3 + $0x3f8] sm:$0xff] }
0x1f4c   : > { %13551 = vmatmul.mubr.f32.vlgmr.msra.gmra.mrb[4].mxu0 %v13470_v47  ;;  %13625 = vmatprep.mubr.f32.mxu1 %v13473_v36  ;;  %v15517_v49 = vpop.permute.xlu1 %15516  ;;  %v15316_v47 = vpack.c.bf16 %v13280_v42, %v13279_v22  ;;  %v13250_v36 = vld [vmem:[#allocation3 + $0x2c8] sm:$0xff]  ;;  %v13237_v22 = vld [vmem:[#allocation3 + $0x260] sm:$0xff]  ;;  %v13287_v17 = vld [vmem:[#allocation3 + $0x3f0] sm:$0xff] }
0x1f4d   : > { %15275 = vmatpush3.bf16.msra.mxu0 %v15274_v0  ;;  %v15519_v21 = vunpack.i.h.bf16 %v15517_v49  ;;  %v15518_v9 = vunpack.i.l.bf16 %v15517_v49  ;;  %13626 = vmatmul.mubr.f32.vlgmr.msra.gmra.mrb[252].mxu1 %v13472_v37  ;;  %v15286_v0 = vpack.c.bf16 %v13232_v30, %v13231_v3  ;;  %v13249_v37 = vld [vmem:[#allocation3 + $0x2c0] sm:$0xff]  ;;  %v13234_v49 = vld [vmem:[#allocation3 + $0x248] sm:$0xff] }
0x1f4e   : > { %15307 = vmatpush3.bf16.msra.mxu1 %v15306_v61  ;;  %15277 = vmatprep.subr.bf16.mxu0 %v15276_v29  ;;  %v15288_v24 = vpack.c.bf16 %v13250_v36, %v13249_v37  ;;  %v15290_v56 = vpack.c.bf16 %v13234_v49, %v13233_v48  ;;  %v13285_v3 = vld [vmem:[#allocation3 + $0x3e0] sm:$0xff]  ;;  %v13286_v30 = vld [vmem:[#allocation3 + $0x3e8] sm:$0xff]  ;;  %v13239_v37 = vld [vmem:[#allocation3 + $0x270] sm:$0xff] }
0x1f4f   : > { %15309 = vmatprep.subr.bf16.mxu1 %v15308_v58  ;;  %v13465_v31 = vsel %vm13453_vm4, %v15518_v9, %v15519_v21  ;;  %v13281_v58 = vld [vmem:[#allocation3 + $0x3c0] sm:$0xff]  ;;  %v13238_v42 = vld [vmem:[#allocation3 + $0x268] sm:$0xff]  ;;  %v13240_v36 = vld [vmem:[#allocation3 + $0x278] sm:$0xff] }
0x1f50   : > { %v20620_v40 = vpop.permute.xlu0 %15521  ;;  %v13479_v20 = vmax.f32 %v20517_v27, %v13465_v31  ;;  %v15302_v49 = vpack.c.bf16 %v13240_v36, %v13239_v37 }
0x1f51   : > { %15279 = vmatpush3.bf16.msra.mxu0 %v15278_v46  ;;  %v20623_v16 = vpop.permute.xlu1 %15526  ;;  %v15524_v23 = vunpack.i.h.bf16 %v20620_v40  ;;  %v15523_v59 = vunpack.i.l.bf16 %v20620_v40 }
0x1f52   : > { %v15528_v28 = vunpack.i.l.bf16 %v20623_v16  ;;  %15311 = vmatpush3.bf16.msra.mxu1 %v15310_v25  ;;  %13555 = vmatprep.mubr.f32.mxu0 %v13479_v20  ;;  %v15529_v29 = vunpack.i.h.bf16 %v20623_v16  ;;  %v15320_v25 = vpack.c.bf16 %v13282_v8, %v13281_v58  ;;  %v13253_v20 = vld [vmem:[#allocation3 + $0x2e0] sm:$0xff]  ;;  %v13271_v58 = vld [vmem:[#allocation3 + $0x370] sm:$0xff]  ;;  %v13272_v8 = vld [vmem:[#allocation3 + $0x378] sm:$0xff] }
0x1f53   : > { %v13467_v27 = vsel %vm13453_vm4, %v15523_v59, %v15518_v9  ;;  %15281 = vmatprep.subr.bf16.mxu0 %v15280_v6  ;;  %15313 = vmatprep.subr.bf16.mxu1 %v15312_v10  ;;  %v13463_v2 = vsel %vm13453_vm4, %v15519_v21, %v15524_v23  ;;  %v13251_v21 = vld [vmem:[#allocation3 + $0x2d0] sm:$0xff]  ;;  %v13252_v9 = vld [vmem:[#allocation3 + $0x2d8] sm:$0xff] }
0x1f54   : > { %v13478_v51 = vmax.f32 %v20535_v45, %v13467_v27  ;;  %v20635_v34 = vpop.permute.xlu0 %15531  ;;  %v13461_v50 = vsel %vm13453_vm4, %v15524_v23, %v15528_v28  ;;  %v13480_v61 = vmax.f32 %v20522_v32, %v13463_v2  ;;  %v13265_v32 = vld [vmem:[#allocation3 + $0x340] sm:$0xff]  ;;  %v15292_v6 = vpack.c.bf16 %v13252_v9, %v13251_v21  ;;  %v13236_v10 = vld [vmem:[#allocation3 + $0x258] sm:$0xff]  ;;  %v13270_v27 = vld [vmem:[#allocation3 + $0x368] sm:$0xff] }
0x1f55   : > { %15283 = vmatpush3.bf16.msra.mxu0 %v15282_v60  ;;  %v15534_v62 = vunpack.i.h.bf16 %v20635_v34  ;;  %v15533_v1 = vunpack.i.l.bf16 %v20635_v34  ;;  %v13481_v45 = vmax.f32 %v20538_v4, %v13461_v50  ;;  %v15322_v31 = vpack.c.bf16 %v13266_v12, %v13265_v32  ;;  %v13255_v2 = vld [vmem:[#allocation3 + $0x2f0] sm:$0xff] }
0x1f56   : > { %15315 = vmatpush3.bf16.msra.mxu1 %v15314_v53  ;;  %13556 = vmatmul.mubr.f32.gmra.mrb[6].mxu0 %v13478_v51  ;;  %v13269_v53 = vld [vmem:[#allocation3 + $0x360] sm:$0xff]  ;;  %v15537_v51 = vpop.permute.xlu1 %15536  ;;  %v15298_v50 = vpack.c.bf16 %v13238_v42, %v13237_v22 }
0x1f57   : > { %13630 = vmatprep.mubr.f32.mxu1 %v13481_v45  ;;  %15285 = vmatprep.subr.bf16.mxu0 %v15284_v54  ;;  %v13456_v26 = vsel %vm13453_vm4, %v15529_v29, %v15533_v1  ;;  %v13468_v4 = vsel %vm13453_vm4, %v15534_v62, %v15513_v55  ;;  %v13235_v55 = vld [vmem:[#allocation3 + $0x250] sm:$0xff]  ;;  %v15328_v54 = vpack.c.bf16 %v13286_v30, %v13285_v3  ;;  %v15538_v48 = vunpack.i.l.bf16 %v15537_v51 }
0x1f58   : > { %13631 = vmatmul.mubr.f32.gmra.mrb[254].mxu1 %v13480_v61  ;;  %15317 = vmatprep.subr.bf16.mxu1 %v15316_v47  ;;  %v13475_v46 = vmax.f32 %v20547_v44, %v13456_v26  ;;  %v13477_v14 = vmax.f32 %v20550_v38, %v13468_v4  ;;  %v13254_v44 = vld [vmem:[#allocation3 + $0x2e8] sm:$0xff]  ;;  %v15294_v23 = vpack.c.bf16 %v13236_v10, %v13235_v55  ;;  %v13452_v32 = vpop.permute.xlu0 %13451 }
0x1f59   : > { %15287 = vmatpush3.bf16.msra.mxu0 %v15286_v0  ;;  %v15326_v38 = vpack.c.bf16 %v13268_v39, %v13267_v19  ;;  %v15296_v60 = vpack.c.bf16 %v13254_v44, %v13253_v20  ;;  %v13256_v0 = vld [vmem:[#allocation3 + $0x2f8] sm:$0xff]  ;;  %v15330_v61 = vpack.c.bf16 %v13270_v27, %v13269_v53  ;;  %v15332_v45 = vpack.c.bf16 %v13288_v13, %v13287_v17  ;;  %v13788_v27 = vld [vmem:[%s21048_s26 + $0x10] sm:$0xff] }
0x1f5a   : > { %15319 = vmatpush3.bf16.msra.mxu1 %v15318_v52  ;;  %13700 = vmatprep.mubr.f32.mxu0 %v13475_v46  ;;  %v15300_v47 = vpack.c.bf16 %v13256_v0, %v13255_v2  ;;  %v15539_v52 = vunpack.i.h.bf16 %v15537_v51  ;;  %v15334_v26 = vpack.c.bf16 %v13272_v8, %v13271_v58  ;;  %v13458_v4 = vsel %vm13453_vm4, %v20604_v18, %v15529_v29  ;;  %v13789_v2 = vld [vmem:[%s21048_s26 + $0x18] sm:$0xff] }
0x1f5b   : > { %13775 = vmatprep.mubr.f32.mxu1 %v13477_v14  ;;  %15289 = vmatprep.subr.bf16.mxu0 %v15288_v24  ;;  %v13454_v24 = vsel %vm13453_vm4, %v15533_v1, %v15534_v62  ;;  %v13469_v21 = vsel %vm13453_vm4, %v13452_v32, %v15523_v59  ;;  %v13474_v9 = vmax.f32 %v20505_v15, %v13458_v4 }
0x1f5c   : > { %15321 = vmatprep.subr.bf16.mxu1 %v15320_v25  ;;  %v13457_v12 = vsel %vm13453_vm4, %v15538_v48, %v15539_v52  ;;  %v13459_v18 = vsel %vm13453_vm4, %v15528_v28, %v15538_v48  ;;  %v13476_v34 = vmax.f32 %v20553_v5, %v13454_v24  ;;  %v13455_v62 = vsel %vm13453_vm4, %v15539_v52, %v13452_v32  ;;  %v13786_v5 = vld [vmem:[%s21048_s26] sm:$0xff] }
0x1f5d   : > { %15291 = vmatpush3.bf16.msra.mxu0 %v15290_v56  ;;  %v13483_v29 = vmax.f32 %v20564_v7, %v13457_v12  ;;  %v13485_v40 = vmax.f32 %v20584_v11, %v13469_v21  ;;  %v13482_v15 = vmax.f32 %v20541_v43, %v13459_v18  ;;  %v13484_v16 = vmax.f32 %v20567_v35, %v13455_v62 }
0x1f5e   : > { %15323 = vmatpush3.bf16.msra.mxu1 %v15322_v31  ;;  %15293 = vmatprep.subr.bf16.mxu0 %v15292_v6 }
0x1f5f   : > { %15325 = vmatprep.subr.bf16.mxu1 %v15324_v63 }
0x1f61   : > { %15295 = vmatpush3.bf16.msra.mxu0 %v15294_v23 }
0x1f62   : > { %15327 = vmatpush3.bf16.msra.mxu1 %v15326_v38  ;;  %15297 = vmatprep.subr.bf16.mxu0 %v15296_v60 }
0x1f63   : > { %15329 = vmatprep.subr.bf16.mxu1 %v15328_v54  ;;  %v13787_v54 = vld [vmem:[%s21048_s26 + $0x8] sm:$0xff] }
0x1f65   : > { %15299 = vmatpush3.bf16.msra.mxu0 %v15298_v50 }
0x1f66   : > { %15331 = vmatpush3.bf16.msra.mxu1 %v15330_v61  ;;  %15301 = vmatprep.subr.bf16.mxu0 %v15300_v47  ;;  %v13797_v17 = vpop.permute.xlu1 %13796 }
0x1f67   : > { %15333 = vmatprep.subr.bf16.mxu1 %v15332_v45 }
0x1f69   : > { %15303 = vmatpush3.bf16.msra.mxu0 %v15302_v49  ;;  %v13802_v0 = vpop.permute.xlu0 %13801 }
0x1f6a   : > { %15335 = vmatpush3.bf16.msra.mxu1 %v15334_v26  ;;  %v13807_v36 = vpop.permute.xlu1 %13806 }
0x1f6c   : > { %13701 = vmatmul.mubr.f32.vlgmr.msra.gmra.mrb[8].mxu0 %v13474_v9 }
0x1f6d   : > { %13705 = vmatprep.mubr.f32.mxu0 %v13483_v29  ;;  %13776 = vmatmul.mubr.f32.vlgmr.msra.gmra.mrb[0].mxu1 %v13476_v34  ;;  %v13812_v47 = vpop.permute.xlu0 %13811 }
0x1f6e   : > { %13780 = vmatprep.mubr.f32.mxu1 %v13485_v40 }
0x1f70   : > { %13706 = vmatmul.mubr.f32.gmra.mrb[10].mxu0 %v13482_v15 }
0x1f71   : > { %13781 = vmatmul.mubr.f32.gmra.mrb[2].mxu1 %v13484_v16  ;;  %14562 = vmatprep.mubr.msk.f32.mxu0 %vm570_vm0, %v13786_v5 }
0x201f   : > { %v14432_v41 = vpop.f32.mrb[4].mxu0 }
0x2020   : > { %v14433_v7 = vpop.f32.mrb[5].mxu0  ;;  %v14470_v59 = vpop.f32.mrb[252].mxu1 }
0x2021   : > { %v14434_v11 = vadd.f32 %v14433_v7, %v14432_v41  ;;  %v14471_v28 = vpop.f32.mrb[253].mxu1 }
0x2022   : > { %v14472_v1 = vadd.f32 %v14471_v28, %v14470_v59 }
0x2024   : > { %v13628_v46 = vadd.f32 %v14472_v1, %v14434_v11 }
0x2029   : > { %v14435_v25 = vpop.f32.mrb[6].mxu0 }
0x202a   : > { %v14436_v43 = vpop.f32.mrb[7].mxu0 }
0x202b   : > { %v14437_v57 = vadd.f32 %v14436_v43, %v14435_v25  ;;  %v14473_v33 = vpop.f32.mrb[254].mxu1 }
0x202c   : > { %v14474_v35 = vpop.f32.mrb[255].mxu1 }
0x202d   : > { %v14475_v14 = vadd.f32 %v14474_v35, %v14473_v33 }
0x202f   : > { %v13633_v56 = vadd.f32 %v14475_v14, %v14437_v57 }
0x203f   : > { %v14508_v31 = vpop.f32.mrb[8].mxu0 }
0x2040   : > { %v14509_v6 = vpop.f32.mrb[9].mxu0  ;;  %v14546_v55 = vpop.f32.mrb[0].mxu1 }
0x2041   : > { %v14510_v10 = vadd.f32 %v14509_v6, %v14508_v31  ;;  %v14547_v19 = vpop.f32.mrb[1].mxu1 }
0x2042   : > { %v14548_v63 = vadd.f32 %v14547_v19, %v14546_v55 }
0x2043   : > { %v13703_v39 = vadd.f32 %v14510_v10, %v13628_v46  ;;  %v14511_v20 = vpop.f32.mrb[10].mxu0 }
0x2044   : > { %v14512_v44 = vpop.f32.mrb[11].mxu0  ;;  %v14549_v3 = vpop.f32.mrb[2].mxu1 }
0x2045   : > { %v13778_v30 = vadd.f32 %v14548_v63, %v13703_v39  ;;  %v14513_v23 = vadd.f32 %v14512_v44, %v14511_v20  ;;  %v14550_v38 = vpop.f32.mrb[3].mxu1 }
0x2046   : > { %v14551_v60 = vadd.f32 %v14550_v38, %v14549_v3 }
0x2047   : > { %v13708_v22 = vadd.f32 %v14513_v23, %v13633_v56 }
0x2049   : > { %v13783_v42 = vadd.f32 %v14551_v60, %v13708_v22 }
0x204b   : > { %v15336_v53 = vpack.c.bf16 %v13783_v42, %v13778_v30 }
0x204d   : > { %15337 = vmatprep.subr.bf16.mxu0 %v15336_v53 }
0x204e   : > { %15339 = vmatpush3.bf16.msra.mxu0 %v15336_v53 }
0x2051   : > { %14563 = vmatmul.mubr.msk.f32.vlgmr.msra.gmra.mrb[12].mxu0 %vm570_vm0, %v13787_v54 }
0x2052   : > { %14565 = vmatprep.mubr.msk.f32.mxu0 %vm570_vm0, %v13788_v27 }
0x2055   : > { %14566 = vmatmul.mubr.msk.f32.gmra.mrb[14].mxu0 %vm570_vm0, %v13789_v2 }
0x2124   : > { %v14564_v13 = vpop.f32.mrb[12].mxu0 }
0x2125   : > { %v13898_v51 = vadd.f32 %v14564_v13, %v13802_v0  ;;  %v13892_v50 = vpop.f32.mrb[13].mxu0 }
0x2126   : > { %v13893_v61 = vadd.f32 %v13892_v50, %v13797_v17 }
0x2127   : > { %13912 = vst [vmem:[%s548_s21 + $0x8] sm:$0xff] %v13898_v51 }
0x2128   : > { %13911 = vst [vmem:[%s548_s21] sm:$0xff] %v13893_v61  ;;  %v14567_v37 = vpop.f32.mrb[14].mxu0 }
0x2129   : > { %v13908_v45 = vadd.f32 %v14567_v37, %v13812_v47  ;;  %v13902_v58 = vpop.f32.mrb[15].mxu0 }
0x212a   : > { %v13903_v8 = vadd.f32 %v13902_v58, %v13807_v36 }
0x212b   : > { %13914 = vst [vmem:[%s548_s21 + $0x18] sm:$0xff] %v13908_v45 }
0x212c   : > { %13913 = vst [vmem:[%s548_s21 + $0x10] sm:$0xff] %v13903_v8 }
0x212d   : > { %16261 = shalt.err (!%p16258_p11)
}
0x212e   : > { %s16262_s21 = scalar_lea.hbm %s20713_s13, 512  ;;  %s16266_s29 = scalar_lea.hbm %s21052_s10, 2048 }
0x212f   : > { %p16263_p12 = scmp.ne.s32.totalorder %s20713_s13, %s16262_s21  ;;  %p16267_p6 = scmp.lt.u32.totalorder %s20713_s13, %s21052_s10 }
0x2130   : > { %p16268_p3 = scmp.lt.u32.totalorder %s16266_s29, %s16262_s21  ;;  %p16270_p9 = scmp.lt.u32.totalorder %s16262_s21, %s20713_s13 }
0x2131   : > { %p16264_p1 = pnand %p16263_p12, %p21053_p13 }
0x2132   : > { %p16269_p8 = por %p16268_p3, %p16267_p6 }
0x2133   : > { %p16265_p4 = pneg %p16264_p1 }
0x2134   : > { %p16271_p0 = por %p16270_p9, %p16269_p8 }
0x2136   : > { %p16272_p2 = pnand %p16271_p0, %p16265_p4 }
0x2138   : > { %16275 = shalt.err (!%p16272_p2)
}
0x2139   : > { %s16358_s1 = smov 128   ;;  %s16359_s22 = smov 256  }
0x213a   : > { %s16360_s17 = smov 8   ;;  %s21054_s24 = scalar_lea.sflag [#allocation5], %s16574_s8 }
0x213b   : > { %15344 = dma.vmem_to_hbm [thread:$0]  (%p21053_p13), %s20708_s16, 512, %s20713_s13, %s21054_s24, %s16358_s1, %s16359_s22, %s16360_s17  }
0x213c PF: > { %s21055_s25 = sld [smem:[#allocation9_spill]]  ;;  %s21056_s12 = sld [smem:[#allocation15_spill]] }
0x213d   : > { %p15356_p5 = scmp.ge.s32.totalorder %s16346_s20, 2 }
0x2142   : > { %s13945_s29 = sand.u32 1, %s21055_s25   ;;  %p21057_p7 = scmp.ne.s32.totalorder %s21056_s12, 0 }
0x2143   : > { %s13946_s21 = scalar_lea.sflag [#allocation5], %s13945_s29 }
0x2144   : > { %p15351_p10 = pnand %p15356_p5, %p21057_p7 }
0x2146   : > { %16313 = dma.done.wait (!%p15351_p10), %s13946_s21, 512  }
0x2147   : > { %16315 = vsyncadd (!%p15351_p10), %s13946_s21, 4294966784  ;;  %s28_s20 = sadd.s32 1, %s16346_s20   ;;  %s21058_s0 = sld [smem:[#allocation16_spill]] }
0x2148   : > { %p25_p11 = scmp.ge.s32.totalorder %s28_s20, 6   ;;  %s21059_s8 = sld [smem:[#allocation12_spill]] }
0x2149   : > { %s21060_s23 = sld [smem:[#allocation13_spill]]  ;;  %s21061_s29 = smov %s16322_s30 }
0x214a   : > { %s21062_s30 = smov %s16326_s15  ;;  %s21064_s16 = smov %s16338_s18 }
0x214b   : > { %s21065_s17 = smov %s16342_s19  ;;  %27 = sbr.rel (!%p25_p11) target bundleno = 14 (0xe), region = 174 }
0x214d   : > { %s21063_s15 = smov %s21058_s0 }
0x214e   : > { %s21066_s18 = smov %s21059_s8 }
0x214f   : > { %s21067_s19 = smov %s21060_s23 }
0x2152   :  { %13951 = vsyncpa [#allocation4], 1 }
0x2153   :  { %13953 = vsyncpa [#allocation4 + $0x1], 1 }
0x2154   :  { %13954 = vsyncpa [#allocation5], 1 }
0x2155   :  { %13956 = vsyncpa [#allocation5 + $0x1], 1 }

</bundles_post_ra>
